<compile_context>
chip_gen: v6e
topology: v6e:2x2x1
jax: 0.10.0
libtpu: 0.0.40
codegen_flags: <defaults>
</compile_context>

<pallas_src>
import jax
import jax.numpy as jnp
from jax.experimental import pallas as pl
from jax.experimental.pallas import tpu as pltpu


# ---------------------------------------------------------------------------
# Kernel factory (G = images per grid step)
# ---------------------------------------------------------------------------
def _make_lenet_kernel(G):
    f32 = jnp.float32
    bf16 = jnp.bfloat16

    def kernel(x_ref, w1_ref, b1_ref, w2_ref, b2_ref,
               wf1_ref, bf1_ref, wf2_ref, bf2_ref, wf3_ref, bf3_ref,
               out_ref, pool1_ref, c2_ref, p2_ref):
        w1 = w1_ref[...]          # (80, 128) bf16
        b1 = b1_ref[...]          # (1, 128) f32
        b2 = b2_ref[...]          # (1, 128) f32

        for g in range(G):
            # ---- conv1 (+bias+ReLU) + 2x2 maxpool ------------------------
            # x_ref[g, q] is the im2col slab for pool sub-position q (dy,dx):
            # rows = 14x14 pooled positions (+4 zero rows), cols = 5x5x3 patch.
            for q in range(4):
                a = jnp.dot(x_ref[g, q], w1, preferred_element_type=f32)  # (200,128)
                if q == 0:
                    pool1_ref[...] = a
                else:
                    pool1_ref[...] = jnp.maximum(pool1_ref[...], a)
            # max-then-(bias,ReLU) == (bias,ReLU)-then-max (monotone).
            pool1_ref[...] = jnp.maximum(pool1_ref[...] + b1, 0.0)

            # ---- conv2 (+bias+ReLU): 25 shifted-window taps with K=8 ------
            # pool1 row h*14+w holds pooled conv1 at (h,w); channels in lanes 0..5
            # (lanes 6,7 are exact zeros), so the K=8 contraction is exact.
            acc2 = jnp.zeros((136, 128), f32)          # rows = oh2*14 + ow2
            for di in range(5):
                for dj in range(5):
                    t = 5 * di + dj
                    lhs = pool1_ref[pl.ds(14 * di + dj, 136), :][:, :8].astype(bf16)
                    acc2 = acc2 + jnp.dot(lhs, w2_ref[pl.ds(8 * t, 8), :],
                                          preferred_element_type=f32)
            c2_ref[...] = jnp.maximum(acc2 + b2, 0.0)

            # ---- 2x2 maxpool of conv2 -> 25 pooled rows, staged spatial-major
            for ph in range(5):
                for pw in range(5):
                    s = 5 * ph + pw
                    i0 = 28 * ph + 2 * pw
                    m = jnp.maximum(c2_ref[pl.ds(i0, 2), :],
                                    c2_ref[pl.ds(i0 + 14, 2), :])
                    p2_ref[pl.ds(s * G + g, 1), :] = jnp.max(m, axis=0, keepdims=True)

        # ---- fc1 (K=16 per spatial position, M=G) -> fc2 -> fc3 ----------
        h = jnp.zeros((G, 128), f32) + bf1_ref[...]
        for s in range(25):
            lhs = p2_ref[pl.ds(s * G, G), :][:, :16].astype(bf16)
            h = h + jnp.dot(lhs, wf1_ref[pl.ds(16 * s, 16), :],
                            preferred_element_type=f32)
        h = jnp.maximum(h, 0.0)
        h = jnp.maximum(jnp.dot(h.astype(bf16), wf2_ref[...],
                                preferred_element_type=f32) + bf2_ref[...], 0.0)
        out = jnp.dot(h.astype(bf16), wf3_ref[...],
                      preferred_element_type=f32) + bf3_ref[...]
        out_ref[...] = out.astype(out_ref.dtype)

    return kernel


# ---------------------------------------------------------------------------
# Wrapper: layout glue + pallas_call
# ---------------------------------------------------------------------------
def _pick_group(B):
    # Biggest image block that divides B while keeping >=2 grid steps (v7x cores).
    for g in (8, 4, 2, 1):
        if B % g == 0 and B // g >= 2:
            return g
    for g in (8, 4, 2, 1):
        if B % g == 0:
            return g
    return 1


def _im2col_conv1(x_nchw):
    """(B,3,32,32) -> (B, 4, 200, 80) bf16 im2col with pool-partner-major rows."""
    B = x_nchw.shape[0]
    x = jnp.transpose(x_nchw, (0, 2, 3, 1)).astype(jnp.float32)          # NHWC
    taps = [x[:, di:di + 28, dj:dj + 28, :] for di in range(5) for dj in range(5)]
    pat = jnp.stack(taps, axis=3)                                        # (B,28,28,25,3)
    pat = pat.reshape(B, 14, 2, 14, 2, 25, 3)                            # (ph,dy,pw,dx,t,c)
    pat = pat.transpose(0, 2, 4, 1, 3, 5, 6)                             # (B,dy,dx,ph,pw,t,c)
    cols = pat.reshape(B, 4, 196, 75)
    cols = jnp.pad(cols, ((0, 0), (0, 0), (0, 4), (0, 5)))               # (B,4,200,80)
    return cols.astype(jnp.bfloat16)


def lenet_forward(packed, x_nchw):
    B = x_nchw.shape[0]
    assert x_nchw.shape[1:] == (3, 32, 32), "LeNet (fc1=16*5*5) needs 3x32x32 input"
    G = _pick_group(B)
    NB = B // G
    x_cols = _im2col_conv1(x_nchw)

    const = lambda b: (0, 0)
    p2_rows = ((25 * G + 7) // 8) * 8
    out = pl.pallas_call(
        _make_lenet_kernel(G),
        out_shape=jax.ShapeDtypeStruct((NB, G, 128), jnp.float32),
        grid=(NB,),
        in_specs=[
            pl.BlockSpec((G, 4, 200, 80), lambda b: (b, 0, 0, 0)),   # im2col image block
            pl.BlockSpec((80, 128), const),                          # conv1 w (bf16)
            pl.BlockSpec((1, 128), const),                           # conv1 b
            pl.BlockSpec((200, 128), const),                         # conv2 w, 25 K=8 taps
            pl.BlockSpec((1, 128), const),                           # conv2 b
            pl.BlockSpec((400, 128), const),                         # fc1 w, 25 K=16 blocks
            pl.BlockSpec((1, 128), const),                           # fc1 b
            pl.BlockSpec((128, 128), const),                         # fc2 w
            pl.BlockSpec((1, 128), const),                           # fc2 b
            pl.BlockSpec((128, 128), const),                         # fc3 w
            pl.BlockSpec((1, 128), const),                           # fc3 b
        ],
        out_specs=pl.BlockSpec((None, G, 128), lambda b: (b, 0, 0)),
        scratch_shapes=[
            pltpu.VMEM((200, 128), jnp.float32),      # pooled conv1 (14x14 rows)
            pltpu.VMEM((136, 128), jnp.float32),      # conv2+ReLU output rows
            pltpu.VMEM((p2_rows, 128), jnp.float32),  # pooled conv2, spatial-major
        ],
        compiler_params=pltpu.CompilerParams(
            dimension_semantics=("parallel",),
            vmem_limit_bytes=32 * 1024 * 1024),
    )(x_cols, packed["w1"], packed["b1"], packed["w2"], packed["b2"],
      packed["wf1"], packed["bf1"], packed["wf2"], packed["bf2"],
      packed["wf3"], packed["bf3"])
    return out.reshape(B, 128)[:, :10]                                # (B, 10)


_lenet_forward_jit = jax.jit(lenet_forward)


# ---------------------------------------------------------------------------
# Parameters: PyTorch-layout init (Kaiming fan_out, zero bias) + kernel packing
# ---------------------------------------------------------------------------
def init_params(key):
    ks = jax.random.split(key, 5)

    def kaiming(k, shape, fan_out):
        std = (2.0 / fan_out) ** 0.5
        return std * jax.random.normal(k, shape, dtype=jnp.float32)

    return {
        "conv1_w": kaiming(ks[0], (6, 3, 5, 5), 6 * 5 * 5),
        "conv1_b": jnp.zeros((6,), jnp.float32),
        "conv2_w": kaiming(ks[1], (16, 6, 5, 5), 16 * 5 * 5),
        "conv2_b": jnp.zeros((16,), jnp.float32),
        "fc1_w": kaiming(ks[2], (120, 16 * 5 * 5), 120),
        "fc1_b": jnp.zeros((120,), jnp.float32),
        "fc2_w": kaiming(ks[3], (84, 120), 84),
        "fc2_b": jnp.zeros((84,), jnp.float32),
        "fc3_w": kaiming(ks[4], (10, 84), 10),
        "fc3_b": jnp.zeros((10,), jnp.float32),
    }


def _pad2(m, rows, cols):
    r, c = m.shape
    return jnp.pad(m, ((0, rows - r), (0, cols - c)))


def pack_params(p):
    """One-time transpose / pad / bf16-cast of PyTorch-layout weights."""
    bf16 = jnp.bfloat16
    # conv1: (6,3,5,5) -> row (di*5+dj)*3 + cin, col cout; pad to (80,128)
    w1 = jnp.transpose(p["conv1_w"], (2, 3, 1, 0)).reshape(75, 6)
    # conv2: (16,6,5,5) -> 25 stacked (cin_pad=8, cout_pad=128) tap blocks (200,128)
    w2 = jnp.transpose(p["conv2_w"], (2, 3, 1, 0))                    # (5,5,6,16)
    w2 = jnp.pad(w2, ((0, 0), (0, 0), (0, 2), (0, 112))).reshape(200, 128)
    # fc1: fold NCHW flatten (k = c*25 + s) -> 25 stacked (16,128) blocks (400,128)
    wf1 = p["fc1_w"].reshape(120, 16, 25).transpose(2, 1, 0)          # (25,16,120)
    wf1 = jnp.pad(wf1, ((0, 0), (0, 0), (0, 8))).reshape(400, 128)
    return {
        "w1": _pad2(w1, 80, 128).astype(bf16),
        "b1": _pad2(p["conv1_b"].reshape(1, 6), 1, 128),
        "w2": w2.astype(bf16),
        "b2": _pad2(p["conv2_b"].reshape(1, 16), 1, 128),
        "wf1": wf1.astype(bf16),
        "bf1": _pad2(p["fc1_b"].reshape(1, 120), 1, 128),
        "wf2": _pad2(p["fc2_w"].T, 128, 128).astype(bf16),
        "bf2": _pad2(p["fc2_b"].reshape(1, 84), 1, 128),
        "wf3": _pad2(p["fc3_w"].T, 128, 128).astype(bf16),
        "bf3": _pad2(p["fc3_b"].reshape(1, 10), 1, 128),
    }


# ---------------------------------------------------------------------------
# Pure-JAX (f32) reference of Net.forward for correctness checking
# ---------------------------------------------------------------------------
def _reference_forward(params, x):
    dn = ("NCHW", "OIHW", "NCHW")
    y = jax.lax.conv_general_dilated(x, params["conv1_w"], (1, 1), "VALID",
                                     dimension_numbers=dn)
    y = jax.nn.relu(y + params["conv1_b"][None, :, None, None])
    y = jax.lax.reduce_window(y, -jnp.inf, jax.lax.max,
                              (1, 1, 2, 2), (1, 1, 2, 2), "VALID")
    y = jax.lax.conv_general_dilated(y, params["conv2_w"], (1, 1), "VALID",
                                     dimension_numbers=dn)
    y = jax.nn.relu(y + params["conv2_b"][None, :, None, None])
    y = jax.lax.reduce_window(y, -jnp.inf, jax.lax.max,
                              (1, 1, 2, 2), (1, 1, 2, 2), "VALID")
    y = y.reshape(y.shape[0], -1)
    y = jax.nn.relu(y @ params["fc1_w"].T + params["fc1_b"])
    y = jax.nn.relu(y @ params["fc2_w"].T + params["fc2_b"])
    return y @ params["fc3_w"].T + params["fc3_b"]


if __name__ == "__main__":
    key = jax.random.PRNGKey(0)
    pkey, xkey = jax.random.split(key)
    params = init_params(pkey)
    packed = pack_params(params)

    x = jax.random.normal(xkey, (2, 3, 32, 32), dtype=jnp.float32)

    out = jax.block_until_ready(_lenet_forward_jit(packed, x))
    assert out.shape == (2, 10)
    assert bool(jnp.all(jnp.isfinite(out)))

    ref = jax.block_until_ready(_reference_forward(params, x))
    # bf16 MXU operands (f32 accumulate): ~0.5% relative error on logits whose
    # std is ~7, so rtol 2e-2 with a small absolute floor is the right scale.
    assert bool(jnp.allclose(out, ref, rtol=2e-2, atol=1e-1)), "mismatch vs reference"

    print("KERNEL_OK")
</pallas_src>

<mosaic_0001>
module attributes {stable_mosaic.version = 11 : i64} {
  func.func @kernel(%arg0: i32, %arg1: memref<1x4x200x80xbf16, #tpu.memory_space<vmem>>, %arg2: memref<80x128xbf16, #tpu.memory_space<vmem>>, %arg3: memref<1x128xf32, #tpu.memory_space<vmem>>, %arg4: memref<200x128xbf16, #tpu.memory_space<vmem>>, %arg5: memref<1x128xf32, #tpu.memory_space<vmem>>, %arg6: memref<400x128xbf16, #tpu.memory_space<vmem>>, %arg7: memref<1x128xf32, #tpu.memory_space<vmem>>, %arg8: memref<128x128xbf16, #tpu.memory_space<vmem>>, %arg9: memref<1x128xf32, #tpu.memory_space<vmem>>, %arg10: memref<128x128xbf16, #tpu.memory_space<vmem>>, %arg11: memref<1x128xf32, #tpu.memory_space<vmem>>, %arg12: memref<1x1x128xf32, #tpu.memory_space<vmem>>, %arg13: memref<200x128xf32, #tpu.memory_space<vmem>>, %arg14: memref<136x128xf32, #tpu.memory_space<vmem>>, %arg15: memref<32x128xf32, #tpu.memory_space<vmem>>) attributes {dimension_semantics = [#tpu.dimension_semantics<parallel>], iteration_bounds = array<i64: 2>, scalar_prefetch = 0 : i64, scratch_operands = 3 : i64, tpu.core_type = #tpu.core_type<tc>, window_params = [{transform_indices = @transform_0, window_bounds = array<i64: 1, 4, 200, 80>}, {pipeline_mode = #tpu.pipeline_mode<synchronous>, transform_indices = @transform_1, window_bounds = array<i64: 80, 128>}, {pipeline_mode = #tpu.pipeline_mode<synchronous>, transform_indices = @transform_2, window_bounds = array<i64: 1, 128>}, {pipeline_mode = #tpu.pipeline_mode<synchronous>, transform_indices = @transform_3, window_bounds = array<i64: 200, 128>}, {pipeline_mode = #tpu.pipeline_mode<synchronous>, transform_indices = @transform_4, window_bounds = array<i64: 1, 128>}, {pipeline_mode = #tpu.pipeline_mode<synchronous>, transform_indices = @transform_5, window_bounds = array<i64: 400, 128>}, {pipeline_mode = #tpu.pipeline_mode<synchronous>, transform_indices = @transform_6, window_bounds = array<i64: 1, 128>}, {pipeline_mode = #tpu.pipeline_mode<synchronous>, transform_indices = @transform_7, window_bounds = array<i64: 128, 128>}, {pipeline_mode = #tpu.pipeline_mode<synchronous>, transform_indices = @transform_8, window_bounds = array<i64: 1, 128>}, {pipeline_mode = #tpu.pipeline_mode<synchronous>, transform_indices = @transform_9, window_bounds = array<i64: 128, 128>}, {pipeline_mode = #tpu.pipeline_mode<synchronous>, transform_indices = @transform_10, window_bounds = array<i64: 1, 128>}, {transform_indices = @transform_11, window_bounds = array<i64: 1, 1, 128>}]} {
    %c0 = arith.constant 0 : index
    %c0_0 = arith.constant 0 : index
    %0 = vector.load %arg2[%c0, %c0_0] : memref<80x128xbf16, #tpu.memory_space<vmem>>, vector<80x128xbf16>
    %c0_1 = arith.constant 0 : index
    %c0_2 = arith.constant 0 : index
    %1 = vector.load %arg3[%c0_1, %c0_2] : memref<1x128xf32, #tpu.memory_space<vmem>>, vector<1x128xf32>
    %c0_3 = arith.constant 0 : index
    %c0_4 = arith.constant 0 : index
    %2 = vector.load %arg5[%c0_3, %c0_4] : memref<1x128xf32, #tpu.memory_space<vmem>>, vector<1x128xf32>
    %c0_5 = arith.constant 0 : index
    %c0_6 = arith.constant 0 : index
    %c0_7 = arith.constant 0 : index
    %c0_8 = arith.constant 0 : index
    %3 = vector.load %arg1[%c0_5, %c0_6, %c0_7, %c0_8] : memref<1x4x200x80xbf16, #tpu.memory_space<vmem>>, vector<1x1x200x80xbf16>
    %4 = vector.shape_cast %3 : vector<1x1x200x80xbf16> to vector<200x80xbf16>
    %cst = arith.constant dense<0.000000e+00> : vector<200x128xf32>
    %5 = tpu.matmul %4, %0, %cst {dimension_numbers = #tpu.dot_dimension_numbers<[1], [0], [0], [1], [0, 0, 1, 1], [], []>} : vector<200x80xbf16>, vector<80x128xbf16>, vector<200x128xf32> -> vector<200x128xf32>
    %c0_9 = arith.constant 0 : index
    %c0_10 = arith.constant 0 : index
    %6 = vector.load %arg13[%c0_9, %c0_10] : memref<200x128xf32, #tpu.memory_space<vmem>>, vector<200x128xf32>
    tpu.vector_store %arg13[%c0_9, %c0_10], %5 {strides = array<i32>} : memref<200x128xf32, #tpu.memory_space<vmem>>, vector<200x128xf32>,
    %c0_11 = arith.constant 0 : index
    %c1 = arith.constant 1 : index
    %c0_12 = arith.constant 0 : index
    %c0_13 = arith.constant 0 : index
    %7 = vector.load %arg1[%c0_11, %c1, %c0_12, %c0_13] : memref<1x4x200x80xbf16, #tpu.memory_space<vmem>>, vector<1x1x200x80xbf16>
    %8 = vector.shape_cast %7 : vector<1x1x200x80xbf16> to vector<200x80xbf16>
    %cst_14 = arith.constant dense<0.000000e+00> : vector<200x128xf32>
    %9 = tpu.matmul %8, %0, %cst_14 {dimension_numbers = #tpu.dot_dimension_numbers<[1], [0], [0], [1], [0, 0, 1, 1], [], []>} : vector<200x80xbf16>, vector<80x128xbf16>, vector<200x128xf32> -> vector<200x128xf32>
    %c0_15 = arith.constant 0 : index
    %c0_16 = arith.constant 0 : index
    %10 = vector.load %arg13[%c0_15, %c0_16] : memref<200x128xf32, #tpu.memory_space<vmem>>, vector<200x128xf32>
    %11 = arith.maximumf %10, %9 : vector<200x128xf32>
    %c0_17 = arith.constant 0 : index
    %c0_18 = arith.constant 0 : index
    %12 = vector.load %arg13[%c0_17, %c0_18] : memref<200x128xf32, #tpu.memory_space<vmem>>, vector<200x128xf32>
    tpu.vector_store %arg13[%c0_17, %c0_18], %11 {strides = array<i32>} : memref<200x128xf32, #tpu.memory_space<vmem>>, vector<200x128xf32>,
    %c0_19 = arith.constant 0 : index
    %c2 = arith.constant 2 : index
    %c0_20 = arith.constant 0 : index
    %c0_21 = arith.constant 0 : index
    %13 = vector.load %arg1[%c0_19, %c2, %c0_20, %c0_21] : memref<1x4x200x80xbf16, #tpu.memory_space<vmem>>, vector<1x1x200x80xbf16>
    %14 = vector.shape_cast %13 : vector<1x1x200x80xbf16> to vector<200x80xbf16>
    %cst_22 = arith.constant dense<0.000000e+00> : vector<200x128xf32>
    %15 = tpu.matmul %14, %0, %cst_22 {dimension_numbers = #tpu.dot_dimension_numbers<[1], [0], [0], [1], [0, 0, 1, 1], [], []>} : vector<200x80xbf16>, vector<80x128xbf16>, vector<200x128xf32> -> vector<200x128xf32>
    %c0_23 = arith.constant 0 : index
    %c0_24 = arith.constant 0 : index
    %16 = vector.load %arg13[%c0_23, %c0_24] : memref<200x128xf32, #tpu.memory_space<vmem>>, vector<200x128xf32>
    %17 = arith.maximumf %16, %15 : vector<200x128xf32>
    %c0_25 = arith.constant 0 : index
    %c0_26 = arith.constant 0 : index
    %18 = vector.load %arg13[%c0_25, %c0_26] : memref<200x128xf32, #tpu.memory_space<vmem>>, vector<200x128xf32>
    tpu.vector_store %arg13[%c0_25, %c0_26], %17 {strides = array<i32>} : memref<200x128xf32, #tpu.memory_space<vmem>>, vector<200x128xf32>,
    %c0_27 = arith.constant 0 : index
    %c3 = arith.constant 3 : index
    %c0_28 = arith.constant 0 : index
    %c0_29 = arith.constant 0 : index
    %19 = vector.load %arg1[%c0_27, %c3, %c0_28, %c0_29] : memref<1x4x200x80xbf16, #tpu.memory_space<vmem>>, vector<1x1x200x80xbf16>
    %20 = vector.shape_cast %19 : vector<1x1x200x80xbf16> to vector<200x80xbf16>
    %cst_30 = arith.constant dense<0.000000e+00> : vector<200x128xf32>
    %21 = tpu.matmul %20, %0, %cst_30 {dimension_numbers = #tpu.dot_dimension_numbers<[1], [0], [0], [1], [0, 0, 1, 1], [], []>} : vector<200x80xbf16>, vector<80x128xbf16>, vector<200x128xf32> -> vector<200x128xf32>
    %c0_31 = arith.constant 0 : index
    %c0_32 = arith.constant 0 : index
    %22 = vector.load %arg13[%c0_31, %c0_32] : memref<200x128xf32, #tpu.memory_space<vmem>>, vector<200x128xf32>
    %23 = arith.maximumf %22, %21 : vector<200x128xf32>
    %c0_33 = arith.constant 0 : index
    %c0_34 = arith.constant 0 : index
    %24 = vector.load %arg13[%c0_33, %c0_34] : memref<200x128xf32, #tpu.memory_space<vmem>>, vector<200x128xf32>
    tpu.vector_store %arg13[%c0_33, %c0_34], %23 {strides = array<i32>} : memref<200x128xf32, #tpu.memory_space<vmem>>, vector<200x128xf32>,
    %c0_35 = arith.constant 0 : index
    %c0_36 = arith.constant 0 : index
    %25 = vector.load %arg13[%c0_35, %c0_36] : memref<200x128xf32, #tpu.memory_space<vmem>>, vector<200x128xf32>
    %26 = vector.broadcast %1 : vector<1x128xf32> to vector<200x128xf32>
    %27 = arith.addf %25, %26 : vector<200x128xf32>
    %cst_37 = arith.constant 0.000000e+00 : f32
    %28 = vector.broadcast %cst_37 : f32 to vector<200x128xf32>
    %29 = arith.maximumf %27, %28 : vector<200x128xf32>
    %c0_38 = arith.constant 0 : index
    %c0_39 = arith.constant 0 : index
    %30 = vector.load %arg13[%c0_38, %c0_39] : memref<200x128xf32, #tpu.memory_space<vmem>>, vector<200x128xf32>
    tpu.vector_store %arg13[%c0_38, %c0_39], %29 {strides = array<i32>} : memref<200x128xf32, #tpu.memory_space<vmem>>, vector<200x128xf32>,
    %cst_40 = arith.constant 0.000000e+00 : f32
    %31 = vector.broadcast %cst_40 : f32 to vector<136x128xf32>
    %c0_41 = arith.constant 0 : index
    %c0_42 = arith.constant 0 : index
    %32 = vector.load %arg13[%c0_41, %c0_42] : memref<200x128xf32, #tpu.memory_space<vmem>>, vector<136x128xf32>
    %33 = vector.extract_strided_slice %32 {offsets = [0, 0], sizes = [136, 8], strides = [1, 1]} : vector<136x128xf32> to vector<136x8xf32>
    %34 = arith.truncf %33 : vector<136x8xf32> to vector<136x8xbf16>
    %c0_43 = arith.constant 0 : index
    %c0_44 = arith.constant 0 : index
    %35 = vector.load %arg4[%c0_43, %c0_44] : memref<200x128xbf16, #tpu.memory_space<vmem>>, vector<8x128xbf16>
    %cst_45 = arith.constant dense<0.000000e+00> : vector<136x128xf32>
    %36 = tpu.matmul %34, %35, %cst_45 {dimension_numbers = #tpu.dot_dimension_numbers<[1], [0], [0], [1], [0, 0, 1, 1], [], []>} : vector<136x8xbf16>, vector<8x128xbf16>, vector<136x128xf32> -> vector<136x128xf32>
    %37 = arith.addf %31, %36 : vector<136x128xf32>
    %c1_46 = arith.constant 1 : index
    %c0_47 = arith.constant 0 : index
    %38 = vector.load %arg13[%c1_46, %c0_47] : memref<200x128xf32, #tpu.memory_space<vmem>>, vector<136x128xf32>
    %39 = vector.extract_strided_slice %38 {offsets = [0, 0], sizes = [136, 8], strides = [1, 1]} : vector<136x128xf32> to vector<136x8xf32>
    %40 = arith.truncf %39 : vector<136x8xf32> to vector<136x8xbf16>
    %c8 = arith.constant 8 : index
    %c0_48 = arith.constant 0 : index
    %41 = vector.load %arg4[%c8, %c0_48] : memref<200x128xbf16, #tpu.memory_space<vmem>>, vector<8x128xbf16>
    %cst_49 = arith.constant dense<0.000000e+00> : vector<136x128xf32>
    %42 = tpu.matmul %40, %41, %cst_49 {dimension_numbers = #tpu.dot_dimension_numbers<[1], [0], [0], [1], [0, 0, 1, 1], [], []>} : vector<136x8xbf16>, vector<8x128xbf16>, vector<136x128xf32> -> vector<136x128xf32>
    %43 = arith.addf %37, %42 : vector<136x128xf32>
    %c2_50 = arith.constant 2 : index
    %c0_51 = arith.constant 0 : index
    %44 = vector.load %arg13[%c2_50, %c0_51] : memref<200x128xf32, #tpu.memory_space<vmem>>, vector<136x128xf32>
    %45 = vector.extract_strided_slice %44 {offsets = [0, 0], sizes = [136, 8], strides = [1, 1]} : vector<136x128xf32> to vector<136x8xf32>
    %46 = arith.truncf %45 : vector<136x8xf32> to vector<136x8xbf16>
    %c16 = arith.constant 16 : index
    %c0_52 = arith.constant 0 : index
    %47 = vector.load %arg4[%c16, %c0_52] : memref<200x128xbf16, #tpu.memory_space<vmem>>, vector<8x128xbf16>
    %cst_53 = arith.constant dense<0.000000e+00> : vector<136x128xf32>
    %48 = tpu.matmul %46, %47, %cst_53 {dimension_numbers = #tpu.dot_dimension_numbers<[1], [0], [0], [1], [0, 0, 1, 1], [], []>} : vector<136x8xbf16>, vector<8x128xbf16>, vector<136x128xf32> -> vector<136x128xf32>
    %49 = arith.addf %43, %48 : vector<136x128xf32>
    %c3_54 = arith.constant 3 : index
    %c0_55 = arith.constant 0 : index
    %50 = vector.load %arg13[%c3_54, %c0_55] : memref<200x128xf32, #tpu.memory_space<vmem>>, vector<136x128xf32>
    %51 = vector.extract_strided_slice %50 {offsets = [0, 0], sizes = [136, 8], strides = [1, 1]} : vector<136x128xf32> to vector<136x8xf32>
    %52 = arith.truncf %51 : vector<136x8xf32> to vector<136x8xbf16>
    %c24 = arith.constant 24 : index
    %c0_56 = arith.constant 0 : index
    %53 = vector.load %arg4[%c24, %c0_56] : memref<200x128xbf16, #tpu.memory_space<vmem>>, vector<8x128xbf16>
    %cst_57 = arith.constant dense<0.000000e+00> : vector<136x128xf32>
    %54 = tpu.matmul %52, %53, %cst_57 {dimension_numbers = #tpu.dot_dimension_numbers<[1], [0], [0], [1], [0, 0, 1, 1], [], []>} : vector<136x8xbf16>, vector<8x128xbf16>, vector<136x128xf32> -> vector<136x128xf32>
    %55 = arith.addf %49, %54 : vector<136x128xf32>
    %c4 = arith.constant 4 : index
    %c0_58 = arith.constant 0 : index
    %56 = vector.load %arg13[%c4, %c0_58] : memref<200x128xf32, #tpu.memory_space<vmem>>, vector<136x128xf32>
    %57 = vector.extract_strided_slice %56 {offsets = [0, 0], sizes = [136, 8], strides = [1, 1]} : vector<136x128xf32> to vector<136x8xf32>
    %58 = arith.truncf %57 : vector<136x8xf32> to vector<136x8xbf16>
    %c32 = arith.constant 32 : index
    %c0_59 = arith.constant 0 : index
    %59 = vector.load %arg4[%c32, %c0_59] : memref<200x128xbf16, #tpu.memory_space<vmem>>, vector<8x128xbf16>
    %cst_60 = arith.constant dense<0.000000e+00> : vector<136x128xf32>
    %60 = tpu.matmul %58, %59, %cst_60 {dimension_numbers = #tpu.dot_dimension_numbers<[1], [0], [0], [1], [0, 0, 1, 1], [], []>} : vector<136x8xbf16>, vector<8x128xbf16>, vector<136x128xf32> -> vector<136x128xf32>
    %61 = arith.addf %55, %60 : vector<136x128xf32>
    %c14 = arith.constant 14 : index
    %c0_61 = arith.constant 0 : index
    %62 = vector.load %arg13[%c14, %c0_61] : memref<200x128xf32, #tpu.memory_space<vmem>>, vector<136x128xf32>
    %63 = vector.extract_strided_slice %62 {offsets = [0, 0], sizes = [136, 8], strides = [1, 1]} : vector<136x128xf32> to vector<136x8xf32>
    %64 = arith.truncf %63 : vector<136x8xf32> to vector<136x8xbf16>
    %c40 = arith.constant 40 : index
    %c0_62 = arith.constant 0 : index
    %65 = vector.load %arg4[%c40, %c0_62] : memref<200x128xbf16, #tpu.memory_space<vmem>>, vector<8x128xbf16>
    %cst_63 = arith.constant dense<0.000000e+00> : vector<136x128xf32>
    %66 = tpu.matmul %64, %65, %cst_63 {dimension_numbers = #tpu.dot_dimension_numbers<[1], [0], [0], [1], [0, 0, 1, 1], [], []>} : vector<136x8xbf16>, vector<8x128xbf16>, vector<136x128xf32> -> vector<136x128xf32>
    %67 = arith.addf %61, %66 : vector<136x128xf32>
    %c15 = arith.constant 15 : index
    %c0_64 = arith.constant 0 : index
    %68 = vector.load %arg13[%c15, %c0_64] : memref<200x128xf32, #tpu.memory_space<vmem>>, vector<136x128xf32>
    %69 = vector.extract_strided_slice %68 {offsets = [0, 0], sizes = [136, 8], strides = [1, 1]} : vector<136x128xf32> to vector<136x8xf32>
    %70 = arith.truncf %69 : vector<136x8xf32> to vector<136x8xbf16>
    %c48 = arith.constant 48 : index
    %c0_65 = arith.constant 0 : index
    %71 = vector.load %arg4[%c48, %c0_65] : memref<200x128xbf16, #tpu.memory_space<vmem>>, vector<8x128xbf16>
    %cst_66 = arith.constant dense<0.000000e+00> : vector<136x128xf32>
    %72 = tpu.matmul %70, %71, %cst_66 {dimension_numbers = #tpu.dot_dimension_numbers<[1], [0], [0], [1], [0, 0, 1, 1], [], []>} : vector<136x8xbf16>, vector<8x128xbf16>, vector<136x128xf32> -> vector<136x128xf32>
    %73 = arith.addf %67, %72 : vector<136x128xf32>
    %c16_67 = arith.constant 16 : index
    %c0_68 = arith.constant 0 : index
    %74 = vector.load %arg13[%c16_67, %c0_68] : memref<200x128xf32, #tpu.memory_space<vmem>>, vector<136x128xf32>
    %75 = vector.extract_strided_slice %74 {offsets = [0, 0], sizes = [136, 8], strides = [1, 1]} : vector<136x128xf32> to vector<136x8xf32>
    %76 = arith.truncf %75 : vector<136x8xf32> to vector<136x8xbf16>
    %c56 = arith.constant 56 : index
    %c0_69 = arith.constant 0 : index
    %77 = vector.load %arg4[%c56, %c0_69] : memref<200x128xbf16, #tpu.memory_space<vmem>>, vector<8x128xbf16>
    %cst_70 = arith.constant dense<0.000000e+00> : vector<136x128xf32>
    %78 = tpu.matmul %76, %77, %cst_70 {dimension_numbers = #tpu.dot_dimension_numbers<[1], [0], [0], [1], [0, 0, 1, 1], [], []>} : vector<136x8xbf16>, vector<8x128xbf16>, vector<136x128xf32> -> vector<136x128xf32>
    %79 = arith.addf %73, %78 : vector<136x128xf32>
    %c17 = arith.constant 17 : index
    %c0_71 = arith.constant 0 : index
    %80 = vector.load %arg13[%c17, %c0_71] : memref<200x128xf32, #tpu.memory_space<vmem>>, vector<136x128xf32>
    %81 = vector.extract_strided_slice %80 {offsets = [0, 0], sizes = [136, 8], strides = [1, 1]} : vector<136x128xf32> to vector<136x8xf32>
    %82 = arith.truncf %81 : vector<136x8xf32> to vector<136x8xbf16>
    %c64 = arith.constant 64 : index
    %c0_72 = arith.constant 0 : index
    %83 = vector.load %arg4[%c64, %c0_72] : memref<200x128xbf16, #tpu.memory_space<vmem>>, vector<8x128xbf16>
    %cst_73 = arith.constant dense<0.000000e+00> : vector<136x128xf32>
    %84 = tpu.matmul %82, %83, %cst_73 {dimension_numbers = #tpu.dot_dimension_numbers<[1], [0], [0], [1], [0, 0, 1, 1], [], []>} : vector<136x8xbf16>, vector<8x128xbf16>, vector<136x128xf32> -> vector<136x128xf32>
    %85 = arith.addf %79, %84 : vector<136x128xf32>
    %c18 = arith.constant 18 : index
    %c0_74 = arith.constant 0 : index
    %86 = vector.load %arg13[%c18, %c0_74] : memref<200x128xf32, #tpu.memory_space<vmem>>, vector<136x128xf32>
    %87 = vector.extract_strided_slice %86 {offsets = [0, 0], sizes = [136, 8], strides = [1, 1]} : vector<136x128xf32> to vector<136x8xf32>
    %88 = arith.truncf %87 : vector<136x8xf32> to vector<136x8xbf16>
    %c72 = arith.constant 72 : index
    %c0_75 = arith.constant 0 : index
    %89 = vector.load %arg4[%c72, %c0_75] : memref<200x128xbf16, #tpu.memory_space<vmem>>, vector<8x128xbf16>
    %cst_76 = arith.constant dense<0.000000e+00> : vector<136x128xf32>
    %90 = tpu.matmul %88, %89, %cst_76 {dimension_numbers = #tpu.dot_dimension_numbers<[1], [0], [0], [1], [0, 0, 1, 1], [], []>} : vector<136x8xbf16>, vector<8x128xbf16>, vector<136x128xf32> -> vector<136x128xf32>
    %91 = arith.addf %85, %90 : vector<136x128xf32>
    %c28 = arith.constant 28 : index
    %c0_77 = arith.constant 0 : index
    %92 = vector.load %arg13[%c28, %c0_77] : memref<200x128xf32, #tpu.memory_space<vmem>>, vector<136x128xf32>
    %93 = vector.extract_strided_slice %92 {offsets = [0, 0], sizes = [136, 8], strides = [1, 1]} : vector<136x128xf32> to vector<136x8xf32>
    %94 = arith.truncf %93 : vector<136x8xf32> to vector<136x8xbf16>
    %c80 = arith.constant 80 : index
    %c0_78 = arith.constant 0 : index
    %95 = vector.load %arg4[%c80, %c0_78] : memref<200x128xbf16, #tpu.memory_space<vmem>>, vector<8x128xbf16>
    %cst_79 = arith.constant dense<0.000000e+00> : vector<136x128xf32>
    %96 = tpu.matmul %94, %95, %cst_79 {dimension_numbers = #tpu.dot_dimension_numbers<[1], [0], [0], [1], [0, 0, 1, 1], [], []>} : vector<136x8xbf16>, vector<8x128xbf16>, vector<136x128xf32> -> vector<136x128xf32>
    %97 = arith.addf %91, %96 : vector<136x128xf32>
    %c29 = arith.constant 29 : index
    %c0_80 = arith.constant 0 : index
    %98 = vector.load %arg13[%c29, %c0_80] : memref<200x128xf32, #tpu.memory_space<vmem>>, vector<136x128xf32>
    %99 = vector.extract_strided_slice %98 {offsets = [0, 0], sizes = [136, 8], strides = [1, 1]} : vector<136x128xf32> to vector<136x8xf32>
    %100 = arith.truncf %99 : vector<136x8xf32> to vector<136x8xbf16>
    %c88 = arith.constant 88 : index
    %c0_81 = arith.constant 0 : index
    %101 = vector.load %arg4[%c88, %c0_81] : memref<200x128xbf16, #tpu.memory_space<vmem>>, vector<8x128xbf16>
    %cst_82 = arith.constant dense<0.000000e+00> : vector<136x128xf32>
    %102 = tpu.matmul %100, %101, %cst_82 {dimension_numbers = #tpu.dot_dimension_numbers<[1], [0], [0], [1], [0, 0, 1, 1], [], []>} : vector<136x8xbf16>, vector<8x128xbf16>, vector<136x128xf32> -> vector<136x128xf32>
    %103 = arith.addf %97, %102 : vector<136x128xf32>
    %c30 = arith.constant 30 : index
    %c0_83 = arith.constant 0 : index
    %104 = vector.load %arg13[%c30, %c0_83] : memref<200x128xf32, #tpu.memory_space<vmem>>, vector<136x128xf32>
    %105 = vector.extract_strided_slice %104 {offsets = [0, 0], sizes = [136, 8], strides = [1, 1]} : vector<136x128xf32> to vector<136x8xf32>
    %106 = arith.truncf %105 : vector<136x8xf32> to vector<136x8xbf16>
    %c96 = arith.constant 96 : index
    %c0_84 = arith.constant 0 : index
    %107 = vector.load %arg4[%c96, %c0_84] : memref<200x128xbf16, #tpu.memory_space<vmem>>, vector<8x128xbf16>
    %cst_85 = arith.constant dense<0.000000e+00> : vector<136x128xf32>
    %108 = tpu.matmul %106, %107, %cst_85 {dimension_numbers = #tpu.dot_dimension_numbers<[1], [0], [0], [1], [0, 0, 1, 1], [], []>} : vector<136x8xbf16>, vector<8x128xbf16>, vector<136x128xf32> -> vector<136x128xf32>
    %109 = arith.addf %103, %108 : vector<136x128xf32>
    %c31 = arith.constant 31 : index
    %c0_86 = arith.constant 0 : index
    %110 = vector.load %arg13[%c31, %c0_86] : memref<200x128xf32, #tpu.memory_space<vmem>>, vector<136x128xf32>
    %111 = vector.extract_strided_slice %110 {offsets = [0, 0], sizes = [136, 8], strides = [1, 1]} : vector<136x128xf32> to vector<136x8xf32>
    %112 = arith.truncf %111 : vector<136x8xf32> to vector<136x8xbf16>
    %c104 = arith.constant 104 : index
    %c0_87 = arith.constant 0 : index
    %113 = vector.load %arg4[%c104, %c0_87] : memref<200x128xbf16, #tpu.memory_space<vmem>>, vector<8x128xbf16>
    %cst_88 = arith.constant dense<0.000000e+00> : vector<136x128xf32>
    %114 = tpu.matmul %112, %113, %cst_88 {dimension_numbers = #tpu.dot_dimension_numbers<[1], [0], [0], [1], [0, 0, 1, 1], [], []>} : vector<136x8xbf16>, vector<8x128xbf16>, vector<136x128xf32> -> vector<136x128xf32>
    %115 = arith.addf %109, %114 : vector<136x128xf32>
    %c32_89 = arith.constant 32 : index
    %c0_90 = arith.constant 0 : index
    %116 = vector.load %arg13[%c32_89, %c0_90] : memref<200x128xf32, #tpu.memory_space<vmem>>, vector<136x128xf32>
    %117 = vector.extract_strided_slice %116 {offsets = [0, 0], sizes = [136, 8], strides = [1, 1]} : vector<136x128xf32> to vector<136x8xf32>
    %118 = arith.truncf %117 : vector<136x8xf32> to vector<136x8xbf16>
    %c112 = arith.constant 112 : index
    %c0_91 = arith.constant 0 : index
    %119 = vector.load %arg4[%c112, %c0_91] : memref<200x128xbf16, #tpu.memory_space<vmem>>, vector<8x128xbf16>
    %cst_92 = arith.constant dense<0.000000e+00> : vector<136x128xf32>
    %120 = tpu.matmul %118, %119, %cst_92 {dimension_numbers = #tpu.dot_dimension_numbers<[1], [0], [0], [1], [0, 0, 1, 1], [], []>} : vector<136x8xbf16>, vector<8x128xbf16>, vector<136x128xf32> -> vector<136x128xf32>
    %121 = arith.addf %115, %120 : vector<136x128xf32>
    %c42 = arith.constant 42 : index
    %c0_93 = arith.constant 0 : index
    %122 = vector.load %arg13[%c42, %c0_93] : memref<200x128xf32, #tpu.memory_space<vmem>>, vector<136x128xf32>
    %123 = vector.extract_strided_slice %122 {offsets = [0, 0], sizes = [136, 8], strides = [1, 1]} : vector<136x128xf32> to vector<136x8xf32>
    %124 = arith.truncf %123 : vector<136x8xf32> to vector<136x8xbf16>
    %c120 = arith.constant 120 : index
    %c0_94 = arith.constant 0 : index
    %125 = vector.load %arg4[%c120, %c0_94] : memref<200x128xbf16, #tpu.memory_space<vmem>>, vector<8x128xbf16>
    %cst_95 = arith.constant dense<0.000000e+00> : vector<136x128xf32>
    %126 = tpu.matmul %124, %125, %cst_95 {dimension_numbers = #tpu.dot_dimension_numbers<[1], [0], [0], [1], [0, 0, 1, 1], [], []>} : vector<136x8xbf16>, vector<8x128xbf16>, vector<136x128xf32> -> vector<136x128xf32>
    %127 = arith.addf %121, %126 : vector<136x128xf32>
    %c43 = arith.constant 43 : index
    %c0_96 = arith.constant 0 : index
    %128 = vector.load %arg13[%c43, %c0_96] : memref<200x128xf32, #tpu.memory_space<vmem>>, vector<136x128xf32>
    %129 = vector.extract_strided_slice %128 {offsets = [0, 0], sizes = [136, 8], strides = [1, 1]} : vector<136x128xf32> to vector<136x8xf32>
    %130 = arith.truncf %129 : vector<136x8xf32> to vector<136x8xbf16>
    %c128 = arith.constant 128 : index
    %c0_97 = arith.constant 0 : index
    %131 = vector.load %arg4[%c128, %c0_97] : memref<200x128xbf16, #tpu.memory_space<vmem>>, vector<8x128xbf16>
    %cst_98 = arith.constant dense<0.000000e+00> : vector<136x128xf32>
    %132 = tpu.matmul %130, %131, %cst_98 {dimension_numbers = #tpu.dot_dimension_numbers<[1], [0], [0], [1], [0, 0, 1, 1], [], []>} : vector<136x8xbf16>, vector<8x128xbf16>, vector<136x128xf32> -> vector<136x128xf32>
    %133 = arith.addf %127, %132 : vector<136x128xf32>
    %c44 = arith.constant 44 : index
    %c0_99 = arith.constant 0 : index
    %134 = vector.load %arg13[%c44, %c0_99] : memref<200x128xf32, #tpu.memory_space<vmem>>, vector<136x128xf32>
    %135 = vector.extract_strided_slice %134 {offsets = [0, 0], sizes = [136, 8], strides = [1, 1]} : vector<136x128xf32> to vector<136x8xf32>
    %136 = arith.truncf %135 : vector<136x8xf32> to vector<136x8xbf16>
    %c136 = arith.constant 136 : index
    %c0_100 = arith.constant 0 : index
    %137 = vector.load %arg4[%c136, %c0_100] : memref<200x128xbf16, #tpu.memory_space<vmem>>, vector<8x128xbf16>
    %cst_101 = arith.constant dense<0.000000e+00> : vector<136x128xf32>
    %138 = tpu.matmul %136, %137, %cst_101 {dimension_numbers = #tpu.dot_dimension_numbers<[1], [0], [0], [1], [0, 0, 1, 1], [], []>} : vector<136x8xbf16>, vector<8x128xbf16>, vector<136x128xf32> -> vector<136x128xf32>
    %139 = arith.addf %133, %138 : vector<136x128xf32>
    %c45 = arith.constant 45 : index
    %c0_102 = arith.constant 0 : index
    %140 = vector.load %arg13[%c45, %c0_102] : memref<200x128xf32, #tpu.memory_space<vmem>>, vector<136x128xf32>
    %141 = vector.extract_strided_slice %140 {offsets = [0, 0], sizes = [136, 8], strides = [1, 1]} : vector<136x128xf32> to vector<136x8xf32>
    %142 = arith.truncf %141 : vector<136x8xf32> to vector<136x8xbf16>
    %c144 = arith.constant 144 : index
    %c0_103 = arith.constant 0 : index
    %143 = vector.load %arg4[%c144, %c0_103] : memref<200x128xbf16, #tpu.memory_space<vmem>>, vector<8x128xbf16>
    %cst_104 = arith.constant dense<0.000000e+00> : vector<136x128xf32>
    %144 = tpu.matmul %142, %143, %cst_104 {dimension_numbers = #tpu.dot_dimension_numbers<[1], [0], [0], [1], [0, 0, 1, 1], [], []>} : vector<136x8xbf16>, vector<8x128xbf16>, vector<136x128xf32> -> vector<136x128xf32>
    %145 = arith.addf %139, %144 : vector<136x128xf32>
    %c46 = arith.constant 46 : index
    %c0_105 = arith.constant 0 : index
    %146 = vector.load %arg13[%c46, %c0_105] : memref<200x128xf32, #tpu.memory_space<vmem>>, vector<136x128xf32>
    %147 = vector.extract_strided_slice %146 {offsets = [0, 0], sizes = [136, 8], strides = [1, 1]} : vector<136x128xf32> to vector<136x8xf32>
    %148 = arith.truncf %147 : vector<136x8xf32> to vector<136x8xbf16>
    %c152 = arith.constant 152 : index
    %c0_106 = arith.constant 0 : index
    %149 = vector.load %arg4[%c152, %c0_106] : memref<200x128xbf16, #tpu.memory_space<vmem>>, vector<8x128xbf16>
    %cst_107 = arith.constant dense<0.000000e+00> : vector<136x128xf32>
    %150 = tpu.matmul %148, %149, %cst_107 {dimension_numbers = #tpu.dot_dimension_numbers<[1], [0], [0], [1], [0, 0, 1, 1], [], []>} : vector<136x8xbf16>, vector<8x128xbf16>, vector<136x128xf32> -> vector<136x128xf32>
    %151 = arith.addf %145, %150 : vector<136x128xf32>
    %c56_108 = arith.constant 56 : index
    %c0_109 = arith.constant 0 : index
    %152 = vector.load %arg13[%c56_108, %c0_109] : memref<200x128xf32, #tpu.memory_space<vmem>>, vector<136x128xf32>
    %153 = vector.extract_strided_slice %152 {offsets = [0, 0], sizes = [136, 8], strides = [1, 1]} : vector<136x128xf32> to vector<136x8xf32>
    %154 = arith.truncf %153 : vector<136x8xf32> to vector<136x8xbf16>
    %c160 = arith.constant 160 : index
    %c0_110 = arith.constant 0 : index
    %155 = vector.load %arg4[%c160, %c0_110] : memref<200x128xbf16, #tpu.memory_space<vmem>>, vector<8x128xbf16>
    %cst_111 = arith.constant dense<0.000000e+00> : vector<136x128xf32>
    %156 = tpu.matmul %154, %155, %cst_111 {dimension_numbers = #tpu.dot_dimension_numbers<[1], [0], [0], [1], [0, 0, 1, 1], [], []>} : vector<136x8xbf16>, vector<8x128xbf16>, vector<136x128xf32> -> vector<136x128xf32>
    %157 = arith.addf %151, %156 : vector<136x128xf32>
    %c57 = arith.constant 57 : index
    %c0_112 = arith.constant 0 : index
    %158 = vector.load %arg13[%c57, %c0_112] : memref<200x128xf32, #tpu.memory_space<vmem>>, vector<136x128xf32>
    %159 = vector.extract_strided_slice %158 {offsets = [0, 0], sizes = [136, 8], strides = [1, 1]} : vector<136x128xf32> to vector<136x8xf32>
    %160 = arith.truncf %159 : vector<136x8xf32> to vector<136x8xbf16>
    %c168 = arith.constant 168 : index
    %c0_113 = arith.constant 0 : index
    %161 = vector.load %arg4[%c168, %c0_113] : memref<200x128xbf16, #tpu.memory_space<vmem>>, vector<8x128xbf16>
    %cst_114 = arith.constant dense<0.000000e+00> : vector<136x128xf32>
    %162 = tpu.matmul %160, %161, %cst_114 {dimension_numbers = #tpu.dot_dimension_numbers<[1], [0], [0], [1], [0, 0, 1, 1], [], []>} : vector<136x8xbf16>, vector<8x128xbf16>, vector<136x128xf32> -> vector<136x128xf32>
    %163 = arith.addf %157, %162 : vector<136x128xf32>
    %c58 = arith.constant 58 : index
    %c0_115 = arith.constant 0 : index
    %164 = vector.load %arg13[%c58, %c0_115] : memref<200x128xf32, #tpu.memory_space<vmem>>, vector<136x128xf32>
    %165 = vector.extract_strided_slice %164 {offsets = [0, 0], sizes = [136, 8], strides = [1, 1]} : vector<136x128xf32> to vector<136x8xf32>
    %166 = arith.truncf %165 : vector<136x8xf32> to vector<136x8xbf16>
    %c176 = arith.constant 176 : index
    %c0_116 = arith.constant 0 : index
    %167 = vector.load %arg4[%c176, %c0_116] : memref<200x128xbf16, #tpu.memory_space<vmem>>, vector<8x128xbf16>
    %cst_117 = arith.constant dense<0.000000e+00> : vector<136x128xf32>
    %168 = tpu.matmul %166, %167, %cst_117 {dimension_numbers = #tpu.dot_dimension_numbers<[1], [0], [0], [1], [0, 0, 1, 1], [], []>} : vector<136x8xbf16>, vector<8x128xbf16>, vector<136x128xf32> -> vector<136x128xf32>
    %169 = arith.addf %163, %168 : vector<136x128xf32>
    %c59 = arith.constant 59 : index
    %c0_118 = arith.constant 0 : index
    %170 = vector.load %arg13[%c59, %c0_118] : memref<200x128xf32, #tpu.memory_space<vmem>>, vector<136x128xf32>
    %171 = vector.extract_strided_slice %170 {offsets = [0, 0], sizes = [136, 8], strides = [1, 1]} : vector<136x128xf32> to vector<136x8xf32>
    %172 = arith.truncf %171 : vector<136x8xf32> to vector<136x8xbf16>
    %c184 = arith.constant 184 : index
    %c0_119 = arith.constant 0 : index
    %173 = vector.load %arg4[%c184, %c0_119] : memref<200x128xbf16, #tpu.memory_space<vmem>>, vector<8x128xbf16>
    %cst_120 = arith.constant dense<0.000000e+00> : vector<136x128xf32>
    %174 = tpu.matmul %172, %173, %cst_120 {dimension_numbers = #tpu.dot_dimension_numbers<[1], [0], [0], [1], [0, 0, 1, 1], [], []>} : vector<136x8xbf16>, vector<8x128xbf16>, vector<136x128xf32> -> vector<136x128xf32>
    %175 = arith.addf %169, %174 : vector<136x128xf32>
    %c60 = arith.constant 60 : index
    %c0_121 = arith.constant 0 : index
    %176 = vector.load %arg13[%c60, %c0_121] : memref<200x128xf32, #tpu.memory_space<vmem>>, vector<136x128xf32>
    %177 = vector.extract_strided_slice %176 {offsets = [0, 0], sizes = [136, 8], strides = [1, 1]} : vector<136x128xf32> to vector<136x8xf32>
    %178 = arith.truncf %177 : vector<136x8xf32> to vector<136x8xbf16>
    %c192 = arith.constant 192 : index
    %c0_122 = arith.constant 0 : index
    %179 = vector.load %arg4[%c192, %c0_122] : memref<200x128xbf16, #tpu.memory_space<vmem>>, vector<8x128xbf16>
    %cst_123 = arith.constant dense<0.000000e+00> : vector<136x128xf32>
    %180 = tpu.matmul %178, %179, %cst_123 {dimension_numbers = #tpu.dot_dimension_numbers<[1], [0], [0], [1], [0, 0, 1, 1], [], []>} : vector<136x8xbf16>, vector<8x128xbf16>, vector<136x128xf32> -> vector<136x128xf32>
    %181 = arith.addf %175, %180 : vector<136x128xf32>
    %182 = vector.broadcast %2 : vector<1x128xf32> to vector<136x128xf32>
    %183 = arith.addf %181, %182 : vector<136x128xf32>
    %cst_124 = arith.constant 0.000000e+00 : f32
    %184 = vector.broadcast %cst_124 : f32 to vector<136x128xf32>
    %185 = arith.maximumf %183, %184 : vector<136x128xf32>
    %c0_125 = arith.constant 0 : index
    %c0_126 = arith.constant 0 : index
    %186 = vector.load %arg14[%c0_125, %c0_126] : memref<136x128xf32, #tpu.memory_space<vmem>>, vector<136x128xf32>
    tpu.vector_store %arg14[%c0_125, %c0_126], %185 {strides = array<i32>} : memref<136x128xf32, #tpu.memory_space<vmem>>, vector<136x128xf32>,
    %c0_127 = arith.constant 0 : index
    %c0_128 = arith.constant 0 : index
    %187 = vector.load %arg14[%c0_127, %c0_128] : memref<136x128xf32, #tpu.memory_space<vmem>>, vector<2x128xf32>
    %c14_129 = arith.constant 14 : index
    %c0_130 = arith.constant 0 : index
    %188 = vector.load %arg14[%c14_129, %c0_130] : memref<136x128xf32, #tpu.memory_space<vmem>>, vector<2x128xf32>
    %189 = arith.maximumf %187, %188 : vector<2x128xf32>
    %cst_131 = arith.constant dense<0xFF800000> : vector<128xf32>
    %190 = vector.multi_reduction <maximumf>, %189, %cst_131 [0] : vector<2x128xf32> to vector<128xf32>
    %191 = vector.shape_cast %190 : vector<128xf32> to vector<1x128xf32>
    %c0_132 = arith.constant 0 : index
    %c0_133 = arith.constant 0 : index
    %192 = vector.load %arg15[%c0_132, %c0_133] : memref<32x128xf32, #tpu.memory_space<vmem>>, vector<1x128xf32>
    tpu.vector_store %arg15[%c0_132, %c0_133], %191 {strides = array<i32>} : memref<32x128xf32, #tpu.memory_space<vmem>>, vector<1x128xf32>,
    %c2_134 = arith.constant 2 : index
    %c0_135 = arith.constant 0 : index
    %193 = vector.load %arg14[%c2_134, %c0_135] : memref<136x128xf32, #tpu.memory_space<vmem>>, vector<2x128xf32>
    %c16_136 = arith.constant 16 : index
    %c0_137 = arith.constant 0 : index
    %194 = vector.load %arg14[%c16_136, %c0_137] : memref<136x128xf32, #tpu.memory_space<vmem>>, vector<2x128xf32>
    %195 = arith.maximumf %193, %194 : vector<2x128xf32>
    %cst_138 = arith.constant dense<0xFF800000> : vector<128xf32>
    %196 = vector.multi_reduction <maximumf>, %195, %cst_138 [0] : vector<2x128xf32> to vector<128xf32>
    %197 = vector.shape_cast %196 : vector<128xf32> to vector<1x128xf32>
    %c1_139 = arith.constant 1 : index
    %c0_140 = arith.constant 0 : index
    %198 = vector.load %arg15[%c1_139, %c0_140] : memref<32x128xf32, #tpu.memory_space<vmem>>, vector<1x128xf32>
    tpu.vector_store %arg15[%c1_139, %c0_140], %197 {strides = array<i32>} : memref<32x128xf32, #tpu.memory_space<vmem>>, vector<1x128xf32>,
    %c4_141 = arith.constant 4 : index
    %c0_142 = arith.constant 0 : index
    %199 = vector.load %arg14[%c4_141, %c0_142] : memref<136x128xf32, #tpu.memory_space<vmem>>, vector<2x128xf32>
    %c18_143 = arith.constant 18 : index
    %c0_144 = arith.constant 0 : index
    %200 = vector.load %arg14[%c18_143, %c0_144] : memref<136x128xf32, #tpu.memory_space<vmem>>, vector<2x128xf32>
    %201 = arith.maximumf %199, %200 : vector<2x128xf32>
    %cst_145 = arith.constant dense<0xFF800000> : vector<128xf32>
    %202 = vector.multi_reduction <maximumf>, %201, %cst_145 [0] : vector<2x128xf32> to vector<128xf32>
    %203 = vector.shape_cast %202 : vector<128xf32> to vector<1x128xf32>
    %c2_146 = arith.constant 2 : index
    %c0_147 = arith.constant 0 : index
    %204 = vector.load %arg15[%c2_146, %c0_147] : memref<32x128xf32, #tpu.memory_space<vmem>>, vector<1x128xf32>
    tpu.vector_store %arg15[%c2_146, %c0_147], %203 {strides = array<i32>} : memref<32x128xf32, #tpu.memory_space<vmem>>, vector<1x128xf32>,
    %c6 = arith.constant 6 : index
    %c0_148 = arith.constant 0 : index
    %205 = vector.load %arg14[%c6, %c0_148] : memref<136x128xf32, #tpu.memory_space<vmem>>, vector<2x128xf32>
    %c20 = arith.constant 20 : index
    %c0_149 = arith.constant 0 : index
    %206 = vector.load %arg14[%c20, %c0_149] : memref<136x128xf32, #tpu.memory_space<vmem>>, vector<2x128xf32>
    %207 = arith.maximumf %205, %206 : vector<2x128xf32>
    %cst_150 = arith.constant dense<0xFF800000> : vector<128xf32>
    %208 = vector.multi_reduction <maximumf>, %207, %cst_150 [0] : vector<2x128xf32> to vector<128xf32>
    %209 = vector.shape_cast %208 : vector<128xf32> to vector<1x128xf32>
    %c3_151 = arith.constant 3 : index
    %c0_152 = arith.constant 0 : index
    %210 = vector.load %arg15[%c3_151, %c0_152] : memref<32x128xf32, #tpu.memory_space<vmem>>, vector<1x128xf32>
    tpu.vector_store %arg15[%c3_151, %c0_152], %209 {strides = array<i32>} : memref<32x128xf32, #tpu.memory_space<vmem>>, vector<1x128xf32>,
    %c8_153 = arith.constant 8 : index
    %c0_154 = arith.constant 0 : index
    %211 = vector.load %arg14[%c8_153, %c0_154] : memref<136x128xf32, #tpu.memory_space<vmem>>, vector<2x128xf32>
    %c22 = arith.constant 22 : index
    %c0_155 = arith.constant 0 : index
    %212 = vector.load %arg14[%c22, %c0_155] : memref<136x128xf32, #tpu.memory_space<vmem>>, vector<2x128xf32>
    %213 = arith.maximumf %211, %212 : vector<2x128xf32>
    %cst_156 = arith.constant dense<0xFF800000> : vector<128xf32>
    %214 = vector.multi_reduction <maximumf>, %213, %cst_156 [0] : vector<2x128xf32> to vector<128xf32>
    %215 = vector.shape_cast %214 : vector<128xf32> to vector<1x128xf32>
    %c4_157 = arith.constant 4 : index
    %c0_158 = arith.constant 0 : index
    %216 = vector.load %arg15[%c4_157, %c0_158] : memref<32x128xf32, #tpu.memory_space<vmem>>, vector<1x128xf32>
    tpu.vector_store %arg15[%c4_157, %c0_158], %215 {strides = array<i32>} : memref<32x128xf32, #tpu.memory_space<vmem>>, vector<1x128xf32>,
    %c28_159 = arith.constant 28 : index
    %c0_160 = arith.constant 0 : index
    %217 = vector.load %arg14[%c28_159, %c0_160] : memref<136x128xf32, #tpu.memory_space<vmem>>, vector<2x128xf32>
    %c42_161 = arith.constant 42 : index
    %c0_162 = arith.constant 0 : index
    %218 = vector.load %arg14[%c42_161, %c0_162] : memref<136x128xf32, #tpu.memory_space<vmem>>, vector<2x128xf32>
    %219 = arith.maximumf %217, %218 : vector<2x128xf32>
    %cst_163 = arith.constant dense<0xFF800000> : vector<128xf32>
    %220 = vector.multi_reduction <maximumf>, %219, %cst_163 [0] : vector<2x128xf32> to vector<128xf32>
    %221 = vector.shape_cast %220 : vector<128xf32> to vector<1x128xf32>
    %c5 = arith.constant 5 : index
    %c0_164 = arith.constant 0 : index
    %222 = vector.load %arg15[%c5, %c0_164] : memref<32x128xf32, #tpu.memory_space<vmem>>, vector<1x128xf32>
    tpu.vector_store %arg15[%c5, %c0_164], %221 {strides = array<i32>} : memref<32x128xf32, #tpu.memory_space<vmem>>, vector<1x128xf32>,
    %c30_165 = arith.constant 30 : index
    %c0_166 = arith.constant 0 : index
    %223 = vector.load %arg14[%c30_165, %c0_166] : memref<136x128xf32, #tpu.memory_space<vmem>>, vector<2x128xf32>
    %c44_167 = arith.constant 44 : index
    %c0_168 = arith.constant 0 : index
    %224 = vector.load %arg14[%c44_167, %c0_168] : memref<136x128xf32, #tpu.memory_space<vmem>>, vector<2x128xf32>
    %225 = arith.maximumf %223, %224 : vector<2x128xf32>
    %cst_169 = arith.constant dense<0xFF800000> : vector<128xf32>
    %226 = vector.multi_reduction <maximumf>, %225, %cst_169 [0] : vector<2x128xf32> to vector<128xf32>
    %227 = vector.shape_cast %226 : vector<128xf32> to vector<1x128xf32>
    %c6_170 = arith.constant 6 : index
    %c0_171 = arith.constant 0 : index
    %228 = vector.load %arg15[%c6_170, %c0_171] : memref<32x128xf32, #tpu.memory_space<vmem>>, vector<1x128xf32>
    tpu.vector_store %arg15[%c6_170, %c0_171], %227 {strides = array<i32>} : memref<32x128xf32, #tpu.memory_space<vmem>>, vector<1x128xf32>,
    %c32_172 = arith.constant 32 : index
    %c0_173 = arith.constant 0 : index
    %229 = vector.load %arg14[%c32_172, %c0_173] : memref<136x128xf32, #tpu.memory_space<vmem>>, vector<2x128xf32>
    %c46_174 = arith.constant 46 : index
    %c0_175 = arith.constant 0 : index
    %230 = vector.load %arg14[%c46_174, %c0_175] : memref<136x128xf32, #tpu.memory_space<vmem>>, vector<2x128xf32>
    %231 = arith.maximumf %229, %230 : vector<2x128xf32>
    %cst_176 = arith.constant dense<0xFF800000> : vector<128xf32>
    %232 = vector.multi_reduction <maximumf>, %231, %cst_176 [0] : vector<2x128xf32> to vector<128xf32>
    %233 = vector.shape_cast %232 : vector<128xf32> to vector<1x128xf32>
    %c7 = arith.constant 7 : index
    %c0_177 = arith.constant 0 : index
    %234 = vector.load %arg15[%c7, %c0_177] : memref<32x128xf32, #tpu.memory_space<vmem>>, vector<1x128xf32>
    tpu.vector_store %arg15[%c7, %c0_177], %233 {strides = array<i32>} : memref<32x128xf32, #tpu.memory_space<vmem>>, vector<1x128xf32>,
    %c34 = arith.constant 34 : index
    %c0_178 = arith.constant 0 : index
    %235 = vector.load %arg14[%c34, %c0_178] : memref<136x128xf32, #tpu.memory_space<vmem>>, vector<2x128xf32>
    %c48_179 = arith.constant 48 : index
    %c0_180 = arith.constant 0 : index
    %236 = vector.load %arg14[%c48_179, %c0_180] : memref<136x128xf32, #tpu.memory_space<vmem>>, vector<2x128xf32>
    %237 = arith.maximumf %235, %236 : vector<2x128xf32>
    %cst_181 = arith.constant dense<0xFF800000> : vector<128xf32>
    %238 = vector.multi_reduction <maximumf>, %237, %cst_181 [0] : vector<2x128xf32> to vector<128xf32>
    %239 = vector.shape_cast %238 : vector<128xf32> to vector<1x128xf32>
    %c8_182 = arith.constant 8 : index
    %c0_183 = arith.constant 0 : index
    %240 = vector.load %arg15[%c8_182, %c0_183] : memref<32x128xf32, #tpu.memory_space<vmem>>, vector<1x128xf32>
    tpu.vector_store %arg15[%c8_182, %c0_183], %239 {strides = array<i32>} : memref<32x128xf32, #tpu.memory_space<vmem>>, vector<1x128xf32>,
    %c36 = arith.constant 36 : index
    %c0_184 = arith.constant 0 : index
    %241 = vector.load %arg14[%c36, %c0_184] : memref<136x128xf32, #tpu.memory_space<vmem>>, vector<2x128xf32>
    %c50 = arith.constant 50 : index
    %c0_185 = arith.constant 0 : index
    %242 = vector.load %arg14[%c50, %c0_185] : memref<136x128xf32, #tpu.memory_space<vmem>>, vector<2x128xf32>
    %243 = arith.maximumf %241, %242 : vector<2x128xf32>
    %cst_186 = arith.constant dense<0xFF800000> : vector<128xf32>
    %244 = vector.multi_reduction <maximumf>, %243, %cst_186 [0] : vector<2x128xf32> to vector<128xf32>
    %245 = vector.shape_cast %244 : vector<128xf32> to vector<1x128xf32>
    %c9 = arith.constant 9 : index
    %c0_187 = arith.constant 0 : index
    %246 = vector.load %arg15[%c9, %c0_187] : memref<32x128xf32, #tpu.memory_space<vmem>>, vector<1x128xf32>
    tpu.vector_store %arg15[%c9, %c0_187], %245 {strides = array<i32>} : memref<32x128xf32, #tpu.memory_space<vmem>>, vector<1x128xf32>,
    %c56_188 = arith.constant 56 : index
    %c0_189 = arith.constant 0 : index
    %247 = vector.load %arg14[%c56_188, %c0_189] : memref<136x128xf32, #tpu.memory_space<vmem>>, vector<2x128xf32>
    %c70 = arith.constant 70 : index
    %c0_190 = arith.constant 0 : index
    %248 = vector.load %arg14[%c70, %c0_190] : memref<136x128xf32, #tpu.memory_space<vmem>>, vector<2x128xf32>
    %249 = arith.maximumf %247, %248 : vector<2x128xf32>
    %cst_191 = arith.constant dense<0xFF800000> : vector<128xf32>
    %250 = vector.multi_reduction <maximumf>, %249, %cst_191 [0] : vector<2x128xf32> to vector<128xf32>
    %251 = vector.shape_cast %250 : vector<128xf32> to vector<1x128xf32>
    %c10 = arith.constant 10 : index
    %c0_192 = arith.constant 0 : index
    %252 = vector.load %arg15[%c10, %c0_192] : memref<32x128xf32, #tpu.memory_space<vmem>>, vector<1x128xf32>
    tpu.vector_store %arg15[%c10, %c0_192], %251 {strides = array<i32>} : memref<32x128xf32, #tpu.memory_space<vmem>>, vector<1x128xf32>,
    %c58_193 = arith.constant 58 : index
    %c0_194 = arith.constant 0 : index
    %253 = vector.load %arg14[%c58_193, %c0_194] : memref<136x128xf32, #tpu.memory_space<vmem>>, vector<2x128xf32>
    %c72_195 = arith.constant 72 : index
    %c0_196 = arith.constant 0 : index
    %254 = vector.load %arg14[%c72_195, %c0_196] : memref<136x128xf32, #tpu.memory_space<vmem>>, vector<2x128xf32>
    %255 = arith.maximumf %253, %254 : vector<2x128xf32>
    %cst_197 = arith.constant dense<0xFF800000> : vector<128xf32>
    %256 = vector.multi_reduction <maximumf>, %255, %cst_197 [0] : vector<2x128xf32> to vector<128xf32>
    %257 = vector.shape_cast %256 : vector<128xf32> to vector<1x128xf32>
    %c11 = arith.constant 11 : index
    %c0_198 = arith.constant 0 : index
    %258 = vector.load %arg15[%c11, %c0_198] : memref<32x128xf32, #tpu.memory_space<vmem>>, vector<1x128xf32>
    tpu.vector_store %arg15[%c11, %c0_198], %257 {strides = array<i32>} : memref<32x128xf32, #tpu.memory_space<vmem>>, vector<1x128xf32>,
    %c60_199 = arith.constant 60 : index
    %c0_200 = arith.constant 0 : index
    %259 = vector.load %arg14[%c60_199, %c0_200] : memref<136x128xf32, #tpu.memory_space<vmem>>, vector<2x128xf32>
    %c74 = arith.constant 74 : index
    %c0_201 = arith.constant 0 : index
    %260 = vector.load %arg14[%c74, %c0_201] : memref<136x128xf32, #tpu.memory_space<vmem>>, vector<2x128xf32>
    %261 = arith.maximumf %259, %260 : vector<2x128xf32>
    %cst_202 = arith.constant dense<0xFF800000> : vector<128xf32>
    %262 = vector.multi_reduction <maximumf>, %261, %cst_202 [0] : vector<2x128xf32> to vector<128xf32>
    %263 = vector.shape_cast %262 : vector<128xf32> to vector<1x128xf32>
    %c12 = arith.constant 12 : index
    %c0_203 = arith.constant 0 : index
    %264 = vector.load %arg15[%c12, %c0_203] : memref<32x128xf32, #tpu.memory_space<vmem>>, vector<1x128xf32>
    tpu.vector_store %arg15[%c12, %c0_203], %263 {strides = array<i32>} : memref<32x128xf32, #tpu.memory_space<vmem>>, vector<1x128xf32>,
    %c62 = arith.constant 62 : index
    %c0_204 = arith.constant 0 : index
    %265 = vector.load %arg14[%c62, %c0_204] : memref<136x128xf32, #tpu.memory_space<vmem>>, vector<2x128xf32>
    %c76 = arith.constant 76 : index
    %c0_205 = arith.constant 0 : index
    %266 = vector.load %arg14[%c76, %c0_205] : memref<136x128xf32, #tpu.memory_space<vmem>>, vector<2x128xf32>
    %267 = arith.maximumf %265, %266 : vector<2x128xf32>
    %cst_206 = arith.constant dense<0xFF800000> : vector<128xf32>
    %268 = vector.multi_reduction <maximumf>, %267, %cst_206 [0] : vector<2x128xf32> to vector<128xf32>
    %269 = vector.shape_cast %268 : vector<128xf32> to vector<1x128xf32>
    %c13 = arith.constant 13 : index
    %c0_207 = arith.constant 0 : index
    %270 = vector.load %arg15[%c13, %c0_207] : memref<32x128xf32, #tpu.memory_space<vmem>>, vector<1x128xf32>
    tpu.vector_store %arg15[%c13, %c0_207], %269 {strides = array<i32>} : memref<32x128xf32, #tpu.memory_space<vmem>>, vector<1x128xf32>,
    %c64_208 = arith.constant 64 : index
    %c0_209 = arith.constant 0 : index
    %271 = vector.load %arg14[%c64_208, %c0_209] : memref<136x128xf32, #tpu.memory_space<vmem>>, vector<2x128xf32>
    %c78 = arith.constant 78 : index
    %c0_210 = arith.constant 0 : index
    %272 = vector.load %arg14[%c78, %c0_210] : memref<136x128xf32, #tpu.memory_space<vmem>>, vector<2x128xf32>
    %273 = arith.maximumf %271, %272 : vector<2x128xf32>
    %cst_211 = arith.constant dense<0xFF800000> : vector<128xf32>
    %274 = vector.multi_reduction <maximumf>, %273, %cst_211 [0] : vector<2x128xf32> to vector<128xf32>
    %275 = vector.shape_cast %274 : vector<128xf32> to vector<1x128xf32>
    %c14_212 = arith.constant 14 : index
    %c0_213 = arith.constant 0 : index
    %276 = vector.load %arg15[%c14_212, %c0_213] : memref<32x128xf32, #tpu.memory_space<vmem>>, vector<1x128xf32>
    tpu.vector_store %arg15[%c14_212, %c0_213], %275 {strides = array<i32>} : memref<32x128xf32, #tpu.memory_space<vmem>>, vector<1x128xf32>,
    %c84 = arith.constant 84 : index
    %c0_214 = arith.constant 0 : index
    %277 = vector.load %arg14[%c84, %c0_214] : memref<136x128xf32, #tpu.memory_space<vmem>>, vector<2x128xf32>
    %c98 = arith.constant 98 : index
    %c0_215 = arith.constant 0 : index
    %278 = vector.load %arg14[%c98, %c0_215] : memref<136x128xf32, #tpu.memory_space<vmem>>, vector<2x128xf32>
    %279 = arith.maximumf %277, %278 : vector<2x128xf32>
    %cst_216 = arith.constant dense<0xFF800000> : vector<128xf32>
    %280 = vector.multi_reduction <maximumf>, %279, %cst_216 [0] : vector<2x128xf32> to vector<128xf32>
    %281 = vector.shape_cast %280 : vector<128xf32> to vector<1x128xf32>
    %c15_217 = arith.constant 15 : index
    %c0_218 = arith.constant 0 : index
    %282 = vector.load %arg15[%c15_217, %c0_218] : memref<32x128xf32, #tpu.memory_space<vmem>>, vector<1x128xf32>
    tpu.vector_store %arg15[%c15_217, %c0_218], %281 {strides = array<i32>} : memref<32x128xf32, #tpu.memory_space<vmem>>, vector<1x128xf32>,
    %c86 = arith.constant 86 : index
    %c0_219 = arith.constant 0 : index
    %283 = vector.load %arg14[%c86, %c0_219] : memref<136x128xf32, #tpu.memory_space<vmem>>, vector<2x128xf32>
    %c100 = arith.constant 100 : index
    %c0_220 = arith.constant 0 : index
    %284 = vector.load %arg14[%c100, %c0_220] : memref<136x128xf32, #tpu.memory_space<vmem>>, vector<2x128xf32>
    %285 = arith.maximumf %283, %284 : vector<2x128xf32>
    %cst_221 = arith.constant dense<0xFF800000> : vector<128xf32>
    %286 = vector.multi_reduction <maximumf>, %285, %cst_221 [0] : vector<2x128xf32> to vector<128xf32>
    %287 = vector.shape_cast %286 : vector<128xf32> to vector<1x128xf32>
    %c16_222 = arith.constant 16 : index
    %c0_223 = arith.constant 0 : index
    %288 = vector.load %arg15[%c16_222, %c0_223] : memref<32x128xf32, #tpu.memory_space<vmem>>, vector<1x128xf32>
    tpu.vector_store %arg15[%c16_222, %c0_223], %287 {strides = array<i32>} : memref<32x128xf32, #tpu.memory_space<vmem>>, vector<1x128xf32>,
    %c88_224 = arith.constant 88 : index
    %c0_225 = arith.constant 0 : index
    %289 = vector.load %arg14[%c88_224, %c0_225] : memref<136x128xf32, #tpu.memory_space<vmem>>, vector<2x128xf32>
    %c102 = arith.constant 102 : index
    %c0_226 = arith.constant 0 : index
    %290 = vector.load %arg14[%c102, %c0_226] : memref<136x128xf32, #tpu.memory_space<vmem>>, vector<2x128xf32>
    %291 = arith.maximumf %289, %290 : vector<2x128xf32>
    %cst_227 = arith.constant dense<0xFF800000> : vector<128xf32>
    %292 = vector.multi_reduction <maximumf>, %291, %cst_227 [0] : vector<2x128xf32> to vector<128xf32>
    %293 = vector.shape_cast %292 : vector<128xf32> to vector<1x128xf32>
    %c17_228 = arith.constant 17 : index
    %c0_229 = arith.constant 0 : index
    %294 = vector.load %arg15[%c17_228, %c0_229] : memref<32x128xf32, #tpu.memory_space<vmem>>, vector<1x128xf32>
    tpu.vector_store %arg15[%c17_228, %c0_229], %293 {strides = array<i32>} : memref<32x128xf32, #tpu.memory_space<vmem>>, vector<1x128xf32>,
    %c90 = arith.constant 90 : index
    %c0_230 = arith.constant 0 : index
    %295 = vector.load %arg14[%c90, %c0_230] : memref<136x128xf32, #tpu.memory_space<vmem>>, vector<2x128xf32>
    %c104_231 = arith.constant 104 : index
    %c0_232 = arith.constant 0 : index
    %296 = vector.load %arg14[%c104_231, %c0_232] : memref<136x128xf32, #tpu.memory_space<vmem>>, vector<2x128xf32>
    %297 = arith.maximumf %295, %296 : vector<2x128xf32>
    %cst_233 = arith.constant dense<0xFF800000> : vector<128xf32>
    %298 = vector.multi_reduction <maximumf>, %297, %cst_233 [0] : vector<2x128xf32> to vector<128xf32>
    %299 = vector.shape_cast %298 : vector<128xf32> to vector<1x128xf32>
    %c18_234 = arith.constant 18 : index
    %c0_235 = arith.constant 0 : index
    %300 = vector.load %arg15[%c18_234, %c0_235] : memref<32x128xf32, #tpu.memory_space<vmem>>, vector<1x128xf32>
    tpu.vector_store %arg15[%c18_234, %c0_235], %299 {strides = array<i32>} : memref<32x128xf32, #tpu.memory_space<vmem>>, vector<1x128xf32>,
    %c92 = arith.constant 92 : index
    %c0_236 = arith.constant 0 : index
    %301 = vector.load %arg14[%c92, %c0_236] : memref<136x128xf32, #tpu.memory_space<vmem>>, vector<2x128xf32>
    %c106 = arith.constant 106 : index
    %c0_237 = arith.constant 0 : index
    %302 = vector.load %arg14[%c106, %c0_237] : memref<136x128xf32, #tpu.memory_space<vmem>>, vector<2x128xf32>
    %303 = arith.maximumf %301, %302 : vector<2x128xf32>
    %cst_238 = arith.constant dense<0xFF800000> : vector<128xf32>
    %304 = vector.multi_reduction <maximumf>, %303, %cst_238 [0] : vector<2x128xf32> to vector<128xf32>
    %305 = vector.shape_cast %304 : vector<128xf32> to vector<1x128xf32>
    %c19 = arith.constant 19 : index
    %c0_239 = arith.constant 0 : index
    %306 = vector.load %arg15[%c19, %c0_239] : memref<32x128xf32, #tpu.memory_space<vmem>>, vector<1x128xf32>
    tpu.vector_store %arg15[%c19, %c0_239], %305 {strides = array<i32>} : memref<32x128xf32, #tpu.memory_space<vmem>>, vector<1x128xf32>,
    %c112_240 = arith.constant 112 : index
    %c0_241 = arith.constant 0 : index
    %307 = vector.load %arg14[%c112_240, %c0_241] : memref<136x128xf32, #tpu.memory_space<vmem>>, vector<2x128xf32>
    %c126 = arith.constant 126 : index
    %c0_242 = arith.constant 0 : index
    %308 = vector.load %arg14[%c126, %c0_242] : memref<136x128xf32, #tpu.memory_space<vmem>>, vector<2x128xf32>
    %309 = arith.maximumf %307, %308 : vector<2x128xf32>
    %cst_243 = arith.constant dense<0xFF800000> : vector<128xf32>
    %310 = vector.multi_reduction <maximumf>, %309, %cst_243 [0] : vector<2x128xf32> to vector<128xf32>
    %311 = vector.shape_cast %310 : vector<128xf32> to vector<1x128xf32>
    %c20_244 = arith.constant 20 : index
    %c0_245 = arith.constant 0 : index
    %312 = vector.load %arg15[%c20_244, %c0_245] : memref<32x128xf32, #tpu.memory_space<vmem>>, vector<1x128xf32>
    tpu.vector_store %arg15[%c20_244, %c0_245], %311 {strides = array<i32>} : memref<32x128xf32, #tpu.memory_space<vmem>>, vector<1x128xf32>,
    %c114 = arith.constant 114 : index
    %c0_246 = arith.constant 0 : index
    %313 = vector.load %arg14[%c114, %c0_246] : memref<136x128xf32, #tpu.memory_space<vmem>>, vector<2x128xf32>
    %c128_247 = arith.constant 128 : index
    %c0_248 = arith.constant 0 : index
    %314 = vector.load %arg14[%c128_247, %c0_248] : memref<136x128xf32, #tpu.memory_space<vmem>>, vector<2x128xf32>
    %315 = arith.maximumf %313, %314 : vector<2x128xf32>
    %cst_249 = arith.constant dense<0xFF800000> : vector<128xf32>
    %316 = vector.multi_reduction <maximumf>, %315, %cst_249 [0] : vector<2x128xf32> to vector<128xf32>
    %317 = vector.shape_cast %316 : vector<128xf32> to vector<1x128xf32>
    %c21 = arith.constant 21 : index
    %c0_250 = arith.constant 0 : index
    %318 = vector.load %arg15[%c21, %c0_250] : memref<32x128xf32, #tpu.memory_space<vmem>>, vector<1x128xf32>
    tpu.vector_store %arg15[%c21, %c0_250], %317 {strides = array<i32>} : memref<32x128xf32, #tpu.memory_space<vmem>>, vector<1x128xf32>,
    %c116 = arith.constant 116 : index
    %c0_251 = arith.constant 0 : index
    %319 = vector.load %arg14[%c116, %c0_251] : memref<136x128xf32, #tpu.memory_space<vmem>>, vector<2x128xf32>
    %c130 = arith.constant 130 : index
    %c0_252 = arith.constant 0 : index
    %320 = vector.load %arg14[%c130, %c0_252] : memref<136x128xf32, #tpu.memory_space<vmem>>, vector<2x128xf32>
    %321 = arith.maximumf %319, %320 : vector<2x128xf32>
    %cst_253 = arith.constant dense<0xFF800000> : vector<128xf32>
    %322 = vector.multi_reduction <maximumf>, %321, %cst_253 [0] : vector<2x128xf32> to vector<128xf32>
    %323 = vector.shape_cast %322 : vector<128xf32> to vector<1x128xf32>
    %c22_254 = arith.constant 22 : index
    %c0_255 = arith.constant 0 : index
    %324 = vector.load %arg15[%c22_254, %c0_255] : memref<32x128xf32, #tpu.memory_space<vmem>>, vector<1x128xf32>
    tpu.vector_store %arg15[%c22_254, %c0_255], %323 {strides = array<i32>} : memref<32x128xf32, #tpu.memory_space<vmem>>, vector<1x128xf32>,
    %c118 = arith.constant 118 : index
    %c0_256 = arith.constant 0 : index
    %325 = vector.load %arg14[%c118, %c0_256] : memref<136x128xf32, #tpu.memory_space<vmem>>, vector<2x128xf32>
    %c132 = arith.constant 132 : index
    %c0_257 = arith.constant 0 : index
    %326 = vector.load %arg14[%c132, %c0_257] : memref<136x128xf32, #tpu.memory_space<vmem>>, vector<2x128xf32>
    %327 = arith.maximumf %325, %326 : vector<2x128xf32>
    %cst_258 = arith.constant dense<0xFF800000> : vector<128xf32>
    %328 = vector.multi_reduction <maximumf>, %327, %cst_258 [0] : vector<2x128xf32> to vector<128xf32>
    %329 = vector.shape_cast %328 : vector<128xf32> to vector<1x128xf32>
    %c23 = arith.constant 23 : index
    %c0_259 = arith.constant 0 : index
    %330 = vector.load %arg15[%c23, %c0_259] : memref<32x128xf32, #tpu.memory_space<vmem>>, vector<1x128xf32>
    tpu.vector_store %arg15[%c23, %c0_259], %329 {strides = array<i32>} : memref<32x128xf32, #tpu.memory_space<vmem>>, vector<1x128xf32>,
    %c120_260 = arith.constant 120 : index
    %c0_261 = arith.constant 0 : index
    %331 = vector.load %arg14[%c120_260, %c0_261] : memref<136x128xf32, #tpu.memory_space<vmem>>, vector<2x128xf32>
    %c134 = arith.constant 134 : index
    %c0_262 = arith.constant 0 : index
    %332 = vector.load %arg14[%c134, %c0_262] : memref<136x128xf32, #tpu.memory_space<vmem>>, vector<2x128xf32>
    %333 = arith.maximumf %331, %332 : vector<2x128xf32>
    %cst_263 = arith.constant dense<0xFF800000> : vector<128xf32>
    %334 = vector.multi_reduction <maximumf>, %333, %cst_263 [0] : vector<2x128xf32> to vector<128xf32>
    %335 = vector.shape_cast %334 : vector<128xf32> to vector<1x128xf32>
    %c24_264 = arith.constant 24 : index
    %c0_265 = arith.constant 0 : index
    %336 = vector.load %arg15[%c24_264, %c0_265] : memref<32x128xf32, #tpu.memory_space<vmem>>, vector<1x128xf32>
    tpu.vector_store %arg15[%c24_264, %c0_265], %335 {strides = array<i32>} : memref<32x128xf32, #tpu.memory_space<vmem>>, vector<1x128xf32>,
    %cst_266 = arith.constant 0.000000e+00 : f32
    %337 = vector.broadcast %cst_266 : f32 to vector<1x128xf32>
    %c0_267 = arith.constant 0 : index
    %c0_268 = arith.constant 0 : index
    %338 = vector.load %arg7[%c0_267, %c0_268] : memref<1x128xf32, #tpu.memory_space<vmem>>, vector<1x128xf32>
    %339 = arith.addf %337, %338 : vector<1x128xf32>
    %c0_269 = arith.constant 0 : index
    %c0_270 = arith.constant 0 : index
    %340 = vector.load %arg15[%c0_269, %c0_270] : memref<32x128xf32, #tpu.memory_space<vmem>>, vector<1x128xf32>
    %341 = vector.extract_strided_slice %340 {offsets = [0, 0], sizes = [1, 16], strides = [1, 1]} : vector<1x128xf32> to vector<1x16xf32>
    %342 = arith.truncf %341 : vector<1x16xf32> to vector<1x16xbf16>
    %c0_271 = arith.constant 0 : index
    %c0_272 = arith.constant 0 : index
    %343 = vector.load %arg6[%c0_271, %c0_272] : memref<400x128xbf16, #tpu.memory_space<vmem>>, vector<16x128xbf16>
    %cst_273 = arith.constant dense<0.000000e+00> : vector<1x128xf32>
    %344 = tpu.matmul %342, %343, %cst_273 {dimension_numbers = #tpu.dot_dimension_numbers<[1], [0], [0], [1], [0, 0, 1, 1], [], []>} : vector<1x16xbf16>, vector<16x128xbf16>, vector<1x128xf32> -> vector<1x128xf32>
    %345 = arith.addf %339, %344 : vector<1x128xf32>
    %c1_274 = arith.constant 1 : index
    %c0_275 = arith.constant 0 : index
    %346 = vector.load %arg15[%c1_274, %c0_275] : memref<32x128xf32, #tpu.memory_space<vmem>>, vector<1x128xf32>
    %347 = vector.extract_strided_slice %346 {offsets = [0, 0], sizes = [1, 16], strides = [1, 1]} : vector<1x128xf32> to vector<1x16xf32>
    %348 = arith.truncf %347 : vector<1x16xf32> to vector<1x16xbf16>
    %c16_276 = arith.constant 16 : index
    %c0_277 = arith.constant 0 : index
    %349 = vector.load %arg6[%c16_276, %c0_277] : memref<400x128xbf16, #tpu.memory_space<vmem>>, vector<16x128xbf16>
    %cst_278 = arith.constant dense<0.000000e+00> : vector<1x128xf32>
    %350 = tpu.matmul %348, %349, %cst_278 {dimension_numbers = #tpu.dot_dimension_numbers<[1], [0], [0], [1], [0, 0, 1, 1], [], []>} : vector<1x16xbf16>, vector<16x128xbf16>, vector<1x128xf32> -> vector<1x128xf32>
    %351 = arith.addf %345, %350 : vector<1x128xf32>
    %c2_279 = arith.constant 2 : index
    %c0_280 = arith.constant 0 : index
    %352 = vector.load %arg15[%c2_279, %c0_280] : memref<32x128xf32, #tpu.memory_space<vmem>>, vector<1x128xf32>
    %353 = vector.extract_strided_slice %352 {offsets = [0, 0], sizes = [1, 16], strides = [1, 1]} : vector<1x128xf32> to vector<1x16xf32>
    %354 = arith.truncf %353 : vector<1x16xf32> to vector<1x16xbf16>
    %c32_281 = arith.constant 32 : index
    %c0_282 = arith.constant 0 : index
    %355 = vector.load %arg6[%c32_281, %c0_282] : memref<400x128xbf16, #tpu.memory_space<vmem>>, vector<16x128xbf16>
    %cst_283 = arith.constant dense<0.000000e+00> : vector<1x128xf32>
    %356 = tpu.matmul %354, %355, %cst_283 {dimension_numbers = #tpu.dot_dimension_numbers<[1], [0], [0], [1], [0, 0, 1, 1], [], []>} : vector<1x16xbf16>, vector<16x128xbf16>, vector<1x128xf32> -> vector<1x128xf32>
    %357 = arith.addf %351, %356 : vector<1x128xf32>
    %c3_284 = arith.constant 3 : index
    %c0_285 = arith.constant 0 : index
    %358 = vector.load %arg15[%c3_284, %c0_285] : memref<32x128xf32, #tpu.memory_space<vmem>>, vector<1x128xf32>
    %359 = vector.extract_strided_slice %358 {offsets = [0, 0], sizes = [1, 16], strides = [1, 1]} : vector<1x128xf32> to vector<1x16xf32>
    %360 = arith.truncf %359 : vector<1x16xf32> to vector<1x16xbf16>
    %c48_286 = arith.constant 48 : index
    %c0_287 = arith.constant 0 : index
    %361 = vector.load %arg6[%c48_286, %c0_287] : memref<400x128xbf16, #tpu.memory_space<vmem>>, vector<16x128xbf16>
    %cst_288 = arith.constant dense<0.000000e+00> : vector<1x128xf32>
    %362 = tpu.matmul %360, %361, %cst_288 {dimension_numbers = #tpu.dot_dimension_numbers<[1], [0], [0], [1], [0, 0, 1, 1], [], []>} : vector<1x16xbf16>, vector<16x128xbf16>, vector<1x128xf32> -> vector<1x128xf32>
    %363 = arith.addf %357, %362 : vector<1x128xf32>
    %c4_289 = arith.constant 4 : index
    %c0_290 = arith.constant 0 : index
    %364 = vector.load %arg15[%c4_289, %c0_290] : memref<32x128xf32, #tpu.memory_space<vmem>>, vector<1x128xf32>
    %365 = vector.extract_strided_slice %364 {offsets = [0, 0], sizes = [1, 16], strides = [1, 1]} : vector<1x128xf32> to vector<1x16xf32>
    %366 = arith.truncf %365 : vector<1x16xf32> to vector<1x16xbf16>
    %c64_291 = arith.constant 64 : index
    %c0_292 = arith.constant 0 : index
    %367 = vector.load %arg6[%c64_291, %c0_292] : memref<400x128xbf16, #tpu.memory_space<vmem>>, vector<16x128xbf16>
    %cst_293 = arith.constant dense<0.000000e+00> : vector<1x128xf32>
    %368 = tpu.matmul %366, %367, %cst_293 {dimension_numbers = #tpu.dot_dimension_numbers<[1], [0], [0], [1], [0, 0, 1, 1], [], []>} : vector<1x16xbf16>, vector<16x128xbf16>, vector<1x128xf32> -> vector<1x128xf32>
    %369 = arith.addf %363, %368 : vector<1x128xf32>
    %c5_294 = arith.constant 5 : index
    %c0_295 = arith.constant 0 : index
    %370 = vector.load %arg15[%c5_294, %c0_295] : memref<32x128xf32, #tpu.memory_space<vmem>>, vector<1x128xf32>
    %371 = vector.extract_strided_slice %370 {offsets = [0, 0], sizes = [1, 16], strides = [1, 1]} : vector<1x128xf32> to vector<1x16xf32>
    %372 = arith.truncf %371 : vector<1x16xf32> to vector<1x16xbf16>
    %c80_296 = arith.constant 80 : index
    %c0_297 = arith.constant 0 : index
    %373 = vector.load %arg6[%c80_296, %c0_297] : memref<400x128xbf16, #tpu.memory_space<vmem>>, vector<16x128xbf16>
    %cst_298 = arith.constant dense<0.000000e+00> : vector<1x128xf32>
    %374 = tpu.matmul %372, %373, %cst_298 {dimension_numbers = #tpu.dot_dimension_numbers<[1], [0], [0], [1], [0, 0, 1, 1], [], []>} : vector<1x16xbf16>, vector<16x128xbf16>, vector<1x128xf32> -> vector<1x128xf32>
    %375 = arith.addf %369, %374 : vector<1x128xf32>
    %c6_299 = arith.constant 6 : index
    %c0_300 = arith.constant 0 : index
    %376 = vector.load %arg15[%c6_299, %c0_300] : memref<32x128xf32, #tpu.memory_space<vmem>>, vector<1x128xf32>
    %377 = vector.extract_strided_slice %376 {offsets = [0, 0], sizes = [1, 16], strides = [1, 1]} : vector<1x128xf32> to vector<1x16xf32>
    %378 = arith.truncf %377 : vector<1x16xf32> to vector<1x16xbf16>
    %c96_301 = arith.constant 96 : index
    %c0_302 = arith.constant 0 : index
    %379 = vector.load %arg6[%c96_301, %c0_302] : memref<400x128xbf16, #tpu.memory_space<vmem>>, vector<16x128xbf16>
    %cst_303 = arith.constant dense<0.000000e+00> : vector<1x128xf32>
    %380 = tpu.matmul %378, %379, %cst_303 {dimension_numbers = #tpu.dot_dimension_numbers<[1], [0], [0], [1], [0, 0, 1, 1], [], []>} : vector<1x16xbf16>, vector<16x128xbf16>, vector<1x128xf32> -> vector<1x128xf32>
    %381 = arith.addf %375, %380 : vector<1x128xf32>
    %c7_304 = arith.constant 7 : index
    %c0_305 = arith.constant 0 : index
    %382 = vector.load %arg15[%c7_304, %c0_305] : memref<32x128xf32, #tpu.memory_space<vmem>>, vector<1x128xf32>
    %383 = vector.extract_strided_slice %382 {offsets = [0, 0], sizes = [1, 16], strides = [1, 1]} : vector<1x128xf32> to vector<1x16xf32>
    %384 = arith.truncf %383 : vector<1x16xf32> to vector<1x16xbf16>
    %c112_306 = arith.constant 112 : index
    %c0_307 = arith.constant 0 : index
    %385 = vector.load %arg6[%c112_306, %c0_307] : memref<400x128xbf16, #tpu.memory_space<vmem>>, vector<16x128xbf16>
    %cst_308 = arith.constant dense<0.000000e+00> : vector<1x128xf32>
    %386 = tpu.matmul %384, %385, %cst_308 {dimension_numbers = #tpu.dot_dimension_numbers<[1], [0], [0], [1], [0, 0, 1, 1], [], []>} : vector<1x16xbf16>, vector<16x128xbf16>, vector<1x128xf32> -> vector<1x128xf32>
    %387 = arith.addf %381, %386 : vector<1x128xf32>
    %c8_309 = arith.constant 8 : index
    %c0_310 = arith.constant 0 : index
    %388 = vector.load %arg15[%c8_309, %c0_310] : memref<32x128xf32, #tpu.memory_space<vmem>>, vector<1x128xf32>
    %389 = vector.extract_strided_slice %388 {offsets = [0, 0], sizes = [1, 16], strides = [1, 1]} : vector<1x128xf32> to vector<1x16xf32>
    %390 = arith.truncf %389 : vector<1x16xf32> to vector<1x16xbf16>
    %c128_311 = arith.constant 128 : index
    %c0_312 = arith.constant 0 : index
    %391 = vector.load %arg6[%c128_311, %c0_312] : memref<400x128xbf16, #tpu.memory_space<vmem>>, vector<16x128xbf16>
    %cst_313 = arith.constant dense<0.000000e+00> : vector<1x128xf32>
    %392 = tpu.matmul %390, %391, %cst_313 {dimension_numbers = #tpu.dot_dimension_numbers<[1], [0], [0], [1], [0, 0, 1, 1], [], []>} : vector<1x16xbf16>, vector<16x128xbf16>, vector<1x128xf32> -> vector<1x128xf32>
    %393 = arith.addf %387, %392 : vector<1x128xf32>
    %c9_314 = arith.constant 9 : index
    %c0_315 = arith.constant 0 : index
    %394 = vector.load %arg15[%c9_314, %c0_315] : memref<32x128xf32, #tpu.memory_space<vmem>>, vector<1x128xf32>
    %395 = vector.extract_strided_slice %394 {offsets = [0, 0], sizes = [1, 16], strides = [1, 1]} : vector<1x128xf32> to vector<1x16xf32>
    %396 = arith.truncf %395 : vector<1x16xf32> to vector<1x16xbf16>
    %c144_316 = arith.constant 144 : index
    %c0_317 = arith.constant 0 : index
    %397 = vector.load %arg6[%c144_316, %c0_317] : memref<400x128xbf16, #tpu.memory_space<vmem>>, vector<16x128xbf16>
    %cst_318 = arith.constant dense<0.000000e+00> : vector<1x128xf32>
    %398 = tpu.matmul %396, %397, %cst_318 {dimension_numbers = #tpu.dot_dimension_numbers<[1], [0], [0], [1], [0, 0, 1, 1], [], []>} : vector<1x16xbf16>, vector<16x128xbf16>, vector<1x128xf32> -> vector<1x128xf32>
    %399 = arith.addf %393, %398 : vector<1x128xf32>
    %c10_319 = arith.constant 10 : index
    %c0_320 = arith.constant 0 : index
    %400 = vector.load %arg15[%c10_319, %c0_320] : memref<32x128xf32, #tpu.memory_space<vmem>>, vector<1x128xf32>
    %401 = vector.extract_strided_slice %400 {offsets = [0, 0], sizes = [1, 16], strides = [1, 1]} : vector<1x128xf32> to vector<1x16xf32>
    %402 = arith.truncf %401 : vector<1x16xf32> to vector<1x16xbf16>
    %c160_321 = arith.constant 160 : index
    %c0_322 = arith.constant 0 : index
    %403 = vector.load %arg6[%c160_321, %c0_322] : memref<400x128xbf16, #tpu.memory_space<vmem>>, vector<16x128xbf16>
    %cst_323 = arith.constant dense<0.000000e+00> : vector<1x128xf32>
    %404 = tpu.matmul %402, %403, %cst_323 {dimension_numbers = #tpu.dot_dimension_numbers<[1], [0], [0], [1], [0, 0, 1, 1], [], []>} : vector<1x16xbf16>, vector<16x128xbf16>, vector<1x128xf32> -> vector<1x128xf32>
    %405 = arith.addf %399, %404 : vector<1x128xf32>
    %c11_324 = arith.constant 11 : index
    %c0_325 = arith.constant 0 : index
    %406 = vector.load %arg15[%c11_324, %c0_325] : memref<32x128xf32, #tpu.memory_space<vmem>>, vector<1x128xf32>
    %407 = vector.extract_strided_slice %406 {offsets = [0, 0], sizes = [1, 16], strides = [1, 1]} : vector<1x128xf32> to vector<1x16xf32>
    %408 = arith.truncf %407 : vector<1x16xf32> to vector<1x16xbf16>
    %c176_326 = arith.constant 176 : index
    %c0_327 = arith.constant 0 : index
    %409 = vector.load %arg6[%c176_326, %c0_327] : memref<400x128xbf16, #tpu.memory_space<vmem>>, vector<16x128xbf16>
    %cst_328 = arith.constant dense<0.000000e+00> : vector<1x128xf32>
    %410 = tpu.matmul %408, %409, %cst_328 {dimension_numbers = #tpu.dot_dimension_numbers<[1], [0], [0], [1], [0, 0, 1, 1], [], []>} : vector<1x16xbf16>, vector<16x128xbf16>, vector<1x128xf32> -> vector<1x128xf32>
    %411 = arith.addf %405, %410 : vector<1x128xf32>
    %c12_329 = arith.constant 12 : index
    %c0_330 = arith.constant 0 : index
    %412 = vector.load %arg15[%c12_329, %c0_330] : memref<32x128xf32, #tpu.memory_space<vmem>>, vector<1x128xf32>
    %413 = vector.extract_strided_slice %412 {offsets = [0, 0], sizes = [1, 16], strides = [1, 1]} : vector<1x128xf32> to vector<1x16xf32>
    %414 = arith.truncf %413 : vector<1x16xf32> to vector<1x16xbf16>
    %c192_331 = arith.constant 192 : index
    %c0_332 = arith.constant 0 : index
    %415 = vector.load %arg6[%c192_331, %c0_332] : memref<400x128xbf16, #tpu.memory_space<vmem>>, vector<16x128xbf16>
    %cst_333 = arith.constant dense<0.000000e+00> : vector<1x128xf32>
    %416 = tpu.matmul %414, %415, %cst_333 {dimension_numbers = #tpu.dot_dimension_numbers<[1], [0], [0], [1], [0, 0, 1, 1], [], []>} : vector<1x16xbf16>, vector<16x128xbf16>, vector<1x128xf32> -> vector<1x128xf32>
    %417 = arith.addf %411, %416 : vector<1x128xf32>
    %c13_334 = arith.constant 13 : index
    %c0_335 = arith.constant 0 : index
    %418 = vector.load %arg15[%c13_334, %c0_335] : memref<32x128xf32, #tpu.memory_space<vmem>>, vector<1x128xf32>
    %419 = vector.extract_strided_slice %418 {offsets = [0, 0], sizes = [1, 16], strides = [1, 1]} : vector<1x128xf32> to vector<1x16xf32>
    %420 = arith.truncf %419 : vector<1x16xf32> to vector<1x16xbf16>
    %c208 = arith.constant 208 : index
    %c0_336 = arith.constant 0 : index
    %421 = vector.load %arg6[%c208, %c0_336] : memref<400x128xbf16, #tpu.memory_space<vmem>>, vector<16x128xbf16>
    %cst_337 = arith.constant dense<0.000000e+00> : vector<1x128xf32>
    %422 = tpu.matmul %420, %421, %cst_337 {dimension_numbers = #tpu.dot_dimension_numbers<[1], [0], [0], [1], [0, 0, 1, 1], [], []>} : vector<1x16xbf16>, vector<16x128xbf16>, vector<1x128xf32> -> vector<1x128xf32>
    %423 = arith.addf %417, %422 : vector<1x128xf32>
    %c14_338 = arith.constant 14 : index
    %c0_339 = arith.constant 0 : index
    %424 = vector.load %arg15[%c14_338, %c0_339] : memref<32x128xf32, #tpu.memory_space<vmem>>, vector<1x128xf32>
    %425 = vector.extract_strided_slice %424 {offsets = [0, 0], sizes = [1, 16], strides = [1, 1]} : vector<1x128xf32> to vector<1x16xf32>
    %426 = arith.truncf %425 : vector<1x16xf32> to vector<1x16xbf16>
    %c224 = arith.constant 224 : index
    %c0_340 = arith.constant 0 : index
    %427 = vector.load %arg6[%c224, %c0_340] : memref<400x128xbf16, #tpu.memory_space<vmem>>, vector<16x128xbf16>
    %cst_341 = arith.constant dense<0.000000e+00> : vector<1x128xf32>
    %428 = tpu.matmul %426, %427, %cst_341 {dimension_numbers = #tpu.dot_dimension_numbers<[1], [0], [0], [1], [0, 0, 1, 1], [], []>} : vector<1x16xbf16>, vector<16x128xbf16>, vector<1x128xf32> -> vector<1x128xf32>
    %429 = arith.addf %423, %428 : vector<1x128xf32>
    %c15_342 = arith.constant 15 : index
    %c0_343 = arith.constant 0 : index
    %430 = vector.load %arg15[%c15_342, %c0_343] : memref<32x128xf32, #tpu.memory_space<vmem>>, vector<1x128xf32>
    %431 = vector.extract_strided_slice %430 {offsets = [0, 0], sizes = [1, 16], strides = [1, 1]} : vector<1x128xf32> to vector<1x16xf32>
    %432 = arith.truncf %431 : vector<1x16xf32> to vector<1x16xbf16>
    %c240 = arith.constant 240 : index
    %c0_344 = arith.constant 0 : index
    %433 = vector.load %arg6[%c240, %c0_344] : memref<400x128xbf16, #tpu.memory_space<vmem>>, vector<16x128xbf16>
    %cst_345 = arith.constant dense<0.000000e+00> : vector<1x128xf32>
    %434 = tpu.matmul %432, %433, %cst_345 {dimension_numbers = #tpu.dot_dimension_numbers<[1], [0], [0], [1], [0, 0, 1, 1], [], []>} : vector<1x16xbf16>, vector<16x128xbf16>, vector<1x128xf32> -> vector<1x128xf32>
    %435 = arith.addf %429, %434 : vector<1x128xf32>
    %c16_346 = arith.constant 16 : index
    %c0_347 = arith.constant 0 : index
    %436 = vector.load %arg15[%c16_346, %c0_347] : memref<32x128xf32, #tpu.memory_space<vmem>>, vector<1x128xf32>
    %437 = vector.extract_strided_slice %436 {offsets = [0, 0], sizes = [1, 16], strides = [1, 1]} : vector<1x128xf32> to vector<1x16xf32>
    %438 = arith.truncf %437 : vector<1x16xf32> to vector<1x16xbf16>
    %c256 = arith.constant 256 : index
    %c0_348 = arith.constant 0 : index
    %439 = vector.load %arg6[%c256, %c0_348] : memref<400x128xbf16, #tpu.memory_space<vmem>>, vector<16x128xbf16>
    %cst_349 = arith.constant dense<0.000000e+00> : vector<1x128xf32>
    %440 = tpu.matmul %438, %439, %cst_349 {dimension_numbers = #tpu.dot_dimension_numbers<[1], [0], [0], [1], [0, 0, 1, 1], [], []>} : vector<1x16xbf16>, vector<16x128xbf16>, vector<1x128xf32> -> vector<1x128xf32>
    %441 = arith.addf %435, %440 : vector<1x128xf32>
    %c17_350 = arith.constant 17 : index
    %c0_351 = arith.constant 0 : index
    %442 = vector.load %arg15[%c17_350, %c0_351] : memref<32x128xf32, #tpu.memory_space<vmem>>, vector<1x128xf32>
    %443 = vector.extract_strided_slice %442 {offsets = [0, 0], sizes = [1, 16], strides = [1, 1]} : vector<1x128xf32> to vector<1x16xf32>
    %444 = arith.truncf %443 : vector<1x16xf32> to vector<1x16xbf16>
    %c272 = arith.constant 272 : index
    %c0_352 = arith.constant 0 : index
    %445 = vector.load %arg6[%c272, %c0_352] : memref<400x128xbf16, #tpu.memory_space<vmem>>, vector<16x128xbf16>
    %cst_353 = arith.constant dense<0.000000e+00> : vector<1x128xf32>
    %446 = tpu.matmul %444, %445, %cst_353 {dimension_numbers = #tpu.dot_dimension_numbers<[1], [0], [0], [1], [0, 0, 1, 1], [], []>} : vector<1x16xbf16>, vector<16x128xbf16>, vector<1x128xf32> -> vector<1x128xf32>
    %447 = arith.addf %441, %446 : vector<1x128xf32>
    %c18_354 = arith.constant 18 : index
    %c0_355 = arith.constant 0 : index
    %448 = vector.load %arg15[%c18_354, %c0_355] : memref<32x128xf32, #tpu.memory_space<vmem>>, vector<1x128xf32>
    %449 = vector.extract_strided_slice %448 {offsets = [0, 0], sizes = [1, 16], strides = [1, 1]} : vector<1x128xf32> to vector<1x16xf32>
    %450 = arith.truncf %449 : vector<1x16xf32> to vector<1x16xbf16>
    %c288 = arith.constant 288 : index
    %c0_356 = arith.constant 0 : index
    %451 = vector.load %arg6[%c288, %c0_356] : memref<400x128xbf16, #tpu.memory_space<vmem>>, vector<16x128xbf16>
    %cst_357 = arith.constant dense<0.000000e+00> : vector<1x128xf32>
    %452 = tpu.matmul %450, %451, %cst_357 {dimension_numbers = #tpu.dot_dimension_numbers<[1], [0], [0], [1], [0, 0, 1, 1], [], []>} : vector<1x16xbf16>, vector<16x128xbf16>, vector<1x128xf32> -> vector<1x128xf32>
    %453 = arith.addf %447, %452 : vector<1x128xf32>
    %c19_358 = arith.constant 19 : index
    %c0_359 = arith.constant 0 : index
    %454 = vector.load %arg15[%c19_358, %c0_359] : memref<32x128xf32, #tpu.memory_space<vmem>>, vector<1x128xf32>
    %455 = vector.extract_strided_slice %454 {offsets = [0, 0], sizes = [1, 16], strides = [1, 1]} : vector<1x128xf32> to vector<1x16xf32>
    %456 = arith.truncf %455 : vector<1x16xf32> to vector<1x16xbf16>
    %c304 = arith.constant 304 : index
    %c0_360 = arith.constant 0 : index
    %457 = vector.load %arg6[%c304, %c0_360] : memref<400x128xbf16, #tpu.memory_space<vmem>>, vector<16x128xbf16>
    %cst_361 = arith.constant dense<0.000000e+00> : vector<1x128xf32>
    %458 = tpu.matmul %456, %457, %cst_361 {dimension_numbers = #tpu.dot_dimension_numbers<[1], [0], [0], [1], [0, 0, 1, 1], [], []>} : vector<1x16xbf16>, vector<16x128xbf16>, vector<1x128xf32> -> vector<1x128xf32>
    %459 = arith.addf %453, %458 : vector<1x128xf32>
    %c20_362 = arith.constant 20 : index
    %c0_363 = arith.constant 0 : index
    %460 = vector.load %arg15[%c20_362, %c0_363] : memref<32x128xf32, #tpu.memory_space<vmem>>, vector<1x128xf32>
    %461 = vector.extract_strided_slice %460 {offsets = [0, 0], sizes = [1, 16], strides = [1, 1]} : vector<1x128xf32> to vector<1x16xf32>
    %462 = arith.truncf %461 : vector<1x16xf32> to vector<1x16xbf16>
    %c320 = arith.constant 320 : index
    %c0_364 = arith.constant 0 : index
    %463 = vector.load %arg6[%c320, %c0_364] : memref<400x128xbf16, #tpu.memory_space<vmem>>, vector<16x128xbf16>
    %cst_365 = arith.constant dense<0.000000e+00> : vector<1x128xf32>
    %464 = tpu.matmul %462, %463, %cst_365 {dimension_numbers = #tpu.dot_dimension_numbers<[1], [0], [0], [1], [0, 0, 1, 1], [], []>} : vector<1x16xbf16>, vector<16x128xbf16>, vector<1x128xf32> -> vector<1x128xf32>
    %465 = arith.addf %459, %464 : vector<1x128xf32>
    %c21_366 = arith.constant 21 : index
    %c0_367 = arith.constant 0 : index
    %466 = vector.load %arg15[%c21_366, %c0_367] : memref<32x128xf32, #tpu.memory_space<vmem>>, vector<1x128xf32>
    %467 = vector.extract_strided_slice %466 {offsets = [0, 0], sizes = [1, 16], strides = [1, 1]} : vector<1x128xf32> to vector<1x16xf32>
    %468 = arith.truncf %467 : vector<1x16xf32> to vector<1x16xbf16>
    %c336 = arith.constant 336 : index
    %c0_368 = arith.constant 0 : index
    %469 = vector.load %arg6[%c336, %c0_368] : memref<400x128xbf16, #tpu.memory_space<vmem>>, vector<16x128xbf16>
    %cst_369 = arith.constant dense<0.000000e+00> : vector<1x128xf32>
    %470 = tpu.matmul %468, %469, %cst_369 {dimension_numbers = #tpu.dot_dimension_numbers<[1], [0], [0], [1], [0, 0, 1, 1], [], []>} : vector<1x16xbf16>, vector<16x128xbf16>, vector<1x128xf32> -> vector<1x128xf32>
    %471 = arith.addf %465, %470 : vector<1x128xf32>
    %c22_370 = arith.constant 22 : index
    %c0_371 = arith.constant 0 : index
    %472 = vector.load %arg15[%c22_370, %c0_371] : memref<32x128xf32, #tpu.memory_space<vmem>>, vector<1x128xf32>
    %473 = vector.extract_strided_slice %472 {offsets = [0, 0], sizes = [1, 16], strides = [1, 1]} : vector<1x128xf32> to vector<1x16xf32>
    %474 = arith.truncf %473 : vector<1x16xf32> to vector<1x16xbf16>
    %c352 = arith.constant 352 : index
    %c0_372 = arith.constant 0 : index
    %475 = vector.load %arg6[%c352, %c0_372] : memref<400x128xbf16, #tpu.memory_space<vmem>>, vector<16x128xbf16>
    %cst_373 = arith.constant dense<0.000000e+00> : vector<1x128xf32>
    %476 = tpu.matmul %474, %475, %cst_373 {dimension_numbers = #tpu.dot_dimension_numbers<[1], [0], [0], [1], [0, 0, 1, 1], [], []>} : vector<1x16xbf16>, vector<16x128xbf16>, vector<1x128xf32> -> vector<1x128xf32>
    %477 = arith.addf %471, %476 : vector<1x128xf32>
    %c23_374 = arith.constant 23 : index
    %c0_375 = arith.constant 0 : index
    %478 = vector.load %arg15[%c23_374, %c0_375] : memref<32x128xf32, #tpu.memory_space<vmem>>, vector<1x128xf32>
    %479 = vector.extract_strided_slice %478 {offsets = [0, 0], sizes = [1, 16], strides = [1, 1]} : vector<1x128xf32> to vector<1x16xf32>
    %480 = arith.truncf %479 : vector<1x16xf32> to vector<1x16xbf16>
    %c368 = arith.constant 368 : index
    %c0_376 = arith.constant 0 : index
    %481 = vector.load %arg6[%c368, %c0_376] : memref<400x128xbf16, #tpu.memory_space<vmem>>, vector<16x128xbf16>
    %cst_377 = arith.constant dense<0.000000e+00> : vector<1x128xf32>
    %482 = tpu.matmul %480, %481, %cst_377 {dimension_numbers = #tpu.dot_dimension_numbers<[1], [0], [0], [1], [0, 0, 1, 1], [], []>} : vector<1x16xbf16>, vector<16x128xbf16>, vector<1x128xf32> -> vector<1x128xf32>
    %483 = arith.addf %477, %482 : vector<1x128xf32>
    %c24_378 = arith.constant 24 : index
    %c0_379 = arith.constant 0 : index
    %484 = vector.load %arg15[%c24_378, %c0_379] : memref<32x128xf32, #tpu.memory_space<vmem>>, vector<1x128xf32>
    %485 = vector.extract_strided_slice %484 {offsets = [0, 0], sizes = [1, 16], strides = [1, 1]} : vector<1x128xf32> to vector<1x16xf32>
    %486 = arith.truncf %485 : vector<1x16xf32> to vector<1x16xbf16>
    %c384 = arith.constant 384 : index
    %c0_380 = arith.constant 0 : index
    %487 = vector.load %arg6[%c384, %c0_380] : memref<400x128xbf16, #tpu.memory_space<vmem>>, vector<16x128xbf16>
    %cst_381 = arith.constant dense<0.000000e+00> : vector<1x128xf32>
    %488 = tpu.matmul %486, %487, %cst_381 {dimension_numbers = #tpu.dot_dimension_numbers<[1], [0], [0], [1], [0, 0, 1, 1], [], []>} : vector<1x16xbf16>, vector<16x128xbf16>, vector<1x128xf32> -> vector<1x128xf32>
    %489 = arith.addf %483, %488 : vector<1x128xf32>
    %cst_382 = arith.constant 0.000000e+00 : f32
    %490 = vector.broadcast %cst_382 : f32 to vector<1x128xf32>
    %491 = arith.maximumf %489, %490 : vector<1x128xf32>
    %492 = arith.truncf %491 : vector<1x128xf32> to vector<1x128xbf16>
    %c0_383 = arith.constant 0 : index
    %c0_384 = arith.constant 0 : index
    %493 = vector.load %arg8[%c0_383, %c0_384] : memref<128x128xbf16, #tpu.memory_space<vmem>>, vector<128x128xbf16>
    %cst_385 = arith.constant dense<0.000000e+00> : vector<1x128xf32>
    %494 = tpu.matmul %492, %493, %cst_385 {dimension_numbers = #tpu.dot_dimension_numbers<[1], [0], [0], [1], [0, 0, 1, 1], [], []>} : vector<1x128xbf16>, vector<128x128xbf16>, vector<1x128xf32> -> vector<1x128xf32>
    %c0_386 = arith.constant 0 : index
    %c0_387 = arith.constant 0 : index
    %495 = vector.load %arg9[%c0_386, %c0_387] : memref<1x128xf32, #tpu.memory_space<vmem>>, vector<1x128xf32>
    %496 = arith.addf %494, %495 : vector<1x128xf32>
    %cst_388 = arith.constant 0.000000e+00 : f32
    %497 = vector.broadcast %cst_388 : f32 to vector<1x128xf32>
    %498 = arith.maximumf %496, %497 : vector<1x128xf32>
    %499 = arith.truncf %498 : vector<1x128xf32> to vector<1x128xbf16>
    %c0_389 = arith.constant 0 : index
    %c0_390 = arith.constant 0 : index
    %500 = vector.load %arg10[%c0_389, %c0_390] : memref<128x128xbf16, #tpu.memory_space<vmem>>, vector<128x128xbf16>
    %cst_391 = arith.constant dense<0.000000e+00> : vector<1x128xf32>
    %501 = tpu.matmul %499, %500, %cst_391 {dimension_numbers = #tpu.dot_dimension_numbers<[1], [0], [0], [1], [0, 0, 1, 1], [], []>} : vector<1x128xbf16>, vector<128x128xbf16>, vector<1x128xf32> -> vector<1x128xf32>
    %c0_392 = arith.constant 0 : index
    %c0_393 = arith.constant 0 : index
    %502 = vector.load %arg11[%c0_392, %c0_393] : memref<1x128xf32, #tpu.memory_space<vmem>>, vector<1x128xf32>
    %503 = arith.addf %501, %502 : vector<1x128xf32>
    %c0_394 = arith.constant 0 : index
    %c0_395 = arith.constant 0 : index
    %c0_396 = arith.constant 0 : index
    %504 = vector.load %arg12[%c0_394, %c0_395, %c0_396] : memref<1x1x128xf32, #tpu.memory_space<vmem>>, vector<1x1x128xf32>
    %505 = vector.shape_cast %504 : vector<1x1x128xf32> to vector<1x128xf32>
    %506 = vector.shape_cast %503 : vector<1x128xf32> to vector<1x1x128xf32>
    tpu.vector_store %arg12[%c0_394, %c0_395, %c0_396], %506 {strides = array<i32>} : memref<1x1x128xf32, #tpu.memory_space<vmem>>, vector<1x1x128xf32>,
    return
  }
  func.func @transform_0(%arg0: i32) -> (i32, i32, i32, i32) {
    %c0_i32 = arith.constant 0 : i32
    %c0_i32_0 = arith.constant 0 : i32
    %c0_i32_1 = arith.constant 0 : i32
    %c0_i32_2 = arith.constant 0 : i32
    return %arg0, %c0_i32, %c0_i32_0, %c0_i32_1 : i32, i32, i32, i32
  }
  func.func @transform_1(%arg0: i32) -> (i32, i32) {
    %c0_i32 = arith.constant 0 : i32
    %c0_i32_0 = arith.constant 0 : i32
    %c0_i32_1 = arith.constant 0 : i32
    return %c0_i32, %c0_i32_0 : i32, i32
  }
  func.func @transform_2(%arg0: i32) -> (i32, i32) {
    %c0_i32 = arith.constant 0 : i32
    %c0_i32_0 = arith.constant 0 : i32
    %c0_i32_1 = arith.constant 0 : i32
    return %c0_i32, %c0_i32_0 : i32, i32
  }
  func.func @transform_3(%arg0: i32) -> (i32, i32) {
    %c0_i32 = arith.constant 0 : i32
    %c0_i32_0 = arith.constant 0 : i32
    %c0_i32_1 = arith.constant 0 : i32
    return %c0_i32, %c0_i32_0 : i32, i32
  }
  func.func @transform_4(%arg0: i32) -> (i32, i32) {
    %c0_i32 = arith.constant 0 : i32
    %c0_i32_0 = arith.constant 0 : i32
    %c0_i32_1 = arith.constant 0 : i32
    return %c0_i32, %c0_i32_0 : i32, i32
  }
  func.func @transform_5(%arg0: i32) -> (i32, i32) {
    %c0_i32 = arith.constant 0 : i32
    %c0_i32_0 = arith.constant 0 : i32
    %c0_i32_1 = arith.constant 0 : i32
    return %c0_i32, %c0_i32_0 : i32, i32
  }
  func.func @transform_6(%arg0: i32) -> (i32, i32) {
    %c0_i32 = arith.constant 0 : i32
    %c0_i32_0 = arith.constant 0 : i32
    %c0_i32_1 = arith.constant 0 : i32
    return %c0_i32, %c0_i32_0 : i32, i32
  }
  func.func @transform_7(%arg0: i32) -> (i32, i32) {
    %c0_i32 = arith.constant 0 : i32
    %c0_i32_0 = arith.constant 0 : i32
    %c0_i32_1 = arith.constant 0 : i32
    return %c0_i32, %c0_i32_0 : i32, i32
  }
  func.func @transform_8(%arg0: i32) -> (i32, i32) {
    %c0_i32 = arith.constant 0 : i32
    %c0_i32_0 = arith.constant 0 : i32
    %c0_i32_1 = arith.constant 0 : i32
    return %c0_i32, %c0_i32_0 : i32, i32
  }
  func.func @transform_9(%arg0: i32) -> (i32, i32) {
    %c0_i32 = arith.constant 0 : i32
    %c0_i32_0 = arith.constant 0 : i32
    %c0_i32_1 = arith.constant 0 : i32
    return %c0_i32, %c0_i32_0 : i32, i32
  }
  func.func @transform_10(%arg0: i32) -> (i32, i32) {
    %c0_i32 = arith.constant 0 : i32
    %c0_i32_0 = arith.constant 0 : i32
    %c0_i32_1 = arith.constant 0 : i32
    return %c0_i32, %c0_i32_0 : i32, i32
  }
  func.func @transform_11(%arg0: i32) -> (i32, i32, i32) {
    %c0_i32 = arith.constant 0 : i32
    %c0_i32_0 = arith.constant 0 : i32
    %c0_i32_1 = arith.constant 0 : i32
    return %arg0, %c0_i32, %c0_i32_0 : i32, i32, i32
  }
}

</mosaic_0001>

<bundles_post_ra>
// kernel: lenet_forward.1
= control target key start
LH: loop header
LB: loop body
LE: loop exit
PB: predicated region body
PF: predicated region fallthrough
CT: control target
= control target key end

     0   :  { %s13117_s0 = inlined_call_operand.vmem [shape: bf16[2,4,200,80], index: 0, kind: input, shape index: {}]   ;;  %s13118_s1 = inlined_call_operand.vmem [shape: bf16[80,128], index: 1, kind: input, shape index: {}]   ;;  %s13119_s2 = inlined_call_operand.vmem [shape: f32[1,128], index: 2, kind: input, shape index: {}]   ;;  %s13120_s3 = inlined_call_operand.vmem [shape: bf16[200,128], index: 3, kind: input, shape index: {}]   ;;  %s13121_s4 = inlined_call_operand.vmem [shape: f32[1,128], index: 4, kind: input, shape index: {}]   ;;  %s13122_s5 = inlined_call_operand.vmem [shape: bf16[400,128], index: 5, kind: input, shape index: {}]   ;;  %s13123_s6 = inlined_call_operand.vmem [shape: f32[1,128], index: 6, kind: input, shape index: {}]   ;;  %s13124_s7 = inlined_call_operand.vmem [shape: bf16[128,128], index: 7, kind: input, shape index: {}]   ;;  %s13125_s8 = inlined_call_operand.vmem [shape: f32[1,128], index: 8, kind: input, shape index: {}]   ;;  %s13126_s9 = inlined_call_operand.vmem [shape: bf16[128,128], index: 9, kind: input, shape index: {}]   ;;  %s13127_s10 = inlined_call_operand.vmem [shape: f32[1,128], index: 10, kind: input, shape index: {}]   ;;  %s13128_s11 = inlined_call_operand.hbm [shape: f32[2,1,128], index: 11, kind: output, shape index: {}]  }
   0x1   :  { %13133 = sst [smem:[#allocation10_spill]] %s13117_s0 }
   0x2   :  { %16 = vsyncpa [#allocation6], 0 }
   0x3   :  { %18 = vsyncpa [#allocation6 + $0x1], 0  ;;  %s10754_s17 = smov 0   ;;  %s10756_s18 = smov 0  }
   0x4   :  { %s10758_s19 = smov 0   ;;  %s10760_s20 = smov 0  }
   0x5 LB: > { %s10775_s21 = sadd.s32 4294967295, %s10689_s20   ;;  %s8226_s22 = sadd.s32 4294967294, %s10689_s20   ;;  %s10689_s20 = sphi %s10760_s20, %s13169_s20   ;;  %s10685_s19 = sphi %s10758_s19, %s13168_s19   ;;  %s10681_s18 = sphi %s10756_s18, %s13167_s18   ;;  %s10677_s17 = sphi %s10754_s17, %s13166_s17  }
   0x6   : > { %s10779_s23 = sadd.s32 1, %s10689_s20   ;;  %s267_s24 = sadd.s32 1, %s10685_s19 }
   0x7   : > { %s264_s25 = ssub.s32 %s10689_s20, %s10779_s23  ;;  %p277_p0 = scmp.ne.s32.totalorder %s10685_s19, %s10681_s18 }
   0x8   : > { %p265_p1 = scmp.eq.s32.totalorder %s264_s25, 0  ;;  %p278_p2 = scmp.eq.s32.totalorder %s10775_s21, 1 }
   0x9   : > { %p283_p3 = scmp.ne.s32.totalorder %s10681_s18, %s10677_s17  ;;  %p284_p4 = scmp.eq.s32.totalorder %s8226_s22, 1 }
   0xa   : > { %s10790_s26 = scalar_select %p265_p1, %s10685_s19, %s267_s24  }
   0xb   : > { %p10792_p5 = por %p278_p2, %p277_p0  ;;  %p10796_p6 = por %p284_p4, %p283_p3 }
   0xc   : > { %p8229_p7 = scmp.ge.s32.totalorder %s10689_s20, 1  ;;  %p340_p8 = scmp.lt.s32.totalorder %s10689_s20, 3 }
   0xe   : > { %p341_p9 = pnand %p8229_p7, %p340_p8 }
  0x10   : > { %344 = sbr.rel (%p341_p9) target bundleno = 2200 (0x898), region = 64 }
  0x15   : > { %v10531_v0 = vld [vmem:[%s13118_s1 + $0x20] sm:$0xff]   ;;  %v13129_v1 = vmov 0.0   ;;  %v10532_v2 = vld [vmem:[%s13118_s1 + $0x18] sm:$0xff]   ;;  %p379_p10 = scmp.lt.s32.totalorder %s10775_s21, 1  ;;  %vm10692_vm0 = vmmov 0   ;;  %v10533_v3 = vld [vmem:[%s13118_s1 + $0x10] sm:$0xff]  }
  0x16   : > { %9101 = vmatprep.subr.bf16.mxu0 %v13129_v1  ;;  %9163 = vmatprep.subr.bf16.mxu1 %v13129_v1  ;;  %s13136_s0 = sld [smem:[#allocation10_spill]]  ;;  %v10534_v4 = vld [vmem:[%s13118_s1 + $0x8] sm:$0xff]   ;;  %v10535_v5 = vld [vmem:[%s13118_s1] sm:$0xff]   ;;  %vm515_vm1 = vcmask 654336   ;;  %vm1921_vm2 = vcmask 1043456   ;;  %vm1893_vm3 = vcmask 64512  }
  0x17   : > { %9102 = vmatpush3.bf16.msra.mxu0 %v10531_v0  ;;  %9164 = vmatpush3.bf16.msra.mxu1 %v10531_v0  ;;  %s380_s14 = scalar_select %p379_p10, %s10775_s21, 1  ;;  %v1892_v36 = vld [vmem:[%s13120_s3 + $0x4] sm:$0xf]  ;;  %v1865_v54 = vld [vmem:[%s13120_s3] sm:$0xf]  ;;  %vm6317_vm4 = vcmask 1041408  }
  0x18   : > { %9103 = vmatprep.subr.bf16.mxu0 %v13129_v1  ;;  %9165 = vmatprep.subr.bf16.mxu1 %v13129_v1  ;;  %v1923_v37 = vsel %vm1921_vm2, %v1892_v36, 0  ;;  %v2057_v55 = vsel %vm1921_vm2, %v1865_v54, 0  ;;  %vm6602_vm5 = vcmask 130048   ;;  %s377_s15 = sand.u32 1, %s10681_s18   ;;  %s8708_s24 = sshll.u32 %s10775_s21, 4 }
  0x19   : > { %9111 = vmatprep.mubr.msk.bf16.mxu0 %vm10692_vm0, %v13129_v1  ;;  %9173 = vmatprep.mubr.msk.bf16.mxu1 %vm10692_vm0, %v13129_v1  ;;  %s10489_s22 = smul.u32 400, %s380_s14  ;;  %s378_s25 = scalar_lea.vmem [#allocation5], %s377_s15 }
  0x1a   : > { %s13076_s13 = scalar_lea.hbm %s13128_s11, %s8708_s24  ;;  %s8159_s14 = scalar_lea.sflag [#allocation6], %s377_s15 }
  0x1b   : > { %9104 = vmatpush3.bf16.msra.mxu0 %v10532_v2  ;;  %9166 = vmatpush3.bf16.msra.mxu1 %v10532_v2  ;;  %s10693_s21 = smov [#allocation5]  }
  0x1c   : > { %9105 = vmatprep.subr.bf16.mxu0 %v13129_v1  ;;  %9167 = vmatprep.subr.bf16.mxu1 %v13129_v1  ;;  %s10826_s29 = scalar_lea.vmem %s13136_s0, %s10489_s22  ;;  %s10633_s22 = sshll.u32 %s10693_s21, 4  ;;  %s10634_s22 = int_to_ptr.vmem [resolvable:$false] %s10633_s22 }
  0x1d   : > { %v10536_v6 = vld [vmem:[%s10826_s29] sm:$0xff]   ;;  %v10538_v8 = vld [vmem:[%s10826_s29 + $0x8] sm:$0xff]   ;;  %v10540_v10 = vld [vmem:[%s10826_s29 + $0x10] sm:$0xff]   ;;  %s10635_s30 = scalar_lea.vmem %s10634_s22, 32 }
  0x1e   : > { %v10537_v7 = vld [vmem:[%s10826_s29 + $0x64] sm:$0xff]   ;;  %v10539_v9 = vld [vmem:[%s10826_s29 + $0x6c] sm:$0xff]   ;;  %v10541_v11 = vld [vmem:[%s10826_s29 + $0x74] sm:$0xff]  }
  0x1f   : > { %9106 = vmatpush3.bf16.msra.mxu0 %v10533_v3  ;;  %9168 = vmatpush3.bf16.msra.mxu1 %v10533_v3  ;;  %v10542_v12 = vld [vmem:[%s10826_s29 + $0x18] sm:$0xff]   ;;  %v10544_v14 = vld [vmem:[%s10826_s29 + $0x20] sm:$0xff]   ;;  %v10546_v16 = vld [vmem:[%s10826_s29 + $0x28] sm:$0xff]  }
  0x20   : > { %9107 = vmatprep.subr.bf16.mxu0 %v13129_v1  ;;  %9169 = vmatprep.subr.bf16.mxu1 %v13129_v1  ;;  %v10543_v13 = vld [vmem:[%s10826_s29 + $0x7c] sm:$0xff]   ;;  %v10545_v15 = vld [vmem:[%s10826_s29 + $0x84] sm:$0xff]   ;;  %v10547_v17 = vld [vmem:[%s10826_s29 + $0x8c] sm:$0xff]  }
  0x21   : > { %v10548_v18 = vld [vmem:[%s10826_s29 + $0x30] sm:$0xff]   ;;  %v10550_v20 = vld [vmem:[%s10826_s29 + $0x38] sm:$0xff]   ;;  %v10552_v22 = vld [vmem:[%s10826_s29 + $0x40] sm:$0xff]  }
  0x22   : > { %v10549_v19 = vld [vmem:[%s10826_s29 + $0x94] sm:$0xff]   ;;  %v10551_v21 = vld [vmem:[%s10826_s29 + $0x9c] sm:$0xff]   ;;  %v10553_v23 = vld [vmem:[%s10826_s29 + $0xa4] sm:$0xff]  }
  0x23   : > { %9108 = vmatpush3.bf16.msra.mxu0 %v10534_v4  ;;  %9170 = vmatpush3.bf16.msra.mxu1 %v10534_v4  ;;  %v10554_v24 = vld [vmem:[%s10826_s29 + $0x48] sm:$0xff]   ;;  %v10556_v26 = vld [vmem:[%s10826_s29 + $0x50] sm:$0xff]   ;;  %v10558_v28 = vld [vmem:[%s10826_s29 + $0x58] sm:$0xff]  }
  0x24   : > { %9109 = vmatprep.subr.bf16.mxu0 %v13129_v1  ;;  %9171 = vmatprep.subr.bf16.mxu1 %v13129_v1  ;;  %v10555_v25 = vld [vmem:[%s10826_s29 + $0xac] sm:$0xff]   ;;  %v10557_v27 = vld [vmem:[%s10826_s29 + $0xb4] sm:$0xff]   ;;  %v10559_v29 = vld [vmem:[%s10826_s29 + $0xbc] sm:$0xff]  }
  0x25   : > { %v10560_v30 = vld [vmem:[%s10826_s29 + $0x60] ss:$0 sps:$4 sm:$0xff]   ;;  %v10561_v31 = vld [vmem:[%s10826_s29 + $0xc4] ss:$0 sps:$4 sm:$0xff]   ;;  %v10562_v32 = vld [vmem:[%s10826_s29 + $0xc8] sm:$0xff]  }
  0x26   : > { %v10563_v33 = vld [vmem:[%s10826_s29 + $0x12c] sm:$0xff]   ;;  %v10565_v35 = vld [vmem:[%s10826_s29 + $0x134] sm:$0xff]   ;;  %v10567_v39 = vld [vmem:[%s10826_s29 + $0x13c] sm:$0xff]  }
  0x27   : > { %9110 = vmatpush3.bf16.msra.mxu0 %v10535_v5  ;;  %9172 = vmatpush3.bf16.msra.mxu1 %v10535_v5  ;;  %v10564_v34 = vld [vmem:[%s10826_s29 + $0xd0] sm:$0xff]   ;;  %v10566_v38 = vld [vmem:[%s10826_s29 + $0xd8] sm:$0xff]   ;;  %v10568_v40 = vld [vmem:[%s10826_s29 + $0xe0] sm:$0xff]  }
  0x28   : > { %9225 = vmatprep.subr.bf16.mxu0 %v13129_v1  ;;  %9287 = vmatprep.subr.bf16.mxu1 %v13129_v1  ;;  %v10569_v41 = vld [vmem:[%s10826_s29 + $0x144] sm:$0xff]   ;;  %v10571_v43 = vld [vmem:[%s10826_s29 + $0x14c] sm:$0xff]   ;;  %v10573_v45 = vld [vmem:[%s10826_s29 + $0x154] sm:$0xff]  }
  0x29   : > { %v10570_v42 = vld [vmem:[%s10826_s29 + $0xe8] sm:$0xff]   ;;  %v10572_v44 = vld [vmem:[%s10826_s29 + $0xf0] sm:$0xff]   ;;  %v10574_v46 = vld [vmem:[%s10826_s29 + $0xf8] sm:$0xff]  }
  0x2a   : > { %9112 = vmatmul.mubr.msk.bf16.vlgmr.msra.gmra.mxu0 %vm515_vm1, %v10536_v6  ;;  %9174 = vmatmul.mubr.msk.bf16.vlgmr.msra.gmra.mxu1 %vm515_vm1, %v10537_v7  ;;  %v10575_v47 = vld [vmem:[%s10826_s29 + $0x15c] sm:$0xff]   ;;  %v10577_v49 = vld [vmem:[%s10826_s29 + $0x164] sm:$0xff]   ;;  %v10579_v51 = vld [vmem:[%s10826_s29 + $0x16c] sm:$0xff]  }
  0x2b   : > { %9226 = vmatpush3.bf16.msra.mxu0 %v10531_v0  ;;  %9115 = vmatprep.mubr.msk.bf16.mxu0 %vm10692_vm0, %v13129_v1  ;;  %v10576_v48 = vld [vmem:[%s10826_s29 + $0x100] sm:$0xff]   ;;  %v10578_v50 = vld [vmem:[%s10826_s29 + $0x108] sm:$0xff]   ;;  %v10580_v52 = vld [vmem:[%s10826_s29 + $0x110] sm:$0xff]  }
  0x2c   : > { %9288 = vmatpush3.bf16.msra.mxu1 %v10531_v0  ;;  %9177 = vmatprep.mubr.msk.bf16.mxu1 %vm10692_vm0, %v13129_v1  ;;  %v10582_v53 = vld [vmem:[%s10826_s29 + $0x174] sm:$0xff]   ;;  %v10584_v57 = vld [vmem:[%s10826_s29 + $0x17c] sm:$0xff]   ;;  %v10586_v59 = vld [vmem:[%s10826_s29 + $0x184] sm:$0xff]  }
  0x2d   : > { %9227 = vmatprep.subr.bf16.mxu0 %v13129_v1  ;;  %9289 = vmatprep.subr.bf16.mxu1 %v13129_v1  ;;  %v10581_v56 = vld [vmem:[%s10826_s29 + $0x118] sm:$0xff]   ;;  %v10583_v58 = vld [vmem:[%s10826_s29 + $0x120] sm:$0xff]  }
  0x2f   : > { %9228 = vmatpush3.bf16.msra.mxu0 %v10532_v2 }
  0x30   : > { %9290 = vmatpush3.bf16.msra.mxu1 %v10532_v2  ;;  %9229 = vmatprep.subr.bf16.mxu0 %v13129_v1 }
  0x31   : > { %9291 = vmatprep.subr.bf16.mxu1 %v13129_v1 }
  0x32   : > { %9116 = vmatmul.mubr.msk.bf16.gmra.mxu0 %vm515_vm1, %v10538_v8  ;;  %9178 = vmatmul.mubr.msk.bf16.gmra.mxu1 %vm515_vm1, %v10539_v9 }
  0x33   : > { %9119 = vmatprep.mubr.msk.bf16.mxu0 %vm10692_vm0, %v13129_v1  ;;  %9181 = vmatprep.mubr.msk.bf16.mxu1 %vm10692_vm0, %v13129_v1 }
  0x34   : > { %9230 = vmatpush3.bf16.msra.mxu0 %v10533_v3  ;;  %9292 = vmatpush3.bf16.msra.mxu1 %v10533_v3  ;;  %v10585_v3 = vld [vmem:[%s10826_s29 + $0x128] ss:$0 sps:$4 sm:$0xff]  }
  0x35   : > { %9231 = vmatprep.subr.bf16.mxu0 %v13129_v1  ;;  %9293 = vmatprep.subr.bf16.mxu1 %v13129_v1 }
  0x38   : > { %9232 = vmatpush3.bf16.msra.mxu0 %v10534_v4  ;;  %9294 = vmatpush3.bf16.msra.mxu1 %v10534_v4 }
  0x39   : > { %9233 = vmatprep.subr.bf16.mxu0 %v13129_v1  ;;  %9295 = vmatprep.subr.bf16.mxu1 %v13129_v1 }
  0x3a   : > { %9120 = vmatmul.mubr.msk.bf16.gmra.mxu0 %vm515_vm1, %v10540_v10  ;;  %9182 = vmatmul.mubr.msk.bf16.gmra.mxu1 %vm515_vm1, %v10541_v11 }
  0x3b   : > { %9123 = vmatprep.mubr.msk.bf16.mxu0 %vm10692_vm0, %v13129_v1  ;;  %9185 = vmatprep.mubr.msk.bf16.mxu1 %vm10692_vm0, %v13129_v1 }
  0x3c   : > { %9234 = vmatpush3.bf16.msra.mxu0 %v10535_v5  ;;  %9296 = vmatpush3.bf16.msra.mxu1 %v10535_v5  ;;  %v10587_v5 = vld [vmem:[%s10826_s29 + $0x18c] ss:$0 sps:$4 sm:$0xff]   ;;  %s8171_s29 = sshll.u32 %s378_s25, 4  ;;  %s13078_s29 = int_to_ptr.vmem [resolvable:$true] %s8171_s29 }
  0x3d   : > { %9349 = vmatprep.subr.bf16.mxu0 %v13129_v1  ;;  %9387 = vmatprep.subr.bf16.mxu1 %v13129_v1  ;;  %s10629_s16 = scalar_lea.vmem %s13078_s29, 16  ;;  %p10636_p0 = scmp.lt.s32.totalorder %s13078_s29, %s10634_s22 }
  0x3e   : > { %p10630_p11 = scmp.ne.s32.totalorder %s13078_s29, %s10629_s16  ;;  %p10637_p1 = scmp.lt.s32.totalorder %s10635_s30, %s10629_s16 }
  0x40   : > { %p10631_p12 = pnand %p10630_p11, %p10792_p5  ;;  %p10638_p2 = por %p10637_p1, %p10636_p0 }
  0x42   : > { %9124 = vmatmul.mubr.msk.bf16.gmra.mxu0 %vm515_vm1, %v10542_v12  ;;  %9186 = vmatmul.mubr.msk.bf16.gmra.mxu1 %vm515_vm1, %v10543_v13  ;;  %p10632_p13 = pneg %p10631_p12 }
  0x43   : > { %9127 = vmatprep.mubr.msk.bf16.mxu0 %vm10692_vm0, %v13129_v1  ;;  %9189 = vmatprep.mubr.msk.bf16.mxu1 %vm10692_vm0, %v13129_v1 }
  0x44   : > { %p10639_p3 = pnand %p10638_p2, %p10632_p13 }
  0x4a   : > { %9128 = vmatmul.mubr.msk.bf16.gmra.mxu0 %vm515_vm1, %v10544_v14  ;;  %9190 = vmatmul.mubr.msk.bf16.gmra.mxu1 %vm515_vm1, %v10545_v15 }
  0x4b   : > { %9131 = vmatprep.mubr.msk.bf16.mxu0 %vm10692_vm0, %v13129_v1  ;;  %9193 = vmatprep.mubr.msk.bf16.mxu1 %vm10692_vm0, %v13129_v1 }
  0x52   : > { %9132 = vmatmul.mubr.msk.bf16.gmra.mxu0 %vm515_vm1, %v10546_v16  ;;  %9194 = vmatmul.mubr.msk.bf16.gmra.mxu1 %vm515_vm1, %v10547_v17 }
  0x53   : > { %9135 = vmatprep.mubr.msk.bf16.mxu0 %vm10692_vm0, %v13129_v1  ;;  %9197 = vmatprep.mubr.msk.bf16.mxu1 %vm10692_vm0, %v13129_v1 }
  0x5a   : > { %9136 = vmatmul.mubr.msk.bf16.gmra.mxu0 %vm515_vm1, %v10548_v18  ;;  %9198 = vmatmul.mubr.msk.bf16.gmra.mxu1 %vm515_vm1, %v10549_v19 }
  0x5b   : > { %9139 = vmatprep.mubr.msk.bf16.mxu0 %vm10692_vm0, %v13129_v1  ;;  %9201 = vmatprep.mubr.msk.bf16.mxu1 %vm10692_vm0, %v13129_v1 }
  0x62   : > { %9140 = vmatmul.mubr.msk.bf16.gmra.mxu0 %vm515_vm1, %v10550_v20  ;;  %9202 = vmatmul.mubr.msk.bf16.gmra.mxu1 %vm515_vm1, %v10551_v21 }
  0x63   : > { %9143 = vmatprep.mubr.msk.bf16.mxu0 %vm10692_vm0, %v13129_v1  ;;  %9205 = vmatprep.mubr.msk.bf16.mxu1 %vm10692_vm0, %v13129_v1 }
  0x6a   : > { %9144 = vmatmul.mubr.msk.bf16.gmra.mxu0 %vm515_vm1, %v10552_v22  ;;  %9206 = vmatmul.mubr.msk.bf16.gmra.mxu1 %vm515_vm1, %v10553_v23 }
  0x6b   : > { %9147 = vmatprep.mubr.msk.bf16.mxu0 %vm10692_vm0, %v13129_v1  ;;  %9209 = vmatprep.mubr.msk.bf16.mxu1 %vm10692_vm0, %v13129_v1 }
  0x72   : > { %9148 = vmatmul.mubr.msk.bf16.gmra.mxu0 %vm515_vm1, %v10554_v24  ;;  %9210 = vmatmul.mubr.msk.bf16.gmra.mxu1 %vm515_vm1, %v10555_v25 }
  0x73   : > { %9151 = vmatprep.mubr.msk.bf16.mxu0 %vm10692_vm0, %v13129_v1  ;;  %9213 = vmatprep.mubr.msk.bf16.mxu1 %vm10692_vm0, %v13129_v1 }
  0x7a   : > { %9152 = vmatmul.mubr.msk.bf16.gmra.mxu0 %vm515_vm1, %v10556_v26  ;;  %9214 = vmatmul.mubr.msk.bf16.gmra.mxu1 %vm515_vm1, %v10557_v27 }
  0x7b   : > { %9155 = vmatprep.mubr.msk.bf16.mxu0 %vm10692_vm0, %v13129_v1  ;;  %9217 = vmatprep.mubr.msk.bf16.mxu1 %vm10692_vm0, %v13129_v1 }
  0x82   : > { %9156 = vmatmul.mubr.msk.bf16.gmra.mxu0 %vm515_vm1, %v10558_v28  ;;  %9218 = vmatmul.mubr.msk.bf16.gmra.mxu1 %vm515_vm1, %v10559_v29 }
  0x83   : > { %9159 = vmatprep.mubr.msk.bf16.mxu0 %vm10692_vm0, %v13129_v1  ;;  %9221 = vmatprep.mubr.msk.bf16.mxu1 %vm10692_vm0, %v13129_v1 }
  0x8a   : > { %9160 = vmatmul.mubr.msk.bf16.gmra.mxu0 %vm515_vm1, %v10560_v30  ;;  %9222 = vmatmul.mubr.msk.bf16.gmra.mxu1 %vm515_vm1, %v10561_v31 }
  0x8b   : > { %9235 = vmatprep.mubr.msk.bf16.mxu0 %vm10692_vm0, %v13129_v1  ;;  %9297 = vmatprep.mubr.msk.bf16.mxu1 %vm10692_vm0, %v13129_v1 }
  0x92   : > { %9236 = vmatmul.mubr.msk.bf16.vlgmr.msra.gmra.mxu0 %vm515_vm1, %v10562_v32  ;;  %9298 = vmatmul.mubr.msk.bf16.vlgmr.msra.gmra.mxu1 %vm515_vm1, %v10563_v33 }
  0x93   : > { %9239 = vmatprep.mubr.msk.bf16.mxu0 %vm10692_vm0, %v13129_v1  ;;  %9301 = vmatprep.mubr.msk.bf16.mxu1 %vm10692_vm0, %v13129_v1 }
  0x94   : > { %9350 = vmatpush3.bf16.msra.mxu0 %v1923_v37  ;;  %9388 = vmatpush3.bf16.msra.mxu1 %v2057_v55 }
  0x95   : > { %9425 = vmatprep.subr.bf16.mxu0 %v13129_v1  ;;  %9463 = vmatprep.subr.bf16.mxu1 %v13129_v1 }
  0x9a   : > { %9240 = vmatmul.mubr.msk.bf16.gmra.mxu0 %vm515_vm1, %v10564_v34  ;;  %9302 = vmatmul.mubr.msk.bf16.gmra.mxu1 %vm515_vm1, %v10565_v35 }
  0x9b   : > { %9243 = vmatprep.mubr.msk.bf16.mxu0 %vm10692_vm0, %v13129_v1  ;;  %9305 = vmatprep.mubr.msk.bf16.mxu1 %vm10692_vm0, %v13129_v1 }
  0xa2   : > { %9244 = vmatmul.mubr.msk.bf16.gmra.mxu0 %vm515_vm1, %v10566_v38  ;;  %9306 = vmatmul.mubr.msk.bf16.gmra.mxu1 %vm515_vm1, %v10567_v39 }
  0xa3   : > { %9247 = vmatprep.mubr.msk.bf16.mxu0 %vm10692_vm0, %v13129_v1  ;;  %9309 = vmatprep.mubr.msk.bf16.mxu1 %vm10692_vm0, %v13129_v1 }
  0xaa   : > { %9248 = vmatmul.mubr.msk.bf16.gmra.mxu0 %vm515_vm1, %v10568_v40  ;;  %9310 = vmatmul.mubr.msk.bf16.gmra.mxu1 %vm515_vm1, %v10569_v41  ;;  %v11224_v41 = vld [vmem:[%s13119_s2] ss:$0 sm:$0xff] }
  0xab   : > { %9251 = vmatprep.mubr.msk.bf16.mxu0 %vm10692_vm0, %v13129_v1  ;;  %9313 = vmatprep.mubr.msk.bf16.mxu1 %vm10692_vm0, %v13129_v1 }
  0xb2   : > { %9252 = vmatmul.mubr.msk.bf16.gmra.mxu0 %vm515_vm1, %v10570_v42  ;;  %9314 = vmatmul.mubr.msk.bf16.gmra.mxu1 %vm515_vm1, %v10571_v43 }
  0xb3   : > { %9255 = vmatprep.mubr.msk.bf16.mxu0 %vm10692_vm0, %v13129_v1  ;;  %9317 = vmatprep.mubr.msk.bf16.mxu1 %vm10692_vm0, %v13129_v1 }
  0xba   : > { %9256 = vmatmul.mubr.msk.bf16.gmra.mxu0 %vm515_vm1, %v10572_v44  ;;  %9318 = vmatmul.mubr.msk.bf16.gmra.mxu1 %vm515_vm1, %v10573_v45 }
  0xbb   : > { %9259 = vmatprep.mubr.msk.bf16.mxu0 %vm10692_vm0, %v13129_v1  ;;  %9321 = vmatprep.mubr.msk.bf16.mxu1 %vm10692_vm0, %v13129_v1 }
  0xc2   : > { %9260 = vmatmul.mubr.msk.bf16.gmra.mxu0 %vm515_vm1, %v10574_v46  ;;  %9322 = vmatmul.mubr.msk.bf16.gmra.mxu1 %vm515_vm1, %v10575_v47 }
  0xc3   : > { %9263 = vmatprep.mubr.msk.bf16.mxu0 %vm10692_vm0, %v13129_v1  ;;  %9325 = vmatprep.mubr.msk.bf16.mxu1 %vm10692_vm0, %v13129_v1 }
  0xca   : > { %9264 = vmatmul.mubr.msk.bf16.gmra.mxu0 %vm515_vm1, %v10576_v48  ;;  %9326 = vmatmul.mubr.msk.bf16.gmra.mxu1 %vm515_vm1, %v10577_v49 }
  0xcb   : > { %9267 = vmatprep.mubr.msk.bf16.mxu0 %vm10692_vm0, %v13129_v1  ;;  %9329 = vmatprep.mubr.msk.bf16.mxu1 %vm10692_vm0, %v13129_v1 }
  0xd2   : > { %9268 = vmatmul.mubr.msk.bf16.gmra.mxu0 %vm515_vm1, %v10578_v50  ;;  %9330 = vmatmul.mubr.msk.bf16.gmra.mxu1 %vm515_vm1, %v10579_v51 }
  0xd3   : > { %9271 = vmatprep.mubr.msk.bf16.mxu0 %vm10692_vm0, %v13129_v1  ;;  %9333 = vmatprep.mubr.msk.bf16.mxu1 %vm10692_vm0, %v13129_v1 }
  0xda   : > { %9272 = vmatmul.mubr.msk.bf16.gmra.mxu0 %vm515_vm1, %v10580_v52  ;;  %9334 = vmatmul.mubr.msk.bf16.gmra.mxu1 %vm515_vm1, %v10582_v53 }
  0xdb   : > { %9275 = vmatprep.mubr.msk.bf16.mxu0 %vm10692_vm0, %v13129_v1  ;;  %9337 = vmatprep.mubr.msk.bf16.mxu1 %vm10692_vm0, %v13129_v1 }
  0xe2   : > { %9276 = vmatmul.mubr.msk.bf16.gmra.mxu0 %vm515_vm1, %v10581_v56  ;;  %9338 = vmatmul.mubr.msk.bf16.gmra.mxu1 %vm515_vm1, %v10584_v57 }
  0xe3   : > { %9279 = vmatprep.mubr.msk.bf16.mxu0 %vm10692_vm0, %v13129_v1  ;;  %9341 = vmatprep.mubr.msk.bf16.mxu1 %vm10692_vm0, %v13129_v1 }
  0xea   : > { %v11054_v60 = vpop.f32.mrf.mxu0  ;;  %9280 = vmatmul.mubr.msk.bf16.gmra.mxu0 %vm515_vm1, %v10583_v58  ;;  %v11057_v61 = vpop.f32.mrf.mxu1  ;;  %9342 = vmatmul.mubr.msk.bf16.gmra.mxu1 %vm515_vm1, %v10586_v59 }
  0xeb   : > { %v1005_v62 = vmax.f32 %v11054_v60, %v11057_v61  ;;  %9283 = vmatprep.mubr.msk.bf16.mxu0 %vm10692_vm0, %v13129_v1  ;;  %9345 = vmatprep.mubr.msk.bf16.mxu1 %vm10692_vm0, %v13129_v1 }
  0xec   : > { %v9113_v63 = vpop.f32.mrf.mxu0  ;;  %v9175_v0 = vpop.f32.mrf.mxu1 }
  0xee   : > { %v11066_v2 = vpop.f32.mrf.mxu0  ;;  %v11069_v4 = vpop.f32.mrf.mxu1 }
  0xf0   : > { %v9114_v7 = vpop.f32.mrf.mxu0  ;;  %v9176_v8 = vpop.f32.mrf.mxu1 }
  0xf2   : > { %v11074_v9 = vpop.f32.mrf.mxu0  ;;  %9284 = vmatmul.mubr.msk.bf16.gmra.mxu0 %vm515_vm1, %v10585_v3  ;;  %v11077_v10 = vpop.f32.mrf.mxu1  ;;  %9346 = vmatmul.mubr.msk.bf16.gmra.mxu1 %vm515_vm1, %v10587_v5 }
  0xf3   : > { %9389 = vmatprep.mubr.msk.bf16.mxu1 %vm10692_vm0, %v13129_v1  ;;  %9351 = vmatprep.mubr.msk.bf16.mxu0 %vm10692_vm0, %v13129_v1 }
  0xf4   : > { %v9117_v12 = vpop.f32.mrf.mxu0  ;;  %v9179_v13 = vpop.f32.mrf.mxu1 }
  0xf6   : > { %v11086_v14 = vpop.f32.mrf.mxu0  ;;  %v11088_v15 = vpop.f32.mrf.mxu1 }
  0xf8   : > { %v9118_v17 = vpop.f32.mrf.mxu0  ;;  %v9180_v18 = vpop.f32.mrf.mxu1 }
  0xfa   : > { %v11092_v19 = vpop.f32.mrf.mxu0  ;;  %v11094_v20 = vpop.f32.mrf.mxu1 }
  0xfc   : > { %v9121_v22 = vpop.f32.mrf.mxu0  ;;  %v9183_v23 = vpop.f32.mrf.mxu1 }
  0xfe   : > { %v11098_v24 = vpop.f32.mrf.mxu0  ;;  %v11100_v25 = vpop.f32.mrf.mxu1 }
 0x100   : > { %v9122_v27 = vpop.f32.mrf.mxu0  ;;  %v9184_v28 = vpop.f32.mrf.mxu1 }
 0x102   : > { %v11104_v29 = vpop.f32.mrf.mxu0  ;;  %v11106_v30 = vpop.f32.mrf.mxu1 }
 0x104   : > { %v9125_v32 = vpop.f32.mrf.mxu0  ;;  %v9187_v33 = vpop.f32.mrf.mxu1 }
 0x106   : > { %v11110_v34 = vpop.f32.mrf.mxu0  ;;  %v11112_v35 = vpop.f32.mrf.mxu1 }
 0x108   : > { %v9126_v37 = vpop.f32.mrf.mxu0  ;;  %v9188_v38 = vpop.f32.mrf.mxu1 }
 0x10a   : > { %v11116_v39 = vpop.f32.mrf.mxu0  ;;  %v11118_v40 = vpop.f32.mrf.mxu1 }
 0x10c   : > { %v9129_v42 = vpop.f32.mrf.mxu0  ;;  %v9191_v43 = vpop.f32.mrf.mxu1 }
 0x10e   : > { %v11122_v44 = vpop.f32.mrf.mxu0  ;;  %v11124_v45 = vpop.f32.mrf.mxu1 }
 0x110   : > { %v9130_v47 = vpop.f32.mrf.mxu0  ;;  %v9192_v48 = vpop.f32.mrf.mxu1 }
 0x112   : > { %v11128_v49 = vpop.f32.mrf.mxu0  ;;  %v11130_v50 = vpop.f32.mrf.mxu1 }
 0x114   : > { %v9133_v52 = vpop.f32.mrf.mxu0  ;;  %v9195_v53 = vpop.f32.mrf.mxu1 }
 0x116   : > { %v11134_v54 = vpop.f32.mrf.mxu0  ;;  %v11136_v55 = vpop.f32.mrf.mxu1 }
 0x118   : > { %v9134_v57 = vpop.f32.mrf.mxu0  ;;  %v9196_v58 = vpop.f32.mrf.mxu1 }
 0x11a   : > { %v11140_v59 = vpop.f32.mrf.mxu0  ;;  %v11142_v63 = vpop.f32.mrf.mxu1 }
 0x11c   : > { %v9137_v3 = vpop.f32.mrf.mxu0  ;;  %v9199_v5 = vpop.f32.mrf.mxu1 }
 0x11e   : > { %v11146_v7 = vpop.f32.mrf.mxu0  ;;  %v11148_v8 = vpop.f32.mrf.mxu1 }
 0x120   : > { %v9138_v13 = vpop.f32.mrf.mxu0  ;;  %v9200_v17 = vpop.f32.mrf.mxu1 }
 0x122   : > { %v11152_v18 = vpop.f32.mrf.mxu0  ;;  %v11154_v22 = vpop.f32.mrf.mxu1 }
 0x124   : > { %v9141_v27 = vpop.f32.mrf.mxu0  ;;  %v9203_v28 = vpop.f32.mrf.mxu1 }
 0x126   : > { %v11158_v32 = vpop.f32.mrf.mxu0  ;;  %v11160_v33 = vpop.f32.mrf.mxu1 }
 0x128   : > { %v9142_v38 = vpop.f32.mrf.mxu0  ;;  %v9204_v42 = vpop.f32.mrf.mxu1 }
 0x12a   : > { %v11164_v43 = vpop.f32.mrf.mxu0  ;;  %v11166_v47 = vpop.f32.mrf.mxu1 }
 0x12c   : > { %v9145_v52 = vpop.f32.mrf.mxu0  ;;  %v9207_v53 = vpop.f32.mrf.mxu1 }
 0x12e   : > { %v11170_v57 = vpop.f32.mrf.mxu0  ;;  %v11172_v58 = vpop.f32.mrf.mxu1 }
 0x130   : > { %v9146_v5 = vpop.f32.mrf.mxu0  ;;  %v9208_v13 = vpop.f32.mrf.mxu1 }
 0x132   : > { %v11176_v17 = vpop.f32.mrf.mxu0  ;;  %v11178_v27 = vpop.f32.mrf.mxu1 }
 0x134   : > { %v9149_v38 = vpop.f32.mrf.mxu0  ;;  %v9211_v42 = vpop.f32.mrf.mxu1 }
 0x136   : > { %v11182_v52 = vpop.f32.mrf.mxu0  ;;  %v11184_v53 = vpop.f32.mrf.mxu1 }
 0x138   : > { %v9150_v37 = vpop.f32.mrf.mxu0  ;;  %v9212_v3 = vpop.f32.mrf.mxu1 }
 0x13a   : > { %v11188_v5 = vpop.f32.mrf.mxu0  ;;  %v11190_v13 = vpop.f32.mrf.mxu1 }
 0x13c   : > { %v9153_v12 = vpop.f32.mrf.mxu0  ;;  %v9215_v28 = vpop.f32.mrf.mxu1 }
 0x13e   : > { %v11194_v38 = vpop.f32.mrf.mxu0  ;;  %v11196_v42 = vpop.f32.mrf.mxu1 }
 0x140   : > { %v9154_v56 = vpop.f32.mrf.mxu0  ;;  %v9216_v48 = vpop.f32.mrf.mxu1 }
 0x142   : > { %v11200_v37 = vpop.f32.mrf.mxu0  ;;  %v11202_v3 = vpop.f32.mrf.mxu1 }
 0x144   : > { %v9157_v46 = vpop.f32.mrf.mxu0  ;;  %v9219_v23 = vpop.f32.mrf.mxu1 }
 0x146   : > { %v11206_v12 = vpop.f32.mrf.mxu0  ;;  %v11208_v28 = vpop.f32.mrf.mxu1 }
 0x148   : > { %v9158_v36 = vpop.f32.mrf.mxu0  ;;  %v9220_v0 = vpop.f32.mrf.mxu1 }
 0x14a   : > { %v11212_v56 = vpop.f32.mrf.mxu0  ;;  %v11214_v48 = vpop.f32.mrf.mxu1 }
 0x14b   : > { %13137 = vst [vmem:[#allocation8_spill] sm:$0xff] %v11212_v56  ;;  %13138 = vst [vmem:[#allocation9_spill] sm:$0xff] %v11214_v48 }
 0x14c   : > { %v9161_v26 = vpop.f32.mrf.mxu0  ;;  %v9223_v51 = vpop.f32.mrf.mxu1 }
 0x14e   : > { %v688_v46 = vpop.f32.mrf.mxu0  ;;  %v977_v23 = vpop.f32.mrf.mxu1 }
 0x150   : > { %v9162_v21 = vpop.f32.mrf.mxu0  ;;  %v9224_v1 = vpop.f32.mrf.mxu1 }
 0x151   : > { %v13139_v21 = vmax.f32 %v11066_v2, %v11069_v4  ;;  %v2367_v2 = vld [vmem:[%s13120_s3 + $0xc] sm:$0xf] }
 0x152   : > { %v1217_v16 = vpop.f32.mrf.mxu0  ;;  %v1556_v11 = vpop.f32.mrf.mxu1 }
 0x153   : > { %v1344_v36 = vmax.f32 %v1005_v62, %v1217_v16 }
 0x154   : > { %v9237_v0 = vpop.f32.mrf.mxu0  ;;  %v9299_v6 = vpop.f32.mrf.mxu1 }
 0x155   : > { %v1683_v31 = vmax.f32 %v1344_v36, %v1556_v11  ;;  %v13140_v0 = vmax.f32 %v11074_v9, %v11077_v10 }
 0x156   : > { %v1220_v26 = vpop.f32.mrf.mxu0  ;;  %v1559_v51 = vpop.f32.mrf.mxu1 }
 0x157   : > { %v1345_v1 = vmax.f32 %v13139_v21, %v1220_v26  ;;  %v1764_v46 = vadd.f32 %v11224_v41, %v1683_v31 }
 0x158   : > { %v9238_v23 = vpop.f32.mrf.mxu0  ;;  %v9300_v48 = vpop.f32.mrf.mxu1 }
 0x159   : > { %v1789_v60 = vmax.f32 %v1764_v46, 0.0  ;;  %v1684_v61 = vmax.f32 %v1345_v1, %v1559_v51  ;;  %v13141_v51 = vmax.f32 %v11086_v14, %v11088_v15  ;;  %v2396_v1 = vsel %vm1921_vm2, %v2367_v2, 0 }
 0x15a   : > { %v1225_v62 = vpop.f32.mrf.mxu0  ;;  %v1564_v16 = vpop.f32.mrf.mxu1  ;;  %v13143_v14 = vmax.f32 %v11092_v19, %v11094_v20 }
 0x15b   : > { %1814 = vst [vmem:[#allocation2] sm:$0xff] %v1789_v60  ;;  %v1346_v6 = vmax.f32 %v13140_v0, %v1225_v62  ;;  %v1765_v11 = vadd.f32 %v11224_v41, %v1684_v61  ;;  %v13142_v0 = vmov 0.0  }
 0x15c   : > { %v9241_v36 = vpop.f32.mrf.mxu0  ;;  %v9303_v56 = vpop.f32.mrf.mxu1 }
 0x15d   : > { %v1790_v4 = vmax.f32 %v1765_v11, 0.0  ;;  %v1685_v31 = vmax.f32 %v1346_v6, %v1564_v16 }
 0x15e   : > { %v1228_v48 = vpop.f32.mrf.mxu0  ;;  %v1567_v26 = vpop.f32.mrf.mxu1 }
 0x15f   : > { %1815 = vst [vmem:[#allocation2 + $0x8] sm:$0xff] %v1790_v4  ;;  %v1347_v21 = vmax.f32 %v13141_v51, %v1228_v48  ;;  %v1766_v9 = vadd.f32 %v11224_v41, %v1685_v31  ;;  %v1856_v10 = vpack.c.bf16 %v1790_v4, %v1789_v60  ;;  %v13144_v48 = vmax.f32 %v11098_v24, %v11100_v25 }
 0x160   : > { %v9242_v56 = vpop.f32.mrf.mxu0  ;;  %v9304_v46 = vpop.f32.mrf.mxu1  ;;  %v13145_v24 = vmax.f32 %v11104_v29, %v11106_v30  ;;  %v13146_v29 = vmax.f32 %v11110_v34, %v11112_v35  ;;  %v13147_v34 = vmax.f32 %v11116_v39, %v11118_v40 }
 0x161   : > { %v1791_v23 = vmax.f32 %v1766_v9, 0.0  ;;  %v1686_v61 = vmax.f32 %v1347_v21, %v1567_v26  ;;  %9390 = vmatmul.mubr.msk.bf16.vlgmr.msra.gmra.mxu1 %vm1893_vm3, %v1856_v10  ;;  %v2189_v9 = vld [vmem:[%s13120_s3 + $0x8] sm:$0xf] }
 0x162   : > { %v1233_v62 = vpop.f32.mrf.mxu0  ;;  %v1572_v16 = vpop.f32.mrf.mxu1  ;;  %9393 = vmatprep.mubr.msk.bf16.mxu1 %vm10692_vm0, %v13142_v0  ;;  %9464 = vmatpush3.bf16.msra.mxu1 %v2396_v1 }
 0x163   : > { %1816 = vst [vmem:[#allocation2 + $0x10] sm:$0xff] %v1791_v23  ;;  %v1348_v15 = vmax.f32 %v13143_v14, %v1233_v62  ;;  %v1767_v60 = vadd.f32 %v11224_v41, %v1686_v61  ;;  %9539 = vmatprep.subr.bf16.mxu1 %v13142_v0  ;;  %v2218_v14 = vsel %vm1921_vm2, %v2189_v9, 0 }
 0x164   : > { %v9245_v6 = vpop.f32.mrf.mxu0  ;;  %v9307_v11 = vpop.f32.mrf.mxu1 }
 0x165   : > { %v1792_v36 = vmax.f32 %v1767_v60, 0.0  ;;  %v1687_v2 = vmax.f32 %v1348_v15, %v1572_v16 }
 0x166   : > { %v1236_v4 = vpop.f32.mrf.mxu0  ;;  %v1575_v31 = vpop.f32.mrf.mxu1  ;;  %v1866_v61 = vld [vmem:[#allocation2 + $0x1] sm:$0xff] }
 0x167   : > { %1817 = vst [vmem:[#allocation2 + $0x18] sm:$0xff] %v1792_v36  ;;  %v1349_v26 = vmax.f32 %v13144_v48, %v1236_v4  ;;  %v1768_v51 = vadd.f32 %v11224_v41, %v1687_v2  ;;  %v1857_v21 = vpack.c.bf16 %v1792_v36, %v1791_v23 }
 0x168   : > { %v9246_v19 = vpop.f32.mrf.mxu0  ;;  %v9308_v20 = vpop.f32.mrf.mxu1 }
 0x169   : > { %v1793_v10 = vmax.f32 %v1768_v51, 0.0  ;;  %v1688_v1 = vmax.f32 %v1349_v26, %v1575_v31  ;;  %9394 = vmatmul.mubr.msk.bf16.gmra.mxu1 %vm1893_vm3, %v1857_v21 }
 0x16a   : > { %v1241_v56 = vpop.f32.mrf.mxu0  ;;  %v1580_v46 = vpop.f32.mrf.mxu1  ;;  %v1867_v62 = vld [vmem:[#allocation2 + $0x9] sm:$0xff]  ;;  %9397 = vmatprep.mubr.msk.bf16.mxu1 %vm10692_vm0, %v13142_v0 }
 0x16b   : > { %1818 = vst [vmem:[#allocation2 + $0x20] sm:$0xff] %v1793_v10  ;;  %v1350_v25 = vmax.f32 %v13145_v24, %v1241_v56  ;;  %v1769_v23 = vadd.f32 %v11224_v41, %v1688_v1  ;;  %v1883_v16 = vpack.c.bf16 %v1867_v62, %v1866_v61 }
 0x16c   : > { %v9249_v15 = vpop.f32.mrf.mxu0  ;;  %v9311_v60 = vpop.f32.mrf.mxu1 }
 0x16d   : > { %v1794_v6 = vmax.f32 %v1769_v23, 0.0  ;;  %v1689_v11 = vmax.f32 %v1350_v25, %v1580_v46  ;;  %9352 = vmatmul.mubr.msk.bf16.vlgmr.msra.gmra.mxu0 %vm1893_vm3, %v1883_v16  ;;  %v13148_v16 = vmax.f32 %v11122_v44, %v11124_v45 }
 0x16e   : > { %v1244_v36 = vpop.f32.mrf.mxu0  ;;  %v1583_v2 = vpop.f32.mrf.mxu1  ;;  %9426 = vmatpush3.bf16.msra.mxu0 %v2218_v14  ;;  %9355 = vmatprep.mubr.msk.bf16.mxu0 %vm10692_vm0, %v13142_v0  ;;  %v1868_v9 = vld [vmem:[#allocation2 + $0x11] sm:$0xff] }
 0x16f   : > { %1819 = vst [vmem:[#allocation2 + $0x28] sm:$0xff] %v1794_v6  ;;  %v1351_v30 = vmax.f32 %v13146_v29, %v1244_v36  ;;  %v1770_v4 = vadd.f32 %v11224_v41, %v1689_v11  ;;  %v1858_v31 = vpack.c.bf16 %v1794_v6, %v1793_v10  ;;  %9501 = vmatprep.subr.bf16.mxu0 %v13142_v0 }
 0x170   : > { %v9250_v48 = vpop.f32.mrf.mxu0  ;;  %v9312_v26 = vpop.f32.mrf.mxu1 }
 0x171   : > { %v1795_v51 = vmax.f32 %v1770_v4, 0.0  ;;  %v1690_v21 = vmax.f32 %v1351_v30, %v1583_v2  ;;  %9398 = vmatmul.mubr.msk.bf16.gmra.mxu1 %vm1893_vm3, %v1858_v31  ;;  %v13149_v31 = vmax.f32 %v11128_v49, %v11130_v50 }
 0x172   : > { %v1249_v19 = vpop.f32.mrf.mxu0  ;;  %v1588_v20 = vpop.f32.mrf.mxu1  ;;  %v1869_v1 = vld [vmem:[#allocation2 + $0x19] sm:$0xff]  ;;  %9401 = vmatprep.mubr.msk.bf16.mxu1 %vm10692_vm0, %v13142_v0 }
 0x173   : > { %1820 = vst [vmem:[#allocation2 + $0x30] sm:$0xff] %v1795_v51  ;;  %v1352_v35 = vmax.f32 %v13147_v34, %v1249_v19  ;;  %v1771_v10 = vadd.f32 %v11224_v41, %v1690_v21  ;;  %v1884_v56 = vpack.c.bf16 %v1869_v1, %v1868_v9  ;;  %v11287_v15 = vld [vmem:[#allocation2 + $0x1c] sm:$0xff] }
 0x174   : > { %v9253_v46 = vpop.f32.mrf.mxu0  ;;  %v9315_v61 = vpop.f32.mrf.mxu1 }
 0x175   : > { %v1796_v62 = vmax.f32 %v1771_v10, 0.0  ;;  %v1691_v24 = vmax.f32 %v1352_v35, %v1588_v20  ;;  %9356 = vmatmul.mubr.msk.bf16.gmra.mxu0 %vm1893_vm3, %v1884_v56  ;;  %v13150_v35 = vmax.f32 %v11134_v54, %v11136_v55  ;;  %v13151_v54 = vmax.f32 %v11140_v59, %v11142_v63 }
 0x176   : > { %v1252_v25 = vpop.f32.mrf.mxu0  ;;  %v1591_v23 = vpop.f32.mrf.mxu1  ;;  %9359 = vmatprep.mubr.msk.bf16.mxu0 %vm10692_vm0, %v13142_v0  ;;  %v11289_v60 = vld [vmem:[#allocation2 + $0x24] sm:$0xff] }
 0x177   : > { %1821 = vst [vmem:[#allocation2 + $0x38] sm:$0xff] %v1796_v62  ;;  %v1353_v39 = vmax.f32 %v13148_v16, %v1252_v25  ;;  %v1772_v40 = vadd.f32 %v11224_v41, %v1691_v24  ;;  %v1859_v14 = vpack.c.bf16 %v1796_v62, %v1795_v51  ;;  %v3604_v36 = vpack.c.bf16 %v11289_v60, %v11287_v15  ;;  %v1870_v44 = vld [vmem:[#allocation2 + $0x21] sm:$0xff] }
 0x178   : > { %v9254_v6 = vpop.f32.mrf.mxu0  ;;  %v9316_v11 = vpop.f32.mrf.mxu1 }
 0x179   : > { %v1797_v2 = vmax.f32 %v1772_v40, 0.0  ;;  %v1692_v29 = vmax.f32 %v1353_v39, %v1591_v23  ;;  %9402 = vmatmul.mubr.msk.bf16.gmra.mxu1 %vm1893_vm3, %v1859_v14 }
 0x17a   : > { %v1257_v30 = vpop.f32.mrf.mxu0  ;;  %v1596_v4 = vpop.f32.mrf.mxu1  ;;  %v1871_v45 = vld [vmem:[#allocation2 + $0x29] sm:$0xff]  ;;  %9405 = vmatprep.mubr.msk.bf16.mxu1 %vm10692_vm0, %v13142_v0 }
 0x17b   : > { %1822 = vst [vmem:[#allocation2 + $0x40] sm:$0xff] %v1797_v2  ;;  %v1354_v48 = vmax.f32 %v13149_v31, %v1257_v30  ;;  %v1773_v26 = vadd.f32 %v11224_v41, %v1692_v29  ;;  %v1885_v51 = vpack.c.bf16 %v1871_v45, %v1870_v44 }
 0x17c   : > { %v9257_v21 = vpop.f32.mrf.mxu0  ;;  %v9319_v19 = vpop.f32.mrf.mxu1 }
 0x17d   : > { %v1798_v20 = vmax.f32 %v1773_v26, 0.0  ;;  %v1693_v9 = vmax.f32 %v1354_v48, %v1596_v4  ;;  %9360 = vmatmul.mubr.msk.bf16.gmra.mxu0 %vm1893_vm3, %v1885_v51  ;;  %v13152_v4 = vmax.f32 %v11146_v7, %v11148_v8  ;;  %v13153_v7 = vmax.f32 %v11152_v18, %v11154_v22 }
 0x17e   : > { %v1260_v1 = vpop.f32.mrf.mxu0  ;;  %v1599_v34 = vpop.f32.mrf.mxu1  ;;  %9363 = vmatprep.mubr.msk.bf16.mxu0 %vm10692_vm0, %v13142_v0  ;;  %v1872_v23 = vld [vmem:[#allocation2 + $0x31] sm:$0xff] }
 0x17f   : > { %1823 = vst [vmem:[#allocation2 + $0x48] sm:$0xff] %v1798_v20  ;;  %v1355_v49 = vmax.f32 %v13150_v35, %v1260_v1  ;;  %v1774_v50 = vadd.f32 %v11224_v41, %v1693_v9  ;;  %v1860_v10 = vpack.c.bf16 %v1798_v20, %v1797_v2 }
 0x180   : > { %v9258_v56 = vpop.f32.mrf.mxu0  ;;  %v9320_v46 = vpop.f32.mrf.mxu1 }
 0x181   : > { %v1799_v61 = vmax.f32 %v1774_v50, 0.0  ;;  %v1694_v62 = vmax.f32 %v1355_v49, %v1599_v34  ;;  %9406 = vmatmul.mubr.msk.bf16.gmra.mxu1 %vm1893_vm3, %v1860_v10  ;;  %v13154_v46 = vmax.f32 %v11158_v32, %v11160_v33  ;;  %v13155_v32 = vmax.f32 %v11164_v43, %v11166_v47 }
 0x182   : > { %v1265_v24 = vpop.f32.mrf.mxu0  ;;  %v1604_v25 = vpop.f32.mrf.mxu1  ;;  %v1873_v16 = vld [vmem:[#allocation2 + $0x39] sm:$0xff]  ;;  %9409 = vmatprep.mubr.msk.bf16.mxu1 %vm10692_vm0, %v13142_v0 }
 0x183   : > { %1824 = vst [vmem:[#allocation2 + $0x50] sm:$0xff] %v1799_v61  ;;  %v1356_v55 = vmax.f32 %v13151_v54, %v1265_v24  ;;  %v1775_v39 = vadd.f32 %v11224_v41, %v1694_v62  ;;  %v1886_v40 = vpack.c.bf16 %v1873_v16, %v1872_v23 }
 0x184   : > { %v9261_v14 = vpop.f32.mrf.mxu0  ;;  %v9323_v6 = vpop.f32.mrf.mxu1 }
 0x185   : > { %v1800_v11 = vmax.f32 %v1775_v39, 0.0  ;;  %v1695_v2 = vmax.f32 %v1356_v55, %v1604_v25  ;;  %9364 = vmatmul.mubr.msk.bf16.gmra.mxu0 %vm1893_vm3, %v1886_v40 }
 0x186   : > { %v1268_v29 = vpop.f32.mrf.mxu0  ;;  %v1607_v30 = vpop.f32.mrf.mxu1  ;;  %9367 = vmatprep.mubr.msk.bf16.mxu0 %vm10692_vm0, %v13142_v0  ;;  %v1874_v19 = vld [vmem:[#allocation2 + $0x41] sm:$0xff] }
 0x187   : > { %1825 = vst [vmem:[#allocation2 + $0x58] sm:$0xff] %v1800_v11  ;;  %v1357_v59 = vmax.f32 %v13152_v4, %v1268_v29  ;;  %v1776_v63 = vadd.f32 %v11224_v41, %v1695_v2  ;;  %v1861_v44 = vpack.c.bf16 %v1800_v11, %v1799_v61 }
 0x188   : > { %v9262_v45 = vpop.f32.mrf.mxu0  ;;  %v9324_v31 = vpop.f32.mrf.mxu1 }
 0x189   : > { %v1801_v48 = vmax.f32 %v1776_v63, 0.0  ;;  %v1696_v26 = vmax.f32 %v1357_v59, %v1607_v30  ;;  %9410 = vmatmul.mubr.msk.bf16.gmra.mxu1 %vm1893_vm3, %v1861_v44  ;;  %v13156_v59 = vmax.f32 %v11170_v57, %v11172_v58  ;;  %v13157_v57 = vmax.f32 %v11176_v17, %v11178_v27 }
 0x18a   : > { %v1273_v51 = vpop.f32.mrf.mxu0  ;;  %v1612_v21 = vpop.f32.mrf.mxu1  ;;  %v1875_v20 = vld [vmem:[#allocation2 + $0x49] sm:$0xff]  ;;  %9413 = vmatprep.mubr.msk.bf16.mxu1 %vm10692_vm0, %v13142_v0 }
 0x18b   : > { %1826 = vst [vmem:[#allocation2 + $0x60] sm:$0xff] %v1801_v48  ;;  %v1358_v8 = vmax.f32 %v13153_v7, %v1273_v51  ;;  %v1777_v9 = vadd.f32 %v11224_v41, %v1696_v26  ;;  %v1887_v1 = vpack.c.bf16 %v1875_v20, %v1874_v19 }
 0x18c   : > { %v9265_v34 = vpop.f32.mrf.mxu0  ;;  %v9327_v35 = vpop.f32.mrf.mxu1 }
 0x18d   : > { %v1802_v49 = vmax.f32 %v1777_v9, 0.0  ;;  %v1697_v50 = vmax.f32 %v1358_v8, %v1612_v21  ;;  %9368 = vmatmul.mubr.msk.bf16.gmra.mxu0 %vm1893_vm3, %v1887_v1 }
 0x18e   : > { %v1276_v10 = vpop.f32.mrf.mxu0  ;;  %v1615_v56 = vpop.f32.mrf.mxu1  ;;  %9371 = vmatprep.mubr.msk.bf16.mxu0 %vm10692_vm0, %v13142_v0  ;;  %v1876_v55 = vld [vmem:[#allocation2 + $0x51] sm:$0xff] }
 0x18f   : > { %1827 = vst [vmem:[#allocation2 + $0x68] sm:$0xff] %v1802_v49  ;;  %v1359_v18 = vmax.f32 %v13154_v46, %v1276_v10  ;;  %v1778_v22 = vadd.f32 %v11224_v41, %v1697_v50  ;;  %v1862_v61 = vpack.c.bf16 %v1802_v49, %v1801_v48  ;;  %v13158_v50 = vmax.f32 %v11182_v52, %v11184_v53 }
 0x190   : > { %v9266_v62 = vpop.f32.mrf.mxu0  ;;  %v9328_v24 = vpop.f32.mrf.mxu1  ;;  %v13159_v52 = vmax.f32 %v11188_v5, %v11190_v13  ;;  %v2341_v5 = vld [vmem:[#allocation2 + $0x3] sm:$0xff]  ;;  %v13160_v13 = vmax.f32 %v11194_v38, %v11196_v42  ;;  %v13161_v38 = vmax.f32 %v11200_v37, %v11202_v3  ;;  %v2343_v37 = vld [vmem:[#allocation2 + $0x13] sm:$0xff]  ;;  %v13162_v3 = vmax.f32 %v11206_v12, %v11208_v28 }
 0x191   : > { %v1803_v25 = vmax.f32 %v1778_v22, 0.0  ;;  %v1698_v23 = vmax.f32 %v1359_v18, %v1615_v56  ;;  %9414 = vmatmul.mubr.msk.bf16.gmra.mxu1 %vm1893_vm3, %v1862_v61  ;;  %v13163_v12 = vld [vmem:[#allocation8_spill] sm:$0xff]  ;;  %v13164_v28 = vld [vmem:[#allocation9_spill] sm:$0xff] }
 0x192   : > { %v1281_v16 = vpop.f32.mrf.mxu0  ;;  %v1620_v54 = vpop.f32.mrf.mxu1  ;;  %v1877_v39 = vld [vmem:[#allocation2 + $0x59] sm:$0xff]  ;;  %9417 = vmatprep.mubr.msk.bf16.mxu1 %vm10692_vm0, %v13142_v0 }
 0x193   : > { %1828 = vst [vmem:[#allocation2 + $0x70] sm:$0xff] %v1803_v25  ;;  %v1360_v33 = vmax.f32 %v13155_v32, %v1281_v16  ;;  %v1779_v40 = vadd.f32 %v11224_v41, %v1698_v23  ;;  %v1888_v14 = vpack.c.bf16 %v1877_v39, %v1876_v55  ;;  %v2342_v39 = vld [vmem:[#allocation2 + $0xb] sm:$0xff]  ;;  %v2723_v32 = vld [vmem:[%s13120_s3 + $0x14] sm:$0xf] }
 0x194   : > { %v9269_v6 = vpop.f32.mrf.mxu0  ;;  %v9331_v11 = vpop.f32.mrf.mxu1 }
 0x195   : > { %v1804_v2 = vmax.f32 %v1779_v40, 0.0  ;;  %v1699_v29 = vmax.f32 %v1360_v33, %v1620_v54  ;;  %9372 = vmatmul.mubr.msk.bf16.gmra.mxu0 %vm1893_vm3, %v1888_v14 }
 0x196   : > { %v1284_v30 = vpop.f32.mrf.mxu0  ;;  %v1623_v4 = vpop.f32.mrf.mxu1  ;;  %9375 = vmatprep.mubr.msk.bf16.mxu0 %vm10692_vm0, %v13142_v0  ;;  %v1878_v21 = vld [vmem:[#allocation2 + $0x61] sm:$0xff] }
 0x197   : > { %1829 = vst [vmem:[#allocation2 + $0x78] sm:$0xff] %v1804_v2  ;;  %v1361_v43 = vmax.f32 %v13156_v59, %v1284_v30  ;;  %v1780_v47 = vadd.f32 %v11224_v41, %v1699_v29  ;;  %v1863_v63 = vpack.c.bf16 %v1804_v2, %v1803_v25  ;;  %v2358_v29 = vpack.c.bf16 %v2342_v39, %v2341_v5 }
 0x198   : > { %v9270_v44 = vpop.f32.mrf.mxu0  ;;  %v9332_v45 = vpop.f32.mrf.mxu1  ;;  %v2752_v30 = vsel %vm1921_vm2, %v2723_v32, 0 }
 0x199   : > { %v1805_v31 = vmax.f32 %v1780_v47, 0.0  ;;  %v1700_v48 = vmax.f32 %v1361_v43, %v1623_v4  ;;  %9418 = vmatmul.mubr.msk.bf16.gmra.mxu1 %vm1893_vm3, %v1863_v63 }
 0x19a   : > { %v1289_v26 = vpop.f32.mrf.mxu0  ;;  %v1628_v51 = vpop.f32.mrf.mxu1  ;;  %v1879_v19 = vld [vmem:[#allocation2 + $0x69] sm:$0xff]  ;;  %9421 = vmatprep.mubr.msk.bf16.mxu1 %vm10692_vm0, %v13142_v0 }
 0x19b   : > { %1830 = vst [vmem:[#allocation2 + $0x80] sm:$0xff] %v1805_v31  ;;  %v1362_v58 = vmax.f32 %v13157_v57, %v1289_v26  ;;  %v1781_v20 = vadd.f32 %v11224_v41, %v1700_v48  ;;  %v1889_v7 = vpack.c.bf16 %v1879_v19, %v1878_v21  ;;  %v1864_v10 = vpack.c.bf16 %v1805_v31, %v1805_v31  ;;  %v2344_v21 = vld [vmem:[#allocation2 + $0x1b] sm:$0xff] }
 0x19c   : > { %v9273_v8 = vpop.f32.mrf.mxu0  ;;  %v9335_v9 = vpop.f32.mrf.mxu1 }
 0x19d   : > { %v1806_v1 = vmax.f32 %v1781_v20, 0.0  ;;  %v1701_v34 = vmax.f32 %v1362_v58, %v1628_v51  ;;  %9376 = vmatmul.mubr.msk.bf16.gmra.mxu0 %vm1893_vm3, %v1889_v7  ;;  %v2359_v9 = vpack.c.bf16 %v2344_v21, %v2343_v37  ;;  %v2173_v37 = vld [vmem:[#allocation2 + $0x52] sm:$0xff] }
 0x19e   : > { %v1292_v35 = vpop.f32.mrf.mxu0  ;;  %v1631_v49 = vpop.f32.mrf.mxu1  ;;  %9379 = vmatprep.mubr.msk.bf16.mxu0 %vm10692_vm0, %v13142_v0  ;;  %v1880_v24 = vld [vmem:[#allocation2 + $0x71] sm:$0xff] }
 0x19f   : > { %1831 = vst [vmem:[#allocation2 + $0x88] sm:$0xff] %v1806_v1  ;;  %v1363_v17 = vmax.f32 %v13158_v50, %v1292_v35  ;;  %v1782_v27 = vadd.f32 %v11224_v41, %v1701_v34  ;;  %v2164_v35 = vld [vmem:[#allocation2 + $0xa] sm:$0xff] }
 0x1a0   : > { %v9274_v56 = vpop.f32.mrf.mxu0  ;;  %v9336_v46 = vpop.f32.mrf.mxu1 }
 0x1a1   : > { %v11363_v18 = vmax.f32 %v1782_v27, 0.0  ;;  %v1702_v22 = vmax.f32 %v1363_v17, %v1631_v49  ;;  %9422 = vmatmul.mubr.msk.bf16.gmra.mxu1 %vm1893_vm3, %v1864_v10  ;;  %v2545_v49 = vld [vmem:[%s13120_s3 + $0x10] sm:$0xf]  ;;  %v2163_v56 = vld [vmem:[#allocation2 + $0x2] sm:$0xff]  ;;  %v13165_v46 = vmax.f32 %v13163_v12, %v13164_v28  ;;  %v3079_v12 = vld [vmem:[%s13120_s3 + $0x1c] sm:$0xf] }
 0x1a2   : > { %v1297_v61 = vpop.f32.mrf.mxu0  ;;  %v1636_v62 = vpop.f32.mrf.mxu1  ;;  %v1881_v25 = vld [vmem:[#allocation2 + $0x79] sm:$0xff]  ;;  %9465 = vmatprep.mubr.msk.bf16.mxu1 %vm10692_vm0, %v13142_v0  ;;  %v2697_v28 = vld [vmem:[#allocation2 + $0xe] sm:$0xff] }
 0x1a3   : > { %v1364_v53 = vmax.f32 %v13159_v52, %v1297_v61  ;;  %1832 = vst [vmem:[#allocation2 + $0x90] sm:$0xff] %v11363_v18  ;;  %v1783_v23 = vadd.f32 %v11224_v41, %v1702_v22  ;;  %v1890_v16 = vpack.c.bf16 %v1881_v25, %v1880_v24  ;;  %v2574_v24 = vsel %vm1921_vm2, %v2545_v49, 0  ;;  %v2346_v25 = vld [vmem:[#allocation2 + $0x2b] sm:$0xff] }
 0x1a4   : > { %v9277_v54 = vpop.f32.mrf.mxu0  ;;  %v9339_v55 = vpop.f32.mrf.mxu1 }
 0x1a5   : > { %v1808_v33 = vmax.f32 %v1783_v23, 0.0  ;;  %v1703_v40 = vmax.f32 %v1364_v53, %v1636_v62  ;;  %9380 = vmatmul.mubr.msk.bf16.gmra.mxu0 %vm1893_vm3, %v1890_v16  ;;  %v2180_v62 = vpack.c.bf16 %v2164_v35, %v2163_v56  ;;  %v2345_v54 = vld [vmem:[#allocation2 + $0x23] sm:$0xff]  ;;  %v2698_v56 = vld [vmem:[#allocation2 + $0x16] sm:$0xff] }
 0x1a6   : > { %v1300_v14 = vpop.f32.mrf.mxu0  ;;  %v1639_v6 = vpop.f32.mrf.mxu1  ;;  %9383 = vmatprep.mubr.msk.bf16.mxu0 %vm10692_vm0, %v13142_v0  ;;  %v1882_v43 = vld [vmem:[#allocation2 + $0x81] sm:$0xff] }
 0x1a7   : > { %v1365_v11 = vmax.f32 %v13160_v13, %v1300_v14  ;;  %1833 = vst [vmem:[#allocation2 + $0x98] sm:$0xff] %v1808_v33  ;;  %v1784_v2 = vadd.f32 %v11224_v41, %v1703_v40  ;;  %v1891_v48 = vpack.c.bf16 %v1882_v43, %v1882_v43  ;;  %v2360_v33 = vpack.c.bf16 %v2346_v25, %v2345_v54  ;;  %v2166_v40 = vld [vmem:[#allocation2 + $0x1a] sm:$0xff]  ;;  %v2165_v13 = vld [vmem:[#allocation2 + $0x12] sm:$0xff]  ;;  %v2357_v49 = vld [vmem:[#allocation2 + $0x83] sm:$0xff] }
 0x1a8   : > { %v9278_v4 = vpop.f32.mrf.mxu0  ;;  %v9340_v59 = vpop.f32.mrf.mxu1  ;;  %v2350_v43 = vld [vmem:[#allocation2 + $0x4b] sm:$0xff]  ;;  %v2699_v25 = vld [vmem:[#allocation2 + $0x1e] sm:$0xff] }
 0x1a9   : > { %v1809_v47 = vmax.f32 %v1784_v2, 0.0  ;;  %v1704_v63 = vmax.f32 %v1365_v11, %v1639_v6  ;;  %9466 = vmatmul.mubr.msk.bf16.vlgmr.msra.gmra.mxu1 %vm1893_vm3, %v2358_v29  ;;  %v11418_v11 = vpack.c.bf16 %v2166_v40, %v2165_v13  ;;  %v2348_v2 = vld [vmem:[#allocation2 + $0x3b] sm:$0xff] }
 0x1aa   : > { %v1305_v44 = vpop.f32.mrf.mxu0  ;;  %v1644_v45 = vpop.f32.mrf.mxu1  ;;  %9469 = vmatprep.mubr.msk.bf16.mxu1 %vm10692_vm0, %v13142_v0  ;;  %9540 = vmatpush3.bf16.msra.mxu1 %v2752_v30  ;;  %v2168_v30 = vld [vmem:[#allocation2 + $0x2a] sm:$0xff]  ;;  %v2167_v4 = vld [vmem:[#allocation2 + $0x22] sm:$0xff]  ;;  %v2521_v40 = vld [vmem:[#allocation2 + $0x14] sm:$0xff] }
 0x1ab   : > { %v1366_v42 = vmax.f32 %v13161_v38, %v1305_v44  ;;  %1834 = vst [vmem:[#allocation2 + $0xa0] sm:$0xff] %v1809_v47  ;;  %v1785_v31 = vadd.f32 %v11224_v41, %v1704_v63  ;;  %9615 = vmatprep.subr.bf16.mxu1 %v13142_v0  ;;  %v11427_v59 = vpack.c.bf16 %v2168_v30, %v2167_v4  ;;  %v2349_v47 = vld [vmem:[#allocation2 + $0x43] sm:$0xff]  ;;  %v2170_v44 = vld [vmem:[#allocation2 + $0x3a] sm:$0xff]  ;;  %v2705_v30 = vld [vmem:[#allocation2 + $0x4e] sm:$0xff] }
 0x1ac   : > { %v9281_v26 = vpop.f32.mrf.mxu0  ;;  %v9343_v51 = vpop.f32.mrf.mxu1  ;;  %v2362_v63 = vpack.c.bf16 %v2350_v43, %v2349_v47  ;;  %v2526_v43 = vld [vmem:[#allocation2 + $0x3c] sm:$0xff]  ;;  %v11519_v47 = vld [vmem:[#allocation2 + $0x34] sm:$0xff] }
 0x1ad   : > { %v1810_v19 = vmax.f32 %v1785_v31, 0.0  ;;  %v1705_v57 = vmax.f32 %v1366_v42, %v1644_v45  ;;  %9384 = vmatmul.mubr.msk.bf16.gmra.mxu0 %vm1893_vm3, %v1891_v48  ;;  %v2169_v45 = vld [vmem:[#allocation2 + $0x32] sm:$0xff]  ;;  %v2352_v42 = vld [vmem:[#allocation2 + $0x5b] sm:$0xff]  ;;  %v2172_v26 = vld [vmem:[#allocation2 + $0x4a] sm:$0xff] }
 0x1ae   : > { %v1308_v58 = vpop.f32.mrf.mxu0  ;;  %v1647_v20 = vpop.f32.mrf.mxu1  ;;  %9427 = vmatprep.mubr.msk.bf16.mxu0 %vm10692_vm0, %v13142_v0  ;;  %v11436_v38 = vpack.c.bf16 %v2170_v44, %v2169_v45  ;;  %v2351_v31 = vld [vmem:[#allocation2 + $0x53] sm:$0xff]  ;;  %v2171_v51 = vld [vmem:[#allocation2 + $0x42] sm:$0xff] }
 0x1af   : > { %v1367_v7 = vmax.f32 %v13162_v3, %v1308_v58  ;;  %1835 = vst [vmem:[#allocation2 + $0xa8] sm:$0xff] %v1810_v19  ;;  %v1786_v8 = vadd.f32 %v11224_v41, %v1705_v57  ;;  %v2363_v48 = vpack.c.bf16 %v2352_v42, %v2351_v31  ;;  %v11445_v21 = vpack.c.bf16 %v2172_v26, %v2171_v51  ;;  %v2354_v19 = vld [vmem:[#allocation2 + $0x6b] sm:$0xff]  ;;  %v2353_v57 = vld [vmem:[#allocation2 + $0x63] sm:$0xff]  ;;  %v2710_v51 = vld [vmem:[#allocation2 + $0x76] sm:$0xff] }
 0x1b0   : > { %v9282_v1 = vpop.f32.mrf.mxu0  ;;  %v9344_v34 = vpop.f32.mrf.mxu1  ;;  %v2364_v58 = vpack.c.bf16 %v2354_v19, %v2353_v57  ;;  %v2708_v44 = vld [vmem:[#allocation2 + $0x66] sm:$0xff]  ;;  %v2707_v45 = vld [vmem:[#allocation2 + $0x5e] sm:$0xff]  ;;  %v2709_v19 = vld [vmem:[#allocation2 + $0x6e] sm:$0xff] }
 0x1b1   : > { %v1811_v50 = vmax.f32 %v1786_v8, 0.0  ;;  %v1706_v17 = vmax.f32 %v1367_v7, %v1647_v20  ;;  %9470 = vmatmul.mubr.msk.bf16.gmra.mxu1 %vm1893_vm3, %v2359_v9  ;;  %v2174_v20 = vld [vmem:[#allocation2 + $0x5a] sm:$0xff]  ;;  %v2176_v1 = vld [vmem:[#allocation2 + $0x6a] sm:$0xff]  ;;  %v2175_v34 = vld [vmem:[#allocation2 + $0x62] sm:$0xff]  ;;  %v2719_v42 = vpack.c.bf16 %v2708_v44, %v2707_v45  ;;  %v2720_v57 = vpack.c.bf16 %v2710_v51, %v2709_v19 }
 0x1b2   : > { %v1313_v27 = vpop.f32.mrf.mxu0  ;;  %v1652_v10 = vpop.f32.mrf.mxu1  ;;  %9473 = vmatprep.mubr.msk.bf16.mxu1 %vm10692_vm0, %v13142_v0  ;;  %v11454_v3 = vpack.c.bf16 %v2174_v20, %v2173_v37  ;;  %v2356_v7 = vld [vmem:[#allocation2 + $0x7b] sm:$0xff]  ;;  %v2355_v8 = vld [vmem:[#allocation2 + $0x73] sm:$0xff]  ;;  %v11463_v35 = vpack.c.bf16 %v2176_v1, %v2175_v34  ;;  %v3056_v51 = vld [vmem:[#allocation2 + $0x28] sm:$0xff] }
 0x1b3   : > { %v1368_v22 = vmax.f32 %v13165_v46, %v1313_v27  ;;  %1836 = vst [vmem:[#allocation2 + $0xb0] sm:$0xff] %v1811_v50  ;;  %v1787_v61 = vadd.f32 %v11224_v41, %v1706_v17  ;;  %v2365_v9 = vpack.c.bf16 %v2356_v7, %v2355_v8  ;;  %v2366_v50 = vpack.c.bf16 %v2357_v49, %v2357_v49  ;;  %v2178_v17 = vld [vmem:[#allocation2 + $0x7a] sm:$0xff]  ;;  %v2177_v27 = vld [vmem:[#allocation2 + $0x72] sm:$0xff] }
 0x1b4   : > { %v9285_v52 = vpop.f32.mrf.mxu0  ;;  %v9347_v53 = vpop.f32.mrf.mxu1  ;;  %v2714_v46 = vpack.c.bf16 %v2698_v56, %v2697_v28  ;;  %v2528_v31 = vld [vmem:[#allocation2 + $0x4c] sm:$0xff]  ;;  %v2529_v37 = vld [vmem:[#allocation2 + $0x54] sm:$0xff]  ;;  %v2711_v34 = vld [vmem:[#allocation2 + $0x7e] sm:$0xff] }
 0x1b5   : > { %v1812_v23 = vmax.f32 %v1787_v61, 0.0  ;;  %v1707_v16 = vmax.f32 %v1368_v22, %v1652_v10  ;;  %9428 = vmatmul.mubr.msk.bf16.vlgmr.msra.gmra.mxu0 %vm1893_vm3, %v2180_v62  ;;  %v11472_v10 = vpack.c.bf16 %v2178_v17, %v2177_v27  ;;  %v3108_v22 = vsel %vm1921_vm2, %v3079_v12, 0  ;;  %v11482_v61 = vld [vmem:[#allocation2 + $0x82] sm:$0xff]  ;;  %v2520_v53 = vld [vmem:[#allocation2 + $0xc] sm:$0xff] }
 0x1b6   : > { %9502 = vmatpush3.bf16.msra.mxu0 %v2574_v24  ;;  %9431 = vmatprep.mubr.msk.bf16.mxu0 %vm10692_vm0, %v13142_v0  ;;  %v1316_v55 = vpop.f32.mrf.mxu0  ;;  %v1655_v39 = vpop.f32.mrf.mxu1  ;;  %v2188_v62 = vpack.c.bf16 %v11482_v61, %v11482_v61  ;;  %v2700_v24 = vld [vmem:[#allocation2 + $0x26] sm:$0xff] }
 0x1b7   : > { %1837 = vst [vmem:[#allocation2 + $0xb8] sm:$0xff] %v1812_v23  ;;  %v1788_v32 = vadd.f32 %v11224_v41, %v1707_v16  ;;  %9577 = vmatprep.subr.bf16.mxu0 %v13142_v0  ;;  %v2347_v41 = vld [vmem:[#allocation2 + $0x33] sm:$0xff]  ;;  %v2715_v52 = vpack.c.bf16 %v2700_v24, %v2699_v25  ;;  %v2519_v16 = vld [vmem:[#allocation2 + $0x4] sm:$0xff] }
 0x1b8   : > { %v9286_v14 = vpop.f32.mrf.mxu0  ;;  %v9348_v6 = vpop.f32.mrf.mxu1  ;;  %v2361_v29 = vpack.c.bf16 %v2348_v2, %v2347_v41  ;;  %v2901_v23 = vld [vmem:[%s13120_s3 + $0x18] sm:$0xf]  ;;  %v2536_v54 = vpack.c.bf16 %v2520_v53, %v2519_v16  ;;  %v2524_v2 = vld [vmem:[#allocation2 + $0x2c] sm:$0xff]  ;;  %v2531_v56 = vld [vmem:[#allocation2 + $0x64] sm:$0xff] }
 0x1b9   : > { %v1813_v5 = vmax.f32 %v1788_v32, 0.0  ;;  %9474 = vmatmul.mubr.msk.bf16.gmra.mxu1 %vm1893_vm3, %v2360_v33  ;;  %v2930_v55 = vsel %vm1921_vm2, %v2901_v23, 0  ;;  %v2702_v39 = vld [vmem:[#allocation2 + $0x36] sm:$0xff]  ;;  %v2701_v32 = vld [vmem:[#allocation2 + $0x2e] sm:$0xff]  ;;  %v2537_v14 = vpack.c.bf16 %v11287_v15, %v2521_v40  ;;  %v2704_v6 = vld [vmem:[#allocation2 + $0x46] sm:$0xff]  ;;  %v2538_v41 = vpack.c.bf16 %v2524_v2, %v11289_v60 }
 0x1ba   : > { %9477 = vmatprep.mubr.msk.bf16.mxu1 %vm10692_vm0, %v13142_v0  ;;  %v2716_v33 = vpack.c.bf16 %v2702_v39, %v2701_v32  ;;  %v2532_v17 = vld [vmem:[#allocation2 + $0x6c] sm:$0xff]  ;;  %v2534_v23 = vld [vmem:[#allocation2 + $0x7c] sm:$0xff]  ;;  %v2533_v39 = vld [vmem:[#allocation2 + $0x74] sm:$0xff] }
 0x1bb   : > { %1838 = vst [vmem:[#allocation2 + $0xc0] sm:$0xff] %v1813_v5  ;;  %v2703_v5 = vld [vmem:[#allocation2 + $0x3e] sm:$0xff]  ;;  %v2542_v12 = vpack.c.bf16 %v2532_v17, %v2531_v56  ;;  %v2875_v17 = vld [vmem:[#allocation2 + $0xf] sm:$0xff] }
 0x1bc   : > { %v2717_v13 = vpack.c.bf16 %v2704_v6, %v2703_v5  ;;  %v3435_v6 = vld [vmem:[%s13120_s3 + $0x24] sm:$0xf]  ;;  %v3589_v60 = vld [vmem:[#allocation2 + $0x2c] sm:$0xff] }
 0x1bd   : > { %9432 = vmatmul.mubr.msk.bf16.gmra.mxu0 %vm1893_vm3, %v11418_v11 }
 0x1be   : > { %9435 = vmatprep.mubr.msk.bf16.mxu0 %vm10692_vm0, %v13142_v0 }
 0x1c1   : > { %9478 = vmatmul.mubr.msk.bf16.gmra.mxu1 %vm1893_vm3, %v2361_v29  ;;  %v2706_v29 = vld [vmem:[#allocation2 + $0x56] sm:$0xff] }
 0x1c2   : > { %9481 = vmatprep.mubr.msk.bf16.mxu1 %vm10692_vm0, %v13142_v0  ;;  %v2718_v4 = vpack.c.bf16 %v2706_v29, %v2705_v30 }
 0x1c5   : > { %9436 = vmatmul.mubr.msk.bf16.gmra.mxu0 %vm1893_vm3, %v11427_v59 }
 0x1c6   : > { %9439 = vmatprep.mubr.msk.bf16.mxu0 %vm10692_vm0, %v13142_v0 }
 0x1c9   : > { %9482 = vmatmul.mubr.msk.bf16.gmra.mxu1 %vm1893_vm3, %v2362_v63  ;;  %v2539_v63 = vpack.c.bf16 %v2526_v43, %v11519_v47  ;;  %v3464_v43 = vsel %vm1921_vm2, %v3435_v6, 0 }
 0x1ca   : > { %9485 = vmatprep.mubr.msk.bf16.mxu1 %vm10692_vm0, %v13142_v0 }
 0x1cd   : > { %9440 = vmatmul.mubr.msk.bf16.gmra.mxu0 %vm1893_vm3, %v11436_v38 }
 0x1ce   : > { %9443 = vmatprep.mubr.msk.bf16.mxu0 %vm10692_vm0, %v13142_v0 }
 0x1d1   : > { %9486 = vmatmul.mubr.msk.bf16.gmra.mxu1 %vm1893_vm3, %v2363_v48  ;;  %v2527_v48 = vld [vmem:[#allocation2 + $0x44] sm:$0xff] }
 0x1d2   : > { %9489 = vmatprep.mubr.msk.bf16.mxu1 %vm10692_vm0, %v13142_v0  ;;  %v2540_v26 = vpack.c.bf16 %v2528_v31, %v2527_v48 }
 0x1d5   : > { %9444 = vmatmul.mubr.msk.bf16.gmra.mxu0 %vm1893_vm3, %v11445_v21 }
 0x1d6   : > { %9447 = vmatprep.mubr.msk.bf16.mxu0 %vm10692_vm0, %v13142_v0 }
 0x1d9   : > { %9490 = vmatmul.mubr.msk.bf16.gmra.mxu1 %vm1893_vm3, %v2364_v58  ;;  %v2530_v58 = vld [vmem:[#allocation2 + $0x5c] sm:$0xff] }
 0x1da   : > { %9493 = vmatprep.mubr.msk.bf16.mxu1 %vm10692_vm0, %v13142_v0  ;;  %v2541_v7 = vpack.c.bf16 %v2530_v58, %v2529_v37 }
 0x1dd   : > { %9448 = vmatmul.mubr.msk.bf16.gmra.mxu0 %vm1893_vm3, %v11454_v3 }
 0x1de   : > { %9451 = vmatprep.mubr.msk.bf16.mxu0 %vm10692_vm0, %v13142_v0 }
 0x1e1   : > { %9494 = vmatmul.mubr.msk.bf16.gmra.mxu1 %vm1893_vm3, %v2365_v9  ;;  %v2712_v9 = vld [vmem:[#allocation2 + $0x86] sm:$0xff] }
 0x1e2   : > { %9497 = vmatprep.mubr.msk.bf16.mxu1 %vm10692_vm0, %v13142_v0 }
 0x1e5   : > { %9452 = vmatmul.mubr.msk.bf16.gmra.mxu0 %vm1893_vm3, %v11463_v35 }
 0x1e6   : > { %9455 = vmatprep.mubr.msk.bf16.mxu0 %vm10692_vm0, %v13142_v0 }
 0x1e9   : > { %9498 = vmatmul.mubr.msk.bf16.gmra.mxu1 %vm1893_vm3, %v2366_v50  ;;  %v2721_v50 = vpack.c.bf16 %v2712_v9, %v2711_v34  ;;  %v2876_v9 = vld [vmem:[#allocation2 + $0x17] sm:$0xff] }
 0x1ea   : > { %9541 = vmatprep.mubr.msk.bf16.mxu1 %vm10692_vm0, %v13142_v0  ;;  %v2892_v56 = vpack.c.bf16 %v2876_v9, %v2875_v17 }
 0x1ed   : > { %9456 = vmatmul.mubr.msk.bf16.gmra.mxu0 %vm1893_vm3, %v11472_v10 }
 0x1ee   : > { %9459 = vmatprep.mubr.msk.bf16.mxu0 %vm10692_vm0, %v13142_v0 }
 0x1f1   : > { %9542 = vmatmul.mubr.msk.bf16.vlgmr.msra.gmra.mxu1 %vm1893_vm3, %v2714_v46  ;;  %v2713_v46 = vld [vmem:[#allocation2 + $0x8e] sm:$0xff] }
 0x1f2   : > { %9545 = vmatprep.mubr.msk.bf16.mxu1 %vm10692_vm0, %v13142_v0  ;;  %9616 = vmatpush3.bf16.msra.mxu1 %v3108_v22  ;;  %v2722_v53 = vpack.c.bf16 %v2713_v46, %v2713_v46  ;;  %v3058_v46 = vld [vmem:[#allocation2 + $0x38] sm:$0xff] }
 0x1f3   : > { %9691 = vmatprep.subr.bf16.mxu1 %v13142_v0 }
 0x1f5   : > { %9460 = vmatmul.mubr.msk.bf16.gmra.mxu0 %vm1893_vm3, %v2188_v62 }
 0x1f6   : > { %9503 = vmatprep.mubr.msk.bf16.mxu0 %vm10692_vm0, %v13142_v0 }
 0x1f9   : > { %9546 = vmatmul.mubr.msk.bf16.gmra.mxu1 %vm1893_vm3, %v2715_v52 }
 0x1fa   : > { %9549 = vmatprep.mubr.msk.bf16.mxu1 %vm10692_vm0, %v13142_v0 }
 0x1fd   : > { %9504 = vmatmul.mubr.msk.bf16.vlgmr.msra.gmra.mxu0 %vm1893_vm3, %v2536_v54 }
 0x1fe   : > { %9578 = vmatpush3.bf16.msra.mxu0 %v2930_v55  ;;  %9507 = vmatprep.mubr.msk.bf16.mxu0 %vm10692_vm0, %v13142_v0 }
 0x1ff   : > { %9653 = vmatprep.subr.bf16.mxu0 %v13142_v0 }
 0x201   : > { %9550 = vmatmul.mubr.msk.bf16.gmra.mxu1 %vm1893_vm3, %v2716_v33  ;;  %v2543_v33 = vpack.c.bf16 %v2534_v23, %v2533_v39 }
 0x202   : > { %9553 = vmatprep.mubr.msk.bf16.mxu1 %vm10692_vm0, %v13142_v0 }
 0x205   : > { %9508 = vmatmul.mubr.msk.bf16.gmra.mxu0 %vm1893_vm3, %v2537_v14  ;;  %v3054_v14 = vld [vmem:[#allocation2 + $0x18] sm:$0xff] }
 0x206   : > { %9511 = vmatprep.mubr.msk.bf16.mxu0 %vm10692_vm0, %v13142_v0 }
 0x209   : > { %9554 = vmatmul.mubr.msk.bf16.gmra.mxu1 %vm1893_vm3, %v2717_v13 }
 0x20a   : > { %9557 = vmatprep.mubr.msk.bf16.mxu1 %vm10692_vm0, %v13142_v0 }
 0x20d   : > { %9512 = vmatmul.mubr.msk.bf16.gmra.mxu0 %vm1893_vm3, %v2538_v41  ;;  %v3053_v41 = vld [vmem:[#allocation2 + $0x10] sm:$0xff] }
 0x20e   : > { %9515 = vmatprep.mubr.msk.bf16.mxu0 %vm10692_vm0, %v13142_v0 }
 0x211   : > { %9558 = vmatmul.mubr.msk.bf16.gmra.mxu1 %vm1893_vm3, %v2718_v4  ;;  %v3070_v4 = vpack.c.bf16 %v3054_v14, %v3053_v41 }
 0x212   : > { %9561 = vmatprep.mubr.msk.bf16.mxu1 %vm10692_vm0, %v13142_v0 }
 0x215   : > { %9516 = vmatmul.mubr.msk.bf16.gmra.mxu0 %vm1893_vm3, %v2539_v63  ;;  %v2535_v63 = vld [vmem:[#allocation2 + $0x84] sm:$0xff] }
 0x216   : > { %9519 = vmatprep.mubr.msk.bf16.mxu0 %vm10692_vm0, %v13142_v0  ;;  %v2544_v48 = vpack.c.bf16 %v2535_v63, %v2535_v63 }
 0x219   : > { %9562 = vmatmul.mubr.msk.bf16.gmra.mxu1 %vm1893_vm3, %v2719_v42 }
 0x21a   : > { %9565 = vmatprep.mubr.msk.bf16.mxu1 %vm10692_vm0, %v13142_v0 }
 0x21d   : > { %9520 = vmatmul.mubr.msk.bf16.gmra.mxu0 %vm1893_vm3, %v2540_v26 }
 0x21e   : > { %9523 = vmatprep.mubr.msk.bf16.mxu0 %vm10692_vm0, %v13142_v0 }
 0x221   : > { %v2093_v20 = vpop.f32.mrf.mxu1  ;;  %9566 = vmatmul.mubr.msk.bf16.gmra.mxu1 %vm1893_vm3, %v2720_v57 }
 0x222   : > { %9569 = vmatprep.mubr.msk.bf16.mxu1 %vm10692_vm0, %v13142_v0 }
 0x223   : > { %v9391_v8 = vpop.f32.mrf.mxu1 }
 0x225   : > { %9524 = vmatmul.mubr.msk.bf16.gmra.mxu0 %vm1893_vm3, %v2541_v7  ;;  %v2096_v1 = vpop.f32.mrf.mxu1 }
 0x226   : > { %9527 = vmatprep.mubr.msk.bf16.mxu0 %vm10692_vm0, %v13142_v0 }
 0x227   : > { %v9392_v49 = vpop.f32.mrf.mxu1 }
 0x229   : > { %v2101_v27 = vpop.f32.mrf.mxu1  ;;  %9570 = vmatmul.mubr.msk.bf16.gmra.mxu1 %vm1893_vm3, %v2721_v50 }
 0x22a   : > { %9573 = vmatprep.mubr.msk.bf16.mxu1 %vm10692_vm0, %v13142_v0 }
 0x22b   : > { %v9395_v28 = vpop.f32.mrf.mxu1 }
 0x22d   : > { %v1959_v22 = vpop.f32.mrf.mxu0  ;;  %9528 = vmatmul.mubr.msk.bf16.gmra.mxu0 %vm1893_vm3, %v2542_v12  ;;  %v2104_v62 = vpop.f32.mrf.mxu1 }
 0x22e   : > { %v11543_v24 = vadd.f32 %v2093_v20, %v1959_v22  ;;  %9531 = vmatprep.mubr.msk.bf16.mxu0 %vm10692_vm0, %v13142_v0  ;;  %v3055_v20 = vld [vmem:[#allocation2 + $0x20] sm:$0xff] }
 0x22f   : > { %v9353_v25 = vpop.f32.mrf.mxu0  ;;  %v9396_v52 = vpop.f32.mrf.mxu1  ;;  %v3071_v8 = vpack.c.bf16 %v3056_v51, %v3055_v20  ;;  %v2879_v51 = vld [vmem:[#allocation2 + $0x2f] sm:$0xff] }
 0x230   : > { %v3057_v52 = vld [vmem:[#allocation2 + $0x30] sm:$0xff] }
 0x231   : > { %v1962_v16 = vpop.f32.mrf.mxu0  ;;  %v2109_v54 = vpop.f32.mrf.mxu1  ;;  %9574 = vmatmul.mubr.msk.bf16.gmra.mxu1 %vm1893_vm3, %v2722_v53 }
 0x232   : > { %v11548_v55 = vadd.f32 %v2096_v1, %v1962_v16  ;;  %9617 = vmatprep.mubr.msk.bf16.mxu1 %vm10692_vm0, %v13142_v0  ;;  %v3257_v1 = vld [vmem:[%s13120_s3 + $0x20] sm:$0xf]  ;;  %v3072_v16 = vpack.c.bf16 %v3058_v46, %v3057_v52 }
 0x233   : > { %v9354_v32 = vpop.f32.mrf.mxu0  ;;  %v9399_v40 = vpop.f32.mrf.mxu1  ;;  %v3286_v12 = vsel %vm1921_vm2, %v3257_v1, 0  ;;  %v3061_v1 = vld [vmem:[#allocation2 + $0x50] sm:$0xff]  ;;  %v2881_v46 = vld [vmem:[#allocation2 + $0x3f] sm:$0xff] }
 0x234   : > { %v2877_v40 = vld [vmem:[#allocation2 + $0x1f] sm:$0xff] }
 0x235   : > { %v1967_v5 = vpop.f32.mrf.mxu0  ;;  %9532 = vmatmul.mubr.msk.bf16.gmra.mxu0 %vm1893_vm3, %v2543_v33  ;;  %v2112_v13 = vpop.f32.mrf.mxu1 }
 0x236   : > { %v11556_v2 = vadd.f32 %v2101_v27, %v1967_v5  ;;  %9535 = vmatprep.mubr.msk.bf16.mxu0 %vm10692_vm0, %v13142_v0 }
 0x237   : > { %v9357_v29 = vpop.f32.mrf.mxu0  ;;  %v9400_v30 = vpop.f32.mrf.mxu1 }
 0x239   : > { %v1970_v44 = vpop.f32.mrf.mxu0  ;;  %v2117_v45 = vpop.f32.mrf.mxu1  ;;  %9618 = vmatmul.mubr.msk.bf16.vlgmr.msra.gmra.mxu1 %vm1893_vm3, %v3070_v4  ;;  %v3059_v4 = vld [vmem:[#allocation2 + $0x40] sm:$0xff] }
 0x23a   : > { %v11562_v42 = vadd.f32 %v2104_v62, %v1970_v44  ;;  %9621 = vmatprep.mubr.msk.bf16.mxu1 %vm10692_vm0, %v13142_v0  ;;  %9692 = vmatpush3.bf16.msra.mxu1 %v3464_v43 }
 0x23b   : > { %v9358_v31 = vpop.f32.mrf.mxu0  ;;  %v9403_v26 = vpop.f32.mrf.mxu1  ;;  %9767 = vmatprep.subr.bf16.mxu1 %v13142_v0 }
 0x23d   : > { %v1975_v19 = vpop.f32.mrf.mxu0  ;;  %9536 = vmatmul.mubr.msk.bf16.gmra.mxu0 %vm1893_vm3, %v2544_v48  ;;  %v2120_v57 = vpop.f32.mrf.mxu1 }
 0x23e   : > { %v11568_v58 = vadd.f32 %v2109_v54, %v1975_v19  ;;  %9579 = vmatprep.mubr.msk.bf16.mxu0 %vm10692_vm0, %v13142_v0  ;;  %v2878_v54 = vld [vmem:[#allocation2 + $0x27] sm:$0xff] }
 0x23f   : > { %v9361_v37 = vpop.f32.mrf.mxu0  ;;  %v9404_v7 = vpop.f32.mrf.mxu1  ;;  %v2893_v6 = vpack.c.bf16 %v2878_v54, %v2877_v40 }
 0x240   : > { %v3062_v37 = vld [vmem:[#allocation2 + $0x58] sm:$0xff] }
 0x241   : > { %v1978_v34 = vpop.f32.mrf.mxu0  ;;  %v2125_v49 = vpop.f32.mrf.mxu1  ;;  %9622 = vmatmul.mubr.msk.bf16.gmra.mxu1 %vm1893_vm3, %v3071_v8  ;;  %v3074_v17 = vpack.c.bf16 %v3062_v37, %v3061_v1  ;;  %v2886_v37 = vld [vmem:[#allocation2 + $0x67] sm:$0xff] }
 0x242   : > { %v11576_v50 = vadd.f32 %v2112_v13, %v1978_v34  ;;  %9625 = vmatprep.mubr.msk.bf16.mxu1 %vm10692_vm0, %v13142_v0  ;;  %v3060_v13 = vld [vmem:[#allocation2 + $0x48] sm:$0xff] }
 0x243   : > { %v9362_v27 = vpop.f32.mrf.mxu0  ;;  %v9407_v28 = vpop.f32.mrf.mxu1  ;;  %v3073_v44 = vpack.c.bf16 %v3060_v13, %v3059_v4 }
 0x244   : > { %v2882_v27 = vld [vmem:[#allocation2 + $0x47] sm:$0xff] }
 0x245   : > { %v1983_v22 = vpop.f32.mrf.mxu0  ;;  %9580 = vmatmul.mubr.msk.bf16.vlgmr.msra.gmra.mxu0 %vm1893_vm3, %v2892_v56  ;;  %v2128_v62 = vpop.f32.mrf.mxu1 }
 0x246   : > { %v11582_v25 = vadd.f32 %v2117_v45, %v1983_v22  ;;  %9654 = vmatpush3.bf16.msra.mxu0 %v3286_v12  ;;  %9583 = vmatprep.mubr.msk.bf16.mxu0 %vm10692_vm0, %v13142_v0  ;;  %v2880_v45 = vld [vmem:[#allocation2 + $0x37] sm:$0xff] }
 0x247   : > { %v9365_v53 = vpop.f32.mrf.mxu0  ;;  %v9408_v23 = vpop.f32.mrf.mxu1  ;;  %9729 = vmatprep.subr.bf16.mxu0 %v13142_v0 }
 0x248   : > { %v3064_v53 = vld [vmem:[#allocation2 + $0x68] sm:$0xff] }
 0x249   : > { %v1986_v39 = vpop.f32.mrf.mxu0  ;;  %v2133_v32 = vpop.f32.mrf.mxu1  ;;  %9626 = vmatmul.mubr.msk.bf16.gmra.mxu1 %vm1893_vm3, %v3072_v16 }
 0x24a   : > { %v11588_v33 = vadd.f32 %v2120_v57, %v1986_v39  ;;  %9629 = vmatprep.mubr.msk.bf16.mxu1 %vm10692_vm0, %v13142_v0  ;;  %v2894_v57 = vpack.c.bf16 %v2880_v45, %v2879_v51  ;;  %v3063_v39 = vld [vmem:[#allocation2 + $0x60] sm:$0xff]  ;;  %v3065_v51 = vld [vmem:[#allocation2 + $0x70] sm:$0xff] }
 0x24b   : > { %v9366_v14 = vpop.f32.mrf.mxu0  ;;  %v9411_v5 = vpop.f32.mrf.mxu1 }
 0x24c   : > { %v3075_v14 = vpack.c.bf16 %v3064_v53, %v3063_v39 }
 0x24d   : > { %v1991_v41 = vpop.f32.mrf.mxu0  ;;  %9584 = vmatmul.mubr.msk.bf16.gmra.mxu0 %vm1893_vm3, %v2893_v6  ;;  %v2136_v29 = vpop.f32.mrf.mxu1  ;;  %v2884_v6 = vld [vmem:[#allocation2 + $0x57] sm:$0xff] }
 0x24e   : > { %v11593_v30 = vadd.f32 %v2125_v49, %v1991_v41  ;;  %9587 = vmatprep.mubr.msk.bf16.mxu0 %vm10692_vm0, %v13142_v0 }
 0x24f   : > { %v9369_v43 = vpop.f32.mrf.mxu0  ;;  %v9412_v63 = vpop.f32.mrf.mxu1 }
 0x251   : > { %v1994_v31 = vpop.f32.mrf.mxu0  ;;  %v2141_v48 = vpop.f32.mrf.mxu1  ;;  %9630 = vmatmul.mubr.msk.bf16.gmra.mxu1 %vm1893_vm3, %v3073_v44  ;;  %v3066_v44 = vld [vmem:[#allocation2 + $0x78] sm:$0xff] }
 0x252   : > { %v11598_v26 = vadd.f32 %v2128_v62, %v1994_v31  ;;  %9633 = vmatprep.mubr.msk.bf16.mxu1 %vm10692_vm0, %v13142_v0  ;;  %v2895_v62 = vpack.c.bf16 %v2882_v27, %v2881_v46 }
 0x253   : > { %v9370_v19 = vpop.f32.mrf.mxu0  ;;  %v9415_v20 = vpop.f32.mrf.mxu1 }
 0x254   : > { %v3076_v20 = vpack.c.bf16 %v3066_v44, %v3065_v51  ;;  %v3078_v44 = vpack.c.bf16 %v11363_v18, %v11363_v18  ;;  %v3791_v18 = vld [vmem:[%s13120_s3 + $0x2c] sm:$0xf] }
 0x255   : > { %v1999_v7 = vpop.f32.mrf.mxu0  ;;  %9588 = vmatmul.mubr.msk.bf16.gmra.mxu0 %vm1893_vm3, %v2894_v57  ;;  %v2144_v8 = vpop.f32.mrf.mxu1 }
 0x256   : > { %v11603_v9 = vadd.f32 %v2133_v32, %v1999_v7  ;;  %9591 = vmatprep.mubr.msk.bf16.mxu0 %vm10692_vm0, %v13142_v0 }
 0x257   : > { %v9373_v34 = vpop.f32.mrf.mxu0  ;;  %v9416_v49 = vpop.f32.mrf.mxu1 }
 0x258   : > { %v2885_v34 = vld [vmem:[#allocation2 + $0x5f] sm:$0xff] }
 0x259   : > { %v2002_v56 = vpop.f32.mrf.mxu0  ;;  %v2149_v12 = vpop.f32.mrf.mxu1  ;;  %9634 = vmatmul.mubr.msk.bf16.gmra.mxu1 %vm1893_vm3, %v3074_v17  ;;  %v2897_v17 = vpack.c.bf16 %v2886_v37, %v2885_v34 }
 0x25a   : > { %v11608_v28 = vadd.f32 %v2136_v29, %v2002_v56  ;;  %9637 = vmatprep.mubr.msk.bf16.mxu1 %vm10692_vm0, %v13142_v0  ;;  %v2883_v29 = vld [vmem:[#allocation2 + $0x4f] sm:$0xff] }
 0x25b   : > { %v9374_v22 = vpop.f32.mrf.mxu0  ;;  %v9419_v52 = vpop.f32.mrf.mxu1  ;;  %v2896_v43 = vpack.c.bf16 %v2884_v6, %v2883_v29  ;;  %v3068_v56 = vld [vmem:[#allocation2 + $0x88] sm:$0xff] }
 0x25d   : > { %v2007_v23 = vpop.f32.mrf.mxu0  ;;  %9592 = vmatmul.mubr.msk.bf16.gmra.mxu0 %vm1893_vm3, %v2895_v62  ;;  %v2152_v16 = vpop.f32.mrf.mxu1  ;;  %v3067_v62 = vld [vmem:[#allocation2 + $0x80] sm:$0xff] }
 0x25e   : > { %v11613_v54 = vadd.f32 %v2141_v48, %v2007_v23  ;;  %9595 = vmatprep.mubr.msk.bf16.mxu0 %vm10692_vm0, %v13142_v0  ;;  %v3077_v23 = vpack.c.bf16 %v3068_v56, %v3067_v62  ;;  %v3820_v56 = vsel %vm1921_vm2, %v3791_v18, 0 }
 0x25f   : > { %v9377_v32 = vpop.f32.mrf.mxu0  ;;  %v9420_v40 = vpop.f32.mrf.mxu1 }
 0x260   : > { %v2887_v40 = vld [vmem:[#allocation2 + $0x6f] sm:$0xff] }
 0x261   : > { %v2010_v5 = vpop.f32.mrf.mxu0  ;;  %v2157_v13 = vpop.f32.mrf.mxu1  ;;  %9638 = vmatmul.mubr.msk.bf16.gmra.mxu1 %vm1893_vm3, %v3075_v14 }
 0x262   : > { %v11618_v41 = vadd.f32 %v2144_v8, %v2010_v5  ;;  %9641 = vmatprep.mubr.msk.bf16.mxu1 %vm10692_vm0, %v13142_v0 }
 0x263   : > { %v9378_v4 = vpop.f32.mrf.mxu0  ;;  %v9423_v63 = vpop.f32.mrf.mxu1 }
 0x265   : > { %v2015_v45 = vpop.f32.mrf.mxu0  ;;  %9596 = vmatmul.mubr.msk.bf16.gmra.mxu0 %vm1893_vm3, %v2896_v43  ;;  %v2160_v31 = vpop.f32.mrf.mxu1 }
 0x266   : > { %v11623_v48 = vadd.f32 %v2149_v12, %v2015_v45  ;;  %9599 = vmatprep.mubr.msk.bf16.mxu0 %vm10692_vm0, %v13142_v0  ;;  %v2890_v45 = vld [vmem:[#allocation2 + $0x87] sm:$0xff] }
 0x267   : > { %v9381_v19 = vpop.f32.mrf.mxu0  ;;  %v9424_v57 = vpop.f32.mrf.mxu1 }
 0x269   : > { %v2018_v7 = vpop.f32.mrf.mxu0  ;;  %v2432_v8 = vpop.f32.mrf.mxu1  ;;  %9642 = vmatmul.mubr.msk.bf16.gmra.mxu1 %vm1893_vm3, %v3076_v20  ;;  %v2889_v20 = vld [vmem:[#allocation2 + $0x7f] sm:$0xff] }
 0x26a   : > { %v11628_v1 = vadd.f32 %v2152_v16, %v2018_v7  ;;  %9645 = vmatprep.mubr.msk.bf16.mxu1 %vm10692_vm0, %v13142_v0  ;;  %v2888_v16 = vld [vmem:[#allocation2 + $0x77] sm:$0xff]  ;;  %v2899_v37 = vpack.c.bf16 %v2890_v45, %v2889_v20 }
 0x26b   : > { %v9382_v49 = vpop.f32.mrf.mxu0  ;;  %v9467_v27 = vpop.f32.mrf.mxu1  ;;  %v2898_v6 = vpack.c.bf16 %v2888_v16, %v2887_v40 }
 0x26d   : > { %v2023_v12 = vpop.f32.mrf.mxu0  ;;  %9600 = vmatmul.mubr.msk.bf16.gmra.mxu0 %vm1893_vm3, %v2897_v17  ;;  %v2435_v46 = vpop.f32.mrf.mxu1 }
 0x26e   : > { %v11633_v22 = vadd.f32 %v2157_v13, %v2023_v12  ;;  %9603 = vmatprep.mubr.msk.bf16.mxu0 %vm10692_vm0, %v13142_v0  ;;  %v2891_v12 = vld [vmem:[#allocation2 + $0x8f] sm:$0xff] }
 0x26f   : > { %v9385_v52 = vpop.f32.mrf.mxu0  ;;  %v9468_v53 = vpop.f32.mrf.mxu1 }
 0x271   : > { %v2026_v39 = vpop.f32.mrf.mxu0  ;;  %v2440_v32 = vpop.f32.mrf.mxu1  ;;  %9646 = vmatmul.mubr.msk.bf16.gmra.mxu1 %vm1893_vm3, %v3077_v23  ;;  %v2900_v23 = vpack.c.bf16 %v2891_v12, %v2891_v12 }
 0x272   : > { %9649 = vmatprep.mubr.msk.bf16.mxu1 %vm10692_vm0, %v13142_v0 }
 0x273   : > { %v9386_v14 = vpop.f32.mrf.mxu0  ;;  %v9471_v5 = vpop.f32.mrf.mxu1 }
 0x274   : > { %v3613_v5 = vld [vmem:[%s13120_s3 + $0x28] sm:$0xf] }
 0x275   : > { %v2254_v13 = vpop.f32.mrf.mxu0  ;;  %9604 = vmatmul.mubr.msk.bf16.gmra.mxu0 %vm1893_vm3, %v2898_v6  ;;  %v2443_v29 = vpop.f32.mrf.mxu1  ;;  %v3232_v6 = vld [vmem:[#allocation2 + $0x19] sm:$0xff]  ;;  %v3642_v45 = vsel %vm1921_vm2, %v3613_v5, 0 }
 0x276   : > { %v2324_v4 = vadd.f32 %v2254_v13, %v11543_v24  ;;  %9607 = vmatprep.mubr.msk.bf16.mxu0 %vm10692_vm0, %v13142_v0 }
 0x277   : > { %v9429_v43 = vpop.f32.mrf.mxu0  ;;  %v9472_v63 = vpop.f32.mrf.mxu1 }
 0x278   : > { %v11646_v31 = vadd.f32 %v2432_v8, %v2324_v4 }
 0x279   : > { %v2257_v51 = vpop.f32.mrf.mxu0  ;;  %v2448_v19 = vpop.f32.mrf.mxu1  ;;  %9650 = vmatmul.mubr.msk.bf16.gmra.mxu1 %vm1893_vm3, %v3078_v44 }
 0x27a   : > { %v2325_v57 = vadd.f32 %v2257_v51, %v11548_v55  ;;  %9693 = vmatprep.mubr.msk.bf16.mxu1 %vm10692_vm0, %v13142_v0 }
 0x27b   : > { %v9430_v24 = vpop.f32.mrf.mxu0  ;;  %v9475_v7 = vpop.f32.mrf.mxu1 }
 0x27c   : > { %v11652_v34 = vadd.f32 %v2435_v46, %v2325_v57 }
 0x27d   : > { %v2262_v8 = vpop.f32.mrf.mxu0  ;;  %9608 = vmatmul.mubr.msk.bf16.gmra.mxu0 %vm1893_vm3, %v2899_v37  ;;  %v2451_v49 = vpop.f32.mrf.mxu1  ;;  %v3234_v37 = vld [vmem:[#allocation2 + $0x29] sm:$0xff] }
 0x27e   : > { %v2326_v17 = vadd.f32 %v2262_v8, %v11556_v2  ;;  %9611 = vmatprep.mubr.msk.bf16.mxu0 %vm10692_vm0, %v13142_v0 }
 0x27f   : > { %v9433_v55 = vpop.f32.mrf.mxu0  ;;  %v9476_v27 = vpop.f32.mrf.mxu1 }
 0x280   : > { %v11662_v46 = vadd.f32 %v2440_v32, %v2326_v17  ;;  %v3233_v17 = vld [vmem:[#allocation2 + $0x21] sm:$0xff] }
 0x281   : > { %v2265_v62 = vpop.f32.mrf.mxu0  ;;  %v2456_v52 = vpop.f32.mrf.mxu1  ;;  %9694 = vmatmul.mubr.msk.bf16.vlgmr.msra.gmra.mxu1 %vm1893_vm3, %v11418_v11  ;;  %v3249_v55 = vpack.c.bf16 %v3234_v37, %v3233_v17  ;;  %v3240_v37 = vld [vmem:[#allocation2 + $0x59] sm:$0xff] }
 0x282   : > { %v2327_v53 = vadd.f32 %v2265_v62, %v11562_v42  ;;  %9697 = vmatprep.mubr.msk.bf16.mxu1 %vm10692_vm0, %v13142_v0  ;;  %9768 = vmatpush3.bf16.msra.mxu1 %v3820_v56 }
 0x283   : > { %v9434_v2 = vpop.f32.mrf.mxu0  ;;  %v9479_v16 = vpop.f32.mrf.mxu1  ;;  %9843 = vmatprep.subr.bf16.mxu1 %v13142_v0 }
 0x284   : > { %v11670_v39 = vadd.f32 %v2443_v29, %v2327_v53  ;;  %v3236_v53 = vld [vmem:[#allocation2 + $0x39] sm:$0xff] }
 0x285   : > { %v2270_v32 = vpop.f32.mrf.mxu0  ;;  %9612 = vmatmul.mubr.msk.bf16.gmra.mxu0 %vm1893_vm3, %v2900_v23  ;;  %v2459_v40 = vpop.f32.mrf.mxu1 }
 0x286   : > { %v2328_v14 = vadd.f32 %v2270_v32, %v11568_v58  ;;  %9655 = vmatprep.mubr.msk.bf16.mxu0 %vm10692_vm0, %v13142_v0  ;;  %v3231_v58 = vld [vmem:[#allocation2 + $0x11] sm:$0xff] }
 0x287   : > { %v9437_v11 = vpop.f32.mrf.mxu0  ;;  %v9480_v42 = vpop.f32.mrf.mxu1  ;;  %v3248_v44 = vpack.c.bf16 %v3232_v6, %v3231_v58 }
 0x288   : > { %v11679_v13 = vadd.f32 %v2448_v19, %v2328_v14 }
 0x289   : > { %v2273_v29 = vpop.f32.mrf.mxu0  ;;  %v2464_v4 = vpop.f32.mrf.mxu1  ;;  %9698 = vmatmul.mubr.msk.bf16.gmra.mxu1 %vm1893_vm3, %v11427_v59 }
 0x28a   : > { %v2329_v43 = vadd.f32 %v2273_v29, %v11576_v50  ;;  %9701 = vmatprep.mubr.msk.bf16.mxu1 %vm10692_vm0, %v13142_v0 }
 0x28b   : > { %v9438_v63 = vpop.f32.mrf.mxu0  ;;  %v9483_v51 = vpop.f32.mrf.mxu1 }
 0x28c   : > { %v11687_v57 = vadd.f32 %v2451_v49, %v2329_v43 }
 0x28d   : > { %v2278_v19 = vpop.f32.mrf.mxu0  ;;  %9656 = vmatmul.mubr.msk.bf16.vlgmr.msra.gmra.mxu0 %vm1893_vm3, %v3248_v44  ;;  %v2467_v20 = vpop.f32.mrf.mxu1 }
 0x28e   : > { %v2330_v24 = vadd.f32 %v2278_v19, %v11582_v25  ;;  %9730 = vmatpush3.bf16.msra.mxu0 %v3642_v45  ;;  %9659 = vmatprep.mubr.msk.bf16.mxu0 %vm10692_vm0, %v13142_v0  ;;  %v3237_v45 = vld [vmem:[#allocation2 + $0x41] sm:$0xff] }
 0x28f   : > { %v9441_v59 = vpop.f32.mrf.mxu0  ;;  %v9484_v50 = vpop.f32.mrf.mxu1  ;;  %9805 = vmatprep.subr.bf16.mxu0 %v13142_v0 }
 0x290   : > { %v11694_v7 = vadd.f32 %v2456_v52, %v2330_v24 }
 0x291   : > { %v2281_v18 = vpop.f32.mrf.mxu0  ;;  %v2472_v8 = vpop.f32.mrf.mxu1  ;;  %9702 = vmatmul.mubr.msk.bf16.gmra.mxu1 %vm1893_vm3, %v11436_v38 }
 0x292   : > { %v2331_v49 = vadd.f32 %v2281_v18, %v11588_v33  ;;  %9705 = vmatprep.mubr.msk.bf16.mxu1 %vm10692_vm0, %v13142_v0 }
 0x293   : > { %v9442_v25 = vpop.f32.mrf.mxu0  ;;  %v9487_v27 = vpop.f32.mrf.mxu1 }
 0x294   : > { %v11701_v56 = vadd.f32 %v2459_v40, %v2331_v49  ;;  %v3235_v40 = vld [vmem:[#allocation2 + $0x31] sm:$0xff] }
 0x295   : > { %v2286_v12 = vpop.f32.mrf.mxu0  ;;  %9660 = vmatmul.mubr.msk.bf16.gmra.mxu0 %vm1893_vm3, %v3249_v55  ;;  %v2475_v62 = vpop.f32.mrf.mxu1  ;;  %v3250_v14 = vpack.c.bf16 %v3236_v53, %v3235_v40  ;;  %v3239_v25 = vld [vmem:[#allocation2 + $0x51] sm:$0xff]  ;;  %v3241_v40 = vld [vmem:[#allocation2 + $0x61] sm:$0xff] }
 0x296   : > { %v2332_v52 = vadd.f32 %v2286_v12, %v11593_v30  ;;  %9663 = vmatprep.mubr.msk.bf16.mxu0 %vm10692_vm0, %v13142_v0  ;;  %v3252_v55 = vpack.c.bf16 %v3240_v37, %v3239_v25  ;;  %v3246_v37 = vld [vmem:[#allocation2 + $0x89] sm:$0xff] }
 0x297   : > { %v9445_v38 = vpop.f32.mrf.mxu0  ;;  %v9488_v33 = vpop.f32.mrf.mxu1 }
 0x298   : > { %v11707_v2 = vadd.f32 %v2464_v4, %v2332_v52  ;;  %v3238_v4 = vld [vmem:[#allocation2 + $0x49] sm:$0xff] }
 0x299   : > { %v2289_v23 = vpop.f32.mrf.mxu0  ;;  %v2480_v16 = vpop.f32.mrf.mxu1  ;;  %9706 = vmatmul.mubr.msk.bf16.gmra.mxu1 %vm1893_vm3, %v11445_v21  ;;  %v3251_v51 = vpack.c.bf16 %v3238_v4, %v3237_v45  ;;  %v3242_v33 = vld [vmem:[#allocation2 + $0x69] sm:$0xff]  ;;  %v3244_v4 = vld [vmem:[#allocation2 + $0x79] sm:$0xff]  ;;  %v3243_v45 = vld [vmem:[#allocation2 + $0x71] sm:$0xff] }
 0x29a   : > { %v2333_v32 = vadd.f32 %v2289_v23, %v11598_v26  ;;  %9709 = vmatprep.mubr.msk.bf16.mxu1 %vm10692_vm0, %v13142_v0 }
 0x29b   : > { %v9446_v30 = vpop.f32.mrf.mxu0  ;;  %v9491_v11 = vpop.f32.mrf.mxu1 }
 0x29c   : > { %v11714_v42 = vadd.f32 %v2467_v20, %v2333_v32  ;;  %v3253_v30 = vpack.c.bf16 %v3242_v33, %v3241_v40  ;;  %v3424_v11 = vld [vmem:[#allocation2 + $0x8a] sm:$0xff]  ;;  %v3765_v33 = vld [vmem:[#allocation2 + $0x1d] sm:$0xff] }
 0x29d   : > { %v2294_v6 = vpop.f32.mrf.mxu0  ;;  %9664 = vmatmul.mubr.msk.bf16.gmra.mxu0 %vm1893_vm3, %v3250_v14  ;;  %v2483_v5 = vpop.f32.mrf.mxu1 }
 0x29e   : > { %v2334_v29 = vadd.f32 %v2294_v6, %v11603_v9  ;;  %9667 = vmatprep.mubr.msk.bf16.mxu0 %vm10692_vm0, %v13142_v0 }
 0x29f   : > { %v9449_v21 = vpop.f32.mrf.mxu0  ;;  %v9492_v26 = vpop.f32.mrf.mxu1 }
 0x2a0   : > { %v11720_v43 = vadd.f32 %v2472_v8, %v2334_v29  ;;  %v3433_v26 = vpack.c.bf16 %v3424_v11, %v11482_v61 }
 0x2a1   : > { %v2297_v58 = vpop.f32.mrf.mxu0  ;;  %v2488_v63 = vpop.f32.mrf.mxu1  ;;  %9710 = vmatmul.mubr.msk.bf16.gmra.mxu1 %vm1893_vm3, %v11454_v3 }
 0x2a2   : > { %v2335_v44 = vadd.f32 %v2297_v58, %v11608_v28  ;;  %9713 = vmatprep.mubr.msk.bf16.mxu1 %vm10692_vm0, %v13142_v0 }
 0x2a3   : > { %v9450_v9 = vpop.f32.mrf.mxu0  ;;  %v9495_v19 = vpop.f32.mrf.mxu1 }
 0x2a4   : > { %v11727_v20 = vadd.f32 %v2475_v62, %v2335_v44  ;;  %v3425_v19 = vld [vmem:[#allocation2 + $0x92] sm:$0xff] }
 0x2a5   : > { %v2302_v24 = vpop.f32.mrf.mxu0  ;;  %9668 = vmatmul.mubr.msk.bf16.gmra.mxu0 %vm1893_vm3, %v3251_v51  ;;  %v2491_v59 = vpop.f32.mrf.mxu1 }
 0x2a6   : > { %v2336_v50 = vadd.f32 %v2302_v24, %v11613_v54  ;;  %9671 = vmatprep.mubr.msk.bf16.mxu0 %vm10692_vm0, %v13142_v0 }
 0x2a7   : > { %v9453_v3 = vpop.f32.mrf.mxu0  ;;  %v9496_v28 = vpop.f32.mrf.mxu1 }
 0x2a8   : > { %v11733_v18 = vadd.f32 %v2480_v16, %v2336_v50  ;;  %v3434_v28 = vpack.c.bf16 %v3425_v19, %v3425_v19 }
 0x2a9   : > { %v2305_v8 = vpop.f32.mrf.mxu0  ;;  %v2496_v49 = vpop.f32.mrf.mxu1  ;;  %9714 = vmatmul.mubr.msk.bf16.gmra.mxu1 %vm1893_vm3, %v11463_v35 }
 0x2aa   : > { %v2337_v17 = vadd.f32 %v2305_v8, %v11618_v41  ;;  %9717 = vmatprep.mubr.msk.bf16.mxu1 %vm10692_vm0, %v13142_v0 }
 0x2ab   : > { %v9454_v54 = vpop.f32.mrf.mxu0  ;;  %v9499_v27 = vpop.f32.mrf.mxu1 }
 0x2ac   : > { %v11740_v12 = vadd.f32 %v2483_v5, %v2337_v17  ;;  %v3245_v54 = vld [vmem:[#allocation2 + $0x81] sm:$0xff] }
 0x2ad   : > { %v2310_v62 = vpop.f32.mrf.mxu0  ;;  %9672 = vmatmul.mubr.msk.bf16.gmra.mxu0 %vm1893_vm3, %v3252_v55  ;;  %v2499_v52 = vpop.f32.mrf.mxu1  ;;  %v3255_v55 = vpack.c.bf16 %v3246_v37, %v3245_v54 }
 0x2ae   : > { %v2338_v38 = vadd.f32 %v2310_v62, %v11623_v48  ;;  %9675 = vmatprep.mubr.msk.bf16.mxu0 %vm10692_vm0, %v13142_v0  ;;  %v3766_v62 = vld [vmem:[#allocation2 + $0x25] sm:$0xff] }
 0x2af   : > { %v9457_v35 = vpop.f32.mrf.mxu0  ;;  %v9500_v41 = vpop.f32.mrf.mxu1 }
 0x2b0   : > { %v11746_v53 = vadd.f32 %v2488_v63, %v2338_v38  ;;  %v4147_v38 = vld [vmem:[%s13120_s3 + $0x34] sm:$0xf] }
 0x2b1   : > { %v2313_v23 = vpop.f32.mrf.mxu0  ;;  %v2788_v16 = vpop.f32.mrf.mxu1  ;;  %9718 = vmatmul.mubr.msk.bf16.gmra.mxu1 %vm1893_vm3, %v11472_v10  ;;  %v4176_v40 = vsel %vm1921_vm2, %v4147_v38, 0 }
 0x2b2   : > { %v2339_v32 = vadd.f32 %v2313_v23, %v11628_v1  ;;  %9721 = vmatprep.mubr.msk.bf16.mxu1 %vm10692_vm0, %v13142_v0 }
 0x2b3   : > { %v9458_v48 = vpop.f32.mrf.mxu0  ;;  %v9543_v14 = vpop.f32.mrf.mxu1 }
 0x2b4   : > { %v11753_v6 = vadd.f32 %v2491_v59, %v2339_v32  ;;  %v3782_v32 = vpack.c.bf16 %v3766_v62, %v3765_v33  ;;  %v3247_v48 = vld [vmem:[#allocation2 + $0x91] sm:$0xff] }
 0x2b5   : > { %v2318_v5 = vpop.f32.mrf.mxu0  ;;  %9676 = vmatmul.mubr.msk.bf16.gmra.mxu0 %vm1893_vm3, %v3253_v30  ;;  %v2791_v29 = vpop.f32.mrf.mxu1 }
 0x2b6   : > { %v2340_v21 = vadd.f32 %v2318_v5, %v11633_v22  ;;  %9679 = vmatprep.mubr.msk.bf16.mxu0 %vm10692_vm0, %v13142_v0  ;;  %v3254_v22 = vpack.c.bf16 %v3244_v4, %v3243_v45 }
 0x2b7   : > { %v9461_v10 = vpop.f32.mrf.mxu0  ;;  %v9544_v1 = vpop.f32.mrf.mxu1 }
 0x2b8   : > { %v11760_v58 = vadd.f32 %v2496_v49, %v2340_v21  ;;  %v3768_v10 = vld [vmem:[#allocation2 + $0x35] sm:$0xff] }
 0x2b9   : > { %v2321_v63 = vpop.f32.mrf.mxu0  ;;  %v2796_v44 = vpop.f32.mrf.mxu1  ;;  %9722 = vmatmul.mubr.msk.bf16.gmra.mxu1 %vm1893_vm3, %v3433_v26 }
 0x2ba   : > { %9725 = vmatprep.mubr.msk.bf16.mxu1 %vm10692_vm0, %v13142_v0 }
 0x2bb   : > { %v9462_v9 = vpop.f32.mrf.mxu0  ;;  %v9547_v51 = vpop.f32.mrf.mxu1 }
 0x2bd   : > { %v2610_v24 = vpop.f32.mrf.mxu0  ;;  %9680 = vmatmul.mubr.msk.bf16.gmra.mxu0 %vm1893_vm3, %v3254_v22  ;;  %v2799_v59 = vpop.f32.mrf.mxu1  ;;  %v3969_v22 = vld [vmem:[%s13120_s3 + $0x30] sm:$0xf] }
 0x2be   : > { %v2680_v61 = vadd.f32 %v2610_v24, %v11646_v31  ;;  %9683 = vmatprep.mubr.msk.bf16.mxu0 %vm10692_vm0, %v13142_v0 }
 0x2bf   : > { %v9505_v50 = vpop.f32.mrf.mxu0  ;;  %v9548_v3 = vpop.f32.mrf.mxu1 }
 0x2c0   : > { %v11769_v8 = vadd.f32 %v2788_v16, %v2680_v61  ;;  %v3998_v61 = vsel %vm1921_vm2, %v3969_v22, 0  ;;  %v3770_v3 = vld [vmem:[#allocation2 + $0x45] sm:$0xff]  ;;  %v3594_v22 = vld [vmem:[#allocation2 + $0x54] sm:$0xff] }
 0x2c1   : > { %v2613_v49 = vpop.f32.mrf.mxu0  ;;  %v2804_v17 = vpop.f32.mrf.mxu1  ;;  %9726 = vmatmul.mubr.msk.bf16.gmra.mxu1 %vm1893_vm3, %v3434_v28 }
 0x2c2   : > { %v2681_v25 = vadd.f32 %v2613_v49, %v11652_v34  ;;  %9769 = vmatprep.mubr.msk.bf16.mxu1 %vm10692_vm0, %v13142_v0 }
 0x2c3   : > { %v9506_v31 = vpop.f32.mrf.mxu0  ;;  %v9551_v27 = vpop.f32.mrf.mxu1 }
 0x2c4   : > { %v11775_v52 = vadd.f32 %v2791_v29, %v2681_v25  ;;  %v3256_v29 = vpack.c.bf16 %v3247_v48, %v3247_v48  ;;  %v3592_v48 = vld [vmem:[#allocation2 + $0x44] sm:$0xff] }
 0x2c5   : > { %v2618_v35 = vpop.f32.mrf.mxu0  ;;  %9684 = vmatmul.mubr.msk.bf16.gmra.mxu0 %vm1893_vm3, %v3255_v55  ;;  %v2807_v41 = vpop.f32.mrf.mxu1 }
 0x2c6   : > { %v2682_v34 = vadd.f32 %v2618_v35, %v11662_v46  ;;  %9687 = vmatprep.mubr.msk.bf16.mxu0 %vm10692_vm0, %v13142_v0  ;;  %v3772_v35 = vld [vmem:[#allocation2 + $0x55] sm:$0xff] }
 0x2c7   : > { %v9509_v23 = vpop.f32.mrf.mxu0  ;;  %v9552_v16 = vpop.f32.mrf.mxu1 }
 0x2c8   : > { %v11785_v30 = vadd.f32 %v2796_v44, %v2682_v34 }
 0x2c9   : > { %v2621_v14 = vpop.f32.mrf.mxu0  ;;  %v2812_v11 = vpop.f32.mrf.mxu1  ;;  %9770 = vmatmul.mubr.msk.bf16.vlgmr.msra.gmra.mxu1 %vm1893_vm3, %v3782_v32 }
 0x2ca   : > { %v2683_v5 = vadd.f32 %v2621_v14, %v11670_v39  ;;  %9773 = vmatprep.mubr.msk.bf16.mxu1 %vm10692_vm0, %v13142_v0  ;;  %9844 = vmatpush3.bf16.msra.mxu1 %v4176_v40  ;;  %v3767_v39 = vld [vmem:[#allocation2 + $0x2d] sm:$0xff] }
 0x2cb   : > { %v9510_v46 = vpop.f32.mrf.mxu0  ;;  %v9555_v21 = vpop.f32.mrf.mxu1  ;;  %9919 = vmatprep.subr.bf16.mxu1 %v13142_v0  ;;  %v3783_v9 = vpack.c.bf16 %v3768_v10, %v3767_v39  ;;  %v3774_v10 = vld [vmem:[#allocation2 + $0x65] sm:$0xff] }
 0x2cc   : > { %v11792_v1 = vadd.f32 %v2799_v59, %v2683_v5  ;;  %v3591_v46 = vld [vmem:[#allocation2 + $0x3c] sm:$0xff] }
 0x2cd   : > { %v2626_v26 = vpop.f32.mrf.mxu0  ;;  %9688 = vmatmul.mubr.msk.bf16.gmra.mxu0 %vm1893_vm3, %v3256_v29  ;;  %v2815_v4 = vpop.f32.mrf.mxu1  ;;  %v3606_v29 = vpack.c.bf16 %v3592_v48, %v3591_v46 }
 0x2ce   : > { %v2684_v63 = vadd.f32 %v2626_v26, %v11679_v13  ;;  %9731 = vmatprep.mubr.msk.bf16.mxu0 %vm10692_vm0, %v13142_v0 }
 0x2cf   : > { %v9513_v44 = vpop.f32.mrf.mxu0  ;;  %v9556_v45 = vpop.f32.mrf.mxu1 }
 0x2d0   : > { %v11801_v51 = vadd.f32 %v2804_v17, %v2684_v63 }
 0x2d1   : > { %v2629_v19 = vpop.f32.mrf.mxu0  ;;  %v2820_v24 = vpop.f32.mrf.mxu1  ;;  %9774 = vmatmul.mubr.msk.bf16.gmra.mxu1 %vm1893_vm3, %v3783_v9 }
 0x2d2   : > { %v2685_v59 = vadd.f32 %v2629_v19, %v11687_v57  ;;  %9777 = vmatprep.mubr.msk.bf16.mxu1 %vm10692_vm0, %v13142_v0  ;;  %v3769_v57 = vld [vmem:[#allocation2 + $0x3d] sm:$0xff] }
 0x2d3   : > { %v9514_v13 = vpop.f32.mrf.mxu0  ;;  %v9559_v50 = vpop.f32.mrf.mxu1  ;;  %v3784_v31 = vpack.c.bf16 %v3770_v3, %v3769_v57 }
 0x2d4   : > { %v11808_v28 = vadd.f32 %v2807_v41, %v2685_v59 }
 0x2d5   : > { %v2634_v37 = vpop.f32.mrf.mxu0  ;;  %9732 = vmatmul.mubr.msk.bf16.vlgmr.msra.gmra.mxu0 %vm1893_vm3, %v3604_v36  ;;  %v2823_v49 = vpop.f32.mrf.mxu1 }
 0x2d6   : > { %v2686_v17 = vadd.f32 %v2634_v37, %v11694_v7  ;;  %9806 = vmatpush3.bf16.msra.mxu0 %v3998_v61  ;;  %9735 = vmatprep.mubr.msk.bf16.mxu0 %vm10692_vm0, %v13142_v0  ;;  %v3605_v7 = vpack.c.bf16 %v11519_v47, %v3589_v60  ;;  %v3593_v61 = vld [vmem:[#allocation2 + $0x4c] sm:$0xff]  ;;  %v3776_v37 = vld [vmem:[#allocation2 + $0x75] sm:$0xff] }
 0x2d7   : > { %v9517_v25 = vpop.f32.mrf.mxu0  ;;  %v9560_v54 = vpop.f32.mrf.mxu1  ;;  %9881 = vmatprep.subr.bf16.mxu0 %v13142_v0  ;;  %v3607_v50 = vpack.c.bf16 %v3594_v22, %v3593_v61 }
 0x2d8   : > { %v11818_v55 = vadd.f32 %v2812_v11, %v2686_v17 }
 0x2d9   : > { %v2637_v27 = vpop.f32.mrf.mxu0  ;;  %v2828_v62 = vpop.f32.mrf.mxu1  ;;  %9778 = vmatmul.mubr.msk.bf16.gmra.mxu1 %vm1893_vm3, %v3784_v31 }
 0x2da   : > { %v2687_v15 = vadd.f32 %v2637_v27, %v11701_v56  ;;  %9781 = vmatprep.mubr.msk.bf16.mxu1 %vm10692_vm0, %v13142_v0  ;;  %v3771_v56 = vld [vmem:[#allocation2 + $0x4d] sm:$0xff] }
 0x2db   : > { %v9518_v36 = vpop.f32.mrf.mxu0  ;;  %v9563_v38 = vpop.f32.mrf.mxu1  ;;  %v3785_v40 = vpack.c.bf16 %v3772_v35, %v3771_v56 }
 0x2dc   : > { %v11825_v41 = vadd.f32 %v2815_v4, %v2687_v15  ;;  %v3595_v38 = vld [vmem:[#allocation2 + $0x5c] sm:$0xff] }
 0x2dd   : > { %v2642_v34 = vpop.f32.mrf.mxu0  ;;  %9736 = vmatmul.mubr.msk.bf16.gmra.mxu0 %vm1893_vm3, %v3605_v7  ;;  %v2831_v33 = vpop.f32.mrf.mxu1 }
 0x2de   : > { %v2688_v23 = vadd.f32 %v2642_v34, %v11707_v2  ;;  %9739 = vmatprep.mubr.msk.bf16.mxu0 %vm10692_vm0, %v13142_v0 }
 0x2df   : > { %v9521_v16 = vpop.f32.mrf.mxu0  ;;  %v9564_v32 = vpop.f32.mrf.mxu1 }
 0x2e0   : > { %v11831_v14 = vadd.f32 %v2820_v24, %v2688_v23 }
 0x2e1   : > { %v2645_v47 = vpop.f32.mrf.mxu0  ;;  %v2836_v11 = vpop.f32.mrf.mxu1  ;;  %9782 = vmatmul.mubr.msk.bf16.gmra.mxu1 %vm1893_vm3, %v3785_v40 }
 0x2e2   : > { %v2689_v5 = vadd.f32 %v2645_v47, %v11714_v42  ;;  %9785 = vmatprep.mubr.msk.bf16.mxu1 %vm10692_vm0, %v13142_v0  ;;  %v3773_v42 = vld [vmem:[#allocation2 + $0x5d] sm:$0xff] }
 0x2e3   : > { %v9522_v2 = vpop.f32.mrf.mxu0  ;;  %v9567_v21 = vpop.f32.mrf.mxu1  ;;  %v3786_v9 = vpack.c.bf16 %v3774_v10, %v3773_v42 }
 0x2e4   : > { %v11837_v26 = vadd.f32 %v2823_v49, %v2689_v5  ;;  %v3597_v21 = vld [vmem:[#allocation2 + $0x6c] sm:$0xff] }
 0x2e5   : > { %v2650_v4 = vpop.f32.mrf.mxu0  ;;  %9740 = vmatmul.mubr.msk.bf16.gmra.mxu0 %vm1893_vm3, %v3606_v29  ;;  %v2839_v63 = vpop.f32.mrf.mxu1 }
 0x2e6   : > { %v2690_v39 = vadd.f32 %v2650_v4, %v11720_v43  ;;  %9743 = vmatprep.mubr.msk.bf16.mxu0 %vm10692_vm0, %v13142_v0 }
 0x2e7   : > { %v9525_v44 = vpop.f32.mrf.mxu0  ;;  %v9568_v45 = vpop.f32.mrf.mxu1 }
 0x2e8   : > { %v11843_v19 = vadd.f32 %v2828_v62, %v2690_v39  ;;  %v3596_v62 = vld [vmem:[#allocation2 + $0x64] sm:$0xff] }
 0x2e9   : > { %v2653_v24 = vpop.f32.mrf.mxu0  ;;  %v2844_v59 = vpop.f32.mrf.mxu1  ;;  %9786 = vmatmul.mubr.msk.bf16.gmra.mxu1 %vm1893_vm3, %v3786_v9  ;;  %v3608_v35 = vpack.c.bf16 %v3596_v62, %v3595_v38  ;;  %v3602_v62 = vld [vmem:[#allocation2 + $0x94] sm:$0xff] }
 0x2ea   : > { %v2691_v13 = vadd.f32 %v2653_v24, %v11727_v20  ;;  %9789 = vmatprep.mubr.msk.bf16.mxu1 %vm10692_vm0, %v13142_v0  ;;  %v3775_v20 = vld [vmem:[#allocation2 + $0x6d] sm:$0xff] }
 0x2eb   : > { %v9526_v43 = vpop.f32.mrf.mxu0  ;;  %v9571_v3 = vpop.f32.mrf.mxu1  ;;  %v3787_v27 = vpack.c.bf16 %v3776_v37, %v3775_v20 }
 0x2ec   : > { %v11849_v49 = vadd.f32 %v2831_v33, %v2691_v13  ;;  %v3778_v33 = vld [vmem:[#allocation2 + $0x85] sm:$0xff] }
 0x2ed   : > { %v2658_v17 = vpop.f32.mrf.mxu0  ;;  %9744 = vmatmul.mubr.msk.bf16.gmra.mxu0 %vm1893_vm3, %v3607_v50  ;;  %v2847_v57 = vpop.f32.mrf.mxu1  ;;  %v3599_v50 = vld [vmem:[#allocation2 + $0x7c] sm:$0xff] }
 0x2ee   : > { %v2692_v25 = vadd.f32 %v2658_v17, %v11733_v18  ;;  %9747 = vmatprep.mubr.msk.bf16.mxu0 %vm10692_vm0, %v13142_v0  ;;  %v3781_v17 = vld [vmem:[#allocation2 + $0x9d] sm:$0xff] }
 0x2ef   : > { %v9529_v54 = vpop.f32.mrf.mxu0  ;;  %v9572_v31 = vpop.f32.mrf.mxu1 }
 0x2f0   : > { %v11855_v15 = vadd.f32 %v2836_v11, %v2692_v25  ;;  %v3598_v11 = vld [vmem:[#allocation2 + $0x74] sm:$0xff] }
 0x2f1   : > { %v2661_v60 = vpop.f32.mrf.mxu0  ;;  %v2852_v36 = vpop.f32.mrf.mxu1  ;;  %9790 = vmatmul.mubr.msk.bf16.gmra.mxu1 %vm1893_vm3, %v3787_v27  ;;  %v3609_v10 = vpack.c.bf16 %v3598_v11, %v3597_v21  ;;  %v3790_v27 = vpack.c.bf16 %v3781_v17, %v3781_v17 }
 0x2f2   : > { %v2693_v7 = vadd.f32 %v2661_v60, %v11740_v12  ;;  %9793 = vmatprep.mubr.msk.bf16.mxu1 %vm10692_vm0, %v13142_v0  ;;  %v3777_v12 = vld [vmem:[#allocation2 + $0x7d] sm:$0xff] }
 0x2f3   : > { %v9530_v18 = vpop.f32.mrf.mxu0  ;;  %v9575_v34 = vpop.f32.mrf.mxu1  ;;  %v3788_v47 = vpack.c.bf16 %v3778_v33, %v3777_v12  ;;  %v4122_v33 = vld [vmem:[#allocation2 + $0x27] sm:$0xff] }
 0x2f4   : > { %v11861_v23 = vadd.f32 %v2839_v63, %v2693_v7  ;;  %v3780_v63 = vld [vmem:[#allocation2 + $0x95] sm:$0xff]  ;;  %v3601_v18 = vld [vmem:[#allocation2 + $0x8c] sm:$0xff] }
 0x2f5   : > { %v2666_v56 = vpop.f32.mrf.mxu0  ;;  %9748 = vmatmul.mubr.msk.bf16.gmra.mxu0 %vm1893_vm3, %v3608_v35  ;;  %v2855_v16 = vpop.f32.mrf.mxu1  ;;  %v3611_v35 = vpack.c.bf16 %v3602_v62, %v3601_v18 }
 0x2f6   : > { %v2694_v32 = vadd.f32 %v2666_v56, %v11746_v53  ;;  %9751 = vmatprep.mubr.msk.bf16.mxu0 %vm10692_vm0, %v13142_v0  ;;  %v4503_v16 = vld [vmem:[%s13120_s3 + $0x3c] sm:$0xf] }
 0x2f7   : > { %v9533_v40 = vpop.f32.mrf.mxu0  ;;  %v9576_v48 = vpop.f32.mrf.mxu1 }
 0x2f8   : > { %v11867_v5 = vadd.f32 %v2844_v59, %v2694_v32  ;;  %v3600_v59 = vld [vmem:[#allocation2 + $0x84] sm:$0xff] }
 0x2f9   : > { %v2669_v46 = vpop.f32.mrf.mxu0  ;;  %v3144_v2 = vpop.f32.mrf.mxu1  ;;  %9794 = vmatmul.mubr.msk.bf16.gmra.mxu1 %vm1893_vm3, %v3788_v47  ;;  %v4121_v40 = vld [vmem:[#allocation2 + $0x1f] sm:$0xff] }
 0x2fa   : > { %v2695_v29 = vadd.f32 %v2669_v46, %v11753_v6  ;;  %9797 = vmatprep.mubr.msk.bf16.mxu1 %vm10692_vm0, %v13142_v0  ;;  %v3779_v6 = vld [vmem:[#allocation2 + $0x8d] sm:$0xff]  ;;  %v4138_v11 = vpack.c.bf16 %v4122_v33, %v4121_v40  ;;  %v4532_v46 = vsel %vm1921_vm2, %v4503_v16, 0  ;;  %v4128_v40 = vld [vmem:[#allocation2 + $0x57] sm:$0xff] }
 0x2fb   : > { %v9534_v53 = vpop.f32.mrf.mxu0  ;;  %v9619_v4 = vpop.f32.mrf.mxu1  ;;  %v3789_v24 = vpack.c.bf16 %v3780_v63, %v3779_v6 }
 0x2fc   : > { %v11873_v39 = vadd.f32 %v2847_v57, %v2695_v29 }
 0x2fd   : > { %v2674_v42 = vpop.f32.mrf.mxu0  ;;  %9752 = vmatmul.mubr.msk.bf16.gmra.mxu0 %vm1893_vm3, %v3609_v10  ;;  %v3147_v44 = vpop.f32.mrf.mxu1 }
 0x2fe   : > { %v2696_v45 = vadd.f32 %v2674_v42, %v11760_v58  ;;  %9755 = vmatprep.mubr.msk.bf16.mxu0 %vm10692_vm0, %v13142_v0  ;;  %v3610_v58 = vpack.c.bf16 %v3600_v59, %v3599_v50  ;;  %v4124_v42 = vld [vmem:[#allocation2 + $0x37] sm:$0xff] }
 0x2ff   : > { %v9537_v9 = vpop.f32.mrf.mxu0  ;;  %v9620_v22 = vpop.f32.mrf.mxu1 }
 0x300   : > { %v11879_v13 = vadd.f32 %v2852_v36, %v2696_v45 }
 0x301   : > { %v2677_v61 = vpop.f32.mrf.mxu0  ;;  %v3152_v43 = vpop.f32.mrf.mxu1  ;;  %9798 = vmatmul.mubr.msk.bf16.gmra.mxu1 %vm1893_vm3, %v3789_v24 }
 0x302   : > { %9801 = vmatprep.mubr.msk.bf16.mxu1 %vm10692_vm0, %v13142_v0  ;;  %v3944_v61 = vld [vmem:[#allocation2 + $0x26] sm:$0xff] }
 0x303   : > { %v9538_v3 = vpop.f32.mrf.mxu0  ;;  %v9623_v37 = vpop.f32.mrf.mxu1 }
 0x304   : > { %v3943_v37 = vld [vmem:[#allocation2 + $0x1e] sm:$0xff] }
 0x305   : > { %v2966_v57 = vpop.f32.mrf.mxu0  ;;  %9756 = vmatmul.mubr.msk.bf16.gmra.mxu0 %vm1893_vm3, %v3610_v58  ;;  %v3155_v25 = vpop.f32.mrf.mxu1 }
 0x306   : > { %v3036_v20 = vadd.f32 %v2966_v57, %v11769_v8  ;;  %9759 = vmatprep.mubr.msk.bf16.mxu0 %vm10692_vm0, %v13142_v0  ;;  %v3960_v57 = vpack.c.bf16 %v3944_v61, %v3943_v37 }
 0x307   : > { %v9581_v54 = vpop.f32.mrf.mxu0  ;;  %v9624_v31 = vpop.f32.mrf.mxu1 }
 0x308   : > { %v11888_v60 = vadd.f32 %v3144_v2, %v3036_v20  ;;  %v3603_v2 = vld [vmem:[#allocation2 + $0x9c] sm:$0xff]  ;;  %v4126_v54 = vld [vmem:[#allocation2 + $0x47] sm:$0xff] }
 0x309   : > { %v2969_v36 = vpop.f32.mrf.mxu0  ;;  %v3160_v7 = vpop.f32.mrf.mxu1  ;;  %9802 = vmatmul.mubr.msk.bf16.gmra.mxu1 %vm1893_vm3, %v3790_v27  ;;  %v3612_v4 = vpack.c.bf16 %v3603_v2, %v3603_v2 }
 0x30a   : > { %v3037_v38 = vadd.f32 %v2969_v36, %v11775_v52  ;;  %9845 = vmatprep.mubr.msk.bf16.mxu1 %vm10692_vm0, %v13142_v0 }
 0x30b   : > { %v9582_v8 = vpop.f32.mrf.mxu0  ;;  %v9627_v34 = vpop.f32.mrf.mxu1 }
 0x30c   : > { %v11894_v56 = vadd.f32 %v3147_v44, %v3037_v38  ;;  %v3946_v8 = vld [vmem:[#allocation2 + $0x36] sm:$0xff] }
 0x30d   : > { %v2974_v32 = vpop.f32.mrf.mxu0  ;;  %9760 = vmatmul.mubr.msk.bf16.gmra.mxu0 %vm1893_vm3, %v3611_v35  ;;  %v3163_v12 = vpop.f32.mrf.mxu1 }
 0x30e   : > { %v3038_v52 = vadd.f32 %v2974_v32, %v11785_v30  ;;  %9763 = vmatprep.mubr.msk.bf16.mxu0 %vm10692_vm0, %v13142_v0 }
 0x30f   : > { %v9585_v48 = vpop.f32.mrf.mxu0  ;;  %v9628_v47 = vpop.f32.mrf.mxu1 }
 0x310   : > { %v11904_v29 = vadd.f32 %v3152_v43, %v3038_v52  ;;  %v4325_v43 = vld [vmem:[%s13120_s3 + $0x38] sm:$0xf] }
 0x311   : > { %v2977_v21 = vpop.f32.mrf.mxu0  ;;  %v3168_v53 = vpop.f32.mrf.mxu1  ;;  %9846 = vmatmul.mubr.msk.bf16.vlgmr.msra.gmra.mxu1 %vm1893_vm3, %v4138_v11 }
 0x312   : > { %v3039_v10 = vadd.f32 %v2977_v21, %v11792_v1  ;;  %9849 = vmatprep.mubr.msk.bf16.mxu1 %vm10692_vm0, %v13142_v0  ;;  %9920 = vmatpush3.bf16.msra.mxu1 %v4532_v46  ;;  %v4123_v1 = vld [vmem:[#allocation2 + $0x2f] sm:$0xff] }
 0x313   : > { %v9586_v30 = vpop.f32.mrf.mxu0  ;;  %v9631_v63 = vpop.f32.mrf.mxu1  ;;  %9995 = vmatprep.subr.bf16.mxu1 %v13142_v0  ;;  %v4139_v59 = vpack.c.bf16 %v4124_v42, %v4123_v1  ;;  %v4130_v1 = vld [vmem:[#allocation2 + $0x67] sm:$0xff] }
 0x314   : > { %v11911_v44 = vadd.f32 %v3155_v25, %v3039_v10  ;;  %v4354_v25 = vsel %vm1921_vm2, %v4325_v43, 0  ;;  %v3948_v10 = vld [vmem:[#allocation2 + $0x46] sm:$0xff] }
 0x315   : > { %v2982_v45 = vpop.f32.mrf.mxu0  ;;  %9764 = vmatmul.mubr.msk.bf16.gmra.mxu0 %vm1893_vm3, %v3612_v4  ;;  %v3171_v6 = vpop.f32.mrf.mxu1 }
 0x316   : > { %v3040_v9 = vadd.f32 %v2982_v45, %v11801_v51  ;;  %9807 = vmatprep.mubr.msk.bf16.mxu0 %vm10692_vm0, %v13142_v0  ;;  %v3947_v45 = vld [vmem:[#allocation2 + $0x3e] sm:$0xff] }
 0x317   : > { %v9589_v22 = vpop.f32.mrf.mxu0  ;;  %v9632_v24 = vpop.f32.mrf.mxu1 }
 0x318   : > { %v11920_v50 = vadd.f32 %v3160_v7, %v3040_v9 }
 0x319   : > { %v2985_v3 = vpop.f32.mrf.mxu0  ;;  %v3176_v58 = vpop.f32.mrf.mxu1  ;;  %9850 = vmatmul.mubr.msk.bf16.gmra.mxu1 %vm1893_vm3, %v4139_v59 }
 0x31a   : > { %v3041_v51 = vadd.f32 %v2985_v3, %v11808_v28  ;;  %9853 = vmatprep.mubr.msk.bf16.mxu1 %vm10692_vm0, %v13142_v0  ;;  %v4125_v28 = vld [vmem:[#allocation2 + $0x3f] sm:$0xff] }
 0x31b   : > { %v9590_v17 = vpop.f32.mrf.mxu0  ;;  %v9635_v20 = vpop.f32.mrf.mxu1  ;;  %v4140_v18 = vpack.c.bf16 %v4126_v54, %v4125_v28 }
 0x31c   : > { %v11927_v31 = vadd.f32 %v3163_v12, %v3041_v51  ;;  %v3950_v51 = vld [vmem:[#allocation2 + $0x56] sm:$0xff]  ;;  %v3949_v20 = vld [vmem:[#allocation2 + $0x4e] sm:$0xff] }
 0x31d   : > { %v2990_v27 = vpop.f32.mrf.mxu0  ;;  %9808 = vmatmul.mubr.msk.bf16.vlgmr.msra.gmra.mxu0 %vm1893_vm3, %v3960_v57  ;;  %v3179_v62 = vpop.f32.mrf.mxu1  ;;  %v3963_v54 = vpack.c.bf16 %v3950_v51, %v3949_v20 }
 0x31e   : > { %v3042_v36 = vadd.f32 %v2990_v27, %v11818_v55  ;;  %9882 = vmatpush3.bf16.msra.mxu0 %v4354_v25  ;;  %9811 = vmatprep.mubr.msk.bf16.mxu0 %vm10692_vm0, %v13142_v0  ;;  %v3945_v55 = vld [vmem:[#allocation2 + $0x2e] sm:$0xff] }
 0x31f   : > { %v9593_v7 = vpop.f32.mrf.mxu0  ;;  %v9636_v38 = vpop.f32.mrf.mxu1  ;;  %9957 = vmatprep.subr.bf16.mxu0 %v13142_v0  ;;  %v3961_v12 = vpack.c.bf16 %v3946_v8, %v3945_v55 }
 0x320   : > { %v11934_v35 = vadd.f32 %v3168_v53, %v3042_v36 }
 0x321   : > { %v2993_v34 = vpop.f32.mrf.mxu0  ;;  %v3184_v33 = vpop.f32.mrf.mxu1  ;;  %9854 = vmatmul.mubr.msk.bf16.gmra.mxu1 %vm1893_vm3, %v4140_v18 }
 0x322   : > { %v3043_v16 = vadd.f32 %v2993_v34, %v11825_v41  ;;  %9857 = vmatprep.mubr.msk.bf16.mxu1 %vm10692_vm0, %v13142_v0  ;;  %v4127_v41 = vld [vmem:[#allocation2 + $0x4f] sm:$0xff] }
 0x323   : > { %v9594_v32 = vpop.f32.mrf.mxu0  ;;  %v9639_v52 = vpop.f32.mrf.mxu1  ;;  %v4141_v53 = vpack.c.bf16 %v4128_v40, %v4127_v41 }
 0x324   : > { %v11940_v48 = vadd.f32 %v3171_v6, %v3043_v16  ;;  %v3962_v6 = vpack.c.bf16 %v3948_v10, %v3947_v45  ;;  %v3951_v52 = vld [vmem:[#allocation2 + $0x5e] sm:$0xff] }
 0x325   : > { %v2998_v47 = vpop.f32.mrf.mxu0  ;;  %9812 = vmatmul.mubr.msk.bf16.gmra.mxu0 %vm1893_vm3, %v3961_v12  ;;  %v3187_v11 = vpop.f32.mrf.mxu1 }
 0x326   : > { %v3044_v46 = vadd.f32 %v2998_v47, %v11831_v14  ;;  %9815 = vmatprep.mubr.msk.bf16.mxu0 %vm10692_vm0, %v13142_v0 }
 0x327   : > { %v9597_v2 = vpop.f32.mrf.mxu0  ;;  %v9640_v21 = vpop.f32.mrf.mxu1 }
 0x328   : > { %v11946_v30 = vadd.f32 %v3176_v58, %v3044_v46 }
 0x329   : > { %v3001_v4 = vpop.f32.mrf.mxu0  ;;  %v3192_v63 = vpop.f32.mrf.mxu1  ;;  %9858 = vmatmul.mubr.msk.bf16.gmra.mxu1 %vm1893_vm3, %v4141_v53 }
 0x32a   : > { %v3045_v42 = vadd.f32 %v3001_v4, %v11837_v26  ;;  %9861 = vmatprep.mubr.msk.bf16.mxu1 %vm10692_vm0, %v13142_v0  ;;  %v4129_v26 = vld [vmem:[#allocation2 + $0x5f] sm:$0xff] }
 0x32b   : > { %v9598_v14 = vpop.f32.mrf.mxu0  ;;  %v9643_v9 = vpop.f32.mrf.mxu1  ;;  %v4142_v58 = vpack.c.bf16 %v4130_v1, %v4129_v26 }
 0x32c   : > { %v11952_v22 = vadd.f32 %v3179_v62, %v3045_v42  ;;  %v4132_v62 = vld [vmem:[#allocation2 + $0x77] sm:$0xff]  ;;  %v3953_v9 = vld [vmem:[#allocation2 + $0x6e] sm:$0xff] }
 0x32d   : > { %v3006_v24 = vpop.f32.mrf.mxu0  ;;  %9816 = vmatmul.mubr.msk.bf16.gmra.mxu0 %vm1893_vm3, %v3962_v6  ;;  %v3195_v59 = vpop.f32.mrf.mxu1 }
 0x32e   : > { %v3046_v61 = vadd.f32 %v3006_v24, %v11843_v19  ;;  %9819 = vmatprep.mubr.msk.bf16.mxu0 %vm10692_vm0, %v13142_v0 }
 0x32f   : > { %v9601_v43 = vpop.f32.mrf.mxu0  ;;  %v9644_v3 = vpop.f32.mrf.mxu1 }
 0x330   : > { %v11958_v37 = vadd.f32 %v3184_v33, %v3046_v61  ;;  %v3952_v33 = vld [vmem:[#allocation2 + $0x66] sm:$0xff] }
 0x331   : > { %v3009_v17 = vpop.f32.mrf.mxu0  ;;  %v3200_v57 = vpop.f32.mrf.mxu1  ;;  %9862 = vmatmul.mubr.msk.bf16.gmra.mxu1 %vm1893_vm3, %v4142_v58  ;;  %v3964_v40 = vpack.c.bf16 %v3952_v33, %v3951_v52  ;;  %v3958_v33 = vld [vmem:[#allocation2 + $0x96] sm:$0xff] }
 0x332   : > { %v3047_v25 = vadd.f32 %v3009_v17, %v11849_v49  ;;  %9865 = vmatprep.mubr.msk.bf16.mxu1 %vm10692_vm0, %v13142_v0  ;;  %v4131_v49 = vld [vmem:[#allocation2 + $0x6f] sm:$0xff] }
 0x333   : > { %v9602_v19 = vpop.f32.mrf.mxu0  ;;  %v9647_v27 = vpop.f32.mrf.mxu1  ;;  %v4143_v34 = vpack.c.bf16 %v4132_v62, %v4131_v49 }
 0x334   : > { %v11964_v36 = vadd.f32 %v3187_v11, %v3047_v25  ;;  %v4134_v11 = vld [vmem:[#allocation2 + $0x87] sm:$0xff] }
 0x335   : > { %v3014_v28 = vpop.f32.mrf.mxu0  ;;  %9820 = vmatmul.mubr.msk.bf16.gmra.mxu0 %vm1893_vm3, %v3963_v54  ;;  %v3203_v7 = vpop.f32.mrf.mxu1  ;;  %v3955_v54 = vld [vmem:[#allocation2 + $0x7e] sm:$0xff] }
 0x336   : > { %v3048_v38 = vadd.f32 %v3014_v28, %v11855_v15  ;;  %9823 = vmatprep.mubr.msk.bf16.mxu0 %vm10692_vm0, %v13142_v0  ;;  %v4137_v28 = vld [vmem:[#allocation2 + $0x9f] sm:$0xff] }
 0x337   : > { %v9605_v18 = vpop.f32.mrf.mxu0  ;;  %v9648_v8 = vpop.f32.mrf.mxu1 }
 0x338   : > { %v11970_v16 = vadd.f32 %v3192_v63, %v3048_v38  ;;  %v3954_v63 = vld [vmem:[#allocation2 + $0x76] sm:$0xff] }
 0x339   : > { %v3017_v55 = vpop.f32.mrf.mxu0  ;;  %v3208_v32 = vpop.f32.mrf.mxu1  ;;  %9866 = vmatmul.mubr.msk.bf16.gmra.mxu1 %vm1893_vm3, %v4143_v34  ;;  %v3965_v1 = vpack.c.bf16 %v3954_v63, %v3953_v9  ;;  %v4146_v34 = vpack.c.bf16 %v4137_v28, %v4137_v28 }
 0x33a   : > { %v3049_v12 = vadd.f32 %v3017_v55, %v11861_v23  ;;  %9869 = vmatprep.mubr.msk.bf16.mxu1 %vm10692_vm0, %v13142_v0  ;;  %v4133_v23 = vld [vmem:[#allocation2 + $0x7f] sm:$0xff] }
 0x33b   : > { %v9606_v15 = vpop.f32.mrf.mxu0  ;;  %v9651_v47 = vpop.f32.mrf.mxu1  ;;  %v4144_v4 = vpack.c.bf16 %v4134_v11, %v4133_v23  ;;  %v4478_v11 = vld [vmem:[#allocation2 + $0x32] sm:$0xff] }
 0x33c   : > { %v11976_v46 = vadd.f32 %v3195_v59, %v3049_v12  ;;  %v4136_v59 = vld [vmem:[#allocation2 + $0x97] sm:$0xff]  ;;  %v3957_v15 = vld [vmem:[#allocation2 + $0x8e] sm:$0xff] }
 0x33d   : > { %v3022_v41 = vpop.f32.mrf.mxu0  ;;  %9824 = vmatmul.mubr.msk.bf16.gmra.mxu0 %vm1893_vm3, %v3964_v40  ;;  %v3211_v2 = vpop.f32.mrf.mxu1  ;;  %v3967_v40 = vpack.c.bf16 %v3958_v33, %v3957_v15 }
 0x33e   : > { %v3050_v21 = vadd.f32 %v3022_v41, %v11867_v5  ;;  %9827 = vmatprep.mubr.msk.bf16.mxu0 %vm10692_vm0, %v13142_v0  ;;  %v4859_v2 = vld [vmem:[%s13120_s3 + $0x44] sm:$0xf] }
 0x33f   : > { %v9609_v53 = vpop.f32.mrf.mxu0  ;;  %v9652_v10 = vpop.f32.mrf.mxu1 }
 0x340   : > { %v11982_v42 = vadd.f32 %v3200_v57, %v3050_v21  ;;  %v3956_v57 = vld [vmem:[#allocation2 + $0x86] sm:$0xff] }
 0x341   : > { %v3025_v45 = vpop.f32.mrf.mxu0  ;;  %v3500_v14 = vpop.f32.mrf.mxu1  ;;  %9870 = vmatmul.mubr.msk.bf16.gmra.mxu1 %vm1893_vm3, %v4144_v4  ;;  %v4477_v53 = vld [vmem:[#allocation2 + $0x2a] sm:$0xff] }
 0x342   : > { %v3051_v6 = vadd.f32 %v3025_v45, %v11873_v39  ;;  %9873 = vmatprep.mubr.msk.bf16.mxu1 %vm10692_vm0, %v13142_v0  ;;  %v4135_v39 = vld [vmem:[#allocation2 + $0x8f] sm:$0xff]  ;;  %v4494_v63 = vpack.c.bf16 %v4478_v11, %v4477_v53  ;;  %v4888_v45 = vsel %vm1921_vm2, %v4859_v2, 0  ;;  %v4484_v53 = vld [vmem:[#allocation2 + $0x62] sm:$0xff] }
 0x343   : > { %v9610_v5 = vpop.f32.mrf.mxu0  ;;  %v9695_v24 = vpop.f32.mrf.mxu1  ;;  %v4145_v17 = vpack.c.bf16 %v4136_v59, %v4135_v39 }
 0x344   : > { %v11988_v61 = vadd.f32 %v3203_v7, %v3051_v6 }
 0x345   : > { %v3030_v26 = vpop.f32.mrf.mxu0  ;;  %9828 = vmatmul.mubr.msk.bf16.gmra.mxu0 %vm1893_vm3, %v3965_v1  ;;  %v3503_v43 = vpop.f32.mrf.mxu1 }
 0x346   : > { %v3052_v3 = vadd.f32 %v3030_v26, %v11879_v13  ;;  %9831 = vmatprep.mubr.msk.bf16.mxu0 %vm10692_vm0, %v13142_v0  ;;  %v3966_v13 = vpack.c.bf16 %v3956_v57, %v3955_v54  ;;  %v4480_v26 = vld [vmem:[#allocation2 + $0x42] sm:$0xff] }
 0x347   : > { %v9613_v58 = vpop.f32.mrf.mxu0  ;;  %v9696_v51 = vpop.f32.mrf.mxu1 }
 0x348   : > { %v11994_v25 = vadd.f32 %v3208_v32, %v3052_v3 }
 0x349   : > { %v3033_v20 = vpop.f32.mrf.mxu0  ;;  %v3508_v19 = vpop.f32.mrf.mxu1  ;;  %9874 = vmatmul.mubr.msk.bf16.gmra.mxu1 %vm1893_vm3, %v4145_v17 }
 0x34a   : > { %9877 = vmatprep.mubr.msk.bf16.mxu1 %vm10692_vm0, %v13142_v0  ;;  %v4300_v20 = vld [vmem:[#allocation2 + $0x28] sm:$0xff] }
 0x34b   : > { %v9614_v27 = vpop.f32.mrf.mxu0  ;;  %v9699_v62 = vpop.f32.mrf.mxu1 }
 0x34c   : > { %v4299_v62 = vld [vmem:[#allocation2 + $0x20] sm:$0xff] }
 0x34d   : > { %v3322_v7 = vpop.f32.mrf.mxu0  ;;  %9832 = vmatmul.mubr.msk.bf16.gmra.mxu0 %vm1893_vm3, %v3966_v13  ;;  %v3511_v38 = vpop.f32.mrf.mxu1 }
 0x34e   : > { %v3392_v49 = vadd.f32 %v3322_v7, %v11888_v60  ;;  %9835 = vmatprep.mubr.msk.bf16.mxu0 %vm10692_vm0, %v13142_v0  ;;  %v4316_v7 = vpack.c.bf16 %v4300_v20, %v4299_v62 }
 0x34f   : > { %v9657_v18 = vpop.f32.mrf.mxu0  ;;  %v9700_v8 = vpop.f32.mrf.mxu1 }
 0x350   : > { %v12003_v55 = vadd.f32 %v3500_v14, %v3392_v49  ;;  %v3959_v14 = vld [vmem:[#allocation2 + $0x9e] sm:$0xff]  ;;  %v4482_v18 = vld [vmem:[#allocation2 + $0x52] sm:$0xff] }
 0x351   : > { %v3325_v32 = vpop.f32.mrf.mxu0  ;;  %v3516_v12 = vpop.f32.mrf.mxu1  ;;  %9878 = vmatmul.mubr.msk.bf16.gmra.mxu1 %vm1893_vm3, %v4146_v34  ;;  %v3968_v24 = vpack.c.bf16 %v3959_v14, %v3959_v14 }
 0x352   : > { %v3393_v52 = vadd.f32 %v3325_v32, %v11894_v56  ;;  %9921 = vmatprep.mubr.msk.bf16.mxu1 %vm10692_vm0, %v13142_v0 }
 0x353   : > { %v9658_v60 = vpop.f32.mrf.mxu0  ;;  %v9703_v47 = vpop.f32.mrf.mxu1 }
 0x354   : > { %v12009_v41 = vadd.f32 %v3503_v43, %v3393_v52  ;;  %v4302_v60 = vld [vmem:[#allocation2 + $0x38] sm:$0xff] }
 0x355   : > { %v3330_v21 = vpop.f32.mrf.mxu0  ;;  %9836 = vmatmul.mubr.msk.bf16.gmra.mxu0 %vm1893_vm3, %v3967_v40  ;;  %v3519_v23 = vpop.f32.mrf.mxu1 }
 0x356   : > { %v3394_v56 = vadd.f32 %v3330_v21, %v11904_v29  ;;  %9839 = vmatprep.mubr.msk.bf16.mxu0 %vm10692_vm0, %v13142_v0 }
 0x357   : > { %v9661_v10 = vpop.f32.mrf.mxu0  ;;  %v9704_v4 = vpop.f32.mrf.mxu1 }
 0x358   : > { %v12019_v6 = vadd.f32 %v3508_v19, %v3394_v56  ;;  %v4681_v19 = vld [vmem:[%s13120_s3 + $0x40] sm:$0xf] }
 0x359   : > { %v3333_v9 = vpop.f32.mrf.mxu0  ;;  %v3524_v5 = vpop.f32.mrf.mxu1  ;;  %9922 = vmatmul.mubr.msk.bf16.vlgmr.msra.gmra.mxu1 %vm1893_vm3, %v4494_v63 }
 0x35a   : > { %v3395_v1 = vadd.f32 %v3333_v9, %v11911_v44  ;;  %9925 = vmatprep.mubr.msk.bf16.mxu1 %vm10692_vm0, %v13142_v0  ;;  %9996 = vmatpush3.bf16.msra.mxu1 %v4888_v45  ;;  %v4479_v44 = vld [vmem:[#allocation2 + $0x3a] sm:$0xff] }
 0x35b   : > { %v9662_v29 = vpop.f32.mrf.mxu0  ;;  %v9707_v59 = vpop.f32.mrf.mxu1  ;;  %10071 = vmatprep.subr.bf16.mxu1 %v13142_v0  ;;  %v4495_v57 = vpack.c.bf16 %v4480_v26, %v4479_v44  ;;  %v4486_v44 = vld [vmem:[#allocation2 + $0x72] sm:$0xff] }
 0x35c   : > { %v12026_v43 = vadd.f32 %v3511_v38, %v3395_v1  ;;  %v4710_v38 = vsel %vm1921_vm2, %v4681_v19, 0  ;;  %v4304_v1 = vld [vmem:[#allocation2 + $0x48] sm:$0xff] }
 0x35d   : > { %v3338_v3 = vpop.f32.mrf.mxu0  ;;  %9840 = vmatmul.mubr.msk.bf16.gmra.mxu0 %vm1893_vm3, %v3968_v24  ;;  %v3527_v39 = vpop.f32.mrf.mxu1 }
 0x35e   : > { %v3396_v58 = vadd.f32 %v3338_v3, %v11920_v50  ;;  %9883 = vmatprep.mubr.msk.bf16.mxu0 %vm10692_vm0, %v13142_v0  ;;  %v4303_v3 = vld [vmem:[#allocation2 + $0x40] sm:$0xff] }
 0x35f   : > { %v9665_v51 = vpop.f32.mrf.mxu0  ;;  %v9708_v17 = vpop.f32.mrf.mxu1 }
 0x360   : > { %v12035_v54 = vadd.f32 %v3516_v12, %v3396_v58 }
 0x361   : > { %v3341_v27 = vpop.f32.mrf.mxu0  ;;  %v3532_v13 = vpop.f32.mrf.mxu1  ;;  %9926 = vmatmul.mubr.msk.bf16.gmra.mxu1 %vm1893_vm3, %v4495_v57 }
 0x362   : > { %v3397_v50 = vadd.f32 %v3341_v27, %v11927_v31  ;;  %9929 = vmatprep.mubr.msk.bf16.mxu1 %vm10692_vm0, %v13142_v0  ;;  %v4481_v31 = vld [vmem:[#allocation2 + $0x4a] sm:$0xff] }
 0x363   : > { %v9666_v28 = vpop.f32.mrf.mxu0  ;;  %v9711_v49 = vpop.f32.mrf.mxu1  ;;  %v4496_v15 = vpack.c.bf16 %v4482_v18, %v4481_v31 }
 0x364   : > { %v12042_v8 = vadd.f32 %v3519_v23, %v3397_v50  ;;  %v4306_v50 = vld [vmem:[#allocation2 + $0x58] sm:$0xff]  ;;  %v4305_v49 = vld [vmem:[#allocation2 + $0x50] sm:$0xff] }
 0x365   : > { %v3346_v34 = vpop.f32.mrf.mxu0  ;;  %9884 = vmatmul.mubr.msk.bf16.vlgmr.msra.gmra.mxu0 %vm1893_vm3, %v4316_v7  ;;  %v3535_v33 = vpop.f32.mrf.mxu1  ;;  %v4319_v18 = vpack.c.bf16 %v4306_v50, %v4305_v49 }
 0x366   : > { %v3398_v32 = vadd.f32 %v3346_v34, %v11934_v35  ;;  %9958 = vmatpush3.bf16.msra.mxu0 %v4710_v38  ;;  %9887 = vmatprep.mubr.msk.bf16.mxu0 %vm10692_vm0, %v13142_v0  ;;  %v4301_v35 = vld [vmem:[#allocation2 + $0x30] sm:$0xff] }
 0x367   : > { %v9669_v12 = vpop.f32.mrf.mxu0  ;;  %v9712_v52 = vpop.f32.mrf.mxu1  ;;  %10033 = vmatprep.subr.bf16.mxu0 %v13142_v0  ;;  %v4317_v23 = vpack.c.bf16 %v4302_v60, %v4301_v35 }
 0x368   : > { %v12049_v40 = vadd.f32 %v3524_v5, %v3398_v32 }
 0x369   : > { %v3349_v47 = vpop.f32.mrf.mxu0  ;;  %v3540_v11 = vpop.f32.mrf.mxu1  ;;  %9930 = vmatmul.mubr.msk.bf16.gmra.mxu1 %vm1893_vm3, %v4496_v15 }
 0x36a   : > { %v3399_v2 = vadd.f32 %v3349_v47, %v11940_v48  ;;  %9933 = vmatprep.mubr.msk.bf16.mxu1 %vm10692_vm0, %v13142_v0  ;;  %v4483_v48 = vld [vmem:[#allocation2 + $0x5a] sm:$0xff] }
 0x36b   : > { %v9670_v21 = vpop.f32.mrf.mxu0  ;;  %v9715_v56 = vpop.f32.mrf.mxu1  ;;  %v4497_v5 = vpack.c.bf16 %v4484_v53, %v4483_v48 }
 0x36c   : > { %v12055_v10 = vadd.f32 %v3527_v39, %v3399_v2  ;;  %v4318_v39 = vpack.c.bf16 %v4304_v1, %v4303_v3  ;;  %v4307_v56 = vld [vmem:[#allocation2 + $0x60] sm:$0xff] }
 0x36d   : > { %v3354_v4 = vpop.f32.mrf.mxu0  ;;  %9888 = vmatmul.mubr.msk.bf16.gmra.mxu0 %vm1893_vm3, %v4317_v23  ;;  %v3543_v63 = vpop.f32.mrf.mxu1 }
 0x36e   : > { %v3400_v45 = vadd.f32 %v3354_v4, %v11946_v30  ;;  %9891 = vmatprep.mubr.msk.bf16.mxu0 %vm10692_vm0, %v13142_v0 }
 0x36f   : > { %v9673_v14 = vpop.f32.mrf.mxu0  ;;  %v9716_v9 = vpop.f32.mrf.mxu1 }
 0x370   : > { %v12061_v29 = vadd.f32 %v3532_v13, %v3400_v45 }
 0x371   : > { %v3357_v24 = vpop.f32.mrf.mxu0  ;;  %v3548_v59 = vpop.f32.mrf.mxu1  ;;  %9934 = vmatmul.mubr.msk.bf16.gmra.mxu1 %vm1893_vm3, %v4497_v5 }
 0x372   : > { %v3401_v26 = vadd.f32 %v3357_v24, %v11952_v22  ;;  %9937 = vmatprep.mubr.msk.bf16.mxu1 %vm10692_vm0, %v13142_v0  ;;  %v4485_v22 = vld [vmem:[#allocation2 + $0x6a] sm:$0xff] }
 0x373   : > { %v9674_v30 = vpop.f32.mrf.mxu0  ;;  %v9719_v58 = vpop.f32.mrf.mxu1  ;;  %v4498_v13 = vpack.c.bf16 %v4486_v44, %v4485_v22 }
 0x374   : > { %v12067_v51 = vadd.f32 %v3535_v33, %v3401_v26  ;;  %v4488_v33 = vld [vmem:[#allocation2 + $0x82] sm:$0xff]  ;;  %v4309_v58 = vld [vmem:[#allocation2 + $0x70] sm:$0xff] }
 0x375   : > { %v3362_v17 = vpop.f32.mrf.mxu0  ;;  %9892 = vmatmul.mubr.msk.bf16.gmra.mxu0 %vm1893_vm3, %v4318_v39  ;;  %v3551_v57 = vpop.f32.mrf.mxu1 }
 0x376   : > { %v3402_v20 = vadd.f32 %v3362_v17, %v11958_v37  ;;  %9895 = vmatprep.mubr.msk.bf16.mxu0 %vm10692_vm0, %v13142_v0 }
 0x377   : > { %v9677_v19 = vpop.f32.mrf.mxu0  ;;  %v9720_v27 = vpop.f32.mrf.mxu1 }
 0x378   : > { %v12073_v62 = vadd.f32 %v3540_v11, %v3402_v20  ;;  %v4308_v11 = vld [vmem:[#allocation2 + $0x68] sm:$0xff] }
 0x379   : > { %v3365_v28 = vpop.f32.mrf.mxu0  ;;  %v3556_v7 = vpop.f32.mrf.mxu1  ;;  %9938 = vmatmul.mubr.msk.bf16.gmra.mxu1 %vm1893_vm3, %v4498_v13  ;;  %v4320_v53 = vpack.c.bf16 %v4308_v11, %v4307_v56  ;;  %v4314_v11 = vld [vmem:[#allocation2 + $0x98] sm:$0xff] }
 0x37a   : > { %v3403_v38 = vadd.f32 %v3365_v28, %v11964_v36  ;;  %9941 = vmatprep.mubr.msk.bf16.mxu1 %vm10692_vm0, %v13142_v0  ;;  %v4487_v36 = vld [vmem:[#allocation2 + $0x7a] sm:$0xff] }
 0x37b   : > { %v9678_v37 = vpop.f32.mrf.mxu0  ;;  %v9723_v34 = vpop.f32.mrf.mxu1  ;;  %v4499_v47 = vpack.c.bf16 %v4488_v33, %v4487_v36 }
 0x37c   : > { %v12079_v32 = vadd.f32 %v3543_v63, %v3403_v38  ;;  %v4490_v63 = vld [vmem:[#allocation2 + $0x92] sm:$0xff] }
 0x37d   : > { %v3370_v31 = vpop.f32.mrf.mxu0  ;;  %9896 = vmatmul.mubr.msk.bf16.gmra.mxu0 %vm1893_vm3, %v4319_v18  ;;  %v3559_v12 = vpop.f32.mrf.mxu1  ;;  %v4311_v18 = vld [vmem:[#allocation2 + $0x80] sm:$0xff] }
 0x37e   : > { %v3404_v52 = vadd.f32 %v3370_v31, %v11970_v16  ;;  %9899 = vmatprep.mubr.msk.bf16.mxu0 %vm10692_vm0, %v13142_v0  ;;  %v4493_v31 = vld [vmem:[#allocation2 + $0xaa] sm:$0xff] }
 0x37f   : > { %v9681_v15 = vpop.f32.mrf.mxu0  ;;  %v9724_v60 = vpop.f32.mrf.mxu1 }
 0x380   : > { %v12085_v2 = vadd.f32 %v3548_v59, %v3404_v52  ;;  %v4310_v59 = vld [vmem:[#allocation2 + $0x78] sm:$0xff] }
 0x381   : > { %v3373_v35 = vpop.f32.mrf.mxu0  ;;  %v3564_v21 = vpop.f32.mrf.mxu1  ;;  %9942 = vmatmul.mubr.msk.bf16.gmra.mxu1 %vm1893_vm3, %v4499_v47  ;;  %v4321_v44 = vpack.c.bf16 %v4310_v59, %v4309_v58  ;;  %v4502_v47 = vpack.c.bf16 %v4493_v31, %v4493_v31 }
 0x382   : > { %v3405_v23 = vadd.f32 %v3373_v35, %v11976_v46  ;;  %9945 = vmatprep.mubr.msk.bf16.mxu1 %vm10692_vm0, %v13142_v0  ;;  %v4489_v46 = vld [vmem:[#allocation2 + $0x8a] sm:$0xff] }
 0x383   : > { %v9682_v16 = vpop.f32.mrf.mxu0  ;;  %v9727_v4 = vpop.f32.mrf.mxu1  ;;  %v4500_v24 = vpack.c.bf16 %v4490_v63, %v4489_v46  ;;  %v4834_v63 = vld [vmem:[#allocation2 + $0x34] sm:$0xff] }
 0x384   : > { %v12091_v45 = vadd.f32 %v3551_v57, %v3405_v23  ;;  %v4492_v57 = vld [vmem:[#allocation2 + $0xa2] sm:$0xff]  ;;  %v4313_v16 = vld [vmem:[#allocation2 + $0x90] sm:$0xff] }
 0x385   : > { %v3378_v48 = vpop.f32.mrf.mxu0  ;;  %9900 = vmatmul.mubr.msk.bf16.gmra.mxu0 %vm1893_vm3, %v4320_v53  ;;  %v3567_v14 = vpop.f32.mrf.mxu1  ;;  %v4323_v53 = vpack.c.bf16 %v4314_v11, %v4313_v16 }
 0x386   : > { %v3406_v9 = vadd.f32 %v3378_v48, %v11982_v42  ;;  %9903 = vmatprep.mubr.msk.bf16.mxu0 %vm10692_vm0, %v13142_v0  ;;  %v5215_v14 = vld [vmem:[%s13120_s3 + $0x4c] sm:$0xf] }
 0x387   : > { %v9685_v5 = vpop.f32.mrf.mxu0  ;;  %v9728_v1 = vpop.f32.mrf.mxu1 }
 0x388   : > { %v12097_v26 = vadd.f32 %v3556_v7, %v3406_v9  ;;  %v4312_v7 = vld [vmem:[#allocation2 + $0x88] sm:$0xff] }
 0x389   : > { %v3381_v3 = vpop.f32.mrf.mxu0  ;;  %v3856_v30 = vpop.f32.mrf.mxu1  ;;  %9946 = vmatmul.mubr.msk.bf16.gmra.mxu1 %vm1893_vm3, %v4500_v24  ;;  %v4833_v5 = vld [vmem:[#allocation2 + $0x2c] sm:$0xff] }
 0x38a   : > { %v3407_v39 = vadd.f32 %v3381_v3, %v11988_v61  ;;  %9949 = vmatprep.mubr.msk.bf16.mxu1 %vm10692_vm0, %v13142_v0  ;;  %v4491_v61 = vld [vmem:[#allocation2 + $0x9a] sm:$0xff]  ;;  %v4850_v59 = vpack.c.bf16 %v4834_v63, %v4833_v5  ;;  %v5244_v3 = vsel %vm1921_vm2, %v5215_v14, 0  ;;  %v4840_v5 = vld [vmem:[#allocation2 + $0x64] sm:$0xff] }
 0x38b   : > { %v9686_v42 = vpop.f32.mrf.mxu0  ;;  %v9771_v17 = vpop.f32.mrf.mxu1  ;;  %v4501_v28 = vpack.c.bf16 %v4492_v57, %v4491_v61 }
 0x38c   : > { %v12103_v20 = vadd.f32 %v3559_v12, %v3407_v39 }
 0x38d   : > { %v3386_v22 = vpop.f32.mrf.mxu0  ;;  %9904 = vmatmul.mubr.msk.bf16.gmra.mxu0 %vm1893_vm3, %v4321_v44  ;;  %v3859_v19 = vpop.f32.mrf.mxu1 }
 0x38e   : > { %v3408_v27 = vadd.f32 %v3386_v22, %v11994_v25  ;;  %9907 = vmatprep.mubr.msk.bf16.mxu0 %vm10692_vm0, %v13142_v0  ;;  %v4322_v25 = vpack.c.bf16 %v4312_v7, %v4311_v18  ;;  %v4836_v22 = vld [vmem:[#allocation2 + $0x44] sm:$0xff] }
 0x38f   : > { %v9689_v13 = vpop.f32.mrf.mxu0  ;;  %v9772_v50 = vpop.f32.mrf.mxu1 }
 0x390   : > { %v12109_v38 = vadd.f32 %v3564_v21, %v3408_v27 }
 0x391   : > { %v3389_v49 = vpop.f32.mrf.mxu0  ;;  %v3864_v37 = vpop.f32.mrf.mxu1  ;;  %9950 = vmatmul.mubr.msk.bf16.gmra.mxu1 %vm1893_vm3, %v4501_v28 }
 0x392   : > { %9953 = vmatprep.mubr.msk.bf16.mxu1 %vm10692_vm0, %v13142_v0  ;;  %v4656_v49 = vld [vmem:[#allocation2 + $0x33] sm:$0xff] }
 0x393   : > { %v9690_v34 = vpop.f32.mrf.mxu0  ;;  %v9775_v33 = vpop.f32.mrf.mxu1 }
 0x394   : > { %v4655_v33 = vld [vmem:[#allocation2 + $0x2b] sm:$0xff] }
 0x395   : > { %v3678_v12 = vpop.f32.mrf.mxu0  ;;  %9908 = vmatmul.mubr.msk.bf16.gmra.mxu0 %vm1893_vm3, %v4322_v25  ;;  %v3867_v52 = vpop.f32.mrf.mxu1 }
 0x396   : > { %v3748_v36 = vadd.f32 %v3678_v12, %v12003_v55  ;;  %9911 = vmatprep.mubr.msk.bf16.mxu0 %vm10692_vm0, %v13142_v0  ;;  %v4672_v12 = vpack.c.bf16 %v4656_v49, %v4655_v33 }
 0x397   : > { %v9733_v15 = vpop.f32.mrf.mxu0  ;;  %v9776_v60 = vpop.f32.mrf.mxu1 }
 0x398   : > { %v12118_v35 = vadd.f32 %v3856_v30, %v3748_v36  ;;  %v4315_v30 = vld [vmem:[#allocation2 + $0xa0] sm:$0xff]  ;;  %v4838_v15 = vld [vmem:[#allocation2 + $0x54] sm:$0xff] }
 0x399   : > { %v3681_v21 = vpop.f32.mrf.mxu0  ;;  %v3872_v23 = vpop.f32.mrf.mxu1  ;;  %9954 = vmatmul.mubr.msk.bf16.gmra.mxu1 %vm1893_vm3, %v4502_v47  ;;  %v4324_v17 = vpack.c.bf16 %v4315_v30, %v4315_v30 }
 0x39a   : > { %v3749_v56 = vadd.f32 %v3681_v21, %v12009_v41  ;;  %9997 = vmatprep.mubr.msk.bf16.mxu1 %vm10692_vm0, %v13142_v0 }
 0x39b   : > { %v9734_v55 = vpop.f32.mrf.mxu0  ;;  %v9779_v4 = vpop.f32.mrf.mxu1 }
 0x39c   : > { %v12124_v48 = vadd.f32 %v3859_v19, %v3749_v56  ;;  %v4658_v55 = vld [vmem:[#allocation2 + $0x43] sm:$0xff] }
 0x39d   : > { %v3686_v9 = vpop.f32.mrf.mxu0  ;;  %9912 = vmatmul.mubr.msk.bf16.gmra.mxu0 %vm1893_vm3, %v4323_v53  ;;  %v3875_v46 = vpop.f32.mrf.mxu1 }
 0x39e   : > { %v3750_v41 = vadd.f32 %v3686_v9, %v12019_v6  ;;  %9915 = vmatprep.mubr.msk.bf16.mxu0 %vm10692_vm0, %v13142_v0 }
 0x39f   : > { %v9737_v1 = vpop.f32.mrf.mxu0  ;;  %v9780_v24 = vpop.f32.mrf.mxu1 }
 0x3a0   : > { %v12134_v39 = vadd.f32 %v3864_v37, %v3750_v41  ;;  %v5037_v37 = vld [vmem:[%s13120_s3 + $0x48] sm:$0xf] }
 0x3a1   : > { %v3689_v58 = vpop.f32.mrf.mxu0  ;;  %v3880_v42 = vpop.f32.mrf.mxu1  ;;  %9998 = vmatmul.mubr.msk.bf16.vlgmr.msra.gmra.mxu1 %vm1893_vm3, %v4850_v59 }
 0x3a2   : > { %v3751_v44 = vadd.f32 %v3689_v58, %v12026_v43  ;;  %10001 = vmatprep.mubr.msk.bf16.mxu1 %vm10692_vm0, %v13142_v0  ;;  %10072 = vmatpush3.bf16.msra.mxu1 %v5244_v3  ;;  %v4835_v43 = vld [vmem:[#allocation2 + $0x3c] sm:$0xff] }
 0x3a3   : > { %v9738_v6 = vpop.f32.mrf.mxu0  ;;  %v9783_v57 = vpop.f32.mrf.mxu1  ;;  %10147 = vmatprep.subr.bf16.mxu1 %v13142_v0  ;;  %v4851_v7 = vpack.c.bf16 %v4836_v22, %v4835_v43  ;;  %v4842_v43 = vld [vmem:[#allocation2 + $0x74] sm:$0xff] }
 0x3a4   : > { %v12141_v19 = vadd.f32 %v3867_v52, %v3751_v44  ;;  %v5066_v52 = vsel %vm1921_vm2, %v5037_v37, 0  ;;  %v4660_v44 = vld [vmem:[#allocation2 + $0x53] sm:$0xff] }
 0x3a5   : > { %v3694_v27 = vpop.f32.mrf.mxu0  ;;  %9916 = vmatmul.mubr.msk.bf16.gmra.mxu0 %vm1893_vm3, %v4324_v17  ;;  %v3883_v61 = vpop.f32.mrf.mxu1 }
 0x3a6   : > { %v3752_v13 = vadd.f32 %v3694_v27, %v12035_v54  ;;  %9959 = vmatprep.mubr.msk.bf16.mxu0 %vm10692_vm0, %v13142_v0  ;;  %v4659_v27 = vld [vmem:[#allocation2 + $0x4b] sm:$0xff] }
 0x3a7   : > { %v9741_v50 = vpop.f32.mrf.mxu0  ;;  %v9784_v28 = vpop.f32.mrf.mxu1 }
 0x3a8   : > { %v12150_v18 = vadd.f32 %v3872_v23, %v3752_v13 }
 0x3a9   : > { %v3697_v34 = vpop.f32.mrf.mxu0  ;;  %v3888_v25 = vpop.f32.mrf.mxu1  ;;  %10002 = vmatmul.mubr.msk.bf16.gmra.mxu1 %vm1893_vm3, %v4851_v7 }
 0x3aa   : > { %v3753_v54 = vadd.f32 %v3697_v34, %v12042_v8  ;;  %10005 = vmatprep.mubr.msk.bf16.mxu1 %vm10692_vm0, %v13142_v0  ;;  %v4837_v8 = vld [vmem:[#allocation2 + $0x4c] sm:$0xff] }
 0x3ab   : > { %v9742_v31 = vpop.f32.mrf.mxu0  ;;  %v9787_v36 = vpop.f32.mrf.mxu1  ;;  %v4852_v16 = vpack.c.bf16 %v4838_v15, %v4837_v8 }
 0x3ac   : > { %v12157_v60 = vadd.f32 %v3875_v46, %v3753_v54  ;;  %v4662_v54 = vld [vmem:[#allocation2 + $0x63] sm:$0xff]  ;;  %v4661_v36 = vld [vmem:[#allocation2 + $0x5b] sm:$0xff] }
 0x3ad   : > { %v3702_v47 = vpop.f32.mrf.mxu0  ;;  %9960 = vmatmul.mubr.msk.bf16.vlgmr.msra.gmra.mxu0 %vm1893_vm3, %v4672_v12  ;;  %v3891_v11 = vpop.f32.mrf.mxu1  ;;  %v4675_v15 = vpack.c.bf16 %v4662_v54, %v4661_v36 }
 0x3ae   : > { %v3754_v21 = vadd.f32 %v3702_v47, %v12049_v40  ;;  %10034 = vmatpush3.bf16.msra.mxu0 %v5066_v52  ;;  %9963 = vmatprep.mubr.msk.bf16.mxu0 %vm10692_vm0, %v13142_v0  ;;  %v4657_v40 = vld [vmem:[#allocation2 + $0x3b] sm:$0xff] }
 0x3af   : > { %v9745_v23 = vpop.f32.mrf.mxu0  ;;  %v9788_v56 = vpop.f32.mrf.mxu1  ;;  %10109 = vmatprep.subr.bf16.mxu0 %v13142_v0  ;;  %v4673_v46 = vpack.c.bf16 %v4658_v55, %v4657_v40 }
 0x3b0   : > { %v12164_v53 = vadd.f32 %v3880_v42, %v3754_v21 }
 0x3b1   : > { %v3705_v4 = vpop.f32.mrf.mxu0  ;;  %v3896_v63 = vpop.f32.mrf.mxu1  ;;  %10006 = vmatmul.mubr.msk.bf16.gmra.mxu1 %vm1893_vm3, %v4852_v16 }
 0x3b2   : > { %v3755_v14 = vadd.f32 %v3705_v4, %v12055_v10  ;;  %10009 = vmatprep.mubr.msk.bf16.mxu1 %vm10692_vm0, %v13142_v0  ;;  %v4839_v10 = vld [vmem:[#allocation2 + $0x5c] sm:$0xff] }
 0x3b3   : > { %v9746_v9 = vpop.f32.mrf.mxu0  ;;  %v9791_v41 = vpop.f32.mrf.mxu1  ;;  %v4853_v42 = vpack.c.bf16 %v4840_v5, %v4839_v10 }
 0x3b4   : > { %v12170_v1 = vadd.f32 %v3883_v61, %v3755_v14  ;;  %v4674_v61 = vpack.c.bf16 %v4660_v44, %v4659_v27  ;;  %v4663_v41 = vld [vmem:[#allocation2 + $0x6b] sm:$0xff] }
 0x3b5   : > { %v3710_v24 = vpop.f32.mrf.mxu0  ;;  %9964 = vmatmul.mubr.msk.bf16.gmra.mxu0 %vm1893_vm3, %v4673_v46  ;;  %v3899_v59 = vpop.f32.mrf.mxu1 }
 0x3b6   : > { %v3756_v3 = vadd.f32 %v3710_v24, %v12061_v29  ;;  %9967 = vmatprep.mubr.msk.bf16.mxu0 %vm10692_vm0, %v13142_v0 }
 0x3b7   : > { %v9749_v30 = vpop.f32.mrf.mxu0  ;;  %v9792_v58 = vpop.f32.mrf.mxu1 }
 0x3b8   : > { %v12176_v6 = vadd.f32 %v3888_v25, %v3756_v3 }
 0x3b9   : > { %v3713_v17 = vpop.f32.mrf.mxu0  ;;  %v3904_v57 = vpop.f32.mrf.mxu1  ;;  %10010 = vmatmul.mubr.msk.bf16.gmra.mxu1 %vm1893_vm3, %v4853_v42 }
 0x3ba   : > { %v3757_v22 = vadd.f32 %v3713_v17, %v12067_v51  ;;  %10013 = vmatprep.mubr.msk.bf16.mxu1 %vm10692_vm0, %v13142_v0  ;;  %v4841_v51 = vld [vmem:[#allocation2 + $0x6c] sm:$0xff] }
 0x3bb   : > { %v9750_v29 = vpop.f32.mrf.mxu0  ;;  %v9795_v13 = vpop.f32.mrf.mxu1  ;;  %v4854_v25 = vpack.c.bf16 %v4842_v43, %v4841_v51 }
 0x3bc   : > { %v12182_v50 = vadd.f32 %v3891_v11, %v3757_v22  ;;  %v4844_v11 = vld [vmem:[#allocation2 + $0x84] sm:$0xff]  ;;  %v4665_v13 = vld [vmem:[#allocation2 + $0x7b] sm:$0xff] }
 0x3bd   : > { %v3718_v28 = vpop.f32.mrf.mxu0  ;;  %9968 = vmatmul.mubr.msk.bf16.gmra.mxu0 %vm1893_vm3, %v4674_v61  ;;  %v3907_v7 = vpop.f32.mrf.mxu1 }
 0x3be   : > { %v3758_v49 = vadd.f32 %v3718_v28, %v12073_v62  ;;  %9971 = vmatprep.mubr.msk.bf16.mxu0 %vm10692_vm0, %v13142_v0 }
 0x3bf   : > { %v9753_v37 = vpop.f32.mrf.mxu0  ;;  %v9796_v34 = vpop.f32.mrf.mxu1 }
 0x3c0   : > { %v12188_v33 = vadd.f32 %v3896_v63, %v3758_v49  ;;  %v4664_v63 = vld [vmem:[#allocation2 + $0x73] sm:$0xff] }
 0x3c1   : > { %v3721_v31 = vpop.f32.mrf.mxu0  ;;  %v3912_v12 = vpop.f32.mrf.mxu1  ;;  %10014 = vmatmul.mubr.msk.bf16.gmra.mxu1 %vm1893_vm3, %v4854_v25  ;;  %v4676_v5 = vpack.c.bf16 %v4664_v63, %v4663_v41  ;;  %v4670_v63 = vld [vmem:[#allocation2 + $0xa3] sm:$0xff] }
 0x3c2   : > { %v3759_v52 = vadd.f32 %v3721_v31, %v12079_v32  ;;  %10017 = vmatprep.mubr.msk.bf16.mxu1 %vm10692_vm0, %v13142_v0  ;;  %v4843_v32 = vld [vmem:[#allocation2 + $0x7c] sm:$0xff] }
 0x3c3   : > { %v9754_v62 = vpop.f32.mrf.mxu0  ;;  %v9799_v47 = vpop.f32.mrf.mxu1  ;;  %v4855_v4 = vpack.c.bf16 %v4844_v11, %v4843_v32 }
 0x3c4   : > { %v12194_v21 = vadd.f32 %v3899_v59, %v3759_v52  ;;  %v4846_v59 = vld [vmem:[#allocation2 + $0x94] sm:$0xff] }
 0x3c5   : > { %v3726_v8 = vpop.f32.mrf.mxu0  ;;  %9972 = vmatmul.mubr.msk.bf16.gmra.mxu0 %vm1893_vm3, %v4675_v15  ;;  %v3915_v23 = vpop.f32.mrf.mxu1  ;;  %v4667_v15 = vld [vmem:[#allocation2 + $0x8b] sm:$0xff] }
 0x3c6   : > { %v3760_v56 = vadd.f32 %v3726_v8, %v12085_v2  ;;  %9975 = vmatprep.mubr.msk.bf16.mxu0 %vm10692_vm0, %v13142_v0  ;;  %v4849_v8 = vld [vmem:[#allocation2 + $0xac] sm:$0xff] }
 0x3c7   : > { %v9757_v16 = vpop.f32.mrf.mxu0  ;;  %v9800_v55 = vpop.f32.mrf.mxu1 }
 0x3c8   : > { %v12200_v14 = vadd.f32 %v3904_v57, %v3760_v56  ;;  %v4666_v57 = vld [vmem:[#allocation2 + $0x83] sm:$0xff] }
 0x3c9   : > { %v3729_v40 = vpop.f32.mrf.mxu0  ;;  %v3920_v9 = vpop.f32.mrf.mxu1  ;;  %10018 = vmatmul.mubr.msk.bf16.gmra.mxu1 %vm1893_vm3, %v4855_v4  ;;  %v4677_v43 = vpack.c.bf16 %v4666_v57, %v4665_v13  ;;  %v4858_v4 = vpack.c.bf16 %v4849_v8, %v4849_v8 }
 0x3ca   : > { %v3761_v46 = vadd.f32 %v3729_v40, %v12091_v45  ;;  %10021 = vmatprep.mubr.msk.bf16.mxu1 %vm10692_vm0, %v13142_v0  ;;  %v4845_v45 = vld [vmem:[#allocation2 + $0x8c] sm:$0xff] }
 0x3cb   : > { %v9758_v2 = vpop.f32.mrf.mxu0  ;;  %v9803_v24 = vpop.f32.mrf.mxu1  ;;  %v4856_v17 = vpack.c.bf16 %v4846_v59, %v4845_v45  ;;  %v5190_v59 = vld [vmem:[#allocation2 + $0x36] sm:$0xff] }
 0x3cc   : > { %v12206_v3 = vadd.f32 %v3907_v7, %v3761_v46  ;;  %v4848_v7 = vld [vmem:[#allocation2 + $0xa4] sm:$0xff]  ;;  %v4669_v2 = vld [vmem:[#allocation2 + $0x9b] sm:$0xff] }
 0x3cd   : > { %v3734_v10 = vpop.f32.mrf.mxu0  ;;  %9976 = vmatmul.mubr.msk.bf16.gmra.mxu0 %vm1893_vm3, %v4676_v5  ;;  %v3923_v30 = vpop.f32.mrf.mxu1  ;;  %v4679_v5 = vpack.c.bf16 %v4670_v63, %v4669_v2 }
 0x3ce   : > { %v3762_v58 = vadd.f32 %v3734_v10, %v12097_v26  ;;  %9979 = vmatprep.mubr.msk.bf16.mxu0 %vm10692_vm0, %v13142_v0  ;;  %v5571_v30 = vld [vmem:[%s13120_s3 + $0x54] sm:$0xf] }
 0x3cf   : > { %v9761_v42 = vpop.f32.mrf.mxu0  ;;  %v9804_v44 = vpop.f32.mrf.mxu1 }
 0x3d0   : > { %v12212_v22 = vadd.f32 %v3912_v12, %v3762_v58  ;;  %v4668_v12 = vld [vmem:[#allocation2 + $0x93] sm:$0xff] }
 0x3d1   : > { %v3737_v27 = vpop.f32.mrf.mxu0  ;;  %v4212_v29 = vpop.f32.mrf.mxu1  ;;  %10022 = vmatmul.mubr.msk.bf16.gmra.mxu1 %vm1893_vm3, %v4856_v17  ;;  %v5189_v42 = vld [vmem:[#allocation2 + $0x2e] sm:$0xff] }
 0x3d2   : > { %v3763_v61 = vadd.f32 %v3737_v27, %v12103_v20  ;;  %10025 = vmatprep.mubr.msk.bf16.mxu1 %vm10692_vm0, %v13142_v0  ;;  %v4847_v20 = vld [vmem:[#allocation2 + $0x9c] sm:$0xff]  ;;  %v5206_v57 = vpack.c.bf16 %v5190_v59, %v5189_v42  ;;  %v5600_v27 = vsel %vm1921_vm2, %v5571_v30, 0  ;;  %v5196_v42 = vld [vmem:[#allocation2 + $0x66] sm:$0xff] }
 0x3d3   : > { %v9762_v26 = vpop.f32.mrf.mxu0  ;;  %v9847_v28 = vpop.f32.mrf.mxu1  ;;  %v4857_v31 = vpack.c.bf16 %v4848_v7, %v4847_v20 }
 0x3d4   : > { %v12218_v49 = vadd.f32 %v3915_v23, %v3763_v61 }
 0x3d5   : > { %v3742_v51 = vpop.f32.mrf.mxu0  ;;  %9980 = vmatmul.mubr.msk.bf16.gmra.mxu0 %vm1893_vm3, %v4677_v43  ;;  %v4215_v37 = vpop.f32.mrf.mxu1 }
 0x3d6   : > { %v3764_v34 = vadd.f32 %v3742_v51, %v12109_v38  ;;  %9983 = vmatprep.mubr.msk.bf16.mxu0 %vm10692_vm0, %v13142_v0  ;;  %v4678_v38 = vpack.c.bf16 %v4668_v12, %v4667_v15  ;;  %v5192_v51 = vld [vmem:[#allocation2 + $0x46] sm:$0xff] }
 0x3d7   : > { %v9765_v25 = vpop.f32.mrf.mxu0  ;;  %v9848_v54 = vpop.f32.mrf.mxu1 }
 0x3d8   : > { %v12224_v52 = vadd.f32 %v3920_v9, %v3764_v34 }
 0x3d9   : > { %v3745_v36 = vpop.f32.mrf.mxu0  ;;  %v4220_v62 = vpop.f32.mrf.mxu1  ;;  %10026 = vmatmul.mubr.msk.bf16.gmra.mxu1 %vm1893_vm3, %v4857_v31 }
 0x3da   : > { %10029 = vmatprep.mubr.msk.bf16.mxu1 %vm10692_vm0, %v13142_v0  ;;  %v5012_v36 = vld [vmem:[#allocation2 + $0x35] sm:$0xff] }
 0x3db   : > { %v9766_v47 = vpop.f32.mrf.mxu0  ;;  %v9851_v11 = vpop.f32.mrf.mxu1 }
 0x3dc   : > { %v5011_v11 = vld [vmem:[#allocation2 + $0x2d] sm:$0xff] }
 0x3dd   : > { %v4034_v23 = vpop.f32.mrf.mxu0  ;;  %9984 = vmatmul.mubr.msk.bf16.gmra.mxu0 %vm1893_vm3, %v4678_v38  ;;  %v4223_v56 = vpop.f32.mrf.mxu1 }
 0x3de   : > { %v4104_v32 = vadd.f32 %v4034_v23, %v12118_v35  ;;  %9987 = vmatprep.mubr.msk.bf16.mxu0 %vm10692_vm0, %v13142_v0  ;;  %v5028_v23 = vpack.c.bf16 %v5012_v36, %v5011_v11 }
 0x3df   : > { %v9809_v16 = vpop.f32.mrf.mxu0  ;;  %v9852_v55 = vpop.f32.mrf.mxu1 }
 0x3e0   : > { %v12233_v40 = vadd.f32 %v4212_v29, %v4104_v32  ;;  %v4671_v29 = vld [vmem:[#allocation2 + $0xab] sm:$0xff]  ;;  %v5194_v16 = vld [vmem:[#allocation2 + $0x56] sm:$0xff] }
 0x3e1   : > { %v4037_v9 = vpop.f32.mrf.mxu0  ;;  %v4228_v46 = vpop.f32.mrf.mxu1  ;;  %10030 = vmatmul.mubr.msk.bf16.gmra.mxu1 %vm1893_vm3, %v4858_v4  ;;  %v4680_v28 = vpack.c.bf16 %v4671_v29, %v4671_v29 }
 0x3e2   : > { %v4105_v41 = vadd.f32 %v4037_v9, %v12124_v48  ;;  %10073 = vmatprep.mubr.msk.bf16.mxu1 %vm10692_vm0, %v13142_v0 }
 0x3e3   : > { %v9810_v35 = vpop.f32.mrf.mxu0  ;;  %v9855_v24 = vpop.f32.mrf.mxu1 }
 0x3e4   : > { %v12239_v10 = vadd.f32 %v4215_v37, %v4105_v41  ;;  %v5014_v35 = vld [vmem:[#allocation2 + $0x45] sm:$0xff] }
 0x3e5   : > { %v4042_v58 = vpop.f32.mrf.mxu0  ;;  %9988 = vmatmul.mubr.msk.bf16.gmra.mxu0 %vm1893_vm3, %v4679_v5  ;;  %v4231_v45 = vpop.f32.mrf.mxu1 }
 0x3e6   : > { %v4106_v48 = vadd.f32 %v4042_v58, %v12134_v39  ;;  %9991 = vmatprep.mubr.msk.bf16.mxu0 %vm10692_vm0, %v13142_v0 }
 0x3e7   : > { %v9813_v44 = vpop.f32.mrf.mxu0  ;;  %v9856_v17 = vpop.f32.mrf.mxu1 }
 0x3e8   : > { %v12249_v61 = vadd.f32 %v4220_v62, %v4106_v48  ;;  %v5393_v62 = vld [vmem:[%s13120_s3 + $0x50] sm:$0xf] }
 0x3e9   : > { %v4045_v13 = vpop.f32.mrf.mxu0  ;;  %v4236_v26 = vpop.f32.mrf.mxu1  ;;  %10074 = vmatmul.mubr.msk.bf16.vlgmr.msra.gmra.mxu1 %vm1893_vm3, %v5206_v57 }
 0x3ea   : > { %v4107_v43 = vadd.f32 %v4045_v13, %v12141_v19  ;;  %10077 = vmatprep.mubr.msk.bf16.mxu1 %vm10692_vm0, %v13142_v0  ;;  %10148 = vmatpush3.bf16.msra.mxu1 %v5600_v27  ;;  %v5191_v19 = vld [vmem:[#allocation2 + $0x3e] sm:$0xff] }
 0x3eb   : > { %v9814_v39 = vpop.f32.mrf.mxu0  ;;  %v9859_v7 = vpop.f32.mrf.mxu1  ;;  %10223 = vmatprep.subr.bf16.mxu1 %v13142_v0  ;;  %v5207_v12 = vpack.c.bf16 %v5192_v51, %v5191_v19  ;;  %v5198_v19 = vld [vmem:[#allocation2 + $0x76] sm:$0xff] }
 0x3ec   : > { %v12256_v37 = vadd.f32 %v4223_v56, %v4107_v43  ;;  %v5422_v56 = vsel %vm1921_vm2, %v5393_v62, 0  ;;  %v5016_v43 = vld [vmem:[#allocation2 + $0x55] sm:$0xff] }
 0x3ed   : > { %v4050_v34 = vpop.f32.mrf.mxu0  ;;  %9992 = vmatmul.mubr.msk.bf16.gmra.mxu0 %vm1893_vm3, %v4680_v28  ;;  %v4239_v20 = vpop.f32.mrf.mxu1 }
 0x3ee   : > { %v4108_v25 = vadd.f32 %v4050_v34, %v12150_v18  ;;  %10035 = vmatprep.mubr.msk.bf16.mxu0 %vm10692_vm0, %v13142_v0  ;;  %v5015_v34 = vld [vmem:[#allocation2 + $0x4d] sm:$0xff] }
 0x3ef   : > { %v9817_v54 = vpop.f32.mrf.mxu0  ;;  %v9860_v31 = vpop.f32.mrf.mxu1 }
 0x3f0   : > { %v12265_v15 = vadd.f32 %v4228_v46, %v4108_v25 }
 0x3f1   : > { %v4053_v47 = vpop.f32.mrf.mxu0  ;;  %v4244_v38 = vpop.f32.mrf.mxu1  ;;  %10078 = vmatmul.mubr.msk.bf16.gmra.mxu1 %vm1893_vm3, %v5207_v12 }
 0x3f2   : > { %v4109_v18 = vadd.f32 %v4053_v47, %v12157_v60  ;;  %10081 = vmatprep.mubr.msk.bf16.mxu1 %vm10692_vm0, %v13142_v0  ;;  %v5193_v60 = vld [vmem:[#allocation2 + $0x4e] sm:$0xff] }
 0x3f3   : > { %v9818_v8 = vpop.f32.mrf.mxu0  ;;  %v9863_v32 = vpop.f32.mrf.mxu1  ;;  %v5208_v2 = vpack.c.bf16 %v5194_v16, %v5193_v60 }
 0x3f4   : > { %v12272_v55 = vadd.f32 %v4231_v45, %v4109_v18  ;;  %v5018_v18 = vld [vmem:[#allocation2 + $0x65] sm:$0xff]  ;;  %v5017_v32 = vld [vmem:[#allocation2 + $0x5d] sm:$0xff] }
 0x3f5   : > { %v4058_v4 = vpop.f32.mrf.mxu0  ;;  %10036 = vmatmul.mubr.msk.bf16.vlgmr.msra.gmra.mxu0 %vm1893_vm3, %v5028_v23  ;;  %v4247_v63 = vpop.f32.mrf.mxu1  ;;  %v5031_v16 = vpack.c.bf16 %v5018_v18, %v5017_v32 }
 0x3f6   : > { %v4110_v9 = vadd.f32 %v4058_v4, %v12164_v53  ;;  %10110 = vmatpush3.bf16.msra.mxu0 %v5422_v56  ;;  %10039 = vmatprep.mubr.msk.bf16.mxu0 %vm10692_vm0, %v13142_v0  ;;  %v5013_v53 = vld [vmem:[#allocation2 + $0x3d] sm:$0xff] }
 0x3f7   : > { %v9821_v46 = vpop.f32.mrf.mxu0  ;;  %v9864_v41 = vpop.f32.mrf.mxu1  ;;  %10185 = vmatprep.subr.bf16.mxu0 %v13142_v0  ;;  %v5029_v45 = vpack.c.bf16 %v5014_v35, %v5013_v53 }
 0x3f8   : > { %v12279_v5 = vadd.f32 %v4236_v26, %v4110_v9 }
 0x3f9   : > { %v4061_v24 = vpop.f32.mrf.mxu0  ;;  %v4252_v59 = vpop.f32.mrf.mxu1  ;;  %10082 = vmatmul.mubr.msk.bf16.gmra.mxu1 %vm1893_vm3, %v5208_v2 }
 0x3fa   : > { %v4111_v30 = vadd.f32 %v4061_v24, %v12170_v1  ;;  %10085 = vmatprep.mubr.msk.bf16.mxu1 %vm10692_vm0, %v13142_v0  ;;  %v5195_v1 = vld [vmem:[#allocation2 + $0x5e] sm:$0xff] }
 0x3fb   : > { %v9822_v58 = vpop.f32.mrf.mxu0  ;;  %v9867_v48 = vpop.f32.mrf.mxu1  ;;  %v5209_v26 = vpack.c.bf16 %v5196_v42, %v5195_v1 }
 0x3fc   : > { %v12285_v44 = vadd.f32 %v4239_v20, %v4111_v30  ;;  %v5030_v20 = vpack.c.bf16 %v5016_v43, %v5015_v34  ;;  %v5019_v48 = vld [vmem:[#allocation2 + $0x6d] sm:$0xff] }
 0x3fd   : > { %v4066_v17 = vpop.f32.mrf.mxu0  ;;  %10040 = vmatmul.mubr.msk.bf16.gmra.mxu0 %vm1893_vm3, %v5029_v45  ;;  %v4255_v57 = vpop.f32.mrf.mxu1 }
 0x3fe   : > { %v4112_v27 = vadd.f32 %v4066_v17, %v12176_v6  ;;  %10043 = vmatprep.mubr.msk.bf16.mxu0 %vm10692_vm0, %v13142_v0 }
 0x3ff   : > { %v9825_v29 = vpop.f32.mrf.mxu0  ;;  %v9868_v13 = vpop.f32.mrf.mxu1 }
 0x400   : > { %v12291_v39 = vadd.f32 %v4244_v38, %v4112_v27 }
 0x401   : > { %v4069_v28 = vpop.f32.mrf.mxu0  ;;  %v4260_v7 = vpop.f32.mrf.mxu1  ;;  %10086 = vmatmul.mubr.msk.bf16.gmra.mxu1 %vm1893_vm3, %v5209_v26 }
 0x402   : > { %v4113_v51 = vadd.f32 %v4069_v28, %v12182_v50  ;;  %10089 = vmatprep.mubr.msk.bf16.mxu1 %vm10692_vm0, %v13142_v0  ;;  %v5197_v50 = vld [vmem:[#allocation2 + $0x6e] sm:$0xff] }
 0x403   : > { %v9826_v6 = vpop.f32.mrf.mxu0  ;;  %v9871_v25 = vpop.f32.mrf.mxu1  ;;  %v5210_v38 = vpack.c.bf16 %v5198_v19, %v5197_v50 }
 0x404   : > { %v12297_v54 = vadd.f32 %v4247_v63, %v4113_v51  ;;  %v5200_v63 = vld [vmem:[#allocation2 + $0x86] sm:$0xff]  ;;  %v5021_v25 = vld [vmem:[#allocation2 + $0x7d] sm:$0xff] }
 0x405   : > { %v4074_v31 = vpop.f32.mrf.mxu0  ;;  %10044 = vmatmul.mubr.msk.bf16.gmra.mxu0 %vm1893_vm3, %v5030_v20  ;;  %v4263_v12 = vpop.f32.mrf.mxu1 }
 0x406   : > { %v4114_v36 = vadd.f32 %v4074_v31, %v12188_v33  ;;  %10047 = vmatprep.mubr.msk.bf16.mxu0 %vm10692_vm0, %v13142_v0 }
 0x407   : > { %v9829_v62 = vpop.f32.mrf.mxu0  ;;  %v9872_v47 = vpop.f32.mrf.mxu1 }
 0x408   : > { %v12303_v11 = vadd.f32 %v4252_v59, %v4114_v36  ;;  %v5020_v59 = vld [vmem:[#allocation2 + $0x75] sm:$0xff] }
 0x409   : > { %v4077_v8 = vpop.f32.mrf.mxu0  ;;  %v4268_v23 = vpop.f32.mrf.mxu1  ;;  %10090 = vmatmul.mubr.msk.bf16.gmra.mxu1 %vm1893_vm3, %v5210_v38  ;;  %v5032_v42 = vpack.c.bf16 %v5020_v59, %v5019_v48  ;;  %v5026_v59 = vld [vmem:[#allocation2 + $0xa5] sm:$0xff] }
 0x40a   : > { %v4115_v56 = vadd.f32 %v4077_v8, %v12194_v21  ;;  %10093 = vmatprep.mubr.msk.bf16.mxu1 %vm10692_vm0, %v13142_v0  ;;  %v5199_v21 = vld [vmem:[#allocation2 + $0x7e] sm:$0xff] }
 0x40b   : > { %v9830_v33 = vpop.f32.mrf.mxu0  ;;  %v9875_v4 = vpop.f32.mrf.mxu1  ;;  %v5211_v24 = vpack.c.bf16 %v5200_v63, %v5199_v21 }
 0x40c   : > { %v12309_v9 = vadd.f32 %v4255_v57, %v4115_v56  ;;  %v5202_v57 = vld [vmem:[#allocation2 + $0x96] sm:$0xff] }
 0x40d   : > { %v4082_v60 = vpop.f32.mrf.mxu0  ;;  %10048 = vmatmul.mubr.msk.bf16.gmra.mxu0 %vm1893_vm3, %v5031_v16  ;;  %v4271_v46 = vpop.f32.mrf.mxu1  ;;  %v5023_v16 = vld [vmem:[#allocation2 + $0x8d] sm:$0xff] }
 0x40e   : > { %v4116_v41 = vadd.f32 %v4082_v60, %v12200_v14  ;;  %10051 = vmatprep.mubr.msk.bf16.mxu0 %vm10692_vm0, %v13142_v0  ;;  %v5205_v60 = vld [vmem:[#allocation2 + $0xae] sm:$0xff] }
 0x40f   : > { %v9833_v2 = vpop.f32.mrf.mxu0  ;;  %v9876_v35 = vpop.f32.mrf.mxu1 }
 0x410   : > { %v12315_v30 = vadd.f32 %v4260_v7, %v4116_v41  ;;  %v5022_v7 = vld [vmem:[#allocation2 + $0x85] sm:$0xff] }
 0x411   : > { %v4085_v53 = vpop.f32.mrf.mxu0  ;;  %v4276_v58 = vpop.f32.mrf.mxu1  ;;  %10094 = vmatmul.mubr.msk.bf16.gmra.mxu1 %vm1893_vm3, %v5211_v24  ;;  %v5033_v19 = vpack.c.bf16 %v5022_v7, %v5021_v25  ;;  %v5214_v24 = vpack.c.bf16 %v5205_v60, %v5205_v60 }
 0x412   : > { %v4117_v45 = vadd.f32 %v4085_v53, %v12206_v3  ;;  %10097 = vmatprep.mubr.msk.bf16.mxu1 %vm10692_vm0, %v13142_v0  ;;  %v5201_v3 = vld [vmem:[#allocation2 + $0x8e] sm:$0xff] }
 0x413   : > { %v9834_v14 = vpop.f32.mrf.mxu0  ;;  %v9879_v17 = vpop.f32.mrf.mxu1  ;;  %v5212_v28 = vpack.c.bf16 %v5202_v57, %v5201_v3  ;;  %v5546_v57 = vld [vmem:[#allocation2 + $0x41] sm:$0xff] }
 0x414   : > { %v12321_v27 = vadd.f32 %v4263_v12, %v4117_v45  ;;  %v5204_v12 = vld [vmem:[#allocation2 + $0xa6] sm:$0xff]  ;;  %v5025_v14 = vld [vmem:[#allocation2 + $0x9d] sm:$0xff] }
 0x415   : > { %v4090_v1 = vpop.f32.mrf.mxu0  ;;  %10052 = vmatmul.mubr.msk.bf16.gmra.mxu0 %vm1893_vm3, %v5032_v42  ;;  %v4279_v29 = vpop.f32.mrf.mxu1  ;;  %v5035_v42 = vpack.c.bf16 %v5026_v59, %v5025_v14 }
 0x416   : > { %v4118_v13 = vadd.f32 %v4090_v1, %v12212_v22  ;;  %10055 = vmatprep.mubr.msk.bf16.mxu0 %vm10692_vm0, %v13142_v0  ;;  %v5927_v29 = vld [vmem:[%s13120_s3 + $0x5c] sm:$0xf] }
 0x417   : > { %v9837_v26 = vpop.f32.mrf.mxu0  ;;  %v9880_v43 = vpop.f32.mrf.mxu1 }
 0x418   : > { %v12327_v51 = vadd.f32 %v4268_v23, %v4118_v13  ;;  %v5024_v23 = vld [vmem:[#allocation2 + $0x95] sm:$0xff] }
 0x419   : > { %v4093_v34 = vpop.f32.mrf.mxu0  ;;  %v4568_v6 = vpop.f32.mrf.mxu1  ;;  %10098 = vmatmul.mubr.msk.bf16.gmra.mxu1 %vm1893_vm3, %v5212_v28  ;;  %v5545_v26 = vld [vmem:[#allocation2 + $0x39] sm:$0xff] }
 0x41a   : > { %v4119_v20 = vadd.f32 %v4093_v34, %v12218_v49  ;;  %10101 = vmatprep.mubr.msk.bf16.mxu1 %vm10692_vm0, %v13142_v0  ;;  %v5203_v49 = vld [vmem:[#allocation2 + $0x9e] sm:$0xff]  ;;  %v5562_v7 = vpack.c.bf16 %v5546_v57, %v5545_v26  ;;  %v5956_v34 = vsel %vm1921_vm2, %v5927_v29, 0  ;;  %v5552_v26 = vld [vmem:[#allocation2 + $0x71] sm:$0xff] }
 0x41b   : > { %v9838_v22 = vpop.f32.mrf.mxu0  ;;  %v9923_v31 = vpop.f32.mrf.mxu1  ;;  %v5213_v8 = vpack.c.bf16 %v5204_v12, %v5203_v49 }
 0x41c   : > { %v12333_v36 = vadd.f32 %v4271_v46, %v4119_v20 }
 0x41d   : > { %v4098_v50 = vpop.f32.mrf.mxu0  ;;  %10056 = vmatmul.mubr.msk.bf16.gmra.mxu0 %vm1893_vm3, %v5033_v19  ;;  %v4571_v62 = vpop.f32.mrf.mxu1 }
 0x41e   : > { %v4120_v47 = vadd.f32 %v4098_v50, %v12224_v52  ;;  %10059 = vmatprep.mubr.msk.bf16.mxu0 %vm10692_vm0, %v13142_v0  ;;  %v5034_v52 = vpack.c.bf16 %v5024_v23, %v5023_v16  ;;  %v5548_v50 = vld [vmem:[#allocation2 + $0x51] sm:$0xff] }
 0x41f   : > { %v9841_v38 = vpop.f32.mrf.mxu0  ;;  %v9924_v18 = vpop.f32.mrf.mxu1 }
 0x420   : > { %v12339_v56 = vadd.f32 %v4276_v58, %v4120_v47 }
 0x421   : > { %v4101_v32 = vpop.f32.mrf.mxu0  ;;  %v4576_v33 = vpop.f32.mrf.mxu1  ;;  %10102 = vmatmul.mubr.msk.bf16.gmra.mxu1 %vm1893_vm3, %v5213_v8 }
 0x422   : > { %10105 = vmatprep.mubr.msk.bf16.mxu1 %vm10692_vm0, %v13142_v0  ;;  %v5368_v32 = vld [vmem:[#allocation2 + $0x40] sm:$0xff] }
 0x423   : > { %v9842_v4 = vpop.f32.mrf.mxu0  ;;  %v9927_v63 = vpop.f32.mrf.mxu1 }
 0x424   : > { %v5367_v63 = vld [vmem:[#allocation2 + $0x38] sm:$0xff] }
 0x425   : > { %v4390_v46 = vpop.f32.mrf.mxu0  ;;  %10060 = vmatmul.mubr.msk.bf16.gmra.mxu0 %vm1893_vm3, %v5034_v52  ;;  %v4579_v41 = vpop.f32.mrf.mxu1 }
 0x426   : > { %v4460_v21 = vadd.f32 %v4390_v46, %v12233_v40  ;;  %10063 = vmatprep.mubr.msk.bf16.mxu0 %vm10692_vm0, %v13142_v0  ;;  %v5384_v46 = vpack.c.bf16 %v5368_v32, %v5367_v63 }
 0x427   : > { %v9885_v2 = vpop.f32.mrf.mxu0  ;;  %v9928_v35 = vpop.f32.mrf.mxu1 }
 0x428   : > { %v12348_v53 = vadd.f32 %v4568_v6, %v4460_v21  ;;  %v5027_v6 = vld [vmem:[#allocation2 + $0xad] sm:$0xff]  ;;  %v5550_v2 = vld [vmem:[#allocation2 + $0x61] sm:$0xff] }
 0x429   : > { %v4393_v58 = vpop.f32.mrf.mxu0  ;;  %v4584_v45 = vpop.f32.mrf.mxu1  ;;  %10106 = vmatmul.mubr.msk.bf16.gmra.mxu1 %vm1893_vm3, %v5214_v24  ;;  %v5036_v31 = vpack.c.bf16 %v5027_v6, %v5027_v6 }
 0x42a   : > { %v4461_v48 = vadd.f32 %v4393_v58, %v12239_v10  ;;  %10149 = vmatprep.mubr.msk.bf16.mxu1 %vm10692_vm0, %v13142_v0 }
 0x42b   : > { %v9886_v40 = vpop.f32.mrf.mxu0  ;;  %v9931_v17 = vpop.f32.mrf.mxu1 }
 0x42c   : > { %v12354_v1 = vadd.f32 %v4571_v62, %v4461_v48  ;;  %v5370_v40 = vld [vmem:[#allocation2 + $0x50] sm:$0xff] }
 0x42d   : > { %v4398_v13 = vpop.f32.mrf.mxu0  ;;  %10064 = vmatmul.mubr.msk.bf16.gmra.mxu0 %vm1893_vm3, %v5035_v42  ;;  %v4587_v3 = vpop.f32.mrf.mxu1 }
 0x42e   : > { %v4462_v10 = vadd.f32 %v4398_v13, %v12249_v61  ;;  %10067 = vmatprep.mubr.msk.bf16.mxu0 %vm10692_vm0, %v13142_v0 }
 0x42f   : > { %v9889_v43 = vpop.f32.mrf.mxu0  ;;  %v9932_v28 = vpop.f32.mrf.mxu1 }
 0x430   : > { %v12364_v20 = vadd.f32 %v4576_v33, %v4462_v10  ;;  %v5749_v33 = vld [vmem:[%s13120_s3 + $0x58] sm:$0xf] }
 0x431   : > { %v4401_v25 = vpop.f32.mrf.mxu0  ;;  %v4592_v22 = vpop.f32.mrf.mxu1  ;;  %10150 = vmatmul.mubr.msk.bf16.vlgmr.msra.gmra.mxu1 %vm1893_vm3, %v5562_v7 }
 0x432   : > { %v4463_v19 = vadd.f32 %v4401_v25, %v12256_v37  ;;  %10153 = vmatprep.mubr.msk.bf16.mxu1 %vm10692_vm0, %v13142_v0  ;;  %10224 = vmatpush3.bf16.msra.mxu1 %v5956_v34  ;;  %v5547_v37 = vld [vmem:[#allocation2 + $0x49] sm:$0xff] }
 0x433   : > { %v9890_v61 = vpop.f32.mrf.mxu0  ;;  %v9935_v12 = vpop.f32.mrf.mxu1  ;;  %10299 = vmatprep.subr.bf16.mxu1 %v13142_v0  ;;  %v5563_v23 = vpack.c.bf16 %v5548_v50, %v5547_v37  ;;  %v5554_v37 = vld [vmem:[#allocation2 + $0x81] sm:$0xff] }
 0x434   : > { %v12371_v62 = vadd.f32 %v4579_v41, %v4463_v19  ;;  %v5778_v41 = vsel %vm1921_vm2, %v5749_v33, 0  ;;  %v5372_v19 = vld [vmem:[#allocation2 + $0x60] sm:$0xff] }
 0x435   : > { %v4406_v47 = vpop.f32.mrf.mxu0  ;;  %10068 = vmatmul.mubr.msk.bf16.gmra.mxu0 %vm1893_vm3, %v5036_v31  ;;  %v4595_v49 = vpop.f32.mrf.mxu1 }
 0x436   : > { %v4464_v38 = vadd.f32 %v4406_v47, %v12265_v15  ;;  %10111 = vmatprep.mubr.msk.bf16.mxu0 %vm10692_vm0, %v13142_v0  ;;  %v5371_v47 = vld [vmem:[#allocation2 + $0x58] sm:$0xff] }
 0x437   : > { %v9893_v18 = vpop.f32.mrf.mxu0  ;;  %v9936_v8 = vpop.f32.mrf.mxu1 }
 0x438   : > { %v12380_v16 = vadd.f32 %v4584_v45, %v4464_v38 }
 0x439   : > { %v4409_v4 = vpop.f32.mrf.mxu0  ;;  %v4600_v52 = vpop.f32.mrf.mxu1  ;;  %10154 = vmatmul.mubr.msk.bf16.gmra.mxu1 %vm1893_vm3, %v5563_v23 }
 0x43a   : > { %v4465_v15 = vadd.f32 %v4409_v4, %v12272_v55  ;;  %10157 = vmatprep.mubr.msk.bf16.mxu1 %vm10692_vm0, %v13142_v0  ;;  %v5549_v55 = vld [vmem:[#allocation2 + $0x59] sm:$0xff] }
 0x43b   : > { %v9894_v60 = vpop.f32.mrf.mxu0  ;;  %v9939_v21 = vpop.f32.mrf.mxu1  ;;  %v5564_v14 = vpack.c.bf16 %v5550_v2, %v5549_v55 }
 0x43c   : > { %v12387_v35 = vadd.f32 %v4587_v3, %v4465_v15  ;;  %v5374_v15 = vld [vmem:[#allocation2 + $0x70] sm:$0xff]  ;;  %v5373_v21 = vld [vmem:[#allocation2 + $0x68] sm:$0xff] }
 0x43d   : > { %v4414_v24 = vpop.f32.mrf.mxu0  ;;  %10112 = vmatmul.mubr.msk.bf16.vlgmr.msra.gmra.mxu0 %vm1893_vm3, %v5384_v46  ;;  %v4603_v59 = vpop.f32.mrf.mxu1  ;;  %v5387_v2 = vpack.c.bf16 %v5374_v15, %v5373_v21 }
 0x43e   : > { %v4466_v58 = vadd.f32 %v4414_v24, %v12279_v5  ;;  %10186 = vmatpush3.bf16.msra.mxu0 %v5778_v41  ;;  %10115 = vmatprep.mubr.msk.bf16.mxu0 %vm10692_vm0, %v13142_v0  ;;  %v5369_v5 = vld [vmem:[#allocation2 + $0x48] sm:$0xff] }
 0x43f   : > { %v9897_v45 = vpop.f32.mrf.mxu0  ;;  %v9940_v48 = vpop.f32.mrf.mxu1  ;;  %10261 = vmatprep.subr.bf16.mxu0 %v13142_v0  ;;  %v5385_v3 = vpack.c.bf16 %v5370_v40, %v5369_v5 }
 0x440   : > { %v12394_v42 = vadd.f32 %v4592_v22, %v4466_v58 }
 0x441   : > { %v4417_v17 = vpop.f32.mrf.mxu0  ;;  %v4608_v57 = vpop.f32.mrf.mxu1  ;;  %10158 = vmatmul.mubr.msk.bf16.gmra.mxu1 %vm1893_vm3, %v5564_v14 }
 0x442   : > { %v4467_v29 = vadd.f32 %v4417_v17, %v12285_v44  ;;  %10161 = vmatprep.mubr.msk.bf16.mxu1 %vm10692_vm0, %v13142_v0  ;;  %v5551_v44 = vld [vmem:[#allocation2 + $0x69] sm:$0xff] }
 0x443   : > { %v9898_v13 = vpop.f32.mrf.mxu0  ;;  %v9943_v10 = vpop.f32.mrf.mxu1  ;;  %v5565_v22 = vpack.c.bf16 %v5552_v26, %v5551_v44 }
 0x444   : > { %v12400_v43 = vadd.f32 %v4595_v49, %v4467_v29  ;;  %v5386_v49 = vpack.c.bf16 %v5372_v19, %v5371_v47  ;;  %v5375_v10 = vld [vmem:[#allocation2 + $0x78] sm:$0xff] }
 0x445   : > { %v4422_v28 = vpop.f32.mrf.mxu0  ;;  %10116 = vmatmul.mubr.msk.bf16.gmra.mxu0 %vm1893_vm3, %v5385_v3  ;;  %v4611_v7 = vpop.f32.mrf.mxu1 }
 0x446   : > { %v4468_v34 = vadd.f32 %v4422_v28, %v12291_v39  ;;  %10119 = vmatprep.mubr.msk.bf16.mxu0 %vm10692_vm0, %v13142_v0 }
 0x447   : > { %v9901_v6 = vpop.f32.mrf.mxu0  ;;  %v9944_v25 = vpop.f32.mrf.mxu1 }
 0x448   : > { %v12406_v61 = vadd.f32 %v4600_v52, %v4468_v34 }
 0x449   : > { %v4425_v31 = vpop.f32.mrf.mxu0  ;;  %v4616_v12 = vpop.f32.mrf.mxu1  ;;  %10162 = vmatmul.mubr.msk.bf16.gmra.mxu1 %vm1893_vm3, %v5565_v22 }
 0x44a   : > { %v4469_v50 = vadd.f32 %v4425_v31, %v12297_v54  ;;  %10165 = vmatprep.mubr.msk.bf16.mxu1 %vm10692_vm0, %v13142_v0  ;;  %v5553_v54 = vld [vmem:[#allocation2 + $0x79] sm:$0xff] }
 0x44b   : > { %v9902_v39 = vpop.f32.mrf.mxu0  ;;  %v9947_v38 = vpop.f32.mrf.mxu1  ;;  %v5566_v52 = vpack.c.bf16 %v5554_v37, %v5553_v54 }
 0x44c   : > { %v12412_v18 = vadd.f32 %v4603_v59, %v4469_v50  ;;  %v5556_v59 = vld [vmem:[#allocation2 + $0x91] sm:$0xff]  ;;  %v5377_v38 = vld [vmem:[#allocation2 + $0x88] sm:$0xff] }
 0x44d   : > { %v4430_v8 = vpop.f32.mrf.mxu0  ;;  %10120 = vmatmul.mubr.msk.bf16.gmra.mxu0 %vm1893_vm3, %v5386_v49  ;;  %v4619_v23 = vpop.f32.mrf.mxu1 }
 0x44e   : > { %v4470_v32 = vadd.f32 %v4430_v8, %v12303_v11  ;;  %10123 = vmatprep.mubr.msk.bf16.mxu0 %vm10692_vm0, %v13142_v0 }
 0x44f   : > { %v9905_v33 = vpop.f32.mrf.mxu0  ;;  %v9948_v4 = vpop.f32.mrf.mxu1 }
 0x450   : > { %v12418_v63 = vadd.f32 %v4608_v57, %v4470_v32  ;;  %v5376_v57 = vld [vmem:[#allocation2 + $0x80] sm:$0xff] }
 0x451   : > { %v4433_v60 = vpop.f32.mrf.mxu0  ;;  %v4624_v46 = vpop.f32.mrf.mxu1  ;;  %10166 = vmatmul.mubr.msk.bf16.gmra.mxu1 %vm1893_vm3, %v5566_v52  ;;  %v5388_v26 = vpack.c.bf16 %v5376_v57, %v5375_v10  ;;  %v5382_v57 = vld [vmem:[#allocation2 + $0xb0] sm:$0xff] }
 0x452   : > { %v4471_v41 = vadd.f32 %v4433_v60, %v12309_v9  ;;  %10169 = vmatprep.mubr.msk.bf16.mxu1 %vm10692_vm0, %v13142_v0  ;;  %v5555_v9 = vld [vmem:[#allocation2 + $0x89] sm:$0xff] }
 0x453   : > { %v9906_v11 = vpop.f32.mrf.mxu0  ;;  %v9951_v24 = vpop.f32.mrf.mxu1  ;;  %v5567_v17 = vpack.c.bf16 %v5556_v59, %v5555_v9 }
 0x454   : > { %v12424_v58 = vadd.f32 %v4611_v7, %v4471_v41  ;;  %v5558_v7 = vld [vmem:[#allocation2 + $0xa1] sm:$0xff] }
 0x455   : > { %v4438_v55 = vpop.f32.mrf.mxu0  ;;  %10124 = vmatmul.mubr.msk.bf16.gmra.mxu0 %vm1893_vm3, %v5387_v2  ;;  %v4627_v45 = vpop.f32.mrf.mxu1  ;;  %v5379_v2 = vld [vmem:[#allocation2 + $0x98] sm:$0xff] }
 0x456   : > { %v4472_v48 = vadd.f32 %v4438_v55, %v12315_v30  ;;  %10127 = vmatprep.mubr.msk.bf16.mxu0 %vm10692_vm0, %v13142_v0  ;;  %v5561_v55 = vld [vmem:[#allocation2 + $0xb9] sm:$0xff] }
 0x457   : > { %v9909_v14 = vpop.f32.mrf.mxu0  ;;  %v9952_v40 = vpop.f32.mrf.mxu1 }
 0x458   : > { %v12430_v29 = vadd.f32 %v4616_v12, %v4472_v48  ;;  %v5378_v12 = vld [vmem:[#allocation2 + $0x90] sm:$0xff] }
 0x459   : > { %v4441_v5 = vpop.f32.mrf.mxu0  ;;  %v4632_v13 = vpop.f32.mrf.mxu1  ;;  %10170 = vmatmul.mubr.msk.bf16.gmra.mxu1 %vm1893_vm3, %v5567_v17  ;;  %v5389_v37 = vpack.c.bf16 %v5378_v12, %v5377_v38  ;;  %v5570_v17 = vpack.c.bf16 %v5561_v55, %v5561_v55  ;;  %v5383_v12 = vld [vmem:[#allocation2 + $0xb8] sm:$0xff] }
 0x45a   : > { %v4473_v3 = vadd.f32 %v4441_v5, %v12321_v27  ;;  %10173 = vmatprep.mubr.msk.bf16.mxu1 %vm10692_vm0, %v13142_v0  ;;  %v5557_v27 = vld [vmem:[#allocation2 + $0x99] sm:$0xff] }
 0x45b   : > { %v9910_v30 = vpop.f32.mrf.mxu0  ;;  %v9955_v28 = vpop.f32.mrf.mxu1  ;;  %v5568_v31 = vpack.c.bf16 %v5558_v7, %v5557_v27  ;;  %v5902_v7 = vld [vmem:[#allocation2 + $0x43] sm:$0xff] }
 0x45c   : > { %v12436_v34 = vadd.f32 %v4619_v23, %v4473_v3  ;;  %v5560_v23 = vld [vmem:[#allocation2 + $0xb1] sm:$0xff]  ;;  %v5381_v30 = vld [vmem:[#allocation2 + $0xa8] sm:$0xff] }
 0x45d   : > { %v4446_v44 = vpop.f32.mrf.mxu0  ;;  %10128 = vmatmul.mubr.msk.bf16.gmra.mxu0 %vm1893_vm3, %v5388_v26  ;;  %v4635_v6 = vpop.f32.mrf.mxu1  ;;  %v5391_v26 = vpack.c.bf16 %v5382_v57, %v5381_v30 }
 0x45e   : > { %v4474_v25 = vadd.f32 %v4446_v44, %v12327_v51  ;;  %10131 = vmatprep.mubr.msk.bf16.mxu0 %vm10692_vm0, %v13142_v0 }
 0x45f   : > { %v9913_v22 = vpop.f32.mrf.mxu0  ;;  %v9956_v19 = vpop.f32.mrf.mxu1 }
 0x460   : > { %v12442_v50 = vadd.f32 %v4624_v46, %v4474_v25  ;;  %v5380_v46 = vld [vmem:[#allocation2 + $0xa0] sm:$0xff] }
 0x461   : > { %v4449_v47 = vpop.f32.mrf.mxu0  ;;  %v4924_v39 = vpop.f32.mrf.mxu1  ;;  %10174 = vmatmul.mubr.msk.bf16.gmra.mxu1 %vm1893_vm3, %v5568_v31 }
 0x462   : > { %v4475_v49 = vadd.f32 %v4449_v47, %v12333_v36  ;;  %10177 = vmatprep.mubr.msk.bf16.mxu1 %vm10692_vm0, %v13142_v0  ;;  %v5559_v36 = vld [vmem:[#allocation2 + $0xa9] sm:$0xff] }
 0x463   : > { %v9914_v51 = vpop.f32.mrf.mxu0  ;;  %v9999_v8 = vpop.f32.mrf.mxu1  ;;  %v5569_v60 = vpack.c.bf16 %v5560_v23, %v5559_v36  ;;  %v5903_v36 = vld [vmem:[#allocation2 + $0x4b] sm:$0xff] }
 0x464   : > { %v12448_v32 = vadd.f32 %v4627_v45, %v4475_v49  ;;  %v5392_v51 = vpack.c.bf16 %v5383_v12, %v5383_v12  ;;  %v5904_v8 = vld [vmem:[#allocation2 + $0x53] sm:$0xff] }
 0x465   : > { %v4454_v54 = vpop.f32.mrf.mxu0  ;;  %10132 = vmatmul.mubr.msk.bf16.gmra.mxu0 %vm1893_vm3, %v5389_v37  ;;  %v4927_v33 = vpop.f32.mrf.mxu1 }
 0x466   : > { %v4476_v4 = vadd.f32 %v4454_v54, %v12339_v56  ;;  %10135 = vmatprep.mubr.msk.bf16.mxu0 %vm10692_vm0, %v13142_v0  ;;  %v5390_v56 = vpack.c.bf16 %v5380_v46, %v5379_v2  ;;  %v6105_v46 = vld [vmem:[%s13120_s3 + $0x60] sm:$0xf] }
 0x467   : > { %v9917_v52 = vpop.f32.mrf.mxu0  ;;  %v10000_v15 = vpop.f32.mrf.mxu1  ;;  %v6134_v55 = vsel %vm1921_vm2, %v6105_v46, 0 }
 0x468   : > { %v12454_v41 = vadd.f32 %v4632_v13, %v4476_v4  ;;  %v5919_v15 = vpack.c.bf16 %v5904_v8, %v5903_v36  ;;  %v5910_v36 = vld [vmem:[#allocation2 + $0x83] sm:$0xff] }
 0x469   : > { %v4457_v21 = vpop.f32.mrf.mxu0  ;;  %v4932_v11 = vpop.f32.mrf.mxu1  ;;  %10178 = vmatmul.mubr.msk.bf16.gmra.mxu1 %vm1893_vm3, %v5569_v60  ;;  %v5724_v60 = vld [vmem:[#allocation2 + $0x42] sm:$0xff] }
 0x46a   : > { %10181 = vmatprep.mubr.msk.bf16.mxu1 %vm10692_vm0, %v13142_v0 }
 0x46b   : > { %v9918_v24 = vpop.f32.mrf.mxu0  ;;  %v10003_v59 = vpop.f32.mrf.mxu1 }
 0x46c   : > { %v5723_v24 = vld [vmem:[#allocation2 + $0x3a] sm:$0xff] }
 0x46d   : > { %v4746_v45 = vpop.f32.mrf.mxu0  ;;  %10136 = vmatmul.mubr.msk.bf16.gmra.mxu0 %vm1893_vm3, %v5390_v56  ;;  %v4935_v48 = vpop.f32.mrf.mxu1  ;;  %v5740_v59 = vpack.c.bf16 %v5724_v60, %v5723_v24 }
 0x46e   : > { %v4816_v9 = vadd.f32 %v4746_v45, %v12348_v53  ;;  %10139 = vmatprep.mubr.msk.bf16.mxu0 %vm10692_vm0, %v13142_v0 }
 0x46f   : > { %v9961_v14 = vpop.f32.mrf.mxu0  ;;  %v10004_v40 = vpop.f32.mrf.mxu1 }
 0x470   : > { %v12463_v5 = vadd.f32 %v4924_v39, %v4816_v9 }
 0x471   : > { %v4749_v13 = vpop.f32.mrf.mxu0  ;;  %v4940_v3 = vpop.f32.mrf.mxu1  ;;  %10182 = vmatmul.mubr.msk.bf16.gmra.mxu1 %vm1893_vm3, %v5570_v17 }
 0x472   : > { %v4817_v10 = vadd.f32 %v4749_v13, %v12354_v1  ;;  %10225 = vmatprep.mubr.msk.bf16.mxu1 %vm10692_vm0, %v13142_v0  ;;  %v5901_v1 = vld [vmem:[#allocation2 + $0x3b] sm:$0xff] }
 0x473   : > { %v9962_v53 = vpop.f32.mrf.mxu0  ;;  %v10007_v28 = vpop.f32.mrf.mxu1  ;;  %v5918_v31 = vpack.c.bf16 %v5902_v7, %v5901_v1 }
 0x474   : > { %v12469_v44 = vadd.f32 %v4927_v33, %v4817_v10  ;;  %v5726_v10 = vld [vmem:[#allocation2 + $0x52] sm:$0xff] }
 0x475   : > { %v4754_v6 = vpop.f32.mrf.mxu0  ;;  %10140 = vmatmul.mubr.msk.bf16.gmra.mxu0 %vm1893_vm3, %v5391_v26  ;;  %v4943_v25 = vpop.f32.mrf.mxu1 }
 0x476   : > { %v4818_v27 = vadd.f32 %v4754_v6, %v12364_v20  ;;  %10143 = vmatprep.mubr.msk.bf16.mxu0 %vm10692_vm0, %v13142_v0 }
 0x477   : > { %v9965_v22 = vpop.f32.mrf.mxu0  ;;  %v10008_v19 = vpop.f32.mrf.mxu1 }
 0x478   : > { %v12475_v47 = vadd.f32 %v4932_v11, %v4818_v27  ;;  %v5908_v27 = vld [vmem:[#allocation2 + $0x73] sm:$0xff] }
 0x479   : > { %v4757_v39 = vpop.f32.mrf.mxu0  ;;  %v4948_v49 = vpop.f32.mrf.mxu1  ;;  %10226 = vmatmul.mubr.msk.bf16.vlgmr.msra.gmra.mxu1 %vm1893_vm3, %v5918_v31 }
 0x47a   : > { %v4819_v38 = vadd.f32 %v4757_v39, %v12371_v62  ;;  %10229 = vmatprep.mubr.msk.bf16.mxu1 %vm10692_vm0, %v13142_v0 }
 0x47b   : > { %v9966_v20 = vpop.f32.mrf.mxu0  ;;  %v10011_v37 = vpop.f32.mrf.mxu1 }
 0x47c   : > { %v12481_v23 = vadd.f32 %v4935_v48, %v4819_v38  ;;  %v5906_v48 = vld [vmem:[#allocation2 + $0x63] sm:$0xff] }
 0x47d   : > { %v4762_v54 = vpop.f32.mrf.mxu0  ;;  %10144 = vmatmul.mubr.msk.bf16.gmra.mxu0 %vm1893_vm3, %v5392_v51  ;;  %v4951_v33 = vpop.f32.mrf.mxu1  ;;  %v5728_v38 = vld [vmem:[#allocation2 + $0x62] sm:$0xff] }
 0x47e   : > { %v4820_v4 = vadd.f32 %v4762_v54, %v12380_v16  ;;  %10187 = vmatprep.mubr.msk.bf16.mxu0 %vm10692_vm0, %v13142_v0  ;;  %v5727_v54 = vld [vmem:[#allocation2 + $0x5a] sm:$0xff] }
 0x47f   : > { %v9969_v62 = vpop.f32.mrf.mxu0  ;;  %v10012_v52 = vpop.f32.mrf.mxu1 }
 0x480   : > { %v12490_v21 = vadd.f32 %v4940_v3, %v4820_v4 }
 0x481   : > { %v4765_v11 = vpop.f32.mrf.mxu0  ;;  %v4956_v2 = vpop.f32.mrf.mxu1  ;;  %10230 = vmatmul.mubr.msk.bf16.gmra.mxu1 %vm1893_vm3, %v5919_v15 }
 0x482   : > { %v4821_v16 = vadd.f32 %v4765_v11, %v12387_v35  ;;  %10233 = vmatprep.mubr.msk.bf16.mxu1 %vm10692_vm0, %v13142_v0  ;;  %v5905_v35 = vld [vmem:[#allocation2 + $0x5b] sm:$0xff] }
 0x483   : > { %v9970_v56 = vpop.f32.mrf.mxu0  ;;  %v10015_v45 = vpop.f32.mrf.mxu1  ;;  %v5920_v3 = vpack.c.bf16 %v5906_v48, %v5905_v35 }
 0x484   : > { %v12497_v9 = vadd.f32 %v4943_v25, %v4821_v16  ;;  %v5730_v16 = vld [vmem:[#allocation2 + $0x72] sm:$0xff]  ;;  %v5729_v45 = vld [vmem:[#allocation2 + $0x6a] sm:$0xff] }
 0x485   : > { %v4770_v14 = vpop.f32.mrf.mxu0  ;;  %10188 = vmatmul.mubr.msk.bf16.vlgmr.msra.gmra.mxu0 %vm1893_vm3, %v5740_v59  ;;  %v4959_v40 = vpop.f32.mrf.mxu1  ;;  %v5743_v48 = vpack.c.bf16 %v5730_v16, %v5729_v45 }
 0x486   : > { %v4822_v17 = vadd.f32 %v4770_v14, %v12394_v42  ;;  %10262 = vmatpush3.bf16.msra.mxu0 %v6134_v55  ;;  %10191 = vmatprep.mubr.msk.bf16.mxu0 %vm10692_vm0, %v13142_v0  ;;  %v5725_v42 = vld [vmem:[#allocation2 + $0x4a] sm:$0xff] }
 0x487   : > { %v9973_v57 = vpop.f32.mrf.mxu0  ;;  %v10016_v13 = vpop.f32.mrf.mxu1  ;;  %10353 = vmatprep.subr.bf16.mxu0 %v13142_v0  ;;  %v5741_v6 = vpack.c.bf16 %v5726_v10, %v5725_v42 }
 0x488   : > { %v12504_v30 = vadd.f32 %v4948_v49, %v4822_v17 }
 0x489   : > { %v4773_v53 = vpop.f32.mrf.mxu0  ;;  %v4964_v26 = vpop.f32.mrf.mxu1  ;;  %10234 = vmatmul.mubr.msk.bf16.gmra.mxu1 %vm1893_vm3, %v5920_v3 }
 0x48a   : > { %v4823_v28 = vadd.f32 %v4773_v53, %v12400_v43  ;;  %10237 = vmatprep.mubr.msk.bf16.mxu1 %vm10692_vm0, %v13142_v0  ;;  %v5907_v43 = vld [vmem:[#allocation2 + $0x6b] sm:$0xff] }
 0x48b   : > { %v9974_v7 = vpop.f32.mrf.mxu0  ;;  %v10019_v25 = vpop.f32.mrf.mxu1  ;;  %v5921_v49 = vpack.c.bf16 %v5908_v27, %v5907_v43 }
 0x48c   : > { %v12510_v1 = vadd.f32 %v4951_v33, %v4823_v28  ;;  %v5742_v33 = vpack.c.bf16 %v5728_v38, %v5727_v54  ;;  %v5731_v25 = vld [vmem:[#allocation2 + $0x7a] sm:$0xff] }
 0x48d   : > { %v4778_v22 = vpop.f32.mrf.mxu0  ;;  %10192 = vmatmul.mubr.msk.bf16.gmra.mxu0 %vm1893_vm3, %v5741_v6  ;;  %v4967_v19 = vpop.f32.mrf.mxu1 }
 0x48e   : > { %v4824_v31 = vadd.f32 %v4778_v22, %v12406_v61  ;;  %10195 = vmatprep.mubr.msk.bf16.mxu0 %vm10692_vm0, %v13142_v0 }
 0x48f   : > { %v9977_v12 = vpop.f32.mrf.mxu0  ;;  %v10020_v39 = vpop.f32.mrf.mxu1 }
 0x490   : > { %v12516_v20 = vadd.f32 %v4956_v2, %v4824_v31 }
 0x491   : > { %v4781_v51 = vpop.f32.mrf.mxu0  ;;  %v4972_v37 = vpop.f32.mrf.mxu1  ;;  %10238 = vmatmul.mubr.msk.bf16.gmra.mxu1 %vm1893_vm3, %v5921_v49 }
 0x492   : > { %v4825_v8 = vadd.f32 %v4781_v51, %v12412_v18  ;;  %10241 = vmatprep.mubr.msk.bf16.mxu1 %vm10692_vm0, %v13142_v0  ;;  %v5909_v18 = vld [vmem:[#allocation2 + $0x7b] sm:$0xff] }
 0x493   : > { %v9978_v61 = vpop.f32.mrf.mxu0  ;;  %v10023_v4 = vpop.f32.mrf.mxu1  ;;  %v5922_v2 = vpack.c.bf16 %v5910_v36, %v5909_v18 }
 0x494   : > { %v12522_v62 = vadd.f32 %v4959_v40, %v4825_v8  ;;  %v5912_v40 = vld [vmem:[#allocation2 + $0x93] sm:$0xff]  ;;  %v5733_v4 = vld [vmem:[#allocation2 + $0x8a] sm:$0xff] }
 0x495   : > { %v4786_v52 = vpop.f32.mrf.mxu0  ;;  %10196 = vmatmul.mubr.msk.bf16.gmra.mxu0 %vm1893_vm3, %v5742_v33  ;;  %v4975_v15 = vpop.f32.mrf.mxu1 }
 0x496   : > { %v4826_v60 = vadd.f32 %v4786_v52, %v12418_v63  ;;  %10199 = vmatprep.mubr.msk.bf16.mxu0 %vm10692_vm0, %v13142_v0 }
 0x497   : > { %v9981_v46 = vpop.f32.mrf.mxu0  ;;  %v10024_v11 = vpop.f32.mrf.mxu1 }
 0x498   : > { %v12528_v24 = vadd.f32 %v4964_v26, %v4826_v60  ;;  %v5732_v26 = vld [vmem:[#allocation2 + $0x82] sm:$0xff] }
 0x499   : > { %v4789_v56 = vpop.f32.mrf.mxu0  ;;  %v4980_v59 = vpop.f32.mrf.mxu1  ;;  %10242 = vmatmul.mubr.msk.bf16.gmra.mxu1 %vm1893_vm3, %v5922_v2  ;;  %v5744_v27 = vpack.c.bf16 %v5732_v26, %v5731_v25  ;;  %v5738_v26 = vld [vmem:[#allocation2 + $0xb2] sm:$0xff] }
 0x49a   : > { %v4827_v55 = vadd.f32 %v4789_v56, %v12424_v58  ;;  %10245 = vmatprep.mubr.msk.bf16.mxu1 %vm10692_vm0, %v13142_v0  ;;  %v5911_v58 = vld [vmem:[#allocation2 + $0x8b] sm:$0xff] }
 0x49b   : > { %v9982_v63 = vpop.f32.mrf.mxu0  ;;  %v10027_v14 = vpop.f32.mrf.mxu1  ;;  %v5923_v53 = vpack.c.bf16 %v5912_v40, %v5911_v58 }
 0x49c   : > { %v12534_v17 = vadd.f32 %v4967_v19, %v4827_v55  ;;  %v5914_v19 = vld [vmem:[#allocation2 + $0xa3] sm:$0xff] }
 0x49d   : > { %v4794_v35 = vpop.f32.mrf.mxu0  ;;  %10200 = vmatmul.mubr.msk.bf16.gmra.mxu0 %vm1893_vm3, %v5743_v48  ;;  %v4983_v57 = vpop.f32.mrf.mxu1  ;;  %v5735_v48 = vld [vmem:[#allocation2 + $0x9a] sm:$0xff] }
 0x49e   : > { %v4828_v13 = vadd.f32 %v4794_v35, %v12430_v29  ;;  %10203 = vmatprep.mubr.msk.bf16.mxu0 %vm10692_vm0, %v13142_v0  ;;  %v5917_v35 = vld [vmem:[#allocation2 + $0xbb] sm:$0xff] }
 0x49f   : > { %v9985_v3 = vpop.f32.mrf.mxu0  ;;  %v10028_v10 = vpop.f32.mrf.mxu1 }
 0x4a0   : > { %v12540_v28 = vadd.f32 %v4972_v37, %v4828_v13  ;;  %v5734_v37 = vld [vmem:[#allocation2 + $0x92] sm:$0xff] }
 0x4a1   : > { %v4797_v42 = vpop.f32.mrf.mxu0  ;;  %v4988_v7 = vpop.f32.mrf.mxu1  ;;  %10246 = vmatmul.mubr.msk.bf16.gmra.mxu1 %vm1893_vm3, %v5923_v53  ;;  %v5745_v36 = vpack.c.bf16 %v5734_v37, %v5733_v4  ;;  %v5926_v53 = vpack.c.bf16 %v5917_v35, %v5917_v35  ;;  %v6082_v35 = vld [vmem:[#allocation2 + $0x54] sm:$0xff] }
 0x4a2   : > { %v4829_v6 = vadd.f32 %v4797_v42, %v12436_v34  ;;  %10249 = vmatprep.mubr.msk.bf16.mxu1 %vm10692_vm0, %v13142_v0  ;;  %v5913_v34 = vld [vmem:[#allocation2 + $0x9b] sm:$0xff] }
 0x4a3   : > { %v9986_v29 = vpop.f32.mrf.mxu0  ;;  %v10031_v22 = vpop.f32.mrf.mxu1  ;;  %v5924_v51 = vpack.c.bf16 %v5914_v19, %v5913_v34 }
 0x4a4   : > { %v12546_v31 = vadd.f32 %v4975_v15, %v4829_v6  ;;  %v5916_v15 = vld [vmem:[#allocation2 + $0xb3] sm:$0xff]  ;;  %v5737_v29 = vld [vmem:[#allocation2 + $0xaa] sm:$0xff] }
 0x4a5   : > { %v4802_v43 = vpop.f32.mrf.mxu0  ;;  %10204 = vmatmul.mubr.msk.bf16.gmra.mxu0 %vm1893_vm3, %v5744_v27  ;;  %v4991_v12 = vpop.f32.mrf.mxu1  ;;  %v5747_v27 = vpack.c.bf16 %v5738_v26, %v5737_v29 }
 0x4a6   : > { %v4830_v39 = vadd.f32 %v4802_v43, %v12442_v50  ;;  %10207 = vmatprep.mubr.msk.bf16.mxu0 %vm10692_vm0, %v13142_v0 }
 0x4a7   : > { %v9989_v49 = vpop.f32.mrf.mxu0  ;;  %v10032_v38 = vpop.f32.mrf.mxu1 }
 0x4a8   : > { %v12552_v8 = vadd.f32 %v4980_v59, %v4830_v39  ;;  %v5736_v59 = vld [vmem:[#allocation2 + $0xa2] sm:$0xff]  ;;  %v5739_v49 = vld [vmem:[#allocation2 + $0xba] sm:$0xff] }
 0x4a9   : > { %v4805_v54 = vpop.f32.mrf.mxu0  ;;  %v5280_v61 = vpop.f32.mrf.mxu1  ;;  %10250 = vmatmul.mubr.msk.bf16.gmra.mxu1 %vm1893_vm3, %v5924_v51 }
 0x4aa   : > { %v4831_v33 = vadd.f32 %v4805_v54, %v12448_v32  ;;  %10253 = vmatprep.mubr.msk.bf16.mxu1 %vm10692_vm0, %v13142_v0  ;;  %v5915_v32 = vld [vmem:[#allocation2 + $0xab] sm:$0xff] }
 0x4ab   : > { %v9990_v50 = vpop.f32.mrf.mxu0  ;;  %v10075_v52 = vpop.f32.mrf.mxu1  ;;  %v5925_v56 = vpack.c.bf16 %v5916_v15, %v5915_v32 }
 0x4ac   : > { %v12558_v60 = vadd.f32 %v4983_v57, %v4831_v33  ;;  %v5748_v33 = vpack.c.bf16 %v5739_v49, %v5739_v49 }
 0x4ad   : > { %v4810_v18 = vpop.f32.mrf.mxu0  ;;  %10208 = vmatmul.mubr.msk.bf16.gmra.mxu0 %vm1893_vm3, %v5745_v36  ;;  %v5283_v46 = vpop.f32.mrf.mxu1 }
 0x4ae   : > { %v4832_v11 = vadd.f32 %v4810_v18, %v12454_v41  ;;  %10211 = vmatprep.mubr.msk.bf16.mxu0 %vm10692_vm0, %v13142_v0  ;;  %v5746_v41 = vpack.c.bf16 %v5736_v59, %v5735_v48 }
 0x4af   : > { %v9993_v2 = vpop.f32.mrf.mxu0  ;;  %v10076_v16 = vpop.f32.mrf.mxu1 }
 0x4b0   : > { %v12564_v55 = vadd.f32 %v4988_v7, %v4832_v11  ;;  %v6079_v16 = vld [vmem:[#allocation2 + $0x3c] sm:$0xff] }
 0x4b1   : > { %v4813_v45 = vpop.f32.mrf.mxu0  ;;  %v5288_v63 = vpop.f32.mrf.mxu1  ;;  %10254 = vmatmul.mubr.msk.bf16.gmra.mxu1 %vm1893_vm3, %v5925_v56 }
 0x4b2   : > { %10257 = vmatprep.mubr.msk.bf16.mxu1 %vm10692_vm0, %v13142_v0 }
 0x4b3   : > { %v9994_v14 = vpop.f32.mrf.mxu0  ;;  %v10079_v40 = vpop.f32.mrf.mxu1 }
 0x4b5   : > { %v5102_v57 = vpop.f32.mrf.mxu0  ;;  %10212 = vmatmul.mubr.msk.bf16.gmra.mxu0 %vm1893_vm3, %v5746_v41  ;;  %v5291_v13 = vpop.f32.mrf.mxu1 }
 0x4b6   : > { %v5172_v58 = vadd.f32 %v5102_v57, %v12463_v5  ;;  %10215 = vmatprep.mubr.msk.bf16.mxu0 %vm10692_vm0, %v13142_v0 }
 0x4b7   : > { %v10037_v3 = vpop.f32.mrf.mxu0  ;;  %v10080_v10 = vpop.f32.mrf.mxu1 }
 0x4b8   : > { %v12573_v42 = vadd.f32 %v5280_v61, %v5172_v58  ;;  %v6081_v3 = vld [vmem:[#allocation2 + $0x4c] sm:$0xff] }
 0x4b9   : > { %v5105_v7 = vpop.f32.mrf.mxu0  ;;  %v5296_v6 = vpop.f32.mrf.mxu1  ;;  %10258 = vmatmul.mubr.msk.bf16.gmra.mxu1 %vm1893_vm3, %v5926_v53  ;;  %v6097_v53 = vpack.c.bf16 %v6082_v35, %v6081_v3 }
 0x4ba   : > { %v5173_v25 = vadd.f32 %v5105_v7, %v12469_v44  ;;  %10301 = vmatprep.mubr.msk.bf16.mxu1 %vm10692_vm0, %v13142_v0 }
 0x4bb   : > { %v10038_v5 = vpop.f32.mrf.mxu0  ;;  %v10083_v22 = vpop.f32.mrf.mxu1 }
 0x4bc   : > { %v12579_v19 = vadd.f32 %v5283_v46, %v5173_v25  ;;  %v6080_v46 = vld [vmem:[#allocation2 + $0x44] sm:$0xff] }
 0x4bd   : > { %v5110_v43 = vpop.f32.mrf.mxu0  ;;  %10216 = vmatmul.mubr.msk.bf16.gmra.mxu0 %vm1893_vm3, %v5747_v27  ;;  %v5299_v12 = vpop.f32.mrf.mxu1  ;;  %v6096_v59 = vpack.c.bf16 %v6080_v46, %v6079_v16  ;;  %v6084_v27 = vld [vmem:[#allocation2 + $0x64] sm:$0xff] }
 0x4be   : > { %v5174_v39 = vadd.f32 %v5110_v43, %v12475_v47  ;;  %10219 = vmatprep.mubr.msk.bf16.mxu0 %vm10692_vm0, %v13142_v0 }
 0x4bf   : > { %v10041_v34 = vpop.f32.mrf.mxu0  ;;  %v10084_v44 = vpop.f32.mrf.mxu1 }
 0x4c0   : > { %v12585_v38 = vadd.f32 %v5288_v63, %v5174_v39  ;;  %v6083_v39 = vld [vmem:[#allocation2 + $0x5c] sm:$0xff] }
 0x4c1   : > { %v5113_v51 = vpop.f32.mrf.mxu0  ;;  %v5304_v37 = vpop.f32.mrf.mxu1  ;;  %v6098_v44 = vpack.c.bf16 %v6084_v27, %v6083_v39 }
 0x4c2   : > { %v5175_v54 = vadd.f32 %v5113_v51, %v12481_v23 }
 0x4c3   : > { %v10042_v61 = vpop.f32.mrf.mxu0  ;;  %v10087_v4 = vpop.f32.mrf.mxu1 }
 0x4c4   : > { %v12588_v50 = vadd.f32 %v5291_v13, %v5175_v54  ;;  %v6086_v4 = vld [vmem:[#allocation2 + $0x74] sm:$0xff] }
 0x4c5   : > { %v5118_v36 = vpop.f32.mrf.mxu0  ;;  %10220 = vmatmul.mubr.msk.bf16.gmra.mxu0 %vm1893_vm3, %v5748_v33  ;;  %v5307_v47 = vpop.f32.mrf.mxu1 }
 0x4c6   : > { %v5176_v52 = vadd.f32 %v5118_v36, %v12490_v21  ;;  %10263 = vmatprep.mubr.msk.bf16.mxu0 %vm10692_vm0, %v13142_v0 }
 0x4c7   : > { %v10045_v15 = vpop.f32.mrf.mxu0  ;;  %v10088_v18 = vpop.f32.mrf.mxu1 }
 0x4c8   : > { %v12594_v11 = vadd.f32 %v5296_v6, %v5176_v52  ;;  %v6085_v15 = vld [vmem:[#allocation2 + $0x6c] sm:$0xff] }
 0x4c9   : > { %v5121_v23 = vpop.f32.mrf.mxu0  ;;  %v5312_v32 = vpop.f32.mrf.mxu1  ;;  %v6099_v46 = vpack.c.bf16 %v6086_v4, %v6085_v15 }
 0x4ca   : > { %v5177_v2 = vadd.f32 %v5121_v23, %v12497_v9 }
 0x4cb   : > { %v10046_v56 = vpop.f32.mrf.mxu0  ;;  %v10091_v45 = vpop.f32.mrf.mxu1 }
 0x4cc   : > { %v12597_v63 = vadd.f32 %v5299_v12, %v5177_v2  ;;  %v6088_v45 = vld [vmem:[#allocation2 + $0x84] sm:$0xff] }
 0x4cd   : > { %v5126_v48 = vpop.f32.mrf.mxu0  ;;  %10264 = vmatmul.mubr.msk.bf16.vlgmr.msra.gmra.mxu0 %vm1893_vm3, %v6096_v59  ;;  %v5315_v21 = vpop.f32.mrf.mxu1 }
 0x4ce   : > { %v5178_v14 = vadd.f32 %v5126_v48, %v12504_v30  ;;  %10267 = vmatprep.mubr.msk.bf16.mxu0 %vm10692_vm0, %v13142_v0 }
 0x4cf   : > { %v10049_v41 = vpop.f32.mrf.mxu0  ;;  %v10092_v40 = vpop.f32.mrf.mxu1 }
 0x4d0   : > { %v12603_v57 = vadd.f32 %v5304_v37, %v5178_v14  ;;  %v6087_v41 = vld [vmem:[#allocation2 + $0x7c] sm:$0xff] }
 0x4d1   : > { %v5129_v9 = vpop.f32.mrf.mxu0  ;;  %v5320_v13 = vpop.f32.mrf.mxu1  ;;  %v6100_v35 = vpack.c.bf16 %v6088_v45, %v6087_v41 }
 0x4d2   : > { %v5179_v58 = vadd.f32 %v5129_v9, %v12510_v1 }
 0x4d3   : > { %v10050_v10 = vpop.f32.mrf.mxu0  ;;  %v10095_v26 = vpop.f32.mrf.mxu1 }
 0x4d4   : > { %v12606_v7 = vadd.f32 %v5307_v47, %v5179_v58  ;;  %v6090_v26 = vld [vmem:[#allocation2 + $0x94] sm:$0xff] }
 0x4d5   : > { %v5134_v6 = vpop.f32.mrf.mxu0  ;;  %10268 = vmatmul.mubr.msk.bf16.gmra.mxu0 %vm1893_vm3, %v6097_v53  ;;  %v5323_v30 = vpop.f32.mrf.mxu1 }
 0x4d6   : > { %v5180_v25 = vadd.f32 %v5134_v6, %v12516_v20  ;;  %10271 = vmatprep.mubr.msk.bf16.mxu0 %vm10692_vm0, %v13142_v0 }
 0x4d7   : > { %v10053_v29 = vpop.f32.mrf.mxu0  ;;  %v10096_v5 = vpop.f32.mrf.mxu1 }
 0x4d8   : > { %v12612_v22 = vadd.f32 %v5312_v32, %v5180_v25  ;;  %v6089_v29 = vld [vmem:[#allocation2 + $0x8c] sm:$0xff]  ;;  %v10588_v5 = vld [vmem:[%s13122_s5] sm:$0xff]  }
 0x4d9   : > { %v5137_v1 = vpop.f32.mrf.mxu0  ;;  %v5328_v43 = vpop.f32.mrf.mxu1  ;;  %10300 = vmatpush3.bf16.msra.mxu1 %v10588_v5 }
 0x4da   : > { %v5181_v12 = vadd.f32 %v5137_v1, %v12522_v62  ;;  %v6101_v1 = vpack.c.bf16 %v6090_v26, %v6089_v29  ;;  %10305 = vmatprep.subr.bf16.mxu1 %v13142_v0 }
 0x4db   : > { %v10054_v34 = vpop.f32.mrf.mxu0  ;;  %v10099_v49 = vpop.f32.mrf.mxu1 }
 0x4dc   : > { %v12615_v51 = vadd.f32 %v5315_v21, %v5181_v12  ;;  %v6092_v49 = vld [vmem:[#allocation2 + $0xa4] sm:$0xff] }
 0x4dd   : > { %v5142_v37 = vpop.f32.mrf.mxu0  ;;  %10272 = vmatmul.mubr.msk.bf16.gmra.mxu0 %vm1893_vm3, %v6098_v44  ;;  %v5331_v20 = vpop.f32.mrf.mxu1 }
 0x4de   : > { %v5182_v54 = vadd.f32 %v5142_v37, %v12528_v24  ;;  %10275 = vmatprep.mubr.msk.bf16.mxu0 %vm10692_vm0, %v13142_v0 }
 0x4df   : > { %v10057_v61 = vpop.f32.mrf.mxu0  ;;  %v10100_v33 = vpop.f32.mrf.mxu1 }
 0x4e0   : > { %v12621_v36 = vadd.f32 %v5320_v13, %v5182_v54  ;;  %v6091_v61 = vld [vmem:[#allocation2 + $0x9c] sm:$0xff] }
 0x4e1   : > { %v5145_v62 = vpop.f32.mrf.mxu0  ;;  %v5336_v47 = vpop.f32.mrf.mxu1  ;;  %v6102_v4 = vpack.c.bf16 %v6092_v49, %v6091_v61 }
 0x4e2   : > { %v5183_v52 = vadd.f32 %v5145_v62, %v12534_v17 }
 0x4e3   : > { %v10058_v18 = vpop.f32.mrf.mxu0  ;;  %v10103_v23 = vpop.f32.mrf.mxu1 }
 0x4e4   : > { %v12624_v32 = vadd.f32 %v5323_v30, %v5183_v52 }
 0x4e5   : > { %v5150_v2 = vpop.f32.mrf.mxu0  ;;  %10276 = vmatmul.mubr.msk.bf16.gmra.mxu0 %vm1893_vm3, %v6099_v46  ;;  %v5339_v24 = vpop.f32.mrf.mxu1  ;;  %v6094_v46 = vld [vmem:[#allocation2 + $0xb4] sm:$0xff] }
 0x4e6   : > { %v5184_v16 = vadd.f32 %v5150_v2, %v12540_v28  ;;  %10279 = vmatprep.mubr.msk.bf16.mxu0 %vm10692_vm0, %v13142_v0 }
 0x4e7   : > { %v10061_v56 = vpop.f32.mrf.mxu0  ;;  %v10104_v59 = vpop.f32.mrf.mxu1 }
 0x4e8   : > { %v12630_v48 = vadd.f32 %v5328_v43, %v5184_v16  ;;  %v6093_v56 = vld [vmem:[#allocation2 + $0xac] sm:$0xff] }
 0x4e9   : > { %v5153_v17 = vpop.f32.mrf.mxu0  ;;  %v5344_v21 = vpop.f32.mrf.mxu1  ;;  %v6103_v45 = vpack.c.bf16 %v6094_v46, %v6093_v56 }
 0x4ea   : > { %v5185_v14 = vadd.f32 %v5153_v17, %v12546_v31 }
 0x4eb   : > { %v10062_v40 = vpop.f32.mrf.mxu0  ;;  %v10107_v9 = vpop.f32.mrf.mxu1 }
 0x4ec   : > { %v12633_v13 = vadd.f32 %v5331_v20, %v5185_v14  ;;  %v6095_v9 = vld [vmem:[#allocation2 + $0xbc] sm:$0xff] }
 0x4ed   : > { %v5158_v58 = vpop.f32.mrf.mxu0  ;;  %10280 = vmatmul.mubr.msk.bf16.gmra.mxu0 %vm1893_vm3, %v6100_v35  ;;  %v5347_v28 = vpop.f32.mrf.mxu1 }
 0x4ee   : > { %v5186_v3 = vadd.f32 %v5158_v58, %v12552_v8  ;;  %10283 = vmatprep.mubr.msk.bf16.mxu0 %vm10692_vm0, %v13142_v0 }
 0x4ef   : > { %v10065_v10 = vpop.f32.mrf.mxu0  ;;  %v10108_v53 = vpop.f32.mrf.mxu1 }
 0x4f0   : > { %v12639_v6 = vadd.f32 %v5336_v47, %v5186_v3  ;;  %v6104_v53 = vpack.c.bf16 %v6095_v9, %v6095_v9 }
 0x4f1   : > { %v5161_v31 = vpop.f32.mrf.mxu0  ;;  %v5636_v30 = vpop.f32.mrf.mxu1 }
 0x4f2   : > { %v5187_v25 = vadd.f32 %v5161_v31, %v12558_v60 }
 0x4f3   : > { %v10066_v27 = vpop.f32.mrf.mxu0  ;;  %v10151_v8 = vpop.f32.mrf.mxu1 }
 0x4f4   : > { %v12645_v43 = vadd.f32 %v5339_v24, %v5187_v25 }
 0x4f5   : > { %v5166_v12 = vpop.f32.mrf.mxu0  ;;  %10284 = vmatmul.mubr.msk.bf16.gmra.mxu0 %vm1893_vm3, %v6101_v1  ;;  %v5639_v39 = vpop.f32.mrf.mxu1 }
 0x4f6   : > { %v5188_v34 = vadd.f32 %v5166_v12, %v12564_v55  ;;  %10287 = vmatprep.mubr.msk.bf16.mxu0 %vm10692_vm0, %v13142_v0 }
 0x4f7   : > { %v10069_v60 = vpop.f32.mrf.mxu0  ;;  %v10152_v44 = vpop.f32.mrf.mxu1 }
 0x4f8   : > { %v12652_v37 = vadd.f32 %v5344_v21, %v5188_v34 }
 0x4f9   : > { %v5169_v20 = vpop.f32.mrf.mxu0  ;;  %v5644_v54 = vpop.f32.mrf.mxu1 }
 0x4fb   : > { %v10070_v33 = vpop.f32.mrf.mxu0  ;;  %v10155_v62 = vpop.f32.mrf.mxu1 }
 0x4fd   : > { %v5458_v47 = vpop.f32.mrf.mxu0  ;;  %10288 = vmatmul.mubr.msk.bf16.gmra.mxu0 %vm1893_vm3, %v6102_v4  ;;  %v5647_v52 = vpop.f32.mrf.mxu1 }
 0x4fe   : > { %v5528_v55 = vadd.f32 %v5458_v47, %v12573_v42  ;;  %10291 = vmatprep.mubr.msk.bf16.mxu0 %vm10692_vm0, %v13142_v0 }
 0x4ff   : > { %v10113_v15 = vpop.f32.mrf.mxu0  ;;  %v10156_v18 = vpop.f32.mrf.mxu1 }
 0x500   : > { %v12658_v23 = vadd.f32 %v5636_v30, %v5528_v55 }
 0x501   : > { %v5461_v2 = vpop.f32.mrf.mxu0  ;;  %v5652_v24 = vpop.f32.mrf.mxu1 }
 0x502   : > { %v5529_v16 = vadd.f32 %v5461_v2, %v12579_v19 }
 0x503   : > { %v10114_v59 = vpop.f32.mrf.mxu0  ;;  %v10159_v17 = vpop.f32.mrf.mxu1 }
 0x504   : > { %v12661_v21 = vadd.f32 %v5639_v39, %v5529_v16 }
 0x505   : > { %v5466_v14 = vpop.f32.mrf.mxu0  ;;  %10292 = vmatmul.mubr.msk.bf16.gmra.mxu0 %vm1893_vm3, %v6103_v45  ;;  %v5655_v42 = vpop.f32.mrf.mxu1 }
 0x506   : > { %v5530_v41 = vadd.f32 %v5466_v14, %v12585_v38  ;;  %10295 = vmatprep.mubr.msk.bf16.mxu0 %vm10692_vm0, %v13142_v0 }
 0x507   : > { %v10117_v40 = vpop.f32.mrf.mxu0  ;;  %v10160_v35 = vpop.f32.mrf.mxu1 }
 0x508   : > { %v12667_v58 = vadd.f32 %v5644_v54, %v5530_v41 }
 0x509   : > { %v5469_v19 = vpop.f32.mrf.mxu0  ;;  %v5660_v28 = vpop.f32.mrf.mxu1 }
 0x50a   : > { %v5531_v3 = vadd.f32 %v5469_v19, %v12588_v50 }
 0x50b   : > { %v10118_v10 = vpop.f32.mrf.mxu0  ;;  %v10163_v26 = vpop.f32.mrf.mxu1 }
 0x50c   : > { %v12670_v31 = vadd.f32 %v5647_v52, %v5531_v3 }
 0x50d   : > { %v5474_v30 = vpop.f32.mrf.mxu0  ;;  %10296 = vmatmul.mubr.msk.bf16.gmra.mxu0 %vm1893_vm3, %v6104_v53  ;;  %v5663_v38 = vpop.f32.mrf.mxu1 }
 0x50e   : > { %v5532_v25 = vadd.f32 %v5474_v30, %v12594_v11  ;;  %10355 = vmatprep.mubr.msk.bf16.mxu0 %vm10692_vm0, %v13142_v0 }
 0x50f   : > { %v10121_v29 = vpop.f32.mrf.mxu0  ;;  %v10164_v5 = vpop.f32.mrf.mxu1 }
 0x510   : > { %v12676_v27 = vadd.f32 %v5652_v24, %v5532_v25 }
 0x511   : > { %v5477_v1 = vpop.f32.mrf.mxu0  ;;  %v5668_v50 = vpop.f32.mrf.mxu1 }
 0x512   : > { %v5533_v8 = vadd.f32 %v5477_v1, %v12597_v63 }
 0x513   : > { %v10122_v12 = vpop.f32.mrf.mxu0  ;;  %v10167_v39 = vpop.f32.mrf.mxu1 }
 0x514   : > { %v12679_v34 = vadd.f32 %v5655_v42, %v5533_v8 }
 0x515   : > { %v5482_v60 = vpop.f32.mrf.mxu0  ;;  %v5671_v44 = vpop.f32.mrf.mxu1 }
 0x516   : > { %v5534_v49 = vadd.f32 %v5482_v60, %v12603_v57 }
 0x517   : > { %v10125_v11 = vpop.f32.mrf.mxu0  ;;  %v10168_v20 = vpop.f32.mrf.mxu1 }
 0x518   : > { %v12682_v54 = vadd.f32 %v5660_v28, %v5534_v49 }
 0x519   : > { %v5485_v61 = vpop.f32.mrf.mxu0  ;;  %v5676_v33 = vpop.f32.mrf.mxu1 }
 0x51a   : > { %v5535_v4 = vadd.f32 %v5485_v61, %v12606_v7 }
 0x51b   : > { %v10126_v62 = vpop.f32.mrf.mxu0  ;;  %v10171_v47 = vpop.f32.mrf.mxu1 }
 0x51c   : > { %v12685_v52 = vadd.f32 %v5663_v38, %v5535_v4 }
 0x51d   : > { %v5490_v63 = vpop.f32.mrf.mxu0  ;;  %v5679_v55 = vpop.f32.mrf.mxu1 }
 0x51e   : > { %v5536_v15 = vadd.f32 %v5490_v63, %v12612_v22 }
 0x51f   : > { %v10129_v18 = vpop.f32.mrf.mxu0  ;;  %v10172_v46 = vpop.f32.mrf.mxu1 }
 0x520   : > { %v12688_v2 = vadd.f32 %v5668_v50, %v5536_v15 }
 0x521   : > { %v5493_v57 = vpop.f32.mrf.mxu0  ;;  %v5684_v24 = vpop.f32.mrf.mxu1 }
 0x522   : > { %v5537_v16 = vadd.f32 %v5493_v57, %v12615_v51 }
 0x523   : > { %v10130_v56 = vpop.f32.mrf.mxu0  ;;  %v10175_v59 = vpop.f32.mrf.mxu1 }
 0x524   : > { %v12691_v45 = vadd.f32 %v5671_v44, %v5537_v16 }
 0x525   : > { %v5498_v7 = vpop.f32.mrf.mxu0  ;;  %v5687_v17 = vpop.f32.mrf.mxu1 }
 0x526   : > { %v5538_v14 = vadd.f32 %v5498_v7, %v12621_v36 }
 0x527   : > { %v10133_v42 = vpop.f32.mrf.mxu0  ;;  %v10176_v41 = vpop.f32.mrf.mxu1 }
 0x528   : > { %v12694_v40 = vadd.f32 %v5676_v33, %v5538_v14 }
 0x529   : > { %v5501_v22 = vpop.f32.mrf.mxu0  ;;  %v5692_v35 = vpop.f32.mrf.mxu1 }
 0x52a   : > { %v5539_v9 = vadd.f32 %v5501_v22, %v12624_v32 }
 0x52b   : > { %v10134_v19 = vpop.f32.mrf.mxu0  ;;  %v10179_v28 = vpop.f32.mrf.mxu1 }
 0x52c   : > { %v12697_v3 = vadd.f32 %v5679_v55, %v5539_v9 }
 0x52d   : > { %v5506_v51 = vpop.f32.mrf.mxu0  ;;  %v5695_v10 = vpop.f32.mrf.mxu1 }
 0x52e   : > { %v5540_v53 = vadd.f32 %v5506_v51, %v12630_v48 }
 0x52f   : > { %v10137_v26 = vpop.f32.mrf.mxu0  ;;  %v10180_v30 = vpop.f32.mrf.mxu1 }
 0x530   : > { %v12700_v38 = vadd.f32 %v5684_v24, %v5540_v53 }
 0x531   : > { %v5509_v36 = vpop.f32.mrf.mxu0  ;;  %v5700_v25 = vpop.f32.mrf.mxu1 }
 0x532   : > { %v5541_v29 = vadd.f32 %v5509_v36, %v12633_v13 }
 0x533   : > { %v10138_v5 = vpop.f32.mrf.mxu0  ;;  %v10183_v1 = vpop.f32.mrf.mxu1 }
 0x534   : > { %v12703_v50 = vadd.f32 %v5687_v17, %v5541_v29 }
 0x535   : > { %v5514_v32 = vpop.f32.mrf.mxu0  ;;  %v5703_v8 = vpop.f32.mrf.mxu1 }
 0x536   : > { %v5542_v12 = vadd.f32 %v5514_v32, %v12639_v6 }
 0x537   : > { %v10141_v39 = vpop.f32.mrf.mxu0  ;;  %v10184_v60 = vpop.f32.mrf.mxu1 }
 0x538   : > { %v12706_v44 = vadd.f32 %v5692_v35, %v5542_v12 }
 0x539   : > { %v5517_v48 = vpop.f32.mrf.mxu0  ;;  %v5992_v49 = vpop.f32.mrf.mxu1 }
 0x53a   : > { %v5543_v11 = vadd.f32 %v5517_v48, %v12645_v43 }
 0x53b   : > { %v10142_v20 = vpop.f32.mrf.mxu0  ;;  %v10227_v61 = vpop.f32.mrf.mxu1 }
 0x53c   : > { %v12709_v33 = vadd.f32 %v5695_v10, %v5543_v11 }
 0x53d   : > { %v5522_v13 = vpop.f32.mrf.mxu0  ;;  %v5995_v4 = vpop.f32.mrf.mxu1 }
 0x53e   : > { %v5544_v62 = vadd.f32 %v5522_v13, %v12652_v37 }
 0x53f   : > { %v10145_v47 = vpop.f32.mrf.mxu0  ;;  %v10228_v63 = vpop.f32.mrf.mxu1 }
 0x540   : > { %v12712_v55 = vadd.f32 %v5700_v25, %v5544_v62 }
 0x541   : > { %v5525_v6 = vpop.f32.mrf.mxu0  ;;  %v6000_v15 = vpop.f32.mrf.mxu1 }
 0x543   : > { %v10146_v18 = vpop.f32.mrf.mxu0  ;;  %v10231_v46 = vpop.f32.mrf.mxu1 }
 0x545   : > { %v5814_v57 = vpop.f32.mrf.mxu0  ;;  %v6003_v24 = vpop.f32.mrf.mxu1 }
 0x546   : > { %v5884_v43 = vadd.f32 %v5814_v57, %v12658_v23 }
 0x547   : > { %v10189_v16 = vpop.f32.mrf.mxu0  ;;  %v10232_v56 = vpop.f32.mrf.mxu1 }
 0x548   : > { %v12715_v59 = vadd.f32 %v5992_v49, %v5884_v43 }
 0x549   : > { %v5817_v7 = vpop.f32.mrf.mxu0  ;;  %v6008_v17 = vpop.f32.mrf.mxu1 }
 0x54a   : > { %v5885_v37 = vadd.f32 %v5817_v7, %v12661_v21  ;;  %v10589_v21 = vld [vmem:[%s13122_s5 + $0x48] sm:$0xff]  }
 0x54b   : > { %v10190_v14 = vpop.f32.mrf.mxu0  ;;  %v10235_v42 = vpop.f32.mrf.mxu1  ;;  %10354 = vmatpush3.bf16.msra.mxu0 %v10589_v21 }
 0x54c   : > { %v12718_v41 = vadd.f32 %v5995_v4, %v5885_v37  ;;  %10365 = vmatprep.subr.bf16.mxu0 %v13142_v0 }
 0x54d   : > { %v5822_v22 = vpop.f32.mrf.mxu0  ;;  %v6011_v35 = vpop.f32.mrf.mxu1 }
 0x54e   : > { %v5886_v9 = vadd.f32 %v5822_v22, %v12667_v58 }
 0x54f   : > { %v10193_v19 = vpop.f32.mrf.mxu0  ;;  %v10236_v28 = vpop.f32.mrf.mxu1 }
 0x550   : > { %v12721_v51 = vadd.f32 %v6000_v15, %v5886_v9 }
 0x551   : > { %v5825_v23 = vpop.f32.mrf.mxu0  ;;  %v6016_v10 = vpop.f32.mrf.mxu1 }
 0x552   : > { %v5887_v53 = vadd.f32 %v5825_v23, %v12670_v31 }
 0x553   : > { %v10194_v26 = vpop.f32.mrf.mxu0  ;;  %v10239_v30 = vpop.f32.mrf.mxu1 }
 0x554   : > { %v12727_v36 = vadd.f32 %v6003_v24, %v5887_v53 }
 0x555   : > { %v5830_v25 = vpop.f32.mrf.mxu0  ;;  %v6019_v29 = vpop.f32.mrf.mxu1 }
 0x556   : > { %v5888_v58 = vadd.f32 %v5830_v25, %v12676_v27 }
 0x557   : > { %v10197_v5 = vpop.f32.mrf.mxu0  ;;  %v10240_v1 = vpop.f32.mrf.mxu1 }
 0x558   : > { %v12731_v32 = vadd.f32 %v6008_v17, %v5888_v58 }
 0x559   : > { %v5833_v31 = vpop.f32.mrf.mxu0  ;;  %v6024_v8 = vpop.f32.mrf.mxu1 }
 0x55a   : > { %v5889_v12 = vadd.f32 %v5833_v31, %v12679_v34 }
 0x55b   : > { %v10198_v39 = vpop.f32.mrf.mxu0  ;;  %v10243_v60 = vpop.f32.mrf.mxu1 }
 0x55c   : > { %v12734_v48 = vadd.f32 %v6011_v35, %v5889_v12 }
 0x55d   : > { %v5838_v49 = vpop.f32.mrf.mxu0  ;;  %v6027_v11 = vpop.f32.mrf.mxu1 }
 0x55e   : > { %v5890_v20 = vadd.f32 %v5838_v49, %v12682_v54 }
 0x55f   : > { %v10201_v61 = vpop.f32.mrf.mxu0  ;;  %v10244_v27 = vpop.f32.mrf.mxu1 }
 0x560   : > { %v12737_v13 = vadd.f32 %v6016_v10, %v5890_v20 }
 0x561   : > { %v5841_v4 = vpop.f32.mrf.mxu0  ;;  %v6032_v62 = vpop.f32.mrf.mxu1 }
 0x562   : > { %v5891_v47 = vadd.f32 %v5841_v4, %v12685_v52 }
 0x563   : > { %v10202_v63 = vpop.f32.mrf.mxu0  ;;  %v10247_v6 = vpop.f32.mrf.mxu1 }
 0x564   : > { %v12740_v15 = vadd.f32 %v6019_v29, %v5891_v47 }
 0x565   : > { %v5846_v34 = vpop.f32.mrf.mxu0  ;;  %v6035_v18 = vpop.f32.mrf.mxu1 }
 0x566   : > { %v5892_v46 = vadd.f32 %v5846_v34, %v12688_v2 }
 0x567   : > { %v10205_v57 = vpop.f32.mrf.mxu0  ;;  %v10248_v24 = vpop.f32.mrf.mxu1 }
 0x568   : > { %v12743_v43 = vadd.f32 %v6024_v8, %v5892_v46 }
 0x569   : > { %v5849_v54 = vpop.f32.mrf.mxu0  ;;  %v6040_v16 = vpop.f32.mrf.mxu1 }
 0x56a   : > { %v5893_v56 = vadd.f32 %v5849_v54, %v12691_v45 }
 0x56b   : > { %v10206_v7 = vpop.f32.mrf.mxu0  ;;  %v10251_v17 = vpop.f32.mrf.mxu1 }
 0x56c   : > { %v12746_v37 = vadd.f32 %v6027_v11, %v5893_v56 }
 0x56d   : > { %v5854_v52 = vpop.f32.mrf.mxu0  ;;  %v6043_v14 = vpop.f32.mrf.mxu1 }
 0x56e   : > { %v5894_v42 = vadd.f32 %v5854_v52, %v12694_v40 }
 0x56f   : > { %v10209_v22 = vpop.f32.mrf.mxu0  ;;  %v10252_v35 = vpop.f32.mrf.mxu1 }
 0x570   : > { %v12749_v9 = vadd.f32 %v6032_v62, %v5894_v42 }
 0x571   : > { %v5857_v2 = vpop.f32.mrf.mxu0  ;;  %v6048_v19 = vpop.f32.mrf.mxu1 }
 0x572   : > { %v5895_v28 = vadd.f32 %v5857_v2, %v12697_v3 }
 0x573   : > { %v10210_v23 = vpop.f32.mrf.mxu0  ;;  %v10255_v10 = vpop.f32.mrf.mxu1 }
 0x574   : > { %v12752_v53 = vadd.f32 %v6035_v18, %v5895_v28 }
 0x575   : > { %v5862_v45 = vpop.f32.mrf.mxu0  ;;  %v6051_v26 = vpop.f32.mrf.mxu1 }
 0x576   : > { %v5896_v30 = vadd.f32 %v5862_v45, %v12700_v38 }
 0x577   : > { %v10213_v21 = vpop.f32.mrf.mxu0  ;;  %v10256_v25 = vpop.f32.mrf.mxu1 }
 0x578   : > { %v12755_v29 = vadd.f32 %v6040_v16, %v5896_v30 }
 0x579   : > { %v5865_v40 = vpop.f32.mrf.mxu0  ;;  %v6056_v58 = vpop.f32.mrf.mxu1 }
 0x57a   : > { %v5897_v5 = vadd.f32 %v5865_v40, %v12703_v50 }
 0x57b   : > { %v10214_v1 = vpop.f32.mrf.mxu0  ;;  %v10259_v31 = vpop.f32.mrf.mxu1 }
 0x57c   : > { %v12758_v8 = vadd.f32 %v6043_v14, %v5897_v5 }
 0x57d   : > { %v5870_v3 = vpop.f32.mrf.mxu0  ;;  %v6059_v12 = vpop.f32.mrf.mxu1 }
 0x57e   : > { %v5898_v39 = vadd.f32 %v5870_v3, %v12706_v44  ;;  %v12772_v44 = vld [vmem:[%s13121_s4] ss:$0 sm:$0xff] }
 0x57f   : > { %v10217_v60 = vpop.f32.mrf.mxu0  ;;  %v10260_v49 = vpop.f32.mrf.mxu1 }
 0x580   : > { %v12761_v11 = vadd.f32 %v6048_v19, %v5898_v39 }
 0x581   : > { %v5873_v38 = vpop.f32.mrf.mxu0 }
 0x582   : > { %v5899_v20 = vadd.f32 %v5873_v38, %v12709_v33 }
 0x583   : > { %v10218_v61 = vpop.f32.mrf.mxu0 }
 0x584   : > { %v12764_v27 = vadd.f32 %v6051_v26, %v5899_v20 }
 0x585   : > { %v5878_v4 = vpop.f32.mrf.mxu0 }
 0x586   : > { %v5900_v50 = vadd.f32 %v5878_v4, %v12712_v55 }
 0x587   : > { %v10221_v62 = vpop.f32.mrf.mxu0 }
 0x588   : > { %v12767_v47 = vadd.f32 %v6056_v58, %v5900_v50 }
 0x589   : > { %v5881_v63 = vpop.f32.mrf.mxu0 }
 0x58b   : > { %v10222_v6 = vpop.f32.mrf.mxu0 }
 0x58d   : > { %v6170_v34 = vpop.f32.mrf.mxu0 }
 0x58e   : > { %v6240_v18 = vadd.f32 %v6170_v34, %v12715_v59 }
 0x58f   : > { %v10265_v33 = vpop.f32.mrf.mxu0 }
 0x590   : > { %v6263_v46 = vadd.f32 %v12772_v44, %v6240_v18 }
 0x591   : > { %v6173_v57 = vpop.f32.mrf.mxu0 }
 0x592   : > { %v6280_v24 = vmax.f32 %v6263_v46, 0.0  ;;  %v6241_v55 = vadd.f32 %v6173_v57, %v12718_v41 }
 0x593   : > { %v10266_v54 = vpop.f32.mrf.mxu0 }
 0x594   : > { %6297 = vst [vmem:[#allocation3] sm:$0xff] %v6280_v24  ;;  %v6264_v16 = vadd.f32 %v12772_v44, %v6241_v55 }
 0x595   : > { %v6178_v56 = vpop.f32.mrf.mxu0 }
 0x596   : > { %v6281_v7 = vmax.f32 %v6264_v16, 0.0  ;;  %v6242_v17 = vadd.f32 %v6178_v56, %v12721_v51 }
 0x597   : > { %v10269_v52 = vpop.f32.mrf.mxu0 }
 0x598   : > { %6298 = vst [vmem:[#allocation3 + $0x8] sm:$0xff] %v6281_v7  ;;  %v6265_v14 = vadd.f32 %v12772_v44, %v6242_v17 }
 0x599   : > { %v6181_v59 = vpop.f32.mrf.mxu0 }
 0x59a   : > { %v6282_v42 = vmax.f32 %v6265_v14, 0.0  ;;  %v6243_v22 = vadd.f32 %v6181_v59, %v12727_v36 }
 0x59b   : > { %v10270_v35 = vpop.f32.mrf.mxu0  ;;  %v6314_v23 = vld [vmem:[#allocation3] sm:$0x3]  ;;  %v6326_v30 = vld [vmem:[#allocation3 + $0x2] sm:$0x3]  ;;  %v6337_v25 = vld [vmem:[#allocation3 + $0x4] sm:$0x3] }
 0x59c   : > { %6299 = vst [vmem:[#allocation3 + $0x10] sm:$0xff] %v6282_v42  ;;  %v6266_v41 = vadd.f32 %v12772_v44, %v6243_v22  ;;  %v6348_v36 = vld [vmem:[#allocation3 + $0x6] sm:$0x3] }
 0x59d   : > { %v6186_v2 = vpop.f32.mrf.mxu0 }
 0x59e   : > { %v6283_v19 = vmax.f32 %v6266_v41, 0.0  ;;  %v6244_v28 = vadd.f32 %v6186_v2, %v12731_v32 }
 0x59f   : > { %v6315_v10 = vld [vmem:[#allocation3 + $0xe] sm:$0x3]  ;;  %v10273_v51 = vpop.f32.mrf.mxu0  ;;  %v6359_v12 = vld [vmem:[#allocation3 + $0x8] sm:$0x3] }
 0x5a0   : > { %v6316_v45 = vmax.f32 %v6314_v23, %v6315_v10  ;;  %6300 = vst [vmem:[#allocation3 + $0x18] sm:$0xff] %v6283_v19  ;;  %v6267_v26 = vadd.f32 %v12772_v44, %v6244_v28 }
 0x5a1   : > { %v6189_v21 = vpop.f32.mrf.mxu0 }
 0x5a2   : > { %v6318_v40 = vsel %vm6317_vm4, %v6316_v45, -inf  ;;  %v6284_v58 = vmax.f32 %v6267_v26, 0.0  ;;  %v6245_v5 = vadd.f32 %v6189_v21, %v12734_v48 }
 0x5a3   : > { %v6319_v1 = vrot.slane %v6318_v40, 4  ;;  %v6327_v31 = vld [vmem:[#allocation3 + $0x10] sm:$0x3]  ;;  %v6338_v32 = vld [vmem:[#allocation3 + $0x12] sm:$0x3]  ;;  %v10274_v3 = vpop.f32.mrf.mxu0 }
 0x5a4   : > { %v6328_v39 = vmax.f32 %v6326_v30, %v6327_v31  ;;  %v6339_v60 = vmax.f32 %v6337_v25, %v6338_v32  ;;  %v6349_v49 = vld [vmem:[#allocation3 + $0x14] sm:$0x3]  ;;  %v6360_v38 = vld [vmem:[#allocation3 + $0x16] sm:$0x3]  ;;  %6301 = vst [vmem:[#allocation3 + $0x20] sm:$0xff] %v6284_v58  ;;  %v6268_v20 = vadd.f32 %v12772_v44, %v6245_v5 }
 0x5a5   : > { %v6320_v61 = vmax.f32 %v6318_v40, %v6319_v1  ;;  %v6350_v4 = vmax.f32 %v6348_v36, %v6349_v49  ;;  %v6361_v50 = vmax.f32 %v6359_v12, %v6360_v38  ;;  %v6194_v62 = vpop.f32.mrf.mxu0 }
 0x5a6   : > { %v6329_v63 = vsel %vm6317_vm4, %v6328_v39, -inf  ;;  %v6340_v48 = vsel %vm6317_vm4, %v6339_v60, -inf  ;;  %v6285_v6 = vmax.f32 %v6268_v20, 0.0  ;;  %v6246_v34 = vadd.f32 %v6194_v62, %v12737_v13 }
 0x5a7   : > { %v6321_v18 = vrot.slane %v6320_v61, 2  ;;  %v6330_v33 = vrot.slane %v6329_v63, 4  ;;  %v6341_v46 = vrot.slane %v6340_v48, 4  ;;  %v6351_v57 = vsel %vm6317_vm4, %v6350_v4, -inf  ;;  %v10277_v24 = vpop.f32.mrf.mxu0  ;;  %v6370_v25 = vld [vmem:[#allocation3 + $0x1c] sm:$0x3] }
 0x5a8   : > { %v6352_v55 = vrot.slane %v6351_v57, 4  ;;  %v6362_v54 = vsel %vm6317_vm4, %v6361_v50, -inf  ;;  %6302 = vst [vmem:[#allocation3 + $0x28] sm:$0xff] %v6285_v6  ;;  %v6269_v16 = vadd.f32 %v12772_v44, %v6246_v34  ;;  %v6381_v36 = vld [vmem:[#allocation3 + $0x1e] sm:$0x3] }
 0x5a9   : > { %v6322_v56 = vmax.f32 %v6320_v61, %v6321_v18  ;;  %v6331_v7 = vmax.f32 %v6329_v63, %v6330_v33  ;;  %v6342_v17 = vmax.f32 %v6340_v48, %v6341_v46  ;;  %v6363_v52 = vrot.slane %v6362_v54, 4  ;;  %v6197_v14 = vpop.f32.mrf.mxu0 }
 0x5aa   : > { %v6353_v59 = vmax.f32 %v6351_v57, %v6352_v55  ;;  %v6286_v42 = vmax.f32 %v6269_v16, 0.0  ;;  %v6247_v13 = vadd.f32 %v6197_v14, %v12740_v15 }
 0x5ab   : > { %v6323_v22 = vrot.slane %v6322_v56, 1  ;;  %v6332_v35 = vrot.slane %v6331_v7, 2  ;;  %v6343_v41 = vrot.slane %v6342_v17, 2  ;;  %v6364_v2 = vmax.f32 %v6362_v54, %v6363_v52  ;;  %v10278_v19 = vpop.f32.mrf.mxu0  ;;  %v6392_v39 = vld [vmem:[#allocation3 + $0x20] sm:$0x3] }
 0x5ac   : > { %v6354_v28 = vrot.slane %v6353_v59, 2  ;;  %6303 = vst [vmem:[#allocation3 + $0x30] sm:$0xff] %v6286_v42  ;;  %v6270_v23 = vadd.f32 %v12772_v44, %v6247_v13  ;;  %v6403_v48 = vld [vmem:[#allocation3 + $0x22] sm:$0x3]  ;;  %v6414_v16 = vld [vmem:[#allocation3 + $0x24] sm:$0x3] }
 0x5ad   : > { %v6324_v10 = vmax.f32 %v6322_v56, %v6323_v22  ;;  %v6333_v51 = vmax.f32 %v6331_v7, %v6332_v35  ;;  %v6344_v45 = vmax.f32 %v6342_v17, %v6343_v41  ;;  %v6365_v26 = vrot.slane %v6364_v2, 2  ;;  %v6202_v30 = vpop.f32.mrf.mxu0 }
 0x5ae   : > { %v6355_v21 = vmax.f32 %v6353_v59, %v6354_v28  ;;  %v6287_v40 = vmax.f32 %v6270_v23, 0.0  ;;  %v6248_v15 = vadd.f32 %v6202_v30, %v12743_v43 }
 0x5af   : > { %6325 = vst [vmem:[#allocation4] sm:$0x1] %v6324_v10  ;;  %v6334_v58 = vrot.slane %v6333_v51, 1  ;;  %v6345_v5 = vrot.slane %v6344_v45, 1  ;;  %v6366_v1 = vmax.f32 %v6364_v2, %v6365_v26  ;;  %v6371_v31 = vld [vmem:[#allocation3 + $0x2a] sm:$0x3]  ;;  %v10281_v3 = vpop.f32.mrf.mxu0 }
 0x5b0   : > { %v6382_v32 = vld [vmem:[#allocation3 + $0x2c] sm:$0x3]  ;;  %v6356_v12 = vrot.slane %v6355_v21, 1  ;;  %v6372_v60 = vmax.f32 %v6370_v25, %v6371_v31  ;;  %v6393_v38 = vld [vmem:[#allocation3 + $0x2e] sm:$0x3]  ;;  %6304 = vst [vmem:[#allocation3 + $0x38] sm:$0xff] %v6287_v40  ;;  %v6271_v20 = vadd.f32 %v12772_v44, %v6248_v15 }
 0x5b1   : > { %v6383_v49 = vmax.f32 %v6381_v36, %v6382_v32  ;;  %v6335_v61 = vmax.f32 %v6333_v51, %v6334_v58  ;;  %v6346_v4 = vmax.f32 %v6344_v45, %v6345_v5  ;;  %v6367_v50 = vrot.slane %v6366_v1, 1  ;;  %v6205_v43 = vpop.f32.mrf.mxu0  ;;  %v10590_v45 = vld [vmem:[%s13122_s5 + $0x8] sm:$0xff]  }
 0x5b2   : > { %v6394_v62 = vmax.f32 %v6392_v39, %v6393_v38  ;;  %v6357_v63 = vmax.f32 %v6355_v21, %v6356_v12  ;;  %v6373_v6 = vsel %vm6317_vm4, %v6372_v60, -inf  ;;  %v6288_v18 = vmax.f32 %v6271_v20, 0.0 }
 0x5b3   : > { %v6384_v34 = vsel %vm6317_vm4, %v6383_v49, -inf  ;;  %6336 = vst [vmem:[#allocation4 + $0x1] sm:$0x1] %v6335_v61  ;;  %6347 = vst [vmem:[#allocation4 + $0x2] sm:$0x1] %v6346_v4  ;;  %v6368_v33 = vmax.f32 %v6366_v1, %v6367_v50  ;;  %v6374_v46 = vrot.slane %v6373_v6, 4  ;;  %v10282_v54 = vpop.f32.mrf.mxu0  ;;  %v6249_v52 = vadd.f32 %v6205_v43, %v12746_v37 }
 0x5b4   : > { %v6385_v57 = vrot.slane %v6384_v34, 4  ;;  %v6395_v24 = vsel %vm6317_vm4, %v6394_v62, -inf  ;;  %v6404_v55 = vld [vmem:[#allocation3 + $0x30] sm:$0x3]  ;;  %6358 = vst [vmem:[#allocation4 + $0x3] sm:$0x1] %v6357_v63 }
 0x5b5   : > { %v6396_v56 = vrot.slane %v6395_v24, 4  ;;  %v6405_v7 = vmax.f32 %v6403_v48, %v6404_v55  ;;  %v6415_v17 = vld [vmem:[#allocation3 + $0x32] sm:$0x3]  ;;  %6305 = vst [vmem:[#allocation3 + $0x40] sm:$0xff] %v6288_v18  ;;  %6369 = vst [vmem:[#allocation4 + $0x4] sm:$0x1] %v6368_v33  ;;  %v6375_v14 = vmax.f32 %v6373_v6, %v6374_v46  ;;  %v6210_v13 = vpop.f32.mrf.mxu0  ;;  %v6272_v41 = vadd.f32 %v12772_v44, %v6249_v52 }
 0x5b6   : > { %v6386_v59 = vmax.f32 %v6384_v34, %v6385_v57  ;;  %v6416_v42 = vmax.f32 %v6414_v16, %v6415_v17  ;;  %v6250_v2 = vadd.f32 %v6210_v13, %v12749_v9  ;;  %v6592_v19 = vld [vmem:[#allocation4] sm:$0x1] }
 0x5b7   : > { %v6397_v22 = vmax.f32 %v6395_v24, %v6396_v56  ;;  %v6406_v35 = vsel %vm6317_vm4, %v6405_v7, -inf  ;;  %v6376_v28 = vrot.slane %v6375_v14, 2  ;;  %v10285_v37 = vpop.f32.mrf.mxu0  ;;  %v6593_v25 = vpack.c.bf16 %v6592_v19, %v6592_v19  ;;  %v6425_v31 = vld [vmem:[#allocation3 + $0x38] sm:$0x3]  ;;  %v10591_v54 = vld [vmem:[%s13122_s5 + $0x10] sm:$0xff]  }
 0x5b8   : > { %v6387_v23 = vrot.slane %v6386_v59, 2  ;;  %v6407_v10 = vrot.slane %v6406_v35, 4  ;;  %v6417_v51 = vsel %vm6317_vm4, %v6416_v42, -inf  ;;  %v6273_v21 = vadd.f32 %v12772_v44, %v6250_v2  ;;  %v6436_v17 = vld [vmem:[#allocation3 + $0x3a] sm:$0x3] }
 0x5b9   : > { %v6398_v26 = vrot.slane %v6397_v22, 2  ;;  %v6418_v30 = vrot.slane %v6417_v51, 4  ;;  %v6377_v36 = vmax.f32 %v6375_v14, %v6376_v28  ;;  %v6289_v9 = vmax.f32 %v6272_v41, 0.0  ;;  %v6213_v58 = vpop.f32.mrf.mxu0  ;;  %10302 = vmatmul.mubr.msk.bf16.vlgmr.msra.gmra.mxu1 %vm6602_vm5, %v6593_v25  ;;  %v6447_v52 = vld [vmem:[#allocation3 + $0x3c] sm:$0x3] }
 0x5ba   : > { %v6388_v40 = vmax.f32 %v6386_v59, %v6387_v23  ;;  %v6408_v15 = vmax.f32 %v6406_v35, %v6407_v10  ;;  %v6290_v32 = vmax.f32 %v6273_v21, 0.0  ;;  %v6251_v3 = vadd.f32 %v6213_v58, %v12752_v53  ;;  %10306 = vmatpush3.bf16.msra.mxu1 %v10590_v45  ;;  %10307 = vmatprep.mubr.msk.bf16.mxu1 %vm10692_vm0, %v13142_v0  ;;  %v6647_v48 = vld [vmem:[#allocation4 + $0x1] sm:$0x1]  ;;  %v6458_v14 = vld [vmem:[#allocation3 + $0x3e] sm:$0x3] }
 0x5bb   : > { %v6399_v5 = vmax.f32 %v6397_v22, %v6398_v26  ;;  %v6419_v1 = vmax.f32 %v6417_v51, %v6418_v30  ;;  %v6378_v12 = vrot.slane %v6377_v36, 1  ;;  %6306 = vst [vmem:[#allocation3 + $0x48] sm:$0xff] %v6289_v9  ;;  %v10286_v38 = vpop.f32.mrf.mxu0  ;;  %10311 = vmatprep.subr.bf16.mxu1 %v13142_v0  ;;  %v6648_v56 = vpack.c.bf16 %v6647_v48, %v6647_v48 }
 0x5bc   : > { %v6389_v39 = vrot.slane %v6388_v40, 1  ;;  %v6409_v60 = vrot.slane %v6408_v15, 2  ;;  %v6426_v49 = vld [vmem:[#allocation3 + $0x46] sm:$0x3]  ;;  %6307 = vst [vmem:[#allocation3 + $0x50] sm:$0xff] %v6290_v32  ;;  %v6274_v50 = vadd.f32 %v12772_v44, %v6251_v3 }
 0x5bd   : > { %v6400_v20 = vrot.slane %v6399_v5, 1  ;;  %v6420_v61 = vrot.slane %v6419_v1, 2  ;;  %v6427_v4 = vmax.f32 %v6425_v31, %v6426_v49  ;;  %v6379_v53 = vmax.f32 %v6377_v36, %v6378_v12  ;;  %v6218_v63 = vpop.f32.mrf.mxu0  ;;  %v6469_v28 = vld [vmem:[#allocation3 + $0x40] sm:$0x3]  ;;  %v10592_v49 = vld [vmem:[%s13122_s5 + $0x18] sm:$0xff]  }
 0x5be   : > { %v6390_v62 = vmax.f32 %v6388_v40, %v6389_v39  ;;  %v6410_v43 = vmax.f32 %v6408_v15, %v6409_v60  ;;  %v6291_v33 = vmax.f32 %v6274_v50, 0.0  ;;  %v6252_v24 = vadd.f32 %v6218_v63, %v12755_v29 }
 0x5bf   : > { %v6401_v6 = vmax.f32 %v6399_v5, %v6400_v20  ;;  %v6421_v34 = vmax.f32 %v6419_v1, %v6420_v61  ;;  %v6428_v18 = vsel %vm6317_vm4, %v6427_v4, -inf  ;;  %6380 = vst [vmem:[#allocation4 + $0x5] sm:$0x1] %v6379_v53  ;;  %v10289_v55 = vpop.f32.mrf.mxu0 }
 0x5c0   : > { %6391 = vst [vmem:[#allocation4 + $0x6] sm:$0x1] %v6390_v62  ;;  %v6411_v46 = vrot.slane %v6410_v43, 1  ;;  %v6429_v57 = vrot.slane %v6428_v18, 4  ;;  %6308 = vst [vmem:[#allocation3 + $0x58] sm:$0xff] %v6291_v33  ;;  %v6275_v42 = vadd.f32 %v12772_v44, %v6252_v24 }
 0x5c1   : > { %6402 = vst [vmem:[#allocation4 + $0x7] sm:$0x1] %v6401_v6  ;;  %v6422_v16 = vrot.slane %v6421_v34, 1  ;;  %v6221_v13 = vpop.f32.mrf.mxu0  ;;  %10308 = vmatmul.mubr.msk.bf16.vlgmr.msra.gmra.mxu1 %vm6602_vm5, %v6648_v56 }
 0x5c2   : > { %v6412_v7 = vmax.f32 %v6410_v43, %v6411_v46  ;;  %v6430_v59 = vmax.f32 %v6428_v18, %v6429_v57  ;;  %v6437_v35 = vld [vmem:[#allocation3 + $0x48] sm:$0x3]  ;;  %v6448_v29 = vld [vmem:[#allocation3 + $0x4a] sm:$0x3]  ;;  %v6459_v41 = vld [vmem:[#allocation3 + $0x4c] sm:$0x3]  ;;  %v6253_v2 = vadd.f32 %v6221_v13, %v12758_v8  ;;  %10312 = vmatpush3.bf16.msra.mxu1 %v10591_v54  ;;  %10313 = vmatprep.mubr.msk.bf16.mxu1 %vm10692_vm0, %v13142_v0 }
 0x5c3   : > { %v6423_v22 = vmax.f32 %v6421_v34, %v6422_v16  ;;  %v6438_v23 = vmax.f32 %v6436_v17, %v6437_v35  ;;  %v6449_v10 = vmax.f32 %v6447_v52, %v6448_v29  ;;  %v6460_v51 = vmax.f32 %v6458_v14, %v6459_v41  ;;  %v6470_v37 = vld [vmem:[#allocation3 + $0x4e] sm:$0x3]  ;;  %v10290_v45 = vpop.f32.mrf.mxu0  ;;  %v6701_v8 = vld [vmem:[#allocation4 + $0x2] sm:$0x1]  ;;  %10317 = vmatprep.subr.bf16.mxu1 %v13142_v0  ;;  %v6755_v34 = vld [vmem:[#allocation4 + $0x3] sm:$0x1] }
 0x5c4   : > { %6413 = vst [vmem:[#allocation4 + $0x8] sm:$0x1] %v6412_v7  ;;  %v6431_v19 = vrot.slane %v6430_v59, 2  ;;  %v6471_v26 = vmax.f32 %v6469_v28, %v6470_v37  ;;  %v6292_v30 = vmax.f32 %v6275_v42, 0.0  ;;  %v6276_v21 = vadd.f32 %v12772_v44, %v6253_v2  ;;  %v6480_v16 = vld [vmem:[#allocation3 + $0x54] sm:$0x3] }
 0x5c5   : > { %6424 = vst [vmem:[#allocation4 + $0x9] sm:$0x1] %v6423_v22  ;;  %v6439_v36 = vsel %vm6317_vm4, %v6438_v23, -inf  ;;  %v6450_v40 = vsel %vm6317_vm4, %v6449_v10, -inf  ;;  %v6461_v15 = vsel %vm6317_vm4, %v6460_v51, -inf  ;;  %v6226_v9 = vpop.f32.mrf.mxu0  ;;  %v6702_v60 = vpack.c.bf16 %v6701_v8, %v6701_v8  ;;  %v10593_v45 = vld [vmem:[%s13122_s5 + $0x20] sm:$0xff]  }
 0x5c6   : > { %v6432_v25 = vmax.f32 %v6430_v59, %v6431_v19  ;;  %v6440_v58 = vrot.slane %v6439_v36, 4  ;;  %v6451_v5 = vrot.slane %v6450_v40, 4  ;;  %v6462_v1 = vrot.slane %v6461_v15, 4  ;;  %6309 = vst [vmem:[#allocation3 + $0x60] sm:$0xff] %v6292_v30  ;;  %v6491_v56 = vld [vmem:[#allocation3 + $0x56] sm:$0x3] }
 0x5c7   : > { %v6472_v31 = vsel %vm6317_vm4, %v6471_v26, -inf  ;;  %v6254_v12 = vadd.f32 %v6226_v9, %v12761_v11  ;;  %v10293_v39 = vpop.f32.mrf.mxu0  ;;  %v6293_v4 = vmax.f32 %v6276_v21, 0.0  ;;  %v6756_v22 = vpack.c.bf16 %v6755_v34, %v6755_v34  ;;  %v6502_v2 = vld [vmem:[#allocation3 + $0x58] sm:$0x3]  ;;  %v6513_v8 = vld [vmem:[#allocation3 + $0x5a] sm:$0x3] }
 0x5c8   : > { %v6433_v32 = vrot.slane %v6432_v25, 1  ;;  %v6473_v3 = vrot.slane %v6472_v31, 4  ;;  %v6441_v38 = vmax.f32 %v6439_v36, %v6440_v58  ;;  %v6452_v20 = vmax.f32 %v6450_v40, %v6451_v5 }
 0x5c9   : > { %v6463_v61 = vmax.f32 %v6461_v15, %v6462_v1  ;;  %v6277_v62 = vadd.f32 %v12772_v44, %v6254_v12  ;;  %v6229_v43 = vpop.f32.mrf.mxu0  ;;  %6310 = vst [vmem:[#allocation3 + $0x68] sm:$0xff] %v6293_v4  ;;  %10314 = vmatmul.mubr.msk.bf16.vlgmr.msra.gmra.mxu1 %vm6602_vm5, %v6702_v60  ;;  %v6524_v1 = vld [vmem:[#allocation3 + $0x5c] sm:$0x3] }
 0x5ca   : > { %v6434_v50 = vmax.f32 %v6432_v25, %v6433_v32  ;;  %v6474_v53 = vmax.f32 %v6472_v31, %v6473_v3  ;;  %v6442_v63 = vrot.slane %v6441_v38, 2  ;;  %v6453_v48 = vrot.slane %v6452_v20, 2  ;;  %10318 = vmatpush3.bf16.msra.mxu1 %v10592_v49  ;;  %10319 = vmatprep.mubr.msk.bf16.mxu1 %vm10692_vm0, %v13142_v0 }
 0x5cb   : > { %v6464_v6 = vrot.slane %v6463_v61, 2  ;;  %v6255_v11 = vadd.f32 %v6229_v43, %v12764_v27  ;;  %v6294_v33 = vmax.f32 %v6277_v62, 0.0  ;;  %v10294_v46 = vpop.f32.mrf.mxu0  ;;  %10323 = vmatprep.subr.bf16.mxu1 %v13142_v0  ;;  %v10594_v27 = vld [vmem:[%s13122_s5 + $0x58] sm:$0xff]   ;;  %v6809_v43 = vld [vmem:[#allocation4 + $0x4] sm:$0x1] }
 0x5cc   : > { %6435 = vst [vmem:[#allocation4 + $0xa] sm:$0x1] %v6434_v50  ;;  %v6475_v18 = vrot.slane %v6474_v53, 2  ;;  %v7079_v57 = vld [vmem:[#allocation4 + $0x9] sm:$0x1]  ;;  %v6443_v24 = vmax.f32 %v6441_v38, %v6442_v63  ;;  %v6454_v55 = vmax.f32 %v6452_v20, %v6453_v48 }
 0x5cd   : > { %v6465_v54 = vmax.f32 %v6463_v61, %v6464_v6  ;;  %v6278_v7 = vadd.f32 %v12772_v44, %v6255_v11  ;;  %v6481_v52 = vld [vmem:[#allocation3 + $0x62] sm:$0x3]  ;;  %v6492_v14 = vld [vmem:[#allocation3 + $0x64] sm:$0x3]  ;;  %v6503_v59 = vld [vmem:[#allocation3 + $0x66] sm:$0x3]  ;;  %v6234_v42 = vpop.f32.mrf.mxu0  ;;  %v7080_v13 = vpack.c.bf16 %v7079_v57, %v7079_v57 }
 0x5ce   : > { %v6476_v17 = vmax.f32 %v6474_v53, %v6475_v18  ;;  %6311 = vst [vmem:[#allocation3 + $0x70] sm:$0xff] %v6294_v33  ;;  %v6444_v35 = vrot.slane %v6443_v24, 1  ;;  %v6455_v29 = vrot.slane %v6454_v55, 1  ;;  %v6482_v19 = vmax.f32 %v6480_v16, %v6481_v52  ;;  %v10595_v33 = vld [vmem:[%s13122_s5 + $0x28] sm:$0xff]  }
 0x5cf   : > { %v6466_v41 = vrot.slane %v6465_v54, 1  ;;  %v6493_v23 = vmax.f32 %v6491_v56, %v6492_v14  ;;  %v6504_v10 = vmax.f32 %v6502_v2, %v6503_v59  ;;  %v6295_v51 = vmax.f32 %v6278_v7, 0.0  ;;  %10356 = vmatmul.mubr.msk.bf16.vlgmr.msra.gmra.mxu0 %vm6602_vm5, %v7080_v13  ;;  %v10297_v37 = vpop.f32.mrf.mxu0 }
 0x5d0   : > { %v6477_v28 = vrot.slane %v6476_v17, 1  ;;  %v6445_v26 = vmax.f32 %v6443_v24, %v6444_v35  ;;  %v6456_v30 = vmax.f32 %v6454_v55, %v6455_v29  ;;  %v6483_v25 = vsel %vm6317_vm4, %v6482_v19, -inf  ;;  %10366 = vmatpush3.bf16.msra.mxu0 %v10594_v27  ;;  %10367 = vmatprep.mubr.msk.bf16.mxu0 %vm10692_vm0, %v13142_v0  ;;  %v6514_v58 = vld [vmem:[#allocation3 + $0x68] sm:$0x3]  ;;  %v6525_v12 = vld [vmem:[#allocation3 + $0x6a] sm:$0x3] }
 0x5d1   : > { %v6467_v21 = vmax.f32 %v6465_v54, %v6466_v41  ;;  %v6484_v40 = vrot.slane %v6483_v25, 4  ;;  %v6494_v15 = vsel %vm6317_vm4, %v6493_v23, -inf  ;;  %v6505_v9 = vsel %vm6317_vm4, %v6504_v10, -inf  ;;  %6312 = vst [vmem:[#allocation3 + $0x78] sm:$0xff] %v6295_v51  ;;  %v6237_v5 = vpop.f32.mrf.mxu0  ;;  %10377 = vmatprep.subr.bf16.mxu0 %v13142_v0  ;;  %10320 = vmatmul.mubr.msk.bf16.vlgmr.msra.gmra.mxu1 %vm6602_vm5, %v6756_v22 }
 0x5d2   : > { %v6478_v36 = vmax.f32 %v6476_v17, %v6477_v28  ;;  %6446 = vst [vmem:[#allocation4 + $0xb] sm:$0x1] %v6445_v26  ;;  %6457 = vst [vmem:[#allocation4 + $0xc] sm:$0x1] %v6456_v30  ;;  %v6495_v31 = vrot.slane %v6494_v15, 4  ;;  %v6506_v32 = vrot.slane %v6505_v9, 4  ;;  %v6515_v3 = vmax.f32 %v6513_v8, %v6514_v58  ;;  %10324 = vmatpush3.bf16.msra.mxu1 %v10593_v45 }
 0x5d3   : > { %6468 = vst [vmem:[#allocation4 + $0xd] sm:$0x1] %v6467_v21  ;;  %v6256_v39 = vadd.f32 %v6234_v42, %v12767_v47  ;;  %v6485_v60 = vmax.f32 %v6483_v25, %v6484_v40  ;;  %v6526_v49 = vmax.f32 %v6524_v1, %v6525_v12  ;;  %v10298_v38 = vpop.f32.mrf.mxu0  ;;  %10325 = vmatprep.mubr.msk.bf16.mxu1 %vm10692_vm0, %v13142_v0  ;;  %v10596_v17 = vld [vmem:[%s13122_s5 + $0x68] sm:$0xff]   ;;  %v6863_v28 = vld [vmem:[#allocation4 + $0x5] sm:$0x1] }
 0x5d4   : > { %6479 = vst [vmem:[#allocation4 + $0xe] sm:$0x1] %v6478_v36  ;;  %v6496_v20 = vmax.f32 %v6494_v15, %v6495_v31  ;;  %v6507_v61 = vmax.f32 %v6505_v9, %v6506_v32  ;;  %v6516_v4 = vsel %vm6317_vm4, %v6515_v3, -inf  ;;  %10329 = vmatprep.subr.bf16.mxu1 %v13142_v0  ;;  %v6810_v54 = vpack.c.bf16 %v6809_v43, %v6809_v43  ;;  %v10597_v21 = vld [vmem:[%s13122_s5 + $0x30] sm:$0xff]  }
 0x5d5   : > { %v6279_v50 = vadd.f32 %v12772_v44, %v6256_v39  ;;  %v6486_v53 = vrot.slane %v6485_v60, 2  ;;  %v6517_v47 = vrot.slane %v6516_v4, 4  ;;  %v6527_v62 = vsel %vm6317_vm4, %v6526_v49, -inf  ;;  %v6535_v24 = vld [vmem:[#allocation3 + $0x70] sm:$0x3] }
 0x5d6   : > { %v6497_v63 = vrot.slane %v6496_v20, 2  ;;  %v6508_v48 = vrot.slane %v6507_v61, 2  ;;  %v6528_v6 = vrot.slane %v6527_v62, 4  ;;  %v6546_v10 = vld [vmem:[#allocation3 + $0x72] sm:$0x3]  ;;  %v6864_v15 = vpack.c.bf16 %v6863_v28, %v6863_v28  ;;  %v10601_v28 = vld [vmem:[%s13122_s5 + $0x40] sm:$0xff]  }
 0x5d7   : > { %v6296_v11 = vmax.f32 %v6279_v50, 0.0  ;;  %v6487_v34 = vmax.f32 %v6485_v60, %v6486_v53  ;;  %v6518_v18 = vmax.f32 %v6516_v4, %v6517_v47  ;;  %v6557_v51 = vld [vmem:[#allocation3 + $0x74] sm:$0x3]  ;;  %v6568_v45 = vld [vmem:[#allocation3 + $0x76] sm:$0x3] }
 0x5d8   : > { %v6498_v46 = vmax.f32 %v6496_v20, %v6497_v63  ;;  %v6509_v57 = vmax.f32 %v6507_v61, %v6508_v48  ;;  %v6529_v44 = vmax.f32 %v6527_v62, %v6528_v6  ;;  %v6536_v55 = vld [vmem:[#allocation3 + $0x7e] sm:$0x3]  ;;  %v6579_v5 = vld [vmem:[#allocation3 + $0x78] sm:$0x3]  ;;  %v10598_v39 = vld [vmem:[%s13122_s5 + $0x78] sm:$0xff]  }
 0x5d9   : > { %6313 = vst [vmem:[#allocation3 + $0x80] sm:$0xff] %v6296_v11  ;;  %v6488_v16 = vrot.slane %v6487_v34, 1  ;;  %v6519_v56 = vrot.slane %v6518_v18, 2  ;;  %v6537_v7 = vmax.f32 %v6535_v24, %v6536_v55  ;;  %v7187_v27 = vld [vmem:[#allocation4 + $0xb] sm:$0x1]  ;;  %10326 = vmatmul.mubr.msk.bf16.vlgmr.msra.gmra.mxu1 %vm6602_vm5, %v6810_v54 }
 0x5da   : > { %v6499_v52 = vrot.slane %v6498_v46, 1  ;;  %v6510_v14 = vrot.slane %v6509_v57, 1  ;;  %v6530_v59 = vrot.slane %v6529_v44, 2  ;;  %v7188_v42 = vpack.c.bf16 %v7187_v27, %v7187_v27  ;;  %10330 = vmatpush3.bf16.msra.mxu1 %v10595_v33  ;;  %10331 = vmatprep.mubr.msk.bf16.mxu1 %vm10692_vm0, %v13142_v0  ;;  %v7295_v30 = vld [vmem:[#allocation4 + $0xd] sm:$0x1] }
 0x5db   : > { %v6489_v13 = vmax.f32 %v6487_v34, %v6488_v16  ;;  %v6520_v22 = vmax.f32 %v6518_v18, %v6519_v56  ;;  %v6538_v35 = vsel %vm6317_vm4, %v6537_v7, -inf  ;;  %10335 = vmatprep.subr.bf16.mxu1 %v13142_v0  ;;  %v7296_v20 = vpack.c.bf16 %v7295_v30, %v7295_v30  ;;  %v6917_v6 = vld [vmem:[#allocation4 + $0x6] sm:$0x1]  ;;  %v10600_v7 = vld [vmem:[%s13122_s5 + $0x88] sm:$0xff]  }
 0x5dc   : > { %v6500_v29 = vmax.f32 %v6498_v46, %v6499_v52  ;;  %v6511_v41 = vmax.f32 %v6509_v57, %v6510_v14  ;;  %v6531_v2 = vmax.f32 %v6529_v44, %v6530_v59  ;;  %v6539_v19 = vrot.slane %v6538_v35, 4  ;;  %10368 = vmatmul.mubr.msk.bf16.vlgmr.msra.gmra.mxu0 %vm6602_vm5, %v7188_v42  ;;  %v10599_v44 = vld [vmem:[%s13122_s5 + $0x38] sm:$0xff]  }
 0x5dd   : > { %6490 = vst [vmem:[#allocation4 + $0xf] sm:$0x1] %v6489_v13  ;;  %v6521_v23 = vrot.slane %v6520_v22, 1  ;;  %10378 = vmatpush3.bf16.msra.mxu0 %v10596_v17  ;;  %10379 = vmatprep.mubr.msk.bf16.mxu0 %vm10692_vm0, %v13142_v0  ;;  %v6918_v54 = vpack.c.bf16 %v6917_v6, %v6917_v6 }
 0x5de   : > { %6501 = vst [vmem:[#allocation4 + $0x10] sm:$0x1] %v6500_v29  ;;  %6512 = vst [vmem:[#allocation4 + $0x11] sm:$0x1] %v6511_v41  ;;  %v6532_v37 = vrot.slane %v6531_v2, 1  ;;  %v6540_v26 = vmax.f32 %v6538_v35, %v6539_v19  ;;  %10389 = vmatprep.subr.bf16.mxu0 %v13142_v0 }
 0x5df   : > { %v6522_v8 = vmax.f32 %v6520_v22, %v6521_v23  ;;  %v6971_v29 = vld [vmem:[#allocation4 + $0x7] sm:$0x1] }
 0x5e0   : > { %v6547_v25 = vld [vmem:[#allocation3 + $0x80] sm:$0x3]  ;;  %v6558_v36 = vld [vmem:[#allocation3 + $0x82] sm:$0x3]  ;;  %v6569_v40 = vld [vmem:[#allocation3 + $0x84] sm:$0x3]  ;;  %v6533_v9 = vmax.f32 %v6531_v2, %v6532_v37  ;;  %v6972_v23 = vpack.c.bf16 %v6971_v29, %v6971_v29 }
 0x5e1   : > { %v6541_v58 = vrot.slane %v6540_v26, 2  ;;  %v6548_v1 = vmax.f32 %v6546_v10, %v6547_v25  ;;  %v6559_v31 = vmax.f32 %v6557_v51, %v6558_v36  ;;  %v6580_v32 = vld [vmem:[#allocation3 + $0x86] sm:$0x3]  ;;  %6523 = vst [vmem:[#allocation4 + $0x12] sm:$0x1] %v6522_v8  ;;  %v6570_v3 = vmax.f32 %v6568_v45, %v6569_v40  ;;  %10332 = vmatmul.mubr.msk.bf16.vlgmr.msra.gmra.mxu1 %vm6602_vm5, %v6864_v15  ;;  %v10602_v10 = vld [vmem:[%s13122_s5 + $0x98] sm:$0xff]  }
 0x5e2   : > { %v6581_v12 = vmax.f32 %v6579_v5, %v6580_v32  ;;  %6534 = vst [vmem:[#allocation4 + $0x13] sm:$0x1] %v6533_v9  ;;  %10336 = vmatpush3.bf16.msra.mxu1 %v10597_v21  ;;  %10337 = vmatprep.mubr.msk.bf16.mxu1 %vm10692_vm0, %v13142_v0  ;;  %v7025_v37 = vld [vmem:[#allocation4 + $0x8] sm:$0x1]  ;;  %v10604_v21 = vld [vmem:[%s13122_s5 + $0xa8] sm:$0xff]   ;;  %v10605_v40 = vld [vmem:[%s13122_s5 + $0x60] sm:$0xff]  }
 0x5e3   : > { %v6542_v60 = vmax.f32 %v6540_v26, %v6541_v58  ;;  %v6549_v49 = vsel %vm6317_vm4, %v6548_v1, -inf  ;;  %v6560_v38 = vsel %vm6317_vm4, %v6559_v31, -inf  ;;  %v6571_v50 = vsel %vm6317_vm4, %v6570_v3, -inf  ;;  %10341 = vmatprep.subr.bf16.mxu1 %v13142_v0  ;;  %v10603_v26 = vld [vmem:[%s13122_s5 + $0x50] sm:$0xff]   ;;  %v7133_v25 = vld [vmem:[#allocation4 + $0xa] sm:$0x1] }
 0x5e4   : > { %v6550_v61 = vrot.slane %v6549_v49, 4  ;;  %v6561_v4 = vrot.slane %v6560_v38, 4  ;;  %v6582_v53 = vsel %vm6317_vm4, %v6581_v12, -inf  ;;  %v6572_v62 = vrot.slane %v6571_v50, 4  ;;  %10380 = vmatmul.mubr.msk.bf16.vlgmr.msra.gmra.mxu0 %vm6602_vm5, %v7296_v20  ;;  %v7403_v57 = vld [vmem:[#allocation4 + $0xf] sm:$0x1] }
 0x5e5   : > { %v6543_v47 = vrot.slane %v6542_v60, 1  ;;  %v6583_v43 = vrot.slane %v6582_v53, 4  ;;  %10390 = vmatpush3.bf16.msra.mxu0 %v10598_v39  ;;  %10391 = vmatprep.mubr.msk.bf16.mxu0 %vm10692_vm0, %v13142_v0  ;;  %v7404_v52 = vpack.c.bf16 %v7403_v57, %v7403_v57  ;;  %v7511_v19 = vld [vmem:[#allocation4 + $0x11] sm:$0x1]  ;;  %v7026_v30 = vpack.c.bf16 %v7025_v37, %v7025_v37  ;;  %v10606_v9 = vld [vmem:[%s13122_s5 + $0xb8] sm:$0xff]   ;;  %v10607_v31 = vld [vmem:[%s13122_s5 + $0x70] sm:$0xff]  }
 0x5e6   : > { %v6551_v63 = vmax.f32 %v6549_v49, %v6550_v61  ;;  %v6562_v48 = vmax.f32 %v6560_v38, %v6561_v4  ;;  %v6573_v34 = vmax.f32 %v6571_v50, %v6572_v62  ;;  %10401 = vmatprep.subr.bf16.mxu0 %v13142_v0  ;;  %v7512_v51 = vpack.c.bf16 %v7511_v19, %v7511_v19  ;;  %v7241_v5 = vld [vmem:[#allocation4 + $0xc] sm:$0x1]  ;;  %v7349_v12 = vld [vmem:[#allocation4 + $0xe] sm:$0x1]  ;;  %v10608_v39 = vld [vmem:[%s13122_s5 + $0x80] sm:$0xff]  }
 0x5e7   : > { %v6544_v11 = vmax.f32 %v6542_v60, %v6543_v47  ;;  %v6584_v18 = vmax.f32 %v6582_v53, %v6583_v43  ;;  %v7134_v15 = vpack.c.bf16 %v7133_v25, %v7133_v25  ;;  %v7242_v32 = vpack.c.bf16 %v7241_v5, %v7241_v5  ;;  %v7457_v49 = vld [vmem:[#allocation4 + $0x10] sm:$0x1]  ;;  %v10609_v38 = vld [vmem:[%s13122_s5 + $0x90] sm:$0xff]   ;;  %v10617_v57 = vld [vmem:[%s13124_s7 + $0x18] sm:$0xff]  }
 0x5e8   : > { %v6552_v33 = vrot.slane %v6551_v63, 2  ;;  %v6563_v46 = vrot.slane %v6562_v48, 2  ;;  %v6574_v24 = vrot.slane %v6573_v34, 2  ;;  %v7350_v60 = vpack.c.bf16 %v7349_v12, %v7349_v12  ;;  %v7565_v61 = vld [vmem:[#allocation4 + $0x12] sm:$0x1]  ;;  %v10611_v47 = vld [vmem:[%s13122_s5 + $0xb0] sm:$0xff]  }
 0x5e9   : > { %6545 = vst [vmem:[#allocation4 + $0x14] sm:$0x1] %v6544_v11  ;;  %v6585_v55 = vrot.slane %v6584_v18, 2  ;;  %10338 = vmatmul.mubr.msk.bf16.vlgmr.msra.gmra.mxu1 %vm6602_vm5, %v6918_v54  ;;  %v7619_v45 = vld [vmem:[#allocation4 + $0x13] sm:$0x1]  ;;  %v7458_v20 = vpack.c.bf16 %v7457_v49, %v7457_v49  ;;  %v7566_v50 = vpack.c.bf16 %v7565_v61, %v7565_v61 }
 0x5ea   : > { %v6553_v16 = vmax.f32 %v6551_v63, %v6552_v33  ;;  %v6564_v56 = vmax.f32 %v6562_v48, %v6563_v46  ;;  %v6575_v27 = vmax.f32 %v6573_v34, %v6574_v24  ;;  %10342 = vmatpush3.bf16.msra.mxu1 %v10599_v44  ;;  %10343 = vmatprep.mubr.msk.bf16.mxu1 %vm10692_vm0, %v13142_v0  ;;  %v10610_v4 = vld [vmem:[%s13122_s5 + $0xa0] sm:$0xff]   ;;  %v10613_v34 = vld [vmem:[%s13124_s7 + $0x38] sm:$0xff]   ;;  %v10615_v33 = vld [vmem:[%s13124_s7 + $0x28] sm:$0xff]  }
 0x5eb   : > { %v6586_v17 = vmax.f32 %v6584_v18, %v6585_v55  ;;  %10347 = vmatprep.subr.bf16.mxu1 %v13142_v0  ;;  %v7620_v8 = vpack.c.bf16 %v7619_v45, %v7619_v45  ;;  %v10612_v63 = vld [vmem:[%s13122_s5 + $0xc0] sm:$0xff]   ;;  %v10614_v18 = vld [vmem:[%s13124_s7 + $0x30] sm:$0xff]  }
 0x5ec   : > { %v6554_v14 = vrot.slane %v6553_v16, 1  ;;  %v6565_v59 = vrot.slane %v6564_v56, 1  ;;  %v6576_v42 = vrot.slane %v6575_v27, 1  ;;  %10392 = vmatmul.mubr.msk.bf16.vlgmr.msra.gmra.mxu0 %vm6602_vm5, %v7404_v52  ;;  %v10616_v46 = vld [vmem:[%s13124_s7 + $0x20] sm:$0xff]   ;;  %v10618_v44 = vld [vmem:[%s13124_s7 + $0x10] sm:$0xff]   ;;  %v10621_v52 = vld [vmem:[%s13126_s9 + $0x38] sm:$0xff]  }
 0x5ed   : > { %v6587_v13 = vrot.slane %v6586_v17, 1  ;;  %10402 = vmatpush3.bf16.msra.mxu0 %v10600_v7  ;;  %10403 = vmatprep.mubr.msk.bf16.mxu0 %vm10692_vm0, %v13142_v0  ;;  %v6590_v54 = vld [vmem:[%s13123_s6] sm:$0x1] }
 0x5ee   : > { %v6555_v22 = vmax.f32 %v6553_v16, %v6554_v14  ;;  %v6566_v35 = vmax.f32 %v6564_v56, %v6565_v59  ;;  %v6577_v41 = vmax.f32 %v6575_v27, %v6576_v42  ;;  %10413 = vmatprep.subr.bf16.mxu0 %v13142_v0  ;;  %v10619_v56 = vld [vmem:[%s13124_s7 + $0x8] sm:$0xff]   ;;  %v10622_v42 = vld [vmem:[%s13126_s9 + $0x30] sm:$0xff]   ;;  %v10624_v19 = vld [vmem:[%s13126_s9 + $0x20] sm:$0xff]  }
 0x5ef   : > { %v6588_v2 = vmax.f32 %v6586_v17, %v6587_v13  ;;  %v10620_v17 = vld [vmem:[%s13124_s7] sm:$0xff]  }
 0x5f0   : > { %6556 = vst [vmem:[#allocation4 + $0x15] sm:$0x1] %v6555_v22  ;;  %6567 = vst [vmem:[#allocation4 + $0x16] sm:$0x1] %v6566_v35  ;;  %v7673_v53 = vld [vmem:[#allocation4 + $0x14] sm:$0x1] }
 0x5f1   : > { %6578 = vst [vmem:[#allocation4 + $0x17] sm:$0x1] %v6577_v41  ;;  %6589 = vst [vmem:[#allocation4 + $0x18] sm:$0x1] %v6588_v2  ;;  %10344 = vmatmul.mubr.msk.bf16.vlgmr.msra.gmra.mxu1 %vm6602_vm5, %v6972_v23  ;;  %v7674_v62 = vpack.c.bf16 %v7673_v53, %v7673_v53  ;;  %v10623_v35 = vld [vmem:[%s13126_s9 + $0x28] sm:$0xff]  }
 0x5f2   : > { %10348 = vmatpush3.bf16.msra.mxu1 %v10601_v28  ;;  %10349 = vmatprep.mubr.msk.bf16.mxu1 %vm10692_vm0, %v13142_v0 }
 0x5f3   : > { %10359 = vmatprep.subr.bf16.mxu1 %v13142_v0 }
 0x5f4   : > { %10404 = vmatmul.mubr.msk.bf16.vlgmr.msra.gmra.mxu0 %vm6602_vm5, %v7512_v51  ;;  %v10625_v51 = vld [vmem:[%s13126_s9 + $0x18] sm:$0xff]  }
 0x5f5   : > { %10414 = vmatpush3.bf16.msra.mxu0 %v10602_v10  ;;  %10415 = vmatprep.mubr.msk.bf16.mxu0 %vm10692_vm0, %v13142_v0 }
 0x5f6   : > { %10425 = vmatprep.subr.bf16.mxu0 %v13142_v0 }
 0x5f7   : > { %v7727_v36 = vld [vmem:[#allocation4 + $0x15] sm:$0x1]  ;;  %v7781_v43 = vld [vmem:[#allocation4 + $0x16] sm:$0x1] }
 0x5f8   : > { %v7728_v58 = vpack.c.bf16 %v7727_v36, %v7727_v36  ;;  %v7835_v1 = vld [vmem:[#allocation4 + $0x17] sm:$0x1]  ;;  %v7782_v48 = vpack.c.bf16 %v7781_v43, %v7781_v43  ;;  %v7889_v6 = vld [vmem:[#allocation4 + $0x18] sm:$0x1] }
 0x5f9   : > { %10350 = vmatmul.mubr.msk.bf16.vlgmr.msra.gmra.mxu1 %vm6602_vm5, %v7026_v30  ;;  %v7836_v3 = vpack.c.bf16 %v7835_v1, %v7835_v1  ;;  %v7890_v11 = vpack.c.bf16 %v7889_v6, %v7889_v6 }
 0x5fa   : > { %10360 = vmatpush3.bf16.msra.mxu1 %v10603_v26  ;;  %10361 = vmatprep.mubr.msk.bf16.mxu1 %vm10692_vm0, %v13142_v0 }
 0x5fb   : > { %10371 = vmatprep.subr.bf16.mxu1 %v13142_v0 }
 0x5fc   : > { %10416 = vmatmul.mubr.msk.bf16.vlgmr.msra.gmra.mxu0 %vm6602_vm5, %v7620_v8 }
 0x5fd   : > { %10426 = vmatpush3.bf16.msra.mxu0 %v10604_v21  ;;  %10427 = vmatprep.mubr.msk.bf16.mxu0 %vm10692_vm0, %v13142_v0  ;;  %v10626_v21 = vld [vmem:[%s13126_s9 + $0x10] sm:$0xff]  }
 0x5fe   : > { %10437 = vmatprep.subr.bf16.mxu0 %v13142_v0 }
 0x601   : > { %10362 = vmatmul.mubr.msk.bf16.vlgmr.msra.gmra.mxu1 %vm6602_vm5, %v7134_v15 }
 0x602   : > { %10372 = vmatpush3.bf16.msra.mxu1 %v10605_v40  ;;  %10373 = vmatprep.mubr.msk.bf16.mxu1 %vm10692_vm0, %v13142_v0 }
 0x603   : > { %10383 = vmatprep.subr.bf16.mxu1 %v13142_v0 }
 0x604   : > { %10428 = vmatmul.mubr.msk.bf16.vlgmr.msra.gmra.mxu0 %vm6602_vm5, %v7728_v58 }
 0x605   : > { %10438 = vmatpush3.bf16.msra.mxu0 %v10606_v9  ;;  %10439 = vmatprep.mubr.msk.bf16.mxu0 %vm10692_vm0, %v13142_v0 }
 0x606   : > { %10449 = vmatprep.subr.bf16.mxu0 %v13142_v0 }
 0x609   : > { %10374 = vmatmul.mubr.msk.bf16.vlgmr.msra.gmra.mxu1 %vm6602_vm5, %v7242_v32 }
 0x60a   : > { %10384 = vmatpush3.bf16.msra.mxu1 %v10607_v31  ;;  %10385 = vmatprep.mubr.msk.bf16.mxu1 %vm10692_vm0, %v13142_v0 }
 0x60b   : > { %10395 = vmatprep.subr.bf16.mxu1 %v13142_v0 }
 0x60c   : > { %10440 = vmatmul.mubr.msk.bf16.vlgmr.msra.gmra.mxu0 %vm6602_vm5, %v7836_v3 }
 0x60d   : > { %10465 = vmatprep.mubr.msk.bf16.mxu0 %vm10692_vm0, %v13142_v0  ;;  %10450 = vmatpush3.bf16.msra.mxu0 %v10613_v34 }
 0x60e   : > { %10451 = vmatprep.subr.bf16.mxu0 %v13142_v0 }
 0x611   : > { %10386 = vmatmul.mubr.msk.bf16.vlgmr.msra.gmra.mxu1 %vm6602_vm5, %v7350_v60  ;;  %10452 = vmatpush3.bf16.msra.mxu0 %v10614_v18 }
 0x612   : > { %10396 = vmatpush3.bf16.msra.mxu1 %v10608_v39  ;;  %10397 = vmatprep.mubr.msk.bf16.mxu1 %vm10692_vm0, %v13142_v0 }
 0x613   : > { %10407 = vmatprep.subr.bf16.mxu1 %v13142_v0  ;;  %10453 = vmatprep.subr.bf16.mxu0 %v13142_v0 }
 0x615   : > { %10454 = vmatpush3.bf16.msra.mxu0 %v10615_v33 }
 0x616   : > { %10455 = vmatprep.subr.bf16.mxu0 %v13142_v0 }
 0x619   : > { %10398 = vmatmul.mubr.msk.bf16.vlgmr.msra.gmra.mxu1 %vm6602_vm5, %v7458_v20  ;;  %10456 = vmatpush3.bf16.msra.mxu0 %v10616_v46 }
 0x61a   : > { %10408 = vmatpush3.bf16.msra.mxu1 %v10609_v38  ;;  %10409 = vmatprep.mubr.msk.bf16.mxu1 %vm10692_vm0, %v13142_v0 }
 0x61b   : > { %10419 = vmatprep.subr.bf16.mxu1 %v13142_v0  ;;  %10457 = vmatprep.subr.bf16.mxu0 %v13142_v0 }
 0x61d   : > { %10458 = vmatpush3.bf16.msra.mxu0 %v10617_v57 }
 0x61e   : > { %10459 = vmatprep.subr.bf16.mxu0 %v13142_v0 }
 0x621   : > { %10410 = vmatmul.mubr.msk.bf16.vlgmr.msra.gmra.mxu1 %vm6602_vm5, %v7566_v50  ;;  %10460 = vmatpush3.bf16.msra.mxu0 %v10618_v44 }
 0x622   : > { %10420 = vmatpush3.bf16.msra.mxu1 %v10610_v4  ;;  %10421 = vmatprep.mubr.msk.bf16.mxu1 %vm10692_vm0, %v13142_v0 }
 0x623   : > { %10431 = vmatprep.subr.bf16.mxu1 %v13142_v0  ;;  %10461 = vmatprep.subr.bf16.mxu0 %v13142_v0 }
 0x625   : > { %10462 = vmatpush3.bf16.msra.mxu0 %v10619_v56 }
 0x626   : > { %10463 = vmatprep.subr.bf16.mxu0 %v13142_v0 }
 0x629   : > { %10422 = vmatmul.mubr.msk.bf16.vlgmr.msra.gmra.mxu1 %vm6602_vm5, %v7674_v62  ;;  %10464 = vmatpush3.bf16.msra.mxu0 %v10620_v17 }
 0x62a   : > { %10432 = vmatpush3.bf16.msra.mxu1 %v10611_v47  ;;  %10433 = vmatprep.mubr.msk.bf16.mxu1 %vm10692_vm0, %v13142_v0 }
 0x62b   : > { %10443 = vmatprep.subr.bf16.mxu1 %v13142_v0 }
 0x631   : > { %10434 = vmatmul.mubr.msk.bf16.vlgmr.msra.gmra.mxu1 %vm6602_vm5, %v7782_v48 }
 0x632   : > { %10444 = vmatpush3.bf16.msra.mxu1 %v10612_v63  ;;  %10445 = vmatprep.mubr.msk.bf16.mxu1 %vm10692_vm0, %v13142_v0 }
 0x633   : > { %10469 = vmatprep.subr.bf16.mxu1 %v13142_v0 }
 0x639   : > { %10446 = vmatmul.mubr.msk.bf16.vlgmr.msra.gmra.mxu1 %vm6602_vm5, %v7890_v11 }
 0x63a   : > { %10485 = vmatprep.mubr.msk.bf16.mxu1 %vm10692_vm0, %v13142_v0  ;;  %10470 = vmatpush3.bf16.msra.mxu1 %v10621_v52 }
 0x63b   : > { %10471 = vmatprep.subr.bf16.mxu1 %v13142_v0 }
 0x63e   : > { %10472 = vmatpush3.bf16.msra.mxu1 %v10622_v42 }
 0x63f   : > { %10473 = vmatprep.subr.bf16.mxu1 %v13142_v0 }
 0x642   : > { %10474 = vmatpush3.bf16.msra.mxu1 %v10623_v35 }
 0x643   : > { %10475 = vmatprep.subr.bf16.mxu1 %v13142_v0 }
 0x646   : > { %10476 = vmatpush3.bf16.msra.mxu1 %v10624_v19 }
 0x647   : > { %10477 = vmatprep.subr.bf16.mxu1 %v13142_v0 }
 0x64a   : > { %10478 = vmatpush3.bf16.msra.mxu1 %v10625_v51 }
 0x64b   : > { %10479 = vmatprep.subr.bf16.mxu1 %v13142_v0 }
 0x64e   : > { %10480 = vmatpush3.bf16.msra.mxu1 %v10626_v21 }
 0x64f   : > { %10481 = vmatprep.subr.bf16.mxu1 %v13142_v0 }
 0x679   : > { %v6640_v24 = vpop.f32.mrf.mxu1 }
 0x67a   : > { %v6646_v27 = vadd.f32 %v6640_v24, %v6590_v54 }
 0x67b   : > { %v10303_v55 = vpop.f32.mrf.mxu1 }
 0x67d   : > { %v6643_v16 = vpop.f32.mrf.mxu1 }
 0x67f   : > { %v10304_v7 = vpop.f32.mrf.mxu1 }
 0x681   : > { %v6694_v14 = vpop.f32.mrf.mxu1 }
 0x682   : > { %v6700_v59 = vadd.f32 %v6694_v14, %v6646_v27 }
 0x683   : > { %v10309_v13 = vpop.f32.mrf.mxu1 }
 0x685   : > { %v6697_v22 = vpop.f32.mrf.mxu1 }
 0x687   : > { %v10310_v29 = vpop.f32.mrf.mxu1 }
 0x689   : > { %v6748_v41 = vpop.f32.mrf.mxu1 }
 0x68a   : > { %v6754_v2 = vadd.f32 %v6748_v41, %v6700_v59 }
 0x68b   : > { %v10315_v28 = vpop.f32.mrf.mxu1 }
 0x68d   : > { %v6751_v23 = vpop.f32.mrf.mxu1 }
 0x68f   : > { %v7126_v10 = vpop.f32.mrf.mxu0  ;;  %v10316_v37 = vpop.f32.mrf.mxu1 }
 0x691   : > { %v10357_v45 = vpop.f32.mrf.mxu0  ;;  %v6802_v26 = vpop.f32.mrf.mxu1 }
 0x692   : > { %v6808_v6 = vadd.f32 %v6802_v26, %v6754_v2 }
 0x693   : > { %v7129_v30 = vpop.f32.mrf.mxu0  ;;  %v10321_v8 = vpop.f32.mrf.mxu1 }
 0x695   : > { %v10358_v25 = vpop.f32.mrf.mxu0  ;;  %v6805_v36 = vpop.f32.mrf.mxu1 }
 0x697   : > { %v10322_v40 = vpop.f32.mrf.mxu1 }
 0x699   : > { %v6856_v15 = vpop.f32.mrf.mxu1 }
 0x69a   : > { %v6862_v18 = vadd.f32 %v6856_v15, %v6808_v6 }
 0x69b   : > { %v10327_v58 = vpop.f32.mrf.mxu1 }
 0x69c   : > { %v7234_v9 = vpop.f32.mrf.mxu0 }
 0x69d   : > { %v6859_v1 = vpop.f32.mrf.mxu1 }
 0x69e   : > { %v10369_v5 = vpop.f32.mrf.mxu0 }
 0x69f   : > { %v10328_v32 = vpop.f32.mrf.mxu1 }
 0x6a0   : > { %v7237_v31 = vpop.f32.mrf.mxu0 }
 0x6a1   : > { %v6910_v12 = vpop.f32.mrf.mxu1 }
 0x6a2   : > { %v10370_v3 = vpop.f32.mrf.mxu0  ;;  %v6916_v57 = vadd.f32 %v6910_v12, %v6862_v18 }
 0x6a3   : > { %v10333_v60 = vpop.f32.mrf.mxu1 }
 0x6a4   : > { %v7342_v39 = vpop.f32.mrf.mxu0 }
 0x6a5   : > { %v6913_v38 = vpop.f32.mrf.mxu1 }
 0x6a6   : > { %v10381_v49 = vpop.f32.mrf.mxu0 }
 0x6a7   : > { %v10334_v61 = vpop.f32.mrf.mxu1 }
 0x6a8   : > { %v7345_v20 = vpop.f32.mrf.mxu0 }
 0x6a9   : > { %v6964_v50 = vpop.f32.mrf.mxu1 }
 0x6aa   : > { %v10382_v4 = vpop.f32.mrf.mxu0  ;;  %v6970_v55 = vadd.f32 %v6964_v50, %v6916_v57 }
 0x6ab   : > { %v10339_v47 = vpop.f32.mrf.mxu1 }
 0x6ac   : > { %v7450_v53 = vpop.f32.mrf.mxu0 }
 0x6ad   : > { %v6967_v43 = vpop.f32.mrf.mxu1 }
 0x6ae   : > { %v10393_v62 = vpop.f32.mrf.mxu0 }
 0x6af   : > { %v10340_v48 = vpop.f32.mrf.mxu1 }
 0x6b0   : > { %v7453_v63 = vpop.f32.mrf.mxu0 }
 0x6b1   : > { %v7018_v34 = vpop.f32.mrf.mxu1 }
 0x6b2   : > { %v10394_v11 = vpop.f32.mrf.mxu0  ;;  %v7024_v56 = vadd.f32 %v7018_v34, %v6970_v55 }
 0x6b3   : > { %v10345_v46 = vpop.f32.mrf.mxu1 }
 0x6b4   : > { %v7558_v33 = vpop.f32.mrf.mxu0 }
 0x6b5   : > { %v7021_v24 = vpop.f32.mrf.mxu1 }
 0x6b6   : > { %v10405_v44 = vpop.f32.mrf.mxu0 }
 0x6b7   : > { %v10346_v16 = vpop.f32.mrf.mxu1 }
 0x6b8   : > { %v7561_v54 = vpop.f32.mrf.mxu0 }
 0x6b9   : > { %v7072_v27 = vpop.f32.mrf.mxu1 }
 0x6ba   : > { %v10406_v7 = vpop.f32.mrf.mxu0  ;;  %v7078_v17 = vadd.f32 %v7072_v27, %v7024_v56 }
 0x6bb   : > { %v10351_v14 = vpop.f32.mrf.mxu1 }
 0x6bc   : > { %v7666_v52 = vpop.f32.mrf.mxu0  ;;  %v7132_v59 = vadd.f32 %v7126_v10, %v7078_v17 }
 0x6bd   : > { %v7075_v13 = vpop.f32.mrf.mxu1 }
 0x6be   : > { %v10417_v42 = vpop.f32.mrf.mxu0  ;;  %v7961_v13 = vld [vmem:[%s13125_s8] sm:$0x1] }
 0x6bf   : > { %v10352_v35 = vpop.f32.mrf.mxu1  ;;  %v10628_v42 = vld [vmem:[%s13126_s9] sm:$0xff]  }
 0x6c0   : > { %v7669_v22 = vpop.f32.mrf.mxu0 }
 0x6c1   : > { %v7180_v41 = vpop.f32.mrf.mxu1 }
 0x6c2   : > { %v10418_v29 = vpop.f32.mrf.mxu0  ;;  %v7186_v2 = vadd.f32 %v7180_v41, %v7132_v59 }
 0x6c3   : > { %v10363_v28 = vpop.f32.mrf.mxu1 }
 0x6c4   : > { %v7774_v19 = vpop.f32.mrf.mxu0  ;;  %v7240_v23 = vadd.f32 %v7234_v9, %v7186_v2 }
 0x6c5   : > { %v7183_v37 = vpop.f32.mrf.mxu1 }
 0x6c6   : > { %v10429_v51 = vpop.f32.mrf.mxu0 }
 0x6c7   : > { %v10364_v26 = vpop.f32.mrf.mxu1 }
 0x6c8   : > { %v7777_v45 = vpop.f32.mrf.mxu0 }
 0x6c9   : > { %v7288_v21 = vpop.f32.mrf.mxu1 }
 0x6ca   : > { %v10430_v30 = vpop.f32.mrf.mxu0  ;;  %v7294_v8 = vadd.f32 %v7288_v21, %v7240_v23  ;;  %v8068_v23 = vld [vmem:[%s13127_s10] sm:$0x1] }
 0x6cb   : > { %v10375_v36 = vpop.f32.mrf.mxu1 }
 0x6cc   : > { %v7882_v25 = vpop.f32.mrf.mxu0  ;;  %v7348_v10 = vadd.f32 %v7342_v39, %v7294_v8 }
 0x6cd   : > { %v7291_v15 = vpop.f32.mrf.mxu1 }
 0x6ce   : > { %v10441_v40 = vpop.f32.mrf.mxu0 }
 0x6cf   : > { %v10376_v5 = vpop.f32.mrf.mxu1 }
 0x6d0   : > { %v7885_v58 = vpop.f32.mrf.mxu0 }
 0x6d1   : > { %v7396_v31 = vpop.f32.mrf.mxu1 }
 0x6d2   : > { %v10442_v1 = vpop.f32.mrf.mxu0  ;;  %v7402_v49 = vadd.f32 %v7396_v31, %v7348_v10 }
 0x6d3   : > { %v10387_v32 = vpop.f32.mrf.mxu1 }
 0x6d4   : > { %v7456_v61 = vadd.f32 %v7450_v53, %v7402_v49 }
 0x6d5   : > { %v7399_v3 = vpop.f32.mrf.mxu1 }
 0x6d7   : > { %v10388_v12 = vpop.f32.mrf.mxu1 }
 0x6d9   : > { %v7504_v9 = vpop.f32.mrf.mxu1 }
 0x6da   : > { %v7510_v50 = vadd.f32 %v7504_v9, %v7456_v61 }
 0x6db   : > { %v10399_v60 = vpop.f32.mrf.mxu1 }
 0x6dc   : > { %v7564_v39 = vadd.f32 %v7558_v33, %v7510_v50 }
 0x6dd   : > { %v7507_v38 = vpop.f32.mrf.mxu1 }
 0x6df   : > { %v10400_v20 = vpop.f32.mrf.mxu1 }
 0x6e1   : > { %v7612_v4 = vpop.f32.mrf.mxu1 }
 0x6e2   : > { %v7618_v63 = vadd.f32 %v7612_v4, %v7564_v39 }
 0x6e3   : > { %v10411_v47 = vpop.f32.mrf.mxu1 }
 0x6e4   : > { %v7672_v11 = vadd.f32 %v7666_v52, %v7618_v63  ;;  %v10627_v52 = vld [vmem:[%s13126_s9 + $0x8] sm:$0xff]  }
 0x6e5   : > { %v7615_v62 = vpop.f32.mrf.mxu1  ;;  %10482 = vmatpush3.bf16.msra.mxu1 %v10627_v52 }
 0x6e6   : > { %10483 = vmatprep.subr.bf16.mxu1 %v13142_v0 }
 0x6e7   : > { %v10412_v43 = vpop.f32.mrf.mxu1 }
 0x6e9   : > { %v7720_v48 = vpop.f32.mrf.mxu1  ;;  %10484 = vmatpush3.bf16.msra.mxu1 %v10628_v42 }
 0x6ea   : > { %v7726_v18 = vadd.f32 %v7720_v48, %v7672_v11 }
 0x6eb   : > { %v10423_v6 = vpop.f32.mrf.mxu1 }
 0x6ec   : > { %v7780_v44 = vadd.f32 %v7774_v19, %v7726_v18 }
 0x6ed   : > { %v7723_v34 = vpop.f32.mrf.mxu1 }
 0x6ef   : > { %v10424_v46 = vpop.f32.mrf.mxu1 }
 0x6f1   : > { %v7828_v57 = vpop.f32.mrf.mxu1 }
 0x6f2   : > { %v7834_v55 = vadd.f32 %v7828_v57, %v7780_v44 }
 0x6f3   : > { %v10435_v24 = vpop.f32.mrf.mxu1 }
 0x6f4   : > { %v7888_v53 = vadd.f32 %v7882_v25, %v7834_v55 }
 0x6f5   : > { %v7831_v54 = vpop.f32.mrf.mxu1 }
 0x6f7   : > { %v10436_v16 = vpop.f32.mrf.mxu1 }
 0x6f9   : > { %v7936_v56 = vpop.f32.mrf.mxu1 }
 0x6fa   : > { %v7942_v7 = vadd.f32 %v7936_v56, %v7888_v53 }
 0x6fb   : > { %v10447_v27 = vpop.f32.mrf.mxu1 }
 0x6fc   : > { %v7943_v17 = vmax.f32 %v7942_v7, 0.0 }
 0x6fd   : > { %v7939_v33 = vpop.f32.mrf.mxu1 }
 0x6fe   : > { %v7944_v14 = vpack.c.bf16 %v7943_v17, %v7943_v17 }
 0x6ff   : > { %v10448_v59 = vpop.f32.mrf.mxu1 }
 0x700   : > { %10466 = vmatmul.mubr.bf16.vlgmr.msra.gmra.mxu0 %v7944_v14 }
 0x7c0   : > { %v8044_v22 = vpop.f32.mrf.mxu0 }
 0x7c1   : > { %v8045_v35 = vadd.f32 %v8044_v22, %v7961_v13 }
 0x7c2   : > { %v10467_v29 = vpop.f32.mrf.mxu0 }
 0x7c3   : > { %v8050_v41 = vmax.f32 %v8045_v35, 0.0 }
 0x7c4   : > { %v8047_v2 = vpop.f32.mrf.mxu0 }
 0x7c5   : > { %v8051_v19 = vpack.c.bf16 %v8050_v41, %v8050_v41 }
 0x7c6   : > { %v10468_v28 = vpop.f32.mrf.mxu0 }
 0x7c7   : > { %10486 = vmatmul.mubr.bf16.vlgmr.msra.gmra.mxu1 %v8051_v19 }
 0x887   : > { %v8151_v0 = vpop.f32.mrf.mxu1 }
 0x888   : > { %v8152_v51 = vadd.f32 %v8151_v0, %v8068_v23 }
 0x889   : > { %v10487_v37 = vpop.f32.mrf.mxu1 }
 0x88a   : > { %8157 = vst [vmem:[%s378_s25] sm:$0x1] %v8152_v51 }
 0x88b   : > { %v8154_v45 = vpop.f32.mrf.mxu1 }
 0x88c   : > { %10642 = shalt.err (!%p10639_p3)
}
 0x88d   : > { %s10643_s24 = scalar_lea.hbm %s13076_s13, 16  ;;  %s10647_s12 = scalar_lea.hbm %s13128_s11, 32 }
 0x88e   : > { %p10644_p4 = scmp.ne.s32.totalorder %s13076_s13, %s10643_s24  ;;  %p10648_p9 = scmp.lt.s32.totalorder %s13076_s13, %s13128_s11 }
 0x88f   : > { %p10649_p10 = scmp.lt.s32.totalorder %s10647_s12, %s10643_s24 }
 0x890   : > { %p10645_p7 = pnand %p10644_p4, %p10792_p5 }
 0x891   : > { %p10650_p11 = por %p10649_p10, %p10648_p9 }
 0x892   : > { %p10646_p8 = pneg %p10645_p7 }
 0x894   : > { %p10651_p12 = pnand %p10650_p11, %p10646_p8 }
 0x896   : > { %10654 = shalt.err (!%p10651_p12)
}
 0x897   : > { %10490 = dma.vmem_to_hbm [thread:$0]  (%p10792_p5), %s13078_s29, 16, %s13076_s13, %s8159_s14   ;;  %v10488_v26 = vpop.f32.mrf.mxu1 }
 0x898 PF: > { %p10496_p13 = scmp.ge.s32.totalorder %s10689_s20, 2  ;;  %s8183_s16 = sand.u32 1, %s10677_s17  }
 0x899   : > { %s8184_s0 = scalar_lea.sflag [#allocation6], %s8183_s16 }
 0x89a   : > { %p10493_p0 = pnand %p10496_p13, %p10796_p6 }
 0x89c   : > { %p10494_p1 = pneg %p10493_p0 }
 0x89e   : > { %10672 = dma.done.wait (%p10494_p1), %s8184_s0, 16  }
 0x89f   : > { %10674 = vsyncadd (%p10494_p1), %s8184_s0, 4294967280  ;;  %p21_p2 = scmp.ge.s32.totalorder %s10779_s23, 4   ;;  %s13166_s17 = smov %s10681_s18 }
 0x8a0   : > { %s13167_s18 = smov %s10685_s19  ;;  %s13168_s19 = smov %s10790_s26 }
 0x8a1   : > { %s13169_s20 = smov %s10779_s23  ;;  %23 = sbr.rel (!%p21_p2) target bundleno = 5 (0x5), region = 102 }
 0x8a6   :  { %8188 = vsyncpa [#allocation6], 1 }
 0x8a7   :  { %8190 = vsyncpa [#allocation6 + $0x1], 1 }

</bundles_post_ra>
